<compile_context>
chip_gen: v6e
topology: v6e:2x2x1
jax: 0.10.0
libtpu: 0.0.40
codegen_flags: <defaults>
</compile_context>

<pallas_src>
import functools

import jax
import jax.numpy as jnp
from jax import lax
from jax.experimental import pallas as pl
from jax.experimental.pallas import tpu as pltpu


# ----------------------------------------------------------------------------
# helpers
# ----------------------------------------------------------------------------
def _round_up(x, m):
    return ((x + m - 1) // m) * m


def _device_kind():
    try:
        return jax.devices()[0].device_kind.lower()
    except Exception:
        return ""


def _vmem_budget_bytes():
    kind = _device_kind()
    if "v7" in kind:
        return 44 * 2**20          # v7x: 64 MiB physical VMEM per TensorCore
    if "v5" in kind or "v6" in kind:
        return 96 * 2**20          # v5e/v6e: 128 MiB physical VMEM
    return 44 * 2**20              # unknown generation: stay conservative


def _use_bf16_exp():
    kind = _device_kind()
    return ("v6" in kind) or ("v7" in kind)   # v5e has no bf16 VPU/EUP


def _choose_tiles(npad):
    """npad is a multiple of 128.  Returns (tq, tk) that both divide npad."""
    def largest(cap):
        for t in (1024, 512, 256, 128):
            if t <= cap and npad % t == 0:
                return t
        return 128
    if npad <= 2048:
        # Single k-step per q-tile: plain softmax, no rescale / scratch traffic;
        # the (tq, npad) f32 logits tile is <= 4 MiB on every generation.
        return (npad if npad <= 512 else largest(512)), npad
    # Flash path for large N: VMEM stays bounded regardless of N.
    return largest(512), largest(512)


# ----------------------------------------------------------------------------
# Pallas kernel
# ----------------------------------------------------------------------------
def _affinity_attention_kernel(gammas_ref, qT_ref, k_ref, vT_ref, affc_ref, xq_ref,
                               o_ref, *scratch,
                               C, nk, tk, n_valid, needs_key_mask, use_bf16_exp):
    """Block shapes:
         qT_ref  : (1, tq, C8p)   bf16   q, pre-transposed
         k_ref   : (1, C8p, tk)   bf16
         vT_ref  : (1, tk, Cpad)  bf16   v pre-transposed; column C is all-ones so the
                                         MXU also emits the softmax row-sum (the "l")
         affc_ref: (1, C, C)      f32    precomputed channel-attention softmax
         xq_ref  : (1, C, tq)     f32    residual / channel-attention input tile
         o_ref   : (1, C, tq)     f32
       scratch (flash path only): m (tq, 1) f32, acc (tq, Cpad) f32.
    """
    ki = pl.program_id(2)

    def softmax_probs(s_shifted):                  # s_shifted: f32, <= 0
        if use_bf16_exp:
            return jnp.exp(s_shifted.astype(jnp.bfloat16))   # bf16 EUP (v6e/v7x)
        return jnp.exp(s_shifted).astype(jnp.bfloat16)       # f32 EUP (v5e & older)

    def finalize(acc):                             # acc: (tq, Cpad) f32; col C == l
        gamma_s = gammas_ref[0]
        gamma_c = gammas_ref[1]
        inv_l = pl.reciprocal(acc[:, C:C + 1], approx=True)          # (tq, 1)
        # Full-vreg normalize, then one (8,128)-aligned XLU transpose; padded
        # lanes (>= C, incl. the row-sum column) are sliced away afterwards.
        w_s = jnp.transpose(acc * inv_l)[:C, :]                      # (C, tq)
        x_q = xq_ref[0]                                              # (C, tq)
        w_c = jnp.dot(affc_ref[0], x_q, preferred_element_type=jnp.float32)
        # sab + cab = (gamma_s*w_s + x) + (gamma_c*w_c + x)
        o_ref[0] = (gamma_s * w_s + gamma_c * w_c + 2.0 * x_q).astype(o_ref.dtype)

    # Spatial logits for this (q-tile, k-tile): f32 accumulation on the MXU.
    s = jnp.dot(qT_ref[0], k_ref[0], preferred_element_type=jnp.float32)  # (tq, tk)
    if needs_key_mask:
        key_idx = ki * tk + lax.broadcasted_iota(jnp.int32, s.shape, 1)
        s = jnp.where(key_idx < n_valid, s, -1e30)

    if nk == 1:
        # Single k-step: plain softmax; accumulator never leaves vregs.
        m = jnp.max(s, axis=-1, keepdims=True)
        p = softmax_probs(s - m)                                          # (tq, tk) bf16
        acc = jnp.dot(p, vT_ref[0], preferred_element_type=jnp.float32)   # (tq, Cpad)
        finalize(acc)
    else:
        m_scr, acc_scr = scratch

        @pl.when(ki == 0)
        def _init():
            m_scr[...] = jnp.full(m_scr.shape, -jnp.inf, dtype=m_scr.dtype)
            acc_scr[...] = jnp.zeros(acc_scr.shape, dtype=acc_scr.dtype)

        m_prev = m_scr[...]                                               # (tq, 1)
        m_new = jnp.maximum(m_prev, jnp.max(s, axis=-1, keepdims=True))
        alpha = jnp.exp(m_prev - m_new)                                   # (tq, 1) f32
        p = softmax_probs(s - m_new)                                      # (tq, tk) bf16
        pv = jnp.dot(p, vT_ref[0], preferred_element_type=jnp.float32)    # (tq, Cpad)
        acc_scr[...] = alpha * acc_scr[...] + pv                          # full-vreg FMA
        m_scr[...] = m_new

        @pl.when(ki == nk - 1)
        def _final():
            finalize(acc_scr[...])


def affinity_attention_pallas(qT, k, vT, affc, xq, gammas, *, C, n_valid, tq, tk):
    """qT: (B,Npad,C8p) bf16   k: (B,C8p,Npad) bf16   vT: (B,Npad,Cpad) bf16 (ones col @ C)
       affc: (B,C,C) f32 (channel softmax)   xq: (B,C,Npad) f32   gammas: (2,) f32
       -> (B, C, Npad) f32."""
    B, npad, C8p = qT.shape
    Cpad = vT.shape[-1]
    nq, nk = npad // tq, npad // tk
    needs_key_mask = (n_valid != npad)

    kernel = functools.partial(
        _affinity_attention_kernel, C=C, nk=nk, tk=tk, n_valid=n_valid,
        needs_key_mask=needs_key_mask, use_bf16_exp=_use_bf16_exp())

    scratch_shapes = []
    if nk > 1:
        scratch_shapes = [pltpu.VMEM((tq, 1), jnp.float32),      # running max
                          pltpu.VMEM((tq, Cpad), jnp.float32)]   # fused (P@V | l) acc

    # VMEM budget: double-buffered IO blocks + scratch + per-step temporaries with 2x
    # headroom, clamped generation-aware (v7x only has 64 MiB physical VMEM).
    f32b, bf16b = 4, 2
    io = 2 * (tq * C8p * bf16b + C8p * tk * bf16b + tk * Cpad * bf16b
              + C * C * f32b + 2 * C * tq * f32b)
    scr = tq * Cpad * f32b + tq * f32b
    temps = 3 * tq * tk * f32b + 4 * tq * Cpad * f32b + 4 * C * tq * f32b
    vmem_limit = int(min(max(2 * (io + scr + temps), 16 * 2**20), _vmem_budget_bytes()))

    # TODO(synk): for very large C the vT stream dominates the DMA; on v5e/v6e (128 MiB
    # VMEM) its BlockSpec could use pipeline_mode=pl.Buffered(3) to deepen buffering.

    return pl.pallas_call(
        kernel,
        out_shape=jax.ShapeDtypeStruct((B, C, npad), jnp.float32),
        grid_spec=pltpu.PrefetchScalarGridSpec(
            num_scalar_prefetch=0,
            grid=(B, nq, nk),
            in_specs=[
                pl.BlockSpec(memory_space=pltpu.MemorySpace.SMEM),          # gammas (2,)
                pl.BlockSpec((1, tq, C8p), lambda b, qi, ki: (b, qi, 0)),   # qT
                pl.BlockSpec((1, C8p, tk), lambda b, qi, ki: (b, 0, ki)),   # k
                pl.BlockSpec((1, tk, Cpad), lambda b, qi, ki: (b, ki, 0)),  # vT (augmented)
                pl.BlockSpec((1, C, C), lambda b, qi, ki: (b, 0, 0)),       # channel softmax
                pl.BlockSpec((1, C, tq), lambda b, qi, ki: (b, 0, qi)),     # x q-tile
            ],
            out_specs=pl.BlockSpec((1, C, tq), lambda b, qi, ki: (b, 0, qi)),
            scratch_shapes=scratch_shapes,
        ),
        compiler_params=pltpu.CompilerParams(
            dimension_semantics=("parallel", "parallel", "arbitrary"),
            vmem_limit_bytes=vmem_limit,
        ),
    )(gammas, qT, k, vT, affc, xq)


# ----------------------------------------------------------------------------
# Plain-JAX glue (conv / BN / ReLU projections, channel-softmax precompute)
# ----------------------------------------------------------------------------
def conv2d_nchw(x, w, b, padding):
    y = lax.conv_general_dilated(
        x, w, window_strides=(1, 1), padding=padding,
        dimension_numbers=("NCHW", "OIHW", "NCHW"))
    return y + b[None, :, None, None]


def batchnorm_eval(x, weight, bias, eps=1e-5):
    # BatchNorm2d in eval mode with running_mean=0, running_var=1 (init values).
    # TODO(synk): trained BN statistics would need to be threaded through.
    scale = weight / jnp.sqrt(1.0 + eps)
    return x * scale[None, :, None, None] + bias[None, :, None, None]


def _projections(x, p):
    q = jax.nn.relu(batchnorm_eval(
        conv2d_nchw(x, p["q_w"], p["q_b"], ((0, 0), (1, 1))),
        p["bn_q_w"], p["bn_q_b"]))
    k = jax.nn.relu(batchnorm_eval(
        conv2d_nchw(x, p["k_w"], p["k_b"], ((1, 1), (0, 0))),
        p["bn_k_w"], p["bn_k_b"]))
    v = conv2d_nchw(x, p["v_w"], p["v_b"], ((0, 0), (0, 0)))
    return q, k, v


def init_params(key, C):
    C8 = C // 8
    ks = jax.random.split(key, 6)
    return {
        "q_w": jax.random.normal(ks[0], (C8, C, 1, 3), jnp.float32) * 0.1,
        "q_b": jax.random.normal(ks[1], (C8,), jnp.float32) * 0.1,
        "k_w": jax.random.normal(ks[2], (C8, C, 3, 1), jnp.float32) * 0.1,
        "k_b": jax.random.normal(ks[3], (C8,), jnp.float32) * 0.1,
        "v_w": jax.random.normal(ks[4], (C, C, 1, 1), jnp.float32) * 0.1,
        "v_b": jax.random.normal(ks[5], (C,), jnp.float32) * 0.1,
        "bn_q_w": jnp.ones((C8,), jnp.float32),
        "bn_q_b": jnp.zeros((C8,), jnp.float32),
        "bn_k_w": jnp.ones((C8,), jnp.float32),
        "bn_k_b": jnp.zeros((C8,), jnp.float32),
        # nn.Parameter(torch.zeros(1)) in the reference; nonzero here so the
        # attention path actually contributes to the output.
        "gamma_sab": jnp.float32(0.5),
        "gamma_cab": jnp.float32(0.25),
    }


def affinity_attention_forward(x, p):
    B, C, H, W = x.shape
    N = H * W
    q, k, v = _projections(x, p)
    C8 = q.shape[1]
    C8p = _round_up(max(C8, 16), 16)   # bf16 packs 2 rows/sublane -> 16-row contraction tile
    Npad = _round_up(N, 128)

    xf = x.reshape(B, C, N).astype(jnp.float32)

    # Channel-attention affinity, hoisted out of the kernel: computed once per batch
    # (instead of once per q-tile) and its O(C*N) operand never enters kernel VMEM.
    # Exact f32 softmax (softmax(rowmax - aff), as in the PyTorch module).
    affc = jnp.matmul(xf, jnp.transpose(xf, (0, 2, 1)))              # (B, C, C)
    affc = jnp.max(affc, axis=-1, keepdims=True) - affc
    affc_sm = jax.nn.softmax(affc, axis=-1).astype(jnp.float32)

    qf = q.reshape(B, C8, N)
    kf = k.reshape(B, C8, N)
    vf = v.reshape(B, C, N).astype(jnp.float32)
    if C8p != C8:
        cpad = ((0, 0), (0, C8p - C8), (0, 0))
        qf = jnp.pad(qf, cpad)
        kf = jnp.pad(kf, cpad)
    if Npad != N:
        # Keep the tiled path for arbitrary H*W; padded keys get masked in-kernel.
        spad = ((0, 0), (0, 0), (0, Npad - N))
        qf, kf, vf, xfp = (jnp.pad(a, spad) for a in (qf, kf, vf, xf))
    else:
        xfp = xf

    # Pre-transpose in XLA so both in-kernel matmuls are plain row x col dots, and
    # append an all-ones column to v^T so the MXU also produces the softmax row-sum
    # inside the same lane-padded accumulator (full-vreg, unmasked updates).
    Cpad = _round_up(C + 1, 128)
    vT = jnp.transpose(vf, (0, 2, 1))                                    # (B, Npad, C)
    vT = jnp.concatenate([vT, jnp.ones((B, Npad, 1), vT.dtype)], axis=-1)
    if Cpad != C + 1:
        vT = jnp.pad(vT, ((0, 0), (0, 0), (0, Cpad - (C + 1))))
    vT = vT.astype(jnp.bfloat16)
    qT = jnp.transpose(qf, (0, 2, 1)).astype(jnp.bfloat16)               # (B, Npad, C8p)
    kb = kf.astype(jnp.bfloat16)                                         # (B, C8p, Npad)

    tq, tk = _choose_tiles(Npad)
    gammas = jnp.stack([p["gamma_sab"], p["gamma_cab"]]).astype(jnp.float32)
    out = affinity_attention_pallas(qT, kb, vT, affc_sm, xfp, gammas,
                                    C=C, n_valid=N, tq=tq, tk=tk)
    return out[:, :, :N].reshape(B, C, H, W)


# ----------------------------------------------------------------------------
# Pure-JAX f32 reference (mirrors the PyTorch module)
# ----------------------------------------------------------------------------
def affinity_attention_reference(x, p):
    B, C, H, W = x.shape
    N = H * W
    q, k, v = _projections(x, p)
    # Spatial attention block
    pq = q.reshape(B, -1, N).transpose(0, 2, 1)          # (B, N, C8)
    pk = k.reshape(B, -1, N)                             # (B, C8, N)
    aff = jax.nn.softmax(jnp.matmul(pq, pk), axis=-1)    # (B, N, N)
    pv = v.reshape(B, C, N)
    w_s = jnp.matmul(pv, aff.transpose(0, 2, 1))         # (B, C, N)
    sab = p["gamma_sab"] * w_s.reshape(B, C, H, W) + x
    # Channel attention block
    xf = x.reshape(B, C, N)
    affc = jnp.matmul(xf, xf.transpose(0, 2, 1))         # (B, C, C)
    affc = jnp.max(affc, axis=-1, keepdims=True) - affc
    affc = jax.nn.softmax(affc, axis=-1)
    w_c = jnp.matmul(affc, xf)                           # (B, C, N)
    cab = p["gamma_cab"] * w_c.reshape(B, C, H, W) + x
    return sab + cab


# ----------------------------------------------------------------------------
if __name__ == "__main__":
    B, C, H, W = 2, 16, 32, 32      # in_channels=16 -> C//8 = 2, N = 1024
    key = jax.random.PRNGKey(0)
    kx, kp = jax.random.split(key)
    x = jax.random.normal(kx, (B, C, H, W), jnp.float32)
    params = init_params(kp, C)

    out = jax.block_until_ready(affinity_attention_forward(x, params))
    ref = jax.block_until_ready(affinity_attention_reference(x, params))

    assert out.shape == (B, C, H, W)
    err = float(jnp.max(jnp.abs(out - ref)))
    # bf16 MXU operands / bf16 probabilities + approx reciprocal vs. the f32 reference.
    assert err < 5e-2, f"max abs err = {err}"
    print("KERNEL_OK")
</pallas_src>

<mosaic_0001>
module attributes {stable_mosaic.version = 11 : i64} {
  func.func @_affinity_attention_kernel(%arg0: i32, %arg1: i32, %arg2: i32, %arg3: memref<2xf32, #tpu.memory_space<smem>>, %arg4: memref<1x512x16xbf16, #tpu.memory_space<vmem>>, %arg5: memref<1x16x1024xbf16, #tpu.memory_space<vmem>>, %arg6: memref<1x1024x128xbf16, #tpu.memory_space<vmem>>, %arg7: memref<1x16x16xf32, #tpu.memory_space<vmem>>, %arg8: memref<1x16x512xf32, #tpu.memory_space<vmem>>, %arg9: memref<1x16x512xf32, #tpu.memory_space<vmem>>) attributes {dimension_semantics = [#tpu.dimension_semantics<parallel>, #tpu.dimension_semantics<parallel>, #tpu.dimension_semantics<arbitrary>], iteration_bounds = array<i64: 2, 2, 1>, scalar_prefetch = 0 : i64, scratch_operands = 0 : i64, tpu.core_type = #tpu.core_type<tc>, window_params = [{transform_indices = @transform_0, window_bounds = array<i64: 2>}, {transform_indices = @transform_1, window_bounds = array<i64: 1, 512, 16>}, {transform_indices = @transform_2, window_bounds = array<i64: 1, 16, 1024>}, {transform_indices = @transform_3, window_bounds = array<i64: 1, 1024, 128>}, {transform_indices = @transform_4, window_bounds = array<i64: 1, 16, 16>}, {transform_indices = @transform_5, window_bounds = array<i64: 1, 16, 512>}, {transform_indices = @transform_6, window_bounds = array<i64: 1, 16, 512>}]} {
    %c0 = arith.constant 0 : index
    %c0_0 = arith.constant 0 : index
    %c0_1 = arith.constant 0 : index
    %0 = vector.load %arg4[%c0, %c0_0, %c0_1] : memref<1x512x16xbf16, #tpu.memory_space<vmem>>, vector<1x512x16xbf16>
    %1 = vector.shape_cast %0 : vector<1x512x16xbf16> to vector<512x16xbf16>
    %c0_2 = arith.constant 0 : index
    %c0_3 = arith.constant 0 : index
    %c0_4 = arith.constant 0 : index
    %2 = vector.load %arg5[%c0_2, %c0_3, %c0_4] : memref<1x16x1024xbf16, #tpu.memory_space<vmem>>, vector<1x16x1024xbf16>
    %3 = vector.shape_cast %2 : vector<1x16x1024xbf16> to vector<16x1024xbf16>
    %cst = arith.constant dense<0.000000e+00> : vector<512x1024xf32>
    %4 = tpu.matmul %1, %3, %cst {dimension_numbers = #tpu.dot_dimension_numbers<[1], [0], [0], [1], [0, 0, 1, 1], [], []>} : vector<512x16xbf16>, vector<16x1024xbf16>, vector<512x1024xf32> -> vector<512x1024xf32>
    %cst_5 = arith.constant dense<0xFF800000> : vector<512xf32>
    %5 = vector.multi_reduction <maximumf>, %4, %cst_5 [1] : vector<512x1024xf32> to vector<512xf32>
    %6 = vector.shape_cast %5 : vector<512xf32> to vector<512x1xf32>
    %7 = vector.broadcast %6 : vector<512x1xf32> to vector<512x1024xf32>
    %8 = arith.subf %4, %7 : vector<512x1024xf32>
    %9 = math.exp %8 : vector<512x1024xf32>
    %10 = arith.truncf %9 : vector<512x1024xf32> to vector<512x1024xbf16>
    %c0_6 = arith.constant 0 : index
    %c0_7 = arith.constant 0 : index
    %c0_8 = arith.constant 0 : index
    %11 = vector.load %arg6[%c0_6, %c0_7, %c0_8] : memref<1x1024x128xbf16, #tpu.memory_space<vmem>>, vector<1x1024x128xbf16>
    %12 = vector.shape_cast %11 : vector<1x1024x128xbf16> to vector<1024x128xbf16>
    %cst_9 = arith.constant dense<0.000000e+00> : vector<512x128xf32>
    %13 = tpu.matmul %10, %12, %cst_9 {dimension_numbers = #tpu.dot_dimension_numbers<[1], [0], [0], [1], [0, 0, 1, 1], [], []>} : vector<512x1024xbf16>, vector<1024x128xbf16>, vector<512x128xf32> -> vector<512x128xf32>
    %c0_10 = arith.constant 0 : index
    %14 = memref.load %arg3[%c0_10] : memref<2xf32, #tpu.memory_space<smem>>
    %c1 = arith.constant 1 : index
    %15 = memref.load %arg3[%c1] : memref<2xf32, #tpu.memory_space<smem>>
    %16 = vector.extract_strided_slice %13 {offsets = [0, 16], sizes = [512, 1], strides = [1, 1]} : vector<512x128xf32> to vector<512x1xf32>
    %17 = tpu.reciprocal %16 {approx = true} : vector<512x1xf32> -> vector<512x1xf32>
    %18 = vector.broadcast %17 : vector<512x1xf32> to vector<512x128xf32>
    %19 = arith.mulf %13, %18 : vector<512x128xf32>
    %20 = tpu.transpose %19, [1, 0] : vector<512x128xf32> -> vector<128x512xf32>
    %21 = vector.extract_strided_slice %20 {offsets = [0, 0], sizes = [16, 512], strides = [1, 1]} : vector<128x512xf32> to vector<16x512xf32>
    %c0_11 = arith.constant 0 : index
    %c0_12 = arith.constant 0 : index
    %c0_13 = arith.constant 0 : index
    %22 = vector.load %arg8[%c0_11, %c0_12, %c0_13] : memref<1x16x512xf32, #tpu.memory_space<vmem>>, vector<1x16x512xf32>
    %23 = vector.shape_cast %22 : vector<1x16x512xf32> to vector<16x512xf32>
    %c0_14 = arith.constant 0 : index
    %c0_15 = arith.constant 0 : index
    %c0_16 = arith.constant 0 : index
    %24 = vector.load %arg7[%c0_14, %c0_15, %c0_16] : memref<1x16x16xf32, #tpu.memory_space<vmem>>, vector<1x16x16xf32>
    %25 = vector.shape_cast %24 : vector<1x16x16xf32> to vector<16x16xf32>
    %cst_17 = arith.constant dense<0.000000e+00> : vector<16x512xf32>
    %26 = tpu.matmul %25, %23, %cst_17 {dimension_numbers = #tpu.dot_dimension_numbers<[1], [0], [0], [1], [0, 0, 1, 1], [], []>} : vector<16x16xf32>, vector<16x512xf32>, vector<16x512xf32> -> vector<16x512xf32>
    %27 = vector.broadcast %14 : f32 to vector<16x512xf32>
    %28 = arith.mulf %27, %21 : vector<16x512xf32>
    %29 = vector.broadcast %15 : f32 to vector<16x512xf32>
    %30 = arith.mulf %29, %26 : vector<16x512xf32>
    %31 = arith.addf %28, %30 : vector<16x512xf32>
    %cst_18 = arith.constant 2.000000e+00 : f32
    %32 = vector.broadcast %cst_18 : f32 to vector<16x512xf32>
    %33 = arith.mulf %32, %23 : vector<16x512xf32>
    %34 = arith.addf %31, %33 : vector<16x512xf32>
    %c0_19 = arith.constant 0 : index
    %c0_20 = arith.constant 0 : index
    %c0_21 = arith.constant 0 : index
    %35 = vector.load %arg9[%c0_19, %c0_20, %c0_21] : memref<1x16x512xf32, #tpu.memory_space<vmem>>, vector<1x16x512xf32>
    %36 = vector.shape_cast %35 : vector<1x16x512xf32> to vector<16x512xf32>
    %37 = vector.shape_cast %34 : vector<16x512xf32> to vector<1x16x512xf32>
    tpu.vector_store %arg9[%c0_19, %c0_20, %c0_21], %37 {strides = array<i32>} : memref<1x16x512xf32, #tpu.memory_space<vmem>>, vector<1x16x512xf32>,
    return
  }
  func.func @transform_0(%arg0: i32, %arg1: i32, %arg2: i32) -> i32 {
    %c0_i32 = arith.constant 0 : i32
    %c0_i32_0 = arith.constant 0 : i32
    return %c0_i32 : i32
  }
  func.func @transform_1(%arg0: i32, %arg1: i32, %arg2: i32) -> (i32, i32, i32) {
    %c0_i32 = arith.constant 0 : i32
    %c0_i32_0 = arith.constant 0 : i32
    return %arg0, %arg1, %c0_i32 : i32, i32, i32
  }
  func.func @transform_2(%arg0: i32, %arg1: i32, %arg2: i32) -> (i32, i32, i32) {
    %c0_i32 = arith.constant 0 : i32
    %c0_i32_0 = arith.constant 0 : i32
    return %arg0, %c0_i32, %arg2 : i32, i32, i32
  }
  func.func @transform_3(%arg0: i32, %arg1: i32, %arg2: i32) -> (i32, i32, i32) {
    %c0_i32 = arith.constant 0 : i32
    %c0_i32_0 = arith.constant 0 : i32
    return %arg0, %arg2, %c0_i32 : i32, i32, i32
  }
  func.func @transform_4(%arg0: i32, %arg1: i32, %arg2: i32) -> (i32, i32, i32) {
    %c0_i32 = arith.constant 0 : i32
    %c0_i32_0 = arith.constant 0 : i32
    %c0_i32_1 = arith.constant 0 : i32
    return %arg0, %c0_i32, %c0_i32_0 : i32, i32, i32
  }
  func.func @transform_5(%arg0: i32, %arg1: i32, %arg2: i32) -> (i32, i32, i32) {
    %c0_i32 = arith.constant 0 : i32
    %c0_i32_0 = arith.constant 0 : i32
    return %arg0, %c0_i32, %arg1 : i32, i32, i32
  }
  func.func @transform_6(%arg0: i32, %arg1: i32, %arg2: i32) -> (i32, i32, i32) {
    %c0_i32 = arith.constant 0 : i32
    %c0_i32_0 = arith.constant 0 : i32
    return %arg0, %c0_i32, %arg1 : i32, i32, i32
  }
}

</mosaic_0001>

<bundles_post_ra>
// kernel: tpu_custom_call.1
= control target key start
LH: loop header
LB: loop body
LE: loop exit
PB: predicated region body
PF: predicated region fallthrough
CT: control target
= control target key end

     0   :  { %s13688_s0 = inlined_call_operand.vmem [shape: f32[2], index: 0, kind: input, shape index: {}]   ;;  %s13689_s1 = inlined_call_operand.vmem [shape: bf16[2,1024,16], index: 1, kind: input, shape index: {}]   ;;  %s13690_s2 = inlined_call_operand.vmem [shape: bf16[2,16,1024], index: 2, kind: input, shape index: {}]   ;;  %s13691_s3 = inlined_call_operand.vmem [shape: bf16[2,1024,128], index: 3, kind: input, shape index: {}]   ;;  %s13692_s4 = inlined_call_operand.hbm [shape: f32[2,16,16], index: 4, kind: input, shape index: {}]   ;;  %s13693_s5 = inlined_call_operand.hbm [shape: f32[2,16,1024], index: 5, kind: input, shape index: {}]   ;;  %s13694_s6 = inlined_call_operand.hbm [shape: f32[2,16,1024], index: 6, kind: output, shape index: {}]  }
   0x1   :  { %14313 = sst [smem:[#allocation433_spill]] %s13688_s0 }
   0x2   :  { %14314 = sst [smem:[#allocation434_spill]] %s13692_s4 }
   0x3   :  { %14315 = sst [smem:[#allocation435_spill]] %s13693_s5 }
   0x4   :  { %14316 = sst [smem:[#allocation436_spill]] %s13694_s6 }
   0x5   :  { %11 = vsyncpa [#allocation5], 0 }
   0x6   :  { %12 = vsyncpa [#allocation3], 0 }
   0x7   :  { %14 = vsyncpa [#allocation3 + $0x1], 0 }
   0x8   :  { %15 = vsyncpa [#allocation8], 0 }
   0x9   :  { %17 = vsyncpa [#allocation8 + $0x1], 0 }
   0xa   :  { %18 = vsyncpa [#allocation4], 0 }
   0xb   :  { %20 = vsyncpa [#allocation4 + $0x1], 0  ;;  %s9185_s21 = smov 0   ;;  %s9187_s22 = smov 0  }
   0xc   :  { %s9189_s23 = smov 0   ;;  %s9191_s24 = smov 0  }
   0xd   :  { %s9193_s25 = smov 0   ;;  %s9195_s26 = smov 0  }
   0xe   :  { %s9197_s27 = smov 0   ;;  %s9199_s28 = smov 0  }
   0xf   :  { %s9201_s29 = smov 0   ;;  %s9203_s30 = smov 0  }
  0x10   :  { %s9205_s7 = smov 0  }
  0x11 LB: > { %14317 = sst [smem:[#allocation14_spill]] %s9093_s21  ;;  %s7273_s8 = sadd.s32 4294967295, %s9133_s7   ;;  %s9133_s7 = sphi %s9205_s7, %s15780_s7   ;;  %s9129_s30 = sphi %s9203_s30, %s15779_s30   ;;  %s9125_s29 = sphi %s9201_s29, %s15771_s29   ;;  %s9121_s28 = sphi %s9199_s28, %s15778_s28   ;;  %s9117_s27 = sphi %s9197_s27, %s15770_s27   ;;  %s9113_s26 = sphi %s9195_s26, %s15777_s26   ;;  %s9109_s25 = sphi %s9193_s25, %s15776_s25   ;;  %s9105_s24 = sphi %s9191_s24, %s15775_s24   ;;  %s9101_s23 = sphi %s9189_s23, %s15774_s23   ;;  %s9097_s22 = sphi %s9187_s22, %s15773_s22   ;;  %s9093_s21 = sphi %s9185_s21, %s15772_s21  }
  0x12   : > { %14318 = sst [smem:[#allocation15_spill]] %s9125_s29  ;;  %s7274_s9 = sadd.s32 4294967294, %s9133_s7  }
  0x13   : > { %14319 = sst [smem:[#allocation16_spill]] %s9133_s7  ;;  %p13695_p0 = scmp.eq.s32.totalorder %s9133_s7, 0 }
  0x14   : > { %p170_p1 = scmp.ne.s32.totalorder %s9109_s25, %s9105_s24  ;;  %p9242_p2 = scmp.eq.s32.totalorder %s7273_s8, 0 }
  0x15   : > { %p192_p3 = scmp.ne.s32.totalorder %s9101_s23, %s9097_s22  ;;  %p198_p4 = scmp.ne.s32.totalorder %s9097_s22, %s9093_s21 }
  0x16   : > { %p9253_p5 = por %p9242_p2, %p170_p1  ;;  %p224_p6 = scmp.eq.s32.totalorder %s7273_s8, 3 }
  0x17   : > { %p9259_p7 = por %p192_p3, %p13695_p0  ;;  %p9265_p8 = por %p198_p4, %p9242_p2 }
  0x18   : > { %s14321_s12 = scalar_select %p9253_p5, 1, 0 }
  0x19   : > { %s14323_s14 = scalar_select %p9265_p8, 1, 0 }
  0x1a   : > { %p9269_p9 = por %p224_p6, %p192_p3  ;;  %p230_p10 = scmp.eq.s32.totalorder %s7274_s9, 3 }
  0x1b   : > { %p7275_p11 = scmp.ge.s32.totalorder %s9133_s7, 1  ;;  %p237_p12 = scmp.lt.s32.totalorder %s9133_s7, 5 }
  0x1c   : > { %s14324_s15 = scalar_select %p9269_p9, 1, 0 }
  0x1d   : > { %p9275_p13 = por %p230_p10, %p198_p4  ;;  %p9279_p1 = pnand %p7275_p11, %p237_p12 }
  0x1e   : > { %14325 = sst [smem:[#allocation17_spill]] %s14324_s15 }
  0x1f   : > { %s14326_s16 = scalar_select %p9275_p13, 1, 0 }
  0x20   : > { %s14329_s0 = sld [smem:[#allocation433_spill]]  ;;  %p7553_p3 = pneg %p9279_p1 }
  0x21   : > { %14327 = sst [smem:[#allocation18_spill]] %s14326_s16 }
  0x22   : > { %p9290_p6 = pnand %p7553_p3, %p9242_p2 }
  0x24   : > { %p8936_p10 = pneg %p9290_p6 }
  0x26   : > { %s250_s20 = sshll.u32 %s14329_s0, 4  ;;  %s251_s20 = int_to_ptr.vmem [resolvable:$true] %s250_s20 }
  0x27   : > { %s8934_s11 = scalar_lea.vmem %s251_s20, 16  ;;  %p8942_p0 = scmp.lt.s32.totalorder %s251_s20, %s251_s20 }
  0x28   : > { %p8935_p4 = scmp.ne.s32.totalorder %s251_s20, %s8934_s11  ;;  %p8943_p13 = scmp.lt.s32.totalorder %s8934_s11, %s8934_s11 }
  0x2a   : > { %p8937_p11 = pnand %p8936_p10, %p8935_p4  ;;  %p8944_p9 = por %p8943_p13, %p8942_p0 }
  0x2c   : > { %p8938_p12 = pneg %p8937_p11 }
  0x2e   : > { %p8945_p8 = pnand %p8944_p9, %p8938_p12 }
  0x30   : > { %8948 = shalt.err (!%p8945_p8)
}
  0x31   : > { %s9135_s18 = smov [#allocation2]   ;;  %p164_p3 = scmp.ne.s32.totalorder %s9113_s26, %s9109_s25 }
  0x32   : > { %7556 = dma.vmem_to_smem (!%p9290_p6), %s251_s20, 16, %s9135_s18, [#allocation5]  }
  0x33   : > { %p7569_p5 = scmp.lt.s32.totalorder %s9133_s7, 4  ;;  %s300_s19 = sand.u32 1, %s9113_s26  }
  0x34   : > { %s7540_s9 = sshll.u32 %s9129_s30, 8  ;;  %p14331_p4 = scmp.eq.s32.totalorder %s9133_s7, 0 }
  0x35   : > { %s7278_s11 = sshll.u32 %s300_s19, 4  ;;  %s14332_s4 = sld [smem:[#allocation434_spill]] }
  0x36   : > { %p166_p10 = por %p14331_p4, %p164_p3  ;;  %s304_s21 = scalar_lea.vmem [#allocation6], %s7278_s11 }
  0x37   : > { %s311_s6 = sshll.u32 %s304_s21, 4  ;;  %p9316_p8 = pnand %p7569_p5, %p9259_p7  ;;  %s312_s6 = int_to_ptr.vmem [resolvable:$true] %s311_s6 }
  0x38   : > { %p9310_p0 = pnand %p7569_p5, %p166_p10  ;;  %s301_s18 = scalar_lea.sflag [#allocation3], %s300_s19 }
  0x39   : > { %s8962_s7 = scalar_lea.vmem %s312_s6, 256  ;;  %s9136_s0 = smov [#allocation6]  }
  0x3a   : > { %p8951_p9 = pneg %p9310_p0  ;;  %p8963_p13 = scmp.ne.s32.totalorder %s312_s6, %s8962_s7 }
  0x3b   : > { %s310_s16 = scalar_lea.hbm %s14332_s4, %s7540_s9  ;;  %s8967_s8 = sshll.u32 %s9136_s0, 4  ;;  %s8968_s8 = int_to_ptr.vmem [resolvable:$false] %s8967_s8 }
  0x3c   : > { %p8965_p6 = pnand %p8963_p13, %p8951_p9  ;;  %s8969_s9 = scalar_lea.vmem %s8968_s8, 512 }
  0x3d   : > { %p8970_p12 = scmp.lt.s32.totalorder %s312_s6, %s8968_s8  ;;  %p8971_p3 = scmp.lt.s32.totalorder %s8969_s9, %s8962_s7 }
  0x3e   : > { %p8966_p11 = pneg %p8965_p6 }
  0x3f   : > { %p8972_p4 = por %p8971_p3, %p8970_p12 }
  0x41   : > { %p8973_p10 = pnand %p8972_p4, %p8966_p11 }
  0x43   : > { %8976 = shalt.err (!%p8973_p10)
}
  0x44   : > { %s9137_s21 = smov 128   ;;  %s9138_s13 = smov 8  }
  0x45   : > { %7560 = dma.hbm_to_vmem [thread:$0]  (!%p9310_p0), %s310_s16, 256, %s312_s6, %s301_s18, %s9137_s21, %s9137_s21, %s9138_s13  }
  0x46   : > { %s321_s19 = sand.u32 1, %s9101_s23   ;;  %s41_s11 = sadd.s32 1, %s9125_s29 }
  0x47   : > { %p43_p5 = scmp.ge.s32.totalorder %s41_s11, 2  ;;  %s7281_s7 = sshll.u32 %s321_s19, 6 }
  0x48   : > { %s7282_s0 = sshll.u32 %s9125_s29, 2  ;;  %s14336_s8 = sadd.s32 1, %s9129_s30 }
  0x49   : > { %s15782_s11 = smov (%p43_p5, %s41_s11), 0  ;;  %s15784_s8 = smov (!%p43_p5, %s14336_s8), %s9129_s30 }
  0x4a   : > { %14335 = sst [smem:[#allocation19_spill]] %s15782_s11  ;;  %s181_s9 = ssub.s32 %s9125_s29, %s15782_s11 }
  0x4b   : > { %s7283_s4 = sshll.u32 %s9129_s30, 4  ;;  %p47_p7 = scmp.ge.s32.totalorder %s15784_s8, 2 }
  0x4c   : > { %s331_s6 = sadd.s32 %s7283_s4, %s7282_s0  ;;  %s325_s24 = scalar_lea.vmem [#allocation7], %s7281_s7 }
  0x4d   : > { %s7284_s16 = sshll.u32 %s331_s6, 7  ;;  %s334_s18 = sshll.u32 %s325_s24, 4  ;;  %s9342_s18 = int_to_ptr.vmem [resolvable:$true] %s334_s18 }
  0x4e   : > { %s15786_s8 = smov (%p47_p7, %s15784_s8), 0  ;;  %s14337_s5 = sld [smem:[#allocation435_spill]] }
  0x4f   : > { %s154_s11 = ssub.s32 %s9129_s30, %s15786_s8  ;;  %s14338_s4 = sadd.s32 1, %s9113_s26 }
  0x50   : > { %p155_p0 = scmp.eq.s32.totalorder %s154_s11, 0  ;;  %s182_s29 = sor.u32 %s181_s9, %s154_s11 }
  0x51   : > { %p183_p9 = scmp.eq.s32.totalorder %s182_s29, 0  ;;  %s14339_s0 = sadd.s32 1, %s9101_s23 }
  0x52   : > { %s9349_s7 = scalar_select %p155_p0, %s9113_s26, %s14338_s4  }
  0x53   : > { %s9354_s6 = scalar_select %p183_p9, %s9101_s23, %s14339_s0  }
  0x54   : > { %s9340_s15 = scalar_lea.hbm %s14337_s5, %s7284_s16  ;;  %s322_s24 = scalar_lea.sflag [#allocation8], %s321_s19 }
  0x55   : > { %p8979_p13 = pneg %p9316_p8  ;;  %s8990_s16 = scalar_lea.vmem %s9342_s18, 1024 }
  0x56   : > { %p8991_p6 = scmp.ne.s32.totalorder %s9342_s18, %s8990_s16  ;;  %s9139_s21 = smov [#allocation7]  }
  0x57   : > { %s8995_s13 = sshll.u32 %s9139_s21, 4  ;;  %s8996_s13 = int_to_ptr.vmem [resolvable:$false] %s8995_s13 }
  0x58   : > { %p8993_p11 = pnand %p8991_p6, %p8979_p13  ;;  %s8997_s5 = scalar_lea.vmem %s8996_s13, 2048 }
  0x59   : > { %p8998_p3 = scmp.lt.s32.totalorder %s9342_s18, %s8996_s13  ;;  %p8999_p4 = scmp.lt.s32.totalorder %s8997_s5, %s8990_s16 }
  0x5a   : > { %p8994_p12 = pneg %p8993_p11 }
  0x5b   : > { %p9000_p10 = por %p8999_p4, %p8998_p3 }
  0x5d   : > { %p9001_p5 = pnand %p9000_p10, %p8994_p12 }
  0x5f   : > { %9004 = shalt.err (!%p9001_p5)
}
  0x60   : > { %s9140_s29 = smov 1024   ;;  %s9141_s19 = smov 512  }
  0x61   : > { %s9142_s11 = smov 32   ;;  %346 = sbr.rel (%p9279_p1) target bundleno = 1901 (0x76d), region = 44 }
  0x62   : > { %7563 = dma.hbm_to_vmem [thread:$0]  (!%p9316_p8), %s9340_s15, 1024, %s9342_s18, %s322_s24, %s9140_s29, %s9141_s19, %s9142_s11  }
  0x66   : > { %9076 = dma.done.wait (%p9242_p2), [#allocation5], 16  }
  0x67   : > { %9078 = vsyncadd (%p9242_p2), [#allocation5], 4294967280  ;;  %s352_s5 = sand.u32 1, %s9109_s25   ;;  %p14340_p7 = scmp.ne.s32.totalorder %s14321_s12, 0 }
  0x68   : > { %s9372_s9 = sshll.u32 %s352_s5, 4  ;;  %s353_s4 = scalar_lea.sflag [#allocation3], %s352_s5 }
  0x69   : > { %s356_s0 = scalar_lea.vmem [#allocation6], %s9372_s9 }
  0x6a   : > { %9080 = dma.done.wait (%p14340_p7), %s353_s4, 256  }
  0x6b   : > { %9082 = vsyncadd (%p14340_p7), %s353_s4, 4294967040  ;;  %s9380_s15 = sand.u32 1, %s9097_s22   ;;  %p14341_p2 = scmp.ne.s32.totalorder %s14323_s14, 0 }
  0x6c   : > { %s7288_s10 = sshll.u32 %s9380_s15, 6  ;;  %s362_s17 = scalar_lea.sflag [#allocation8], %s9380_s15 }
  0x6d   : > { %s9386_s20 = scalar_lea.vmem [#allocation7], %s7288_s10 }
  0x6e   : > { %9084 = dma.done.wait (%p14341_p2), %s362_s17, 1024  }
  0x6f   : > { %9086 = vsyncadd (%p14341_p2), %s362_s17, 4294966272 }
  0x70   : > { %370 = sfence }
  0x71   : > { %s7290_s12 = sshll.u32 %s9117_s27, 6  ;;  %p428_p1 = scmp.lt.s32.totalorder %s9121_s28, 1  ;;  %v13738_v0 = vmov 0   ;;  %vm732_vm0 = vcmask 130048  }
  0x72   : > { %p430_p8 = scmp.lt.s32.totalorder %s7290_s12, 127  ;;  %861 = vmatprep.mubr.bf16.mxu0 %v13738_v0  ;;  %1214 = vmatprep.mubr.bf16.mxu1 %v13738_v0  ;;  %s7529_s9 = sld [smem:[#allocation2 + $0x1]] }
  0x73   : > { %s9397_s18 = scalar_select %p428_p1, %s9121_s28, 1 }
  0x74   : > { %s15788_s12 = smov (!%p430_p8, %s7290_s12), 127  ;;  %s15764_s11 = sld [smem:[#allocation436_spill]] }
  0x75   : > { %s7291_s24 = sshll.u32 %s9397_s18, 7  ;;  %s7541_s14 = sshll.u32 %s9397_s18, 6 }
  0x76   : > { %s433_s16 = sadd.s32 %s7291_s24, %s15788_s12  ;;  %s445_s29 = scalar_lea.vmem %s13690_s2, %s7541_s14 }
  0x77   : > { %s7292_s19 = sshll.u32 %s433_s16, 2  ;;  %v524_v1 = vld [vmem:[%s445_s29] sm:$0xff]  ;;  %v525_v3 = vld [vmem:[%s445_s29 + $0x8] sm:$0xff]  ;;  %v526_v7 = vld [vmem:[%s445_s29 + $0x10] sm:$0xff]  ;;  %s7542_s17 = sshll.u32 %s9397_s18, 9 }
  0x78   : > { %v528_v2 = vld [vmem:[%s445_s29 + $0x20] sm:$0xff]  ;;  %s9407_s4 = scalar_lea.vmem %s13689_s1, %s7292_s19  ;;  %v529_v5 = vld [vmem:[%s445_s29 + $0x28] sm:$0xff]  ;;  %v530_v8 = vld [vmem:[%s445_s29 + $0x30] sm:$0xff]  ;;  %s9445_s14 = scalar_lea.vmem %s13691_s3, %s7542_s17 }
  0x79   : > { %v7330_v4 = vcombine.high %v524_v1, %v528_v2  ;;  %v7329_v6 = vcombine.low %v524_v1, %v528_v2  ;;  %v7332_v9 = vcombine.high %v525_v3, %v529_v5  ;;  %v7331_v10 = vcombine.low %v525_v3, %v529_v5  ;;  %v9410_v11 = vld [vmem:[%s9407_s4] sm:$0xff]   ;;  %v527_v13 = vld [vmem:[%s445_s29 + $0x18] sm:$0xff]  ;;  %v9420_v18 = vld [vmem:[%s9407_s4 + $0x8] sm:$0xff]   ;;  %s13528_s18 = scalar_lea.vmem [#allocation9], %s7288_s10  ;;  %s7535_s10 = sshll.u32 %s9117_s27, 2 }
  0x7a   : > { %v7334_v12 = vcombine.high %v526_v7, %v530_v8  ;;  %v531_v14 = vld [vmem:[%s445_s29 + $0x38] sm:$0xff]  ;;  %v7333_v15 = vcombine.low %v526_v7, %v530_v8  ;;  %v9430_v19 = vld [vmem:[%s9407_s4 + $0x10] sm:$0xff]   ;;  %v9454_v21 = vld [vmem:[%s9407_s4 + $0x20] sm:$0xff]   ;;  %s7536_s16 = sshll.u32 %s9121_s28, 4  ;;  %s7091_s13 = sshll.u32 %s13528_s18, 4  ;;  %s13619_s13 = int_to_ptr.vmem [resolvable:$true] %s7091_s13 }
  0x7b   : > { %843 = vmatprep.subr.bf16.mxu0 %v7330_v4  ;;  %1196 = vmatprep.subr.bf16.mxu1 %v7332_v9  ;;  %v7336_v16 = vcombine.high %v527_v13, %v531_v14  ;;  %v7335_v17 = vcombine.low %v527_v13, %v531_v14  ;;  %v9440_v20 = vld [vmem:[%s9407_s4 + $0x18] sm:$0xff]   ;;  %v9463_v22 = vld [vmem:[%s9407_s4 + $0x28] sm:$0xff]   ;;  %v9472_v23 = vld [vmem:[%s9407_s4 + $0x30] sm:$0xff]   ;;  %s7088_s21 = sadd.s32 %s7536_s16, %s7535_s10  ;;  %s15763_s29 = sld [smem:[#allocation17_spill]] }
  0x7c   : > { %844 = vmatpush1.bf16.msra.mxu0 %v7329_v6  ;;  %1197 = vmatpush1.bf16.msra.mxu1 %v7331_v10  ;;  %v9481_v24 = vld [vmem:[%s9407_s4 + $0x38] sm:$0xff]   ;;  %v9490_v25 = vld [vmem:[%s9407_s4 + $0x40] sm:$0xff]   ;;  %v9499_v26 = vld [vmem:[%s9407_s4 + $0x48] sm:$0xff]   ;;  %s7537_s27 = sshll.u32 %s7088_s21, 7  ;;  %s9146_s17 = smov [#allocation9]  }
  0x7d   : > { %1549 = vmatprep.subr.bf16.mxu0 %v7334_v12  ;;  %1902 = vmatprep.subr.bf16.mxu1 %v7336_v16  ;;  %v9508_v27 = vld [vmem:[%s9407_s4 + $0x50] sm:$0xff]   ;;  %v9517_v28 = vld [vmem:[%s9407_s4 + $0x58] sm:$0xff]   ;;  %v9526_v29 = vld [vmem:[%s9407_s4 + $0x60] sm:$0xff]   ;;  %s13625_s5 = scalar_lea.hbm %s15764_s11, %s7537_s27  ;;  %s9009_s12 = sshll.u32 %s9146_s17, 4  ;;  %s9010_s12 = int_to_ptr.vmem [resolvable:$false] %s9009_s12 }
  0x7e   : > { %v9535_v30 = vld [vmem:[%s9407_s4 + $0x68] sm:$0xff]   ;;  %v9544_v31 = vld [vmem:[%s9407_s4 + $0x70] sm:$0xff]   ;;  %v9553_v32 = vld [vmem:[%s9407_s4 + $0x78] sm:$0xff]   ;;  %s9011_s24 = scalar_lea.vmem %s9010_s12, 2048  ;;  %p9012_p11 = scmp.lt.s32.totalorder %s13619_s13, %s9010_s12 }
  0x7f   : > { %7337 = vmatmul.mubr.msk.bf16.vlgmr.msra.gmra.mxu0 %vm732_vm0, %v9410_v11  ;;  %7369 = vmatmul.mubr.msk.bf16.vlgmr.msra.gmra.mxu1 %vm732_vm0, %v9410_v11  ;;  %v9562_v33 = vld [vmem:[%s9407_s4 + $0x80] sm:$0xff]   ;;  %v9571_v34 = vld [vmem:[%s9407_s4 + $0x88] sm:$0xff]   ;;  %v9580_v35 = vld [vmem:[%s9407_s4 + $0x90] sm:$0xff]  }
  0x80   : > { %1550 = vmatpush1.bf16.msra.mxu0 %v7333_v15  ;;  %1903 = vmatpush1.bf16.msra.mxu1 %v7335_v17  ;;  %v9589_v36 = vld [vmem:[%s9407_s4 + $0x98] sm:$0xff]   ;;  %v9598_v37 = vld [vmem:[%s9407_s4 + $0xa0] sm:$0xff]   ;;  %v9607_v38 = vld [vmem:[%s9407_s4 + $0xa8] sm:$0xff]  }
  0x81   : > { %871 = vmatprep.mubr.bf16.mxu0 %v13738_v0  ;;  %1224 = vmatprep.mubr.bf16.mxu1 %v13738_v0  ;;  %v9616_v39 = vld [vmem:[%s9407_s4 + $0xb0] sm:$0xff]   ;;  %v9625_v40 = vld [vmem:[%s9407_s4 + $0xb8] sm:$0xff]   ;;  %v9634_v41 = vld [vmem:[%s9407_s4 + $0xc0] sm:$0xff]   ;;  %p15765_p9 = scmp.ne.s32.totalorder %s15763_s29, 0 }
  0x82   : > { %5121 = vmatprep.subr.bf16.mxu0 %v13738_v0  ;;  %5410 = vmatprep.subr.bf16.mxu1 %v13738_v0  ;;  %v9653_v47 = vld [vmem:[%s9407_s4 + $0xc8] sm:$0xff]   ;;  %v7700_v56 = vld [vmem:[%s9407_s4 + $0xd0] sm:$0xff]   ;;  %v7701_v2 = vld [vmem:[%s9407_s4 + $0xd8] sm:$0xff]  }
  0x83   : > { %v7702_v12 = vld [vmem:[%s9407_s4 + $0xe0] sm:$0xff]  }
  0x87   : > { %7338 = vmatmul.mubr.msk.bf16.gmra.mxu0 %vm732_vm0, %v9420_v18  ;;  %7370 = vmatmul.mubr.msk.bf16.gmra.mxu1 %vm732_vm0, %v9420_v18 }
  0x88   : > { %881 = vmatprep.mubr.bf16.mxu0 %v13738_v0  ;;  %1234 = vmatprep.mubr.bf16.mxu1 %v13738_v0 }
  0x8f   : > { %7339 = vmatmul.mubr.msk.bf16.gmra.mxu0 %vm732_vm0, %v9430_v19  ;;  %7371 = vmatmul.mubr.msk.bf16.gmra.mxu1 %vm732_vm0, %v9430_v19 }
  0x90   : > { %891 = vmatprep.mubr.bf16.mxu0 %v13738_v0  ;;  %1244 = vmatprep.mubr.bf16.mxu1 %v13738_v0 }
  0x97   : > { %7340 = vmatmul.mubr.msk.bf16.gmra.mxu0 %vm732_vm0, %v9440_v20  ;;  %7372 = vmatmul.mubr.msk.bf16.gmra.mxu1 %vm732_vm0, %v9440_v20 }
  0x98   : > { %901 = vmatprep.mubr.bf16.mxu0 %v13738_v0  ;;  %1254 = vmatprep.mubr.bf16.mxu1 %v13738_v0 }
  0x9f   : > { %7341 = vmatmul.mubr.msk.bf16.gmra.mxu0 %vm732_vm0, %v9454_v21  ;;  %7373 = vmatmul.mubr.msk.bf16.gmra.mxu1 %vm732_vm0, %v9454_v21 }
  0xa0   : > { %911 = vmatprep.mubr.bf16.mxu0 %v13738_v0  ;;  %1264 = vmatprep.mubr.bf16.mxu1 %v13738_v0 }
  0xa7   : > { %7342 = vmatmul.mubr.msk.bf16.gmra.mxu0 %vm732_vm0, %v9463_v22  ;;  %7374 = vmatmul.mubr.msk.bf16.gmra.mxu1 %vm732_vm0, %v9463_v22 }
  0xa8   : > { %921 = vmatprep.mubr.bf16.mxu0 %v13738_v0  ;;  %1274 = vmatprep.mubr.bf16.mxu1 %v13738_v0 }
  0xaf   : > { %7343 = vmatmul.mubr.msk.bf16.gmra.mxu0 %vm732_vm0, %v9472_v23  ;;  %7375 = vmatmul.mubr.msk.bf16.gmra.mxu1 %vm732_vm0, %v9472_v23 }
  0xb0   : > { %931 = vmatprep.mubr.bf16.mxu0 %v13738_v0  ;;  %1284 = vmatprep.mubr.bf16.mxu1 %v13738_v0 }
  0xb7   : > { %7344 = vmatmul.mubr.msk.bf16.gmra.mxu0 %vm732_vm0, %v9481_v24  ;;  %7376 = vmatmul.mubr.msk.bf16.gmra.mxu1 %vm732_vm0, %v9481_v24 }
  0xb8   : > { %941 = vmatprep.mubr.bf16.mxu0 %v13738_v0  ;;  %1294 = vmatprep.mubr.bf16.mxu1 %v13738_v0 }
  0xbf   : > { %7345 = vmatmul.mubr.msk.bf16.gmra.mxu0 %vm732_vm0, %v9490_v25  ;;  %7377 = vmatmul.mubr.msk.bf16.gmra.mxu1 %vm732_vm0, %v9490_v25 }
  0xc0   : > { %951 = vmatprep.mubr.bf16.mxu0 %v13738_v0  ;;  %1304 = vmatprep.mubr.bf16.mxu1 %v13738_v0 }
  0xc7   : > { %7346 = vmatmul.mubr.msk.bf16.gmra.mxu0 %vm732_vm0, %v9499_v26  ;;  %7378 = vmatmul.mubr.msk.bf16.gmra.mxu1 %vm732_vm0, %v9499_v26 }
  0xc8   : > { %961 = vmatprep.mubr.bf16.mxu0 %v13738_v0  ;;  %1314 = vmatprep.mubr.bf16.mxu1 %v13738_v0 }
  0xcf   : > { %7347 = vmatmul.mubr.msk.bf16.gmra.mxu0 %vm732_vm0, %v9508_v27  ;;  %7379 = vmatmul.mubr.msk.bf16.gmra.mxu1 %vm732_vm0, %v9508_v27 }
  0xd0   : > { %971 = vmatprep.mubr.bf16.mxu0 %v13738_v0  ;;  %1324 = vmatprep.mubr.bf16.mxu1 %v13738_v0 }
  0xd7   : > { %7348 = vmatmul.mubr.msk.bf16.gmra.mxu0 %vm732_vm0, %v9517_v28  ;;  %7380 = vmatmul.mubr.msk.bf16.gmra.mxu1 %vm732_vm0, %v9517_v28 }
  0xd8   : > { %981 = vmatprep.mubr.bf16.mxu0 %v13738_v0  ;;  %1334 = vmatprep.mubr.bf16.mxu1 %v13738_v0 }
  0xdf   : > { %7349 = vmatmul.mubr.msk.bf16.gmra.mxu0 %vm732_vm0, %v9526_v29  ;;  %7381 = vmatmul.mubr.msk.bf16.gmra.mxu1 %vm732_vm0, %v9526_v29 }
  0xe0   : > { %991 = vmatprep.mubr.bf16.mxu0 %v13738_v0  ;;  %1344 = vmatprep.mubr.bf16.mxu1 %v13738_v0 }
  0xe7   : > { %7350 = vmatmul.mubr.msk.bf16.gmra.mxu0 %vm732_vm0, %v9535_v30  ;;  %7382 = vmatmul.mubr.msk.bf16.gmra.mxu1 %vm732_vm0, %v9535_v30 }
  0xe8   : > { %1001 = vmatprep.mubr.bf16.mxu0 %v13738_v0  ;;  %1354 = vmatprep.mubr.bf16.mxu1 %v13738_v0 }
  0xef   : > { %7351 = vmatmul.mubr.msk.bf16.gmra.mxu0 %vm732_vm0, %v9544_v31  ;;  %7383 = vmatmul.mubr.msk.bf16.gmra.mxu1 %vm732_vm0, %v9544_v31 }
  0xf0   : > { %1011 = vmatprep.mubr.bf16.mxu0 %v13738_v0  ;;  %1364 = vmatprep.mubr.bf16.mxu1 %v13738_v0 }
  0xf7   : > { %7352 = vmatmul.mubr.msk.bf16.gmra.mxu0 %vm732_vm0, %v9553_v32  ;;  %7384 = vmatmul.mubr.msk.bf16.gmra.mxu1 %vm732_vm0, %v9553_v32 }
  0xf8   : > { %1021 = vmatprep.mubr.bf16.mxu0 %v13738_v0  ;;  %1374 = vmatprep.mubr.bf16.mxu1 %v13738_v0 }
  0xff   : > { %7353 = vmatmul.mubr.msk.bf16.gmra.mxu0 %vm732_vm0, %v9562_v33  ;;  %7385 = vmatmul.mubr.msk.bf16.gmra.mxu1 %vm732_vm0, %v9562_v33 }
 0x100   : > { %1031 = vmatprep.mubr.bf16.mxu0 %v13738_v0  ;;  %1384 = vmatprep.mubr.bf16.mxu1 %v13738_v0 }
 0x107   : > { %7354 = vmatmul.mubr.msk.bf16.gmra.mxu0 %vm732_vm0, %v9571_v34  ;;  %7386 = vmatmul.mubr.msk.bf16.gmra.mxu1 %vm732_vm0, %v9571_v34 }
 0x108   : > { %1041 = vmatprep.mubr.bf16.mxu0 %v13738_v0  ;;  %1394 = vmatprep.mubr.bf16.mxu1 %v13738_v0 }
 0x10f   : > { %7355 = vmatmul.mubr.msk.bf16.gmra.mxu0 %vm732_vm0, %v9580_v35  ;;  %7387 = vmatmul.mubr.msk.bf16.gmra.mxu1 %vm732_vm0, %v9580_v35 }
 0x110   : > { %1051 = vmatprep.mubr.bf16.mxu0 %v13738_v0  ;;  %1404 = vmatprep.mubr.bf16.mxu1 %v13738_v0 }
 0x117   : > { %7356 = vmatmul.mubr.msk.bf16.gmra.mxu0 %vm732_vm0, %v9589_v36  ;;  %7388 = vmatmul.mubr.msk.bf16.gmra.mxu1 %vm732_vm0, %v9589_v36 }
 0x118   : > { %1061 = vmatprep.mubr.bf16.mxu0 %v13738_v0  ;;  %1414 = vmatprep.mubr.bf16.mxu1 %v13738_v0 }
 0x11f   : > { %7357 = vmatmul.mubr.msk.bf16.gmra.mxu0 %vm732_vm0, %v9598_v37  ;;  %7389 = vmatmul.mubr.msk.bf16.gmra.mxu1 %vm732_vm0, %v9598_v37 }
 0x120   : > { %1071 = vmatprep.mubr.bf16.mxu0 %v13738_v0  ;;  %1424 = vmatprep.mubr.bf16.mxu1 %v13738_v0 }
 0x127   : > { %7358 = vmatmul.mubr.msk.bf16.gmra.mxu0 %vm732_vm0, %v9607_v38  ;;  %7390 = vmatmul.mubr.msk.bf16.gmra.mxu1 %vm732_vm0, %v9607_v38 }
 0x128   : > { %1081 = vmatprep.mubr.bf16.mxu0 %v13738_v0  ;;  %1434 = vmatprep.mubr.bf16.mxu1 %v13738_v0 }
 0x12f   : > { %7359 = vmatmul.mubr.msk.bf16.gmra.mxu0 %vm732_vm0, %v9616_v39  ;;  %7391 = vmatmul.mubr.msk.bf16.gmra.mxu1 %vm732_vm0, %v9616_v39 }
 0x130   : > { %1091 = vmatprep.mubr.bf16.mxu0 %v13738_v0  ;;  %1444 = vmatprep.mubr.bf16.mxu1 %v13738_v0 }
 0x137   : > { %7360 = vmatmul.mubr.msk.bf16.gmra.mxu0 %vm732_vm0, %v9625_v40  ;;  %7392 = vmatmul.mubr.msk.bf16.gmra.mxu1 %vm732_vm0, %v9625_v40 }
 0x138   : > { %1101 = vmatprep.mubr.bf16.mxu0 %v13738_v0  ;;  %1454 = vmatprep.mubr.bf16.mxu1 %v13738_v0 }
 0x13f   : > { %v9636_v42 = vpop.f32.mrf.mxu0  ;;  %7361 = vmatmul.mubr.msk.bf16.gmra.mxu0 %vm732_vm0, %v9634_v41  ;;  %v9640_v43 = vpop.f32.mrf.mxu1  ;;  %7393 = vmatmul.mubr.msk.bf16.gmra.mxu1 %vm732_vm0, %v9634_v41 }
 0x140   : > { %1111 = vmatprep.mubr.bf16.mxu0 %v13738_v0  ;;  %1464 = vmatprep.mubr.bf16.mxu1 %v13738_v0 }
 0x141   : > { %v9645_v44 = vpop.f32.mrf.mxu0  ;;  %v9648_v45 = vpop.f32.mrf.mxu1 }
 0x143   : > { %v9650_v46 = vpop.f32.mrf.mxu0  ;;  %v9655_v48 = vpop.f32.mrf.mxu1 }
 0x144   : > { %14342 = vst [vmem:[#allocation20_spill] sm:$0xff] %v9650_v46 }
 0x145   : > { %v9657_v49 = vpop.f32.mrf.mxu0  ;;  %v9659_v50 = vpop.f32.mrf.mxu1 }
 0x146   : > { %14343 = vst [vmem:[#allocation21_spill] sm:$0xff] %v9657_v49 }
 0x147   : > { %v9661_v51 = vpop.f32.mrf.mxu0  ;;  %7362 = vmatmul.mubr.msk.bf16.gmra.mxu0 %vm732_vm0, %v9653_v47  ;;  %v9665_v52 = vpop.f32.mrf.mxu1  ;;  %7394 = vmatmul.mubr.msk.bf16.gmra.mxu1 %vm732_vm0, %v9653_v47 }
 0x148   : > { %14344 = vst [vmem:[#allocation22_spill] sm:$0xff] %v9661_v51  ;;  %14345 = vst [vmem:[#allocation23_spill] sm:$0xff] %v9665_v52  ;;  %1121 = vmatprep.mubr.bf16.mxu0 %v13738_v0  ;;  %1474 = vmatprep.mubr.bf16.mxu1 %v13738_v0 }
 0x149   : > { %v9670_v53 = vpop.f32.mrf.mxu0  ;;  %v9673_v54 = vpop.f32.mrf.mxu1 }
 0x14b   : > { %v9675_v55 = vpop.f32.mrf.mxu0  ;;  %v9678_v57 = vpop.f32.mrf.mxu1 }
 0x14c   : > { %14346 = vst [vmem:[#allocation24_spill] sm:$0xff] %v9675_v55 }
 0x14d   : > { %v9680_v58 = vpop.f32.mrf.mxu0  ;;  %v9682_v59 = vpop.f32.mrf.mxu1 }
 0x14f   : > { %v9684_v60 = vpop.f32.mrf.mxu0  ;;  %7363 = vmatmul.mubr.msk.bf16.gmra.mxu0 %vm732_vm0, %v7700_v56  ;;  %v9687_v61 = vpop.f32.mrf.mxu1  ;;  %7395 = vmatmul.mubr.msk.bf16.gmra.mxu1 %vm732_vm0, %v7700_v56 }
 0x150   : > { %1131 = vmatprep.mubr.bf16.mxu0 %v13738_v0  ;;  %1484 = vmatprep.mubr.bf16.mxu1 %v13738_v0 }
 0x151   : > { %v9691_v62 = vpop.f32.mrf.mxu0  ;;  %v9694_v63 = vpop.f32.mrf.mxu1 }
 0x153   : > { %v9696_v1 = vpop.f32.mrf.mxu0  ;;  %v9699_v3 = vpop.f32.mrf.mxu1 }
 0x155   : > { %v9701_v4 = vpop.f32.mrf.mxu0  ;;  %v9703_v5 = vpop.f32.mrf.mxu1 }
 0x157   : > { %v9705_v6 = vpop.f32.mrf.mxu0  ;;  %7364 = vmatmul.mubr.msk.bf16.gmra.mxu0 %vm732_vm0, %v7701_v2  ;;  %v9708_v7 = vpop.f32.mrf.mxu1  ;;  %7396 = vmatmul.mubr.msk.bf16.gmra.mxu1 %vm732_vm0, %v7701_v2 }
 0x158   : > { %14347 = vst [vmem:[#allocation25_spill] sm:$0xff] %v9705_v6  ;;  %14348 = vst [vmem:[#allocation26_spill] sm:$0xff] %v9708_v7  ;;  %1141 = vmatprep.mubr.bf16.mxu0 %v13738_v0  ;;  %1494 = vmatprep.mubr.bf16.mxu1 %v13738_v0 }
 0x159   : > { %v9712_v8 = vpop.f32.mrf.mxu0  ;;  %v9715_v9 = vpop.f32.mrf.mxu1 }
 0x15a   : > { %14349 = vst [vmem:[#allocation27_spill] sm:$0xff] %v9712_v8  ;;  %14350 = vst [vmem:[#allocation28_spill] sm:$0xff] %v9715_v9 }
 0x15b   : > { %v9717_v10 = vpop.f32.mrf.mxu0  ;;  %v9720_v13 = vpop.f32.mrf.mxu1 }
 0x15c   : > { %14351 = vst [vmem:[#allocation29_spill] sm:$0xff] %v9717_v10  ;;  %14352 = vst [vmem:[#allocation30_spill] sm:$0xff] %v9720_v13 }
 0x15d   : > { %v9722_v14 = vpop.f32.mrf.mxu0  ;;  %v9724_v15 = vpop.f32.mrf.mxu1 }
 0x15e   : > { %14353 = vst [vmem:[#allocation31_spill] sm:$0xff] %v9722_v14  ;;  %14354 = vst [vmem:[#allocation32_spill] sm:$0xff] %v9724_v15  ;;  %v7703_v15 = vld [vmem:[%s9407_s4 + $0xe8] sm:$0xff]  }
 0x15f   : > { %v9726_v16 = vpop.f32.mrf.mxu0  ;;  %7365 = vmatmul.mubr.msk.bf16.gmra.mxu0 %vm732_vm0, %v7702_v12  ;;  %v9729_v17 = vpop.f32.mrf.mxu1  ;;  %7397 = vmatmul.mubr.msk.bf16.gmra.mxu1 %vm732_vm0, %v7702_v12 }
 0x160   : > { %14355 = vst [vmem:[#allocation33_spill] sm:$0xff] %v9726_v16  ;;  %14356 = vst [vmem:[#allocation34_spill] sm:$0xff] %v9729_v17  ;;  %1151 = vmatprep.mubr.bf16.mxu0 %v13738_v0  ;;  %1504 = vmatprep.mubr.bf16.mxu1 %v13738_v0 }
 0x161   : > { %v9733_v56 = vpop.f32.mrf.mxu0  ;;  %v9736_v2 = vpop.f32.mrf.mxu1 }
 0x162   : > { %14357 = vst [vmem:[#allocation35_spill] sm:$0xff] %v9733_v56  ;;  %14358 = vst [vmem:[#allocation36_spill] sm:$0xff] %v9736_v2 }
 0x163   : > { %v9738_v13 = vpop.f32.mrf.mxu0  ;;  %v9741_v9 = vpop.f32.mrf.mxu1 }
 0x164   : > { %14359 = vst [vmem:[#allocation37_spill] sm:$0xff] %v9738_v13  ;;  %14360 = vst [vmem:[#allocation38_spill] sm:$0xff] %v9741_v9 }
 0x165   : > { %v9743_v16 = vpop.f32.mrf.mxu0  ;;  %v9745_v10 = vpop.f32.mrf.mxu1 }
 0x166   : > { %14361 = vst [vmem:[#allocation39_spill] sm:$0xff] %v9743_v16  ;;  %14362 = vst [vmem:[#allocation40_spill] sm:$0xff] %v9745_v10  ;;  %v7704_v10 = vld [vmem:[%s9407_s4 + $0xf0] sm:$0xff]  }
 0x167   : > { %v9747_v17 = vpop.f32.mrf.mxu0  ;;  %7366 = vmatmul.mubr.msk.bf16.gmra.mxu0 %vm732_vm0, %v7703_v15  ;;  %v9750_v12 = vpop.f32.mrf.mxu1  ;;  %7398 = vmatmul.mubr.msk.bf16.gmra.mxu1 %vm732_vm0, %v7703_v15 }
 0x168   : > { %14363 = vst [vmem:[#allocation41_spill] sm:$0xff] %v9747_v17  ;;  %14364 = vst [vmem:[#allocation42_spill] sm:$0xff] %v9750_v12  ;;  %1161 = vmatprep.mubr.bf16.mxu0 %v13738_v0  ;;  %1514 = vmatprep.mubr.bf16.mxu1 %v13738_v0 }
 0x169   : > { %v9754_v2 = vpop.f32.mrf.mxu0  ;;  %v9757_v9 = vpop.f32.mrf.mxu1 }
 0x16a   : > { %14365 = vst [vmem:[#allocation43_spill] sm:$0xff] %v9754_v2  ;;  %14366 = vst [vmem:[#allocation44_spill] sm:$0xff] %v9757_v9 }
 0x16b   : > { %v9759_v13 = vpop.f32.mrf.mxu0  ;;  %v9762_v16 = vpop.f32.mrf.mxu1 }
 0x16c   : > { %14367 = vst [vmem:[#allocation45_spill] sm:$0xff] %v9759_v13  ;;  %14368 = vst [vmem:[#allocation46_spill] sm:$0xff] %v9762_v16 }
 0x16d   : > { %v9764_v17 = vpop.f32.mrf.mxu0  ;;  %v9766_v56 = vpop.f32.mrf.mxu1 }
 0x16e   : > { %14369 = vst [vmem:[#allocation47_spill] sm:$0xff] %v9764_v17  ;;  %14370 = vst [vmem:[#allocation48_spill] sm:$0xff] %v9766_v56  ;;  %v7705_v56 = vld [vmem:[%s9407_s4 + $0xf8] sm:$0xff]  }
 0x16f   : > { %v9768_v12 = vpop.f32.mrf.mxu0  ;;  %7367 = vmatmul.mubr.msk.bf16.gmra.mxu0 %vm732_vm0, %v7704_v10  ;;  %v9771_v15 = vpop.f32.mrf.mxu1  ;;  %7399 = vmatmul.mubr.msk.bf16.gmra.mxu1 %vm732_vm0, %v7704_v10 }
 0x170   : > { %14371 = vst [vmem:[#allocation49_spill] sm:$0xff] %v9768_v12  ;;  %14372 = vst [vmem:[#allocation50_spill] sm:$0xff] %v9771_v15  ;;  %1171 = vmatprep.mubr.bf16.mxu0 %v13738_v0  ;;  %1524 = vmatprep.mubr.bf16.mxu1 %v13738_v0 }
 0x171   : > { %v9775_v9 = vpop.f32.mrf.mxu0  ;;  %v9778_v13 = vpop.f32.mrf.mxu1 }
 0x172   : > { %14373 = vst [vmem:[#allocation51_spill] sm:$0xff] %v9775_v9  ;;  %14374 = vst [vmem:[#allocation52_spill] sm:$0xff] %v9778_v13 }
 0x173   : > { %v9780_v16 = vpop.f32.mrf.mxu0  ;;  %v9783_v17 = vpop.f32.mrf.mxu1 }
 0x174   : > { %14375 = vst [vmem:[#allocation53_spill] sm:$0xff] %v9780_v16  ;;  %14376 = vst [vmem:[#allocation54_spill] sm:$0xff] %v9783_v17 }
 0x175   : > { %v9785_v12 = vpop.f32.mrf.mxu0  ;;  %v9787_v15 = vpop.f32.mrf.mxu1 }
 0x176   : > { %14377 = vst [vmem:[#allocation55_spill] sm:$0xff] %v9785_v12  ;;  %14378 = vst [vmem:[#allocation56_spill] sm:$0xff] %v9787_v15  ;;  %v7706_v12 = vld [vmem:[%s9445_s14 + $0x38] sm:$0xff]  }
 0x177   : > { %v9789_v10 = vpop.f32.mrf.mxu0  ;;  %7368 = vmatmul.mubr.msk.bf16.gmra.mxu0 %vm732_vm0, %v7705_v56  ;;  %v9792_v9 = vpop.f32.mrf.mxu1  ;;  %7400 = vmatmul.mubr.msk.bf16.gmra.mxu1 %vm732_vm0, %v7705_v56  ;;  %v7707_v56 = vld [vmem:[%s9445_s14 + $0xb8] sm:$0xff]  }
 0x178   : > { %14379 = vst [vmem:[#allocation57_spill] sm:$0xff] %v9789_v10  ;;  %14380 = vst [vmem:[#allocation58_spill] sm:$0xff] %v9792_v9  ;;  %1567 = vmatprep.mubr.bf16.mxu0 %v13738_v0  ;;  %1920 = vmatprep.mubr.bf16.mxu1 %v13738_v0 }
 0x179   : > { %v9796_v13 = vpop.f32.mrf.mxu0  ;;  %v9799_v17 = vpop.f32.mrf.mxu1 }
 0x17a   : > { %14381 = vst [vmem:[#allocation59_spill] sm:$0xff] %v9796_v13  ;;  %14382 = vst [vmem:[#allocation60_spill] sm:$0xff] %v9799_v17  ;;  %v14389_v17 = vmov 0  }
 0x17b   : > { %v9801_v16 = vpop.f32.mrf.mxu0  ;;  %v9803_v15 = vpop.f32.mrf.mxu1 }
 0x17c   : > { %14383 = vst [vmem:[#allocation61_spill] sm:$0xff] %v9801_v16  ;;  %14384 = vst [vmem:[#allocation62_spill] sm:$0xff] %v9803_v15  ;;  %v7708_v16 = vld [vmem:[%s9445_s14 + $0x30] sm:$0xff]  }
 0x17d   : > { %v9805_v10 = vpop.f32.mrf.mxu0  ;;  %v9808_v9 = vpop.f32.mrf.mxu1 }
 0x17e   : > { %14385 = vst [vmem:[#allocation63_spill] sm:$0xff] %v9805_v10  ;;  %14386 = vst [vmem:[#allocation64_spill] sm:$0xff] %v9808_v9 }
 0x17f   : > { %v9811_v2 = vpop.f32.mrf.mxu0  ;;  %7401 = vmatmul.mubr.msk.bf16.vlgmr.msra.gmra.mxu0 %vm732_vm0, %v9410_v11  ;;  %v9815_v0 = vpop.f32.mrf.mxu1  ;;  %7433 = vmatmul.mubr.msk.bf16.vlgmr.msra.gmra.mxu1 %vm732_vm0, %v9410_v11 }
 0x180   : > { %14387 = vst [vmem:[#allocation65_spill] sm:$0xff] %v9811_v2  ;;  %14388 = vst [vmem:[#allocation66_spill] sm:$0xff] %v9815_v0  ;;  %1577 = vmatprep.mubr.bf16.mxu0 %v14389_v17  ;;  %1930 = vmatprep.mubr.bf16.mxu1 %v14389_v17  ;;  %v7709_v2 = vld [vmem:[%s9445_s14 + $0xb0] sm:$0xff]  }
 0x181   : > { %v9820_v15 = vpop.f32.mrf.mxu0  ;;  %5122 = vmatpush1.bf16.msra.mxu0 %v7706_v12  ;;  %v9824_v9 = vpop.f32.mrf.mxu1  ;;  %5411 = vmatpush1.bf16.msra.mxu1 %v7707_v56 }
 0x182   : > { %14390 = vst [vmem:[#allocation67_spill] sm:$0xff] %v9820_v15  ;;  %14391 = vst [vmem:[#allocation68_spill] sm:$0xff] %v9824_v9  ;;  %5123 = vmatprep.subr.bf16.mxu0 %v14389_v17  ;;  %5412 = vmatprep.subr.bf16.mxu1 %v14389_v17 }
 0x183   : > { %v9828_v10 = vpop.f32.mrf.mxu0  ;;  %v9831_v0 = vpop.f32.mrf.mxu1 }
 0x184   : > { %14392 = vst [vmem:[#allocation69_spill] sm:$0xff] %v9828_v10  ;;  %14393 = vst [vmem:[#allocation70_spill] sm:$0xff] %v9831_v0 }
 0x185   : > { %v9833_v11 = vpop.f32.mrf.mxu0  ;;  %5124 = vmatpush1.bf16.msra.mxu0 %v7708_v16  ;;  %v9835_v15 = vpop.f32.mrf.mxu1  ;;  %5413 = vmatpush1.bf16.msra.mxu1 %v7709_v2 }
 0x186   : > { %14394 = vst [vmem:[#allocation71_spill] sm:$0xff] %v9833_v11  ;;  %14395 = vst [vmem:[#allocation72_spill] sm:$0xff] %v9835_v15  ;;  %5125 = vmatprep.subr.bf16.mxu0 %v14389_v17  ;;  %5414 = vmatprep.subr.bf16.mxu1 %v14389_v17 }
 0x187   : > { %v9838_v12 = vpop.f32.mrf.mxu0  ;;  %7402 = vmatmul.mubr.msk.bf16.gmra.mxu0 %vm732_vm0, %v9420_v18  ;;  %v9843_v56 = vpop.f32.mrf.mxu1  ;;  %7434 = vmatmul.mubr.msk.bf16.gmra.mxu1 %vm732_vm0, %v9420_v18 }
 0x188   : > { %14396 = vst [vmem:[#allocation73_spill] sm:$0xff] %v9838_v12  ;;  %14397 = vst [vmem:[#allocation74_spill] sm:$0xff] %v9843_v56  ;;  %1587 = vmatprep.mubr.bf16.mxu0 %v14389_v17  ;;  %1940 = vmatprep.mubr.bf16.mxu1 %v14389_v17  ;;  %v7710_v56 = vld [vmem:[%s9445_s14 + $0x28] sm:$0xff]  }
 0x189   : > { %v9848_v16 = vpop.f32.mrf.mxu0  ;;  %v9851_v2 = vpop.f32.mrf.mxu1  ;;  %5126 = vmatpush1.bf16.msra.mxu0 %v7710_v56 }
 0x18a   : > { %14398 = vst [vmem:[#allocation75_spill] sm:$0xff] %v9848_v16  ;;  %14399 = vst [vmem:[#allocation76_spill] sm:$0xff] %v9851_v2  ;;  %5127 = vmatprep.subr.bf16.mxu0 %v14389_v17 }
 0x18b   : > { %v9853_v15 = vpop.f32.mrf.mxu0  ;;  %v9855_v0 = vpop.f32.mrf.mxu1 }
 0x18c   : > { %14400 = vst [vmem:[#allocation77_spill] sm:$0xff] %v9853_v15  ;;  %14401 = vst [vmem:[#allocation78_spill] sm:$0xff] %v9855_v0 }
 0x18d   : > { %v9857_v9 = vpop.f32.mrf.mxu0  ;;  %v9859_v12 = vpop.f32.mrf.mxu1 }
 0x18e   : > { %14402 = vst [vmem:[#allocation79_spill] sm:$0xff] %v9857_v9  ;;  %14403 = vst [vmem:[#allocation80_spill] sm:$0xff] %v9859_v12  ;;  %v7711_v12 = vld [vmem:[%s9445_s14 + $0xa8] sm:$0xff]  }
 0x18f   : > { %v9862_v10 = vpop.f32.mrf.mxu0  ;;  %7403 = vmatmul.mubr.msk.bf16.gmra.mxu0 %vm732_vm0, %v9430_v19  ;;  %v9866_v18 = vpop.f32.mrf.mxu1  ;;  %7435 = vmatmul.mubr.msk.bf16.gmra.mxu1 %vm732_vm0, %v9430_v19 }
 0x190   : > { %14404 = vst [vmem:[#allocation81_spill] sm:$0xff] %v9862_v10  ;;  %14405 = vst [vmem:[#allocation82_spill] sm:$0xff] %v9866_v18  ;;  %1597 = vmatprep.mubr.bf16.mxu0 %v14389_v17  ;;  %1950 = vmatprep.mubr.bf16.mxu1 %v14389_v17 }
 0x191   : > { %v9871_v2 = vpop.f32.mrf.mxu0  ;;  %v9874_v0 = vpop.f32.mrf.mxu1  ;;  %5415 = vmatpush1.bf16.msra.mxu1 %v7711_v12 }
 0x192   : > { %14406 = vst [vmem:[#allocation83_spill] sm:$0xff] %v9871_v2  ;;  %14407 = vst [vmem:[#allocation84_spill] sm:$0xff] %v9874_v0  ;;  %5416 = vmatprep.subr.bf16.mxu1 %v14389_v17 }
 0x193   : > { %v9878_v10 = vpop.f32.mrf.mxu0  ;;  %v9880_v15 = vpop.f32.mrf.mxu1 }
 0x194   : > { %14408 = vst [vmem:[#allocation85_spill] sm:$0xff] %v9878_v10  ;;  %14409 = vst [vmem:[#allocation86_spill] sm:$0xff] %v9880_v15 }
 0x195   : > { %v9882_v18 = vpop.f32.mrf.mxu0  ;;  %v9885_v19 = vpop.f32.mrf.mxu1 }
 0x196   : > { %14410 = vst [vmem:[#allocation87_spill] sm:$0xff] %v9882_v18  ;;  %14411 = vst [vmem:[#allocation88_spill] sm:$0xff] %v9885_v19 }
 0x197   : > { %v9887_v2 = vpop.f32.mrf.mxu0  ;;  %7404 = vmatmul.mubr.msk.bf16.gmra.mxu0 %vm732_vm0, %v9440_v20  ;;  %v9891_v56 = vpop.f32.mrf.mxu1  ;;  %7436 = vmatmul.mubr.msk.bf16.gmra.mxu1 %vm732_vm0, %v9440_v20 }
 0x198   : > { %14412 = vst [vmem:[#allocation89_spill] sm:$0xff] %v9887_v2  ;;  %14413 = vst [vmem:[#allocation90_spill] sm:$0xff] %v9891_v56  ;;  %1607 = vmatprep.mubr.bf16.mxu0 %v14389_v17  ;;  %1960 = vmatprep.mubr.bf16.mxu1 %v14389_v17  ;;  %v7712_v56 = vld [vmem:[%s9445_s14 + $0x20] sm:$0xff]  }
 0x199   : > { %v9896_v12 = vpop.f32.mrf.mxu0  ;;  %v9899_v0 = vpop.f32.mrf.mxu1  ;;  %5128 = vmatpush1.bf16.msra.mxu0 %v7712_v56 }
 0x19a   : > { %14414 = vst [vmem:[#allocation91_spill] sm:$0xff] %v9896_v12  ;;  %14415 = vst [vmem:[#allocation92_spill] sm:$0xff] %v9899_v0  ;;  %5129 = vmatprep.subr.bf16.mxu0 %v14389_v17 }
 0x19b   : > { %v9901_v19 = vpop.f32.mrf.mxu0  ;;  %v9903_v2 = vpop.f32.mrf.mxu1 }
 0x19c   : > { %14416 = vst [vmem:[#allocation93_spill] sm:$0xff] %v9901_v19  ;;  %14417 = vst [vmem:[#allocation94_spill] sm:$0xff] %v9903_v2 }
 0x19d   : > { %v9905_v15 = vpop.f32.mrf.mxu0  ;;  %v9907_v10 = vpop.f32.mrf.mxu1 }
 0x19e   : > { %14418 = vst [vmem:[#allocation95_spill] sm:$0xff] %v9905_v15  ;;  %14419 = vst [vmem:[#allocation96_spill] sm:$0xff] %v9907_v10  ;;  %v7713_v10 = vld [vmem:[%s9445_s14 + $0xa0] sm:$0xff]  }
 0x19f   : > { %v9910_v18 = vpop.f32.mrf.mxu0  ;;  %7405 = vmatmul.mubr.msk.bf16.gmra.mxu0 %vm732_vm0, %v9454_v21  ;;  %v9914_v20 = vpop.f32.mrf.mxu1  ;;  %7437 = vmatmul.mubr.msk.bf16.gmra.mxu1 %vm732_vm0, %v9454_v21 }
 0x1a0   : > { %14420 = vst [vmem:[#allocation97_spill] sm:$0xff] %v9910_v18  ;;  %14421 = vst [vmem:[#allocation98_spill] sm:$0xff] %v9914_v20  ;;  %1617 = vmatprep.mubr.bf16.mxu0 %v14389_v17  ;;  %1970 = vmatprep.mubr.bf16.mxu1 %v14389_v17 }
 0x1a1   : > { %v9919_v0 = vpop.f32.mrf.mxu0  ;;  %v9922_v2 = vpop.f32.mrf.mxu1  ;;  %5417 = vmatpush1.bf16.msra.mxu1 %v7713_v10 }
 0x1a2   : > { %14422 = vst [vmem:[#allocation99_spill] sm:$0xff] %v9919_v0  ;;  %14423 = vst [vmem:[#allocation100_spill] sm:$0xff] %v9922_v2  ;;  %5418 = vmatprep.subr.bf16.mxu1 %v14389_v17 }
 0x1a3   : > { %v9926_v18 = vpop.f32.mrf.mxu0  ;;  %v9928_v19 = vpop.f32.mrf.mxu1 }
 0x1a4   : > { %14424 = vst [vmem:[#allocation101_spill] sm:$0xff] %v9926_v18  ;;  %14425 = vst [vmem:[#allocation102_spill] sm:$0xff] %v9928_v19 }
 0x1a5   : > { %v9930_v20 = vpop.f32.mrf.mxu0  ;;  %v9933_v21 = vpop.f32.mrf.mxu1 }
 0x1a6   : > { %14426 = vst [vmem:[#allocation103_spill] sm:$0xff] %v9930_v20  ;;  %14427 = vst [vmem:[#allocation104_spill] sm:$0xff] %v9933_v21 }
 0x1a7   : > { %v9935_v0 = vpop.f32.mrf.mxu0  ;;  %7406 = vmatmul.mubr.msk.bf16.gmra.mxu0 %vm732_vm0, %v9463_v22  ;;  %v9939_v56 = vpop.f32.mrf.mxu1  ;;  %7438 = vmatmul.mubr.msk.bf16.gmra.mxu1 %vm732_vm0, %v9463_v22 }
 0x1a8   : > { %14428 = vst [vmem:[#allocation105_spill] sm:$0xff] %v9935_v0  ;;  %14429 = vst [vmem:[#allocation106_spill] sm:$0xff] %v9939_v56  ;;  %1627 = vmatprep.mubr.bf16.mxu0 %v14389_v17  ;;  %1980 = vmatprep.mubr.bf16.mxu1 %v14389_v17  ;;  %v7714_v56 = vld [vmem:[%s9445_s14 + $0x18] sm:$0xff]  }
 0x1a9   : > { %v9944_v10 = vpop.f32.mrf.mxu0  ;;  %v9947_v19 = vpop.f32.mrf.mxu1  ;;  %5130 = vmatpush1.bf16.msra.mxu0 %v7714_v56 }
 0x1aa   : > { %14430 = vst [vmem:[#allocation107_spill] sm:$0xff] %v9944_v10  ;;  %14431 = vst [vmem:[#allocation108_spill] sm:$0xff] %v9947_v19  ;;  %5131 = vmatprep.subr.bf16.mxu0 %v14389_v17 }
 0x1ab   : > { %v9949_v21 = vpop.f32.mrf.mxu0  ;;  %v9951_v0 = vpop.f32.mrf.mxu1 }
 0x1ac   : > { %14432 = vst [vmem:[#allocation109_spill] sm:$0xff] %v9949_v21  ;;  %14433 = vst [vmem:[#allocation110_spill] sm:$0xff] %v9951_v0 }
 0x1ad   : > { %v9953_v2 = vpop.f32.mrf.mxu0  ;;  %v9955_v18 = vpop.f32.mrf.mxu1 }
 0x1ae   : > { %14434 = vst [vmem:[#allocation111_spill] sm:$0xff] %v9953_v2  ;;  %14435 = vst [vmem:[#allocation112_spill] sm:$0xff] %v9955_v18  ;;  %v7715_v18 = vld [vmem:[%s9445_s14 + $0x98] sm:$0xff]  }
 0x1af   : > { %v9958_v20 = vpop.f32.mrf.mxu0  ;;  %7407 = vmatmul.mubr.msk.bf16.gmra.mxu0 %vm732_vm0, %v9472_v23  ;;  %v9962_v22 = vpop.f32.mrf.mxu1  ;;  %7439 = vmatmul.mubr.msk.bf16.gmra.mxu1 %vm732_vm0, %v9472_v23 }
 0x1b0   : > { %14436 = vst [vmem:[#allocation113_spill] sm:$0xff] %v9958_v20  ;;  %14437 = vst [vmem:[#allocation114_spill] sm:$0xff] %v9962_v22  ;;  %1637 = vmatprep.mubr.bf16.mxu0 %v14389_v17  ;;  %1990 = vmatprep.mubr.bf16.mxu1 %v14389_v17 }
 0x1b1   : > { %v9967_v19 = vpop.f32.mrf.mxu0  ;;  %v9970_v0 = vpop.f32.mrf.mxu1  ;;  %5419 = vmatpush1.bf16.msra.mxu1 %v7715_v18 }
 0x1b2   : > { %14438 = vst [vmem:[#allocation115_spill] sm:$0xff] %v9967_v19  ;;  %14439 = vst [vmem:[#allocation116_spill] sm:$0xff] %v9970_v0  ;;  %5420 = vmatprep.subr.bf16.mxu1 %v14389_v17 }
 0x1b3   : > { %v9974_v20 = vpop.f32.mrf.mxu0  ;;  %v9976_v21 = vpop.f32.mrf.mxu1 }
 0x1b4   : > { %14440 = vst [vmem:[#allocation117_spill] sm:$0xff] %v9974_v20  ;;  %14441 = vst [vmem:[#allocation118_spill] sm:$0xff] %v9976_v21 }
 0x1b5   : > { %v9978_v22 = vpop.f32.mrf.mxu0  ;;  %v9981_v23 = vpop.f32.mrf.mxu1 }
 0x1b6   : > { %14442 = vst [vmem:[#allocation119_spill] sm:$0xff] %v9978_v22  ;;  %14443 = vst [vmem:[#allocation120_spill] sm:$0xff] %v9981_v23 }
 0x1b7   : > { %v9983_v19 = vpop.f32.mrf.mxu0  ;;  %7408 = vmatmul.mubr.msk.bf16.gmra.mxu0 %vm732_vm0, %v9481_v24  ;;  %v9987_v56 = vpop.f32.mrf.mxu1  ;;  %7440 = vmatmul.mubr.msk.bf16.gmra.mxu1 %vm732_vm0, %v9481_v24 }
 0x1b8   : > { %14444 = vst [vmem:[#allocation121_spill] sm:$0xff] %v9983_v19  ;;  %14445 = vst [vmem:[#allocation122_spill] sm:$0xff] %v9987_v56  ;;  %1647 = vmatprep.mubr.bf16.mxu0 %v14389_v17  ;;  %2000 = vmatprep.mubr.bf16.mxu1 %v14389_v17  ;;  %v7716_v56 = vld [vmem:[%s9445_s14 + $0x10] sm:$0xff]  }
 0x1b9   : > { %v9992_v18 = vpop.f32.mrf.mxu0  ;;  %v9995_v21 = vpop.f32.mrf.mxu1  ;;  %5132 = vmatpush1.bf16.msra.mxu0 %v7716_v56 }
 0x1ba   : > { %14446 = vst [vmem:[#allocation123_spill] sm:$0xff] %v9992_v18  ;;  %14447 = vst [vmem:[#allocation124_spill] sm:$0xff] %v9995_v21  ;;  %5133 = vmatprep.subr.bf16.mxu0 %v14389_v17 }
 0x1bb   : > { %v9997_v23 = vpop.f32.mrf.mxu0  ;;  %v9999_v0 = vpop.f32.mrf.mxu1 }
 0x1bc   : > { %14448 = vst [vmem:[#allocation125_spill] sm:$0xff] %v9997_v23  ;;  %14449 = vst [vmem:[#allocation126_spill] sm:$0xff] %v9999_v0 }
 0x1bd   : > { %v10001_v19 = vpop.f32.mrf.mxu0  ;;  %v10003_v20 = vpop.f32.mrf.mxu1 }
 0x1be   : > { %14450 = vst [vmem:[#allocation127_spill] sm:$0xff] %v10001_v19  ;;  %14451 = vst [vmem:[#allocation128_spill] sm:$0xff] %v10003_v20  ;;  %v7717_v20 = vld [vmem:[%s9445_s14 + $0x90] sm:$0xff]  }
 0x1bf   : > { %v10006_v22 = vpop.f32.mrf.mxu0  ;;  %7409 = vmatmul.mubr.msk.bf16.gmra.mxu0 %vm732_vm0, %v9490_v25  ;;  %v10010_v24 = vpop.f32.mrf.mxu1  ;;  %7441 = vmatmul.mubr.msk.bf16.gmra.mxu1 %vm732_vm0, %v9490_v25 }
 0x1c0   : > { %14452 = vst [vmem:[#allocation129_spill] sm:$0xff] %v10006_v22  ;;  %14453 = vst [vmem:[#allocation130_spill] sm:$0xff] %v10010_v24  ;;  %1657 = vmatprep.mubr.bf16.mxu0 %v14389_v17  ;;  %2010 = vmatprep.mubr.bf16.mxu1 %v14389_v17 }
 0x1c1   : > { %v10015_v21 = vpop.f32.mrf.mxu0  ;;  %v10018_v0 = vpop.f32.mrf.mxu1  ;;  %5421 = vmatpush1.bf16.msra.mxu1 %v7717_v20 }
 0x1c2   : > { %14454 = vst [vmem:[#allocation131_spill] sm:$0xff] %v10015_v21  ;;  %14455 = vst [vmem:[#allocation132_spill] sm:$0xff] %v10018_v0  ;;  %5422 = vmatprep.subr.bf16.mxu1 %v14389_v17 }
 0x1c3   : > { %v10022_v22 = vpop.f32.mrf.mxu0  ;;  %v10024_v23 = vpop.f32.mrf.mxu1 }
 0x1c4   : > { %14456 = vst [vmem:[#allocation133_spill] sm:$0xff] %v10022_v22  ;;  %14457 = vst [vmem:[#allocation134_spill] sm:$0xff] %v10024_v23 }
 0x1c5   : > { %v10026_v24 = vpop.f32.mrf.mxu0  ;;  %v10029_v25 = vpop.f32.mrf.mxu1 }
 0x1c6   : > { %14458 = vst [vmem:[#allocation135_spill] sm:$0xff] %v10026_v24  ;;  %14459 = vst [vmem:[#allocation136_spill] sm:$0xff] %v10029_v25 }
 0x1c7   : > { %v10031_v21 = vpop.f32.mrf.mxu0  ;;  %7410 = vmatmul.mubr.msk.bf16.gmra.mxu0 %vm732_vm0, %v9499_v26  ;;  %v10035_v56 = vpop.f32.mrf.mxu1  ;;  %7442 = vmatmul.mubr.msk.bf16.gmra.mxu1 %vm732_vm0, %v9499_v26 }
 0x1c8   : > { %14460 = vst [vmem:[#allocation137_spill] sm:$0xff] %v10031_v21  ;;  %14461 = vst [vmem:[#allocation138_spill] sm:$0xff] %v10035_v56  ;;  %1667 = vmatprep.mubr.bf16.mxu0 %v14389_v17  ;;  %2020 = vmatprep.mubr.bf16.mxu1 %v14389_v17  ;;  %v7718_v21 = vld [vmem:[%s9445_s14 + $0x8] sm:$0xff]  }
 0x1c9   : > { %v10040_v20 = vpop.f32.mrf.mxu0  ;;  %v10043_v0 = vpop.f32.mrf.mxu1  ;;  %5134 = vmatpush1.bf16.msra.mxu0 %v7718_v21  ;;  %v7719_v56 = vld [vmem:[%s9445_s14 + $0x88] sm:$0xff]  }
 0x1ca   : > { %14462 = vst [vmem:[#allocation139_spill] sm:$0xff] %v10040_v20  ;;  %14463 = vst [vmem:[#allocation140_spill] sm:$0xff] %v10043_v0  ;;  %5135 = vmatprep.subr.bf16.mxu0 %v14389_v17  ;;  %5423 = vmatpush1.bf16.msra.mxu1 %v7719_v56 }
 0x1cb   : > { %v10045_v23 = vpop.f32.mrf.mxu0  ;;  %v10047_v25 = vpop.f32.mrf.mxu1  ;;  %5424 = vmatprep.subr.bf16.mxu1 %v14389_v17 }
 0x1cc   : > { %14464 = vst [vmem:[#allocation141_spill] sm:$0xff] %v10045_v23  ;;  %14465 = vst [vmem:[#allocation142_spill] sm:$0xff] %v10047_v25 }
 0x1cd   : > { %v10050_v22 = vpop.f32.mrf.mxu0  ;;  %v10052_v24 = vpop.f32.mrf.mxu1 }
 0x1ce   : > { %14466 = vst [vmem:[#allocation143_spill] sm:$0xff] %v10050_v22  ;;  %14467 = vst [vmem:[#allocation144_spill] sm:$0xff] %v10052_v24 }
 0x1cf   : > { %v10055_v26 = vpop.f32.mrf.mxu0  ;;  %7411 = vmatmul.mubr.msk.bf16.gmra.mxu0 %vm732_vm0, %v9508_v27  ;;  %v10060_v20 = vpop.f32.mrf.mxu1  ;;  %7443 = vmatmul.mubr.msk.bf16.gmra.mxu1 %vm732_vm0, %v9508_v27 }
 0x1d0   : > { %14468 = vst [vmem:[#allocation145_spill] sm:$0xff] %v10055_v26  ;;  %14469 = vst [vmem:[#allocation146_spill] sm:$0xff] %v10060_v20  ;;  %1677 = vmatprep.mubr.bf16.mxu0 %v14389_v17  ;;  %2030 = vmatprep.mubr.bf16.mxu1 %v14389_v17 }
 0x1d1   : > { %v10065_v0 = vpop.f32.mrf.mxu0  ;;  %v10068_v21 = vpop.f32.mrf.mxu1 }
 0x1d2   : > { %14470 = vst [vmem:[#allocation147_spill] sm:$0xff] %v10065_v0  ;;  %14471 = vst [vmem:[#allocation148_spill] sm:$0xff] %v10068_v21 }
 0x1d3   : > { %v10071_v24 = vpop.f32.mrf.mxu0  ;;  %v10073_v25 = vpop.f32.mrf.mxu1 }
 0x1d4   : > { %14472 = vst [vmem:[#allocation149_spill] sm:$0xff] %v10071_v24  ;;  %14473 = vst [vmem:[#allocation150_spill] sm:$0xff] %v10073_v25 }
 0x1d5   : > { %v10075_v20 = vpop.f32.mrf.mxu0  ;;  %v10077_v27 = vpop.f32.mrf.mxu1 }
 0x1d6   : > { %14474 = vst [vmem:[#allocation151_spill] sm:$0xff] %v10075_v20  ;;  %14475 = vst [vmem:[#allocation152_spill] sm:$0xff] %v10077_v27 }
 0x1d7   : > { %v10079_v26 = vpop.f32.mrf.mxu0  ;;  %7412 = vmatmul.mubr.msk.bf16.gmra.mxu0 %vm732_vm0, %v9517_v28  ;;  %v10083_v56 = vpop.f32.mrf.mxu1  ;;  %7444 = vmatmul.mubr.msk.bf16.gmra.mxu1 %vm732_vm0, %v9517_v28 }
 0x1d8   : > { %14476 = vst [vmem:[#allocation153_spill] sm:$0xff] %v10079_v26  ;;  %14477 = vst [vmem:[#allocation154_spill] sm:$0xff] %v10083_v56  ;;  %1687 = vmatprep.mubr.bf16.mxu0 %v14389_v17  ;;  %2040 = vmatprep.mubr.bf16.mxu1 %v14389_v17  ;;  %v7720_v26 = vld [vmem:[%s9445_s14] sm:$0xff]  }
 0x1d9   : > { %v10088_v21 = vpop.f32.mrf.mxu0  ;;  %v10091_v25 = vpop.f32.mrf.mxu1  ;;  %5136 = vmatpush1.bf16.msra.mxu0 %v7720_v26  ;;  %v7721_v56 = vld [vmem:[%s9445_s14 + $0x80] sm:$0xff]  }
 0x1da   : > { %14478 = vst [vmem:[#allocation155_spill] sm:$0xff] %v10088_v21  ;;  %14479 = vst [vmem:[#allocation156_spill] sm:$0xff] %v10091_v25  ;;  %5137 = vmatprep.subr.bf16.mxu0 %v14389_v17  ;;  %5425 = vmatpush1.bf16.msra.mxu1 %v7721_v56 }
 0x1db   : > { %v10093_v24 = vpop.f32.mrf.mxu0  ;;  %v10095_v27 = vpop.f32.mrf.mxu1  ;;  %5426 = vmatprep.subr.bf16.mxu1 %v14389_v17 }
 0x1dc   : > { %14480 = vst [vmem:[#allocation157_spill] sm:$0xff] %v10093_v24  ;;  %14481 = vst [vmem:[#allocation158_spill] sm:$0xff] %v10095_v27 }
 0x1dd   : > { %v10098_v20 = vpop.f32.mrf.mxu0  ;;  %v10100_v0 = vpop.f32.mrf.mxu1 }
 0x1de   : > { %14482 = vst [vmem:[#allocation159_spill] sm:$0xff] %v10098_v20  ;;  %14483 = vst [vmem:[#allocation160_spill] sm:$0xff] %v10100_v0 }
 0x1df   : > { %v10103_v28 = vpop.f32.mrf.mxu0  ;;  %7413 = vmatmul.mubr.msk.bf16.gmra.mxu0 %vm732_vm0, %v9526_v29  ;;  %v10108_v21 = vpop.f32.mrf.mxu1  ;;  %7445 = vmatmul.mubr.msk.bf16.gmra.mxu1 %vm732_vm0, %v9526_v29 }
 0x1e0   : > { %14484 = vst [vmem:[#allocation161_spill] sm:$0xff] %v10103_v28  ;;  %14485 = vst [vmem:[#allocation162_spill] sm:$0xff] %v10108_v21  ;;  %1697 = vmatprep.mubr.bf16.mxu0 %v14389_v17  ;;  %2050 = vmatprep.mubr.bf16.mxu1 %v14389_v17 }
 0x1e1   : > { %v10113_v25 = vpop.f32.mrf.mxu0  ;;  %v10116_v26 = vpop.f32.mrf.mxu1 }
 0x1e2   : > { %14486 = vst [vmem:[#allocation163_spill] sm:$0xff] %v10113_v25  ;;  %14487 = vst [vmem:[#allocation164_spill] sm:$0xff] %v10116_v26 }
 0x1e3   : > { %v10119_v0 = vpop.f32.mrf.mxu0  ;;  %v10121_v27 = vpop.f32.mrf.mxu1 }
 0x1e4   : > { %14488 = vst [vmem:[#allocation165_spill] sm:$0xff] %v10119_v0  ;;  %14489 = vst [vmem:[#allocation166_spill] sm:$0xff] %v10121_v27 }
 0x1e5   : > { %v10123_v21 = vpop.f32.mrf.mxu0  ;;  %v10125_v29 = vpop.f32.mrf.mxu1 }
 0x1e6   : > { %14490 = vst [vmem:[#allocation167_spill] sm:$0xff] %v10123_v21  ;;  %14491 = vst [vmem:[#allocation168_spill] sm:$0xff] %v10125_v29 }
 0x1e7   : > { %v10127_v28 = vpop.f32.mrf.mxu0  ;;  %7414 = vmatmul.mubr.msk.bf16.gmra.mxu0 %vm732_vm0, %v9535_v30  ;;  %v10131_v56 = vpop.f32.mrf.mxu1  ;;  %7446 = vmatmul.mubr.msk.bf16.gmra.mxu1 %vm732_vm0, %v9535_v30 }
 0x1e8   : > { %14492 = vst [vmem:[#allocation169_spill] sm:$0xff] %v10127_v28  ;;  %14493 = vst [vmem:[#allocation170_spill] sm:$0xff] %v10131_v56  ;;  %1707 = vmatprep.mubr.bf16.mxu0 %v14389_v17  ;;  %2060 = vmatprep.mubr.bf16.mxu1 %v14389_v17  ;;  %v7722_v28 = vld [vmem:[%s9445_s14 + $0x78] sm:$0xff]  }
 0x1e9   : > { %v10136_v26 = vpop.f32.mrf.mxu0  ;;  %v10139_v27 = vpop.f32.mrf.mxu1  ;;  %5138 = vmatpush2.bf16.msra.mxu0 %v7722_v28  ;;  %v7723_v56 = vld [vmem:[%s9445_s14 + $0xf8] sm:$0xff]  }
 0x1ea   : > { %14494 = vst [vmem:[#allocation171_spill] sm:$0xff] %v10136_v26  ;;  %14495 = vst [vmem:[#allocation172_spill] sm:$0xff] %v10139_v27  ;;  %5139 = vmatprep.subr.bf16.mxu0 %v14389_v17  ;;  %5427 = vmatpush2.bf16.msra.mxu1 %v7723_v56 }
 0x1eb   : > { %v10141_v0 = vpop.f32.mrf.mxu0  ;;  %v10143_v29 = vpop.f32.mrf.mxu1  ;;  %5428 = vmatprep.subr.bf16.mxu1 %v14389_v17 }
 0x1ec   : > { %14496 = vst [vmem:[#allocation173_spill] sm:$0xff] %v10141_v0  ;;  %14497 = vst [vmem:[#allocation174_spill] sm:$0xff] %v10143_v29 }
 0x1ed   : > { %v10146_v21 = vpop.f32.mrf.mxu0  ;;  %v10148_v25 = vpop.f32.mrf.mxu1 }
 0x1ee   : > { %14498 = vst [vmem:[#allocation175_spill] sm:$0xff] %v10146_v21  ;;  %14499 = vst [vmem:[#allocation176_spill] sm:$0xff] %v10148_v25 }
 0x1ef   : > { %v10151_v30 = vpop.f32.mrf.mxu0  ;;  %7415 = vmatmul.mubr.msk.bf16.gmra.mxu0 %vm732_vm0, %v9544_v31  ;;  %v10156_v26 = vpop.f32.mrf.mxu1  ;;  %7447 = vmatmul.mubr.msk.bf16.gmra.mxu1 %vm732_vm0, %v9544_v31 }
 0x1f0   : > { %14500 = vst [vmem:[#allocation177_spill] sm:$0xff] %v10151_v30  ;;  %14501 = vst [vmem:[#allocation178_spill] sm:$0xff] %v10156_v26  ;;  %1717 = vmatprep.mubr.bf16.mxu0 %v14389_v17  ;;  %2070 = vmatprep.mubr.bf16.mxu1 %v14389_v17 }
 0x1f1   : > { %v10161_v27 = vpop.f32.mrf.mxu0  ;;  %v10164_v28 = vpop.f32.mrf.mxu1 }
 0x1f2   : > { %14502 = vst [vmem:[#allocation179_spill] sm:$0xff] %v10161_v27  ;;  %14503 = vst [vmem:[#allocation180_spill] sm:$0xff] %v10164_v28 }
 0x1f3   : > { %v10167_v25 = vpop.f32.mrf.mxu0  ;;  %v10169_v29 = vpop.f32.mrf.mxu1 }
 0x1f4   : > { %14504 = vst [vmem:[#allocation181_spill] sm:$0xff] %v10167_v25  ;;  %14505 = vst [vmem:[#allocation182_spill] sm:$0xff] %v10169_v29 }
 0x1f5   : > { %v10171_v26 = vpop.f32.mrf.mxu0  ;;  %v10173_v31 = vpop.f32.mrf.mxu1 }
 0x1f6   : > { %14506 = vst [vmem:[#allocation183_spill] sm:$0xff] %v10171_v26  ;;  %14507 = vst [vmem:[#allocation184_spill] sm:$0xff] %v10173_v31 }
 0x1f7   : > { %v10175_v30 = vpop.f32.mrf.mxu0  ;;  %7416 = vmatmul.mubr.msk.bf16.gmra.mxu0 %vm732_vm0, %v9553_v32  ;;  %v10179_v56 = vpop.f32.mrf.mxu1  ;;  %7448 = vmatmul.mubr.msk.bf16.gmra.mxu1 %vm732_vm0, %v9553_v32 }
 0x1f8   : > { %14508 = vst [vmem:[#allocation185_spill] sm:$0xff] %v10175_v30  ;;  %14509 = vst [vmem:[#allocation186_spill] sm:$0xff] %v10179_v56  ;;  %1727 = vmatprep.mubr.bf16.mxu0 %v14389_v17  ;;  %2080 = vmatprep.mubr.bf16.mxu1 %v14389_v17  ;;  %v7724_v30 = vld [vmem:[%s9445_s14 + $0x70] sm:$0xff]  }
 0x1f9   : > { %v10184_v28 = vpop.f32.mrf.mxu0  ;;  %v10187_v29 = vpop.f32.mrf.mxu1  ;;  %5140 = vmatpush2.bf16.msra.mxu0 %v7724_v30  ;;  %v7725_v56 = vld [vmem:[%s9445_s14 + $0xf0] sm:$0xff]  }
 0x1fa   : > { %14510 = vst [vmem:[#allocation187_spill] sm:$0xff] %v10184_v28  ;;  %14511 = vst [vmem:[#allocation188_spill] sm:$0xff] %v10187_v29  ;;  %5141 = vmatprep.subr.bf16.mxu0 %v14389_v17  ;;  %5429 = vmatpush2.bf16.msra.mxu1 %v7725_v56 }
 0x1fb   : > { %v10189_v25 = vpop.f32.mrf.mxu0  ;;  %v10191_v31 = vpop.f32.mrf.mxu1  ;;  %5430 = vmatprep.subr.bf16.mxu1 %v14389_v17 }
 0x1fc   : > { %14512 = vst [vmem:[#allocation189_spill] sm:$0xff] %v10189_v25  ;;  %14513 = vst [vmem:[#allocation190_spill] sm:$0xff] %v10191_v31 }
 0x1fd   : > { %v10194_v26 = vpop.f32.mrf.mxu0  ;;  %v10196_v27 = vpop.f32.mrf.mxu1 }
 0x1fe   : > { %14514 = vst [vmem:[#allocation191_spill] sm:$0xff] %v10194_v26  ;;  %14515 = vst [vmem:[#allocation192_spill] sm:$0xff] %v10196_v27 }
 0x1ff   : > { %v10199_v32 = vpop.f32.mrf.mxu0  ;;  %7417 = vmatmul.mubr.msk.bf16.gmra.mxu0 %vm732_vm0, %v9562_v33  ;;  %v10204_v28 = vpop.f32.mrf.mxu1  ;;  %7449 = vmatmul.mubr.msk.bf16.gmra.mxu1 %vm732_vm0, %v9562_v33 }
 0x200   : > { %14516 = vst [vmem:[#allocation193_spill] sm:$0xff] %v10199_v32  ;;  %14517 = vst [vmem:[#allocation194_spill] sm:$0xff] %v10204_v28  ;;  %1737 = vmatprep.mubr.bf16.mxu0 %v14389_v17  ;;  %2090 = vmatprep.mubr.bf16.mxu1 %v14389_v17 }
 0x201   : > { %v10209_v29 = vpop.f32.mrf.mxu0  ;;  %v10212_v30 = vpop.f32.mrf.mxu1 }
 0x202   : > { %14518 = vst [vmem:[#allocation195_spill] sm:$0xff] %v10209_v29  ;;  %14519 = vst [vmem:[#allocation196_spill] sm:$0xff] %v10212_v30 }
 0x203   : > { %v10215_v27 = vpop.f32.mrf.mxu0  ;;  %v10217_v31 = vpop.f32.mrf.mxu1 }
 0x204   : > { %14520 = vst [vmem:[#allocation197_spill] sm:$0xff] %v10215_v27  ;;  %14521 = vst [vmem:[#allocation198_spill] sm:$0xff] %v10217_v31 }
 0x205   : > { %v10219_v28 = vpop.f32.mrf.mxu0  ;;  %v10221_v33 = vpop.f32.mrf.mxu1 }
 0x206   : > { %14522 = vst [vmem:[#allocation199_spill] sm:$0xff] %v10219_v28  ;;  %14523 = vst [vmem:[#allocation200_spill] sm:$0xff] %v10221_v33 }
 0x207   : > { %v10223_v32 = vpop.f32.mrf.mxu0  ;;  %7418 = vmatmul.mubr.msk.bf16.gmra.mxu0 %vm732_vm0, %v9571_v34  ;;  %v10227_v56 = vpop.f32.mrf.mxu1  ;;  %7450 = vmatmul.mubr.msk.bf16.gmra.mxu1 %vm732_vm0, %v9571_v34 }
 0x208   : > { %14524 = vst [vmem:[#allocation201_spill] sm:$0xff] %v10223_v32  ;;  %14525 = vst [vmem:[#allocation202_spill] sm:$0xff] %v10227_v56  ;;  %1747 = vmatprep.mubr.bf16.mxu0 %v14389_v17  ;;  %2100 = vmatprep.mubr.bf16.mxu1 %v14389_v17  ;;  %v7726_v32 = vld [vmem:[%s9445_s14 + $0x68] sm:$0xff]  }
 0x209   : > { %v10232_v30 = vpop.f32.mrf.mxu0  ;;  %v10235_v31 = vpop.f32.mrf.mxu1  ;;  %5142 = vmatpush2.bf16.msra.mxu0 %v7726_v32  ;;  %v7727_v56 = vld [vmem:[%s9445_s14 + $0xe8] sm:$0xff]  }
 0x20a   : > { %14526 = vst [vmem:[#allocation203_spill] sm:$0xff] %v10232_v30  ;;  %14527 = vst [vmem:[#allocation204_spill] sm:$0xff] %v10235_v31  ;;  %5143 = vmatprep.subr.bf16.mxu0 %v14389_v17  ;;  %5431 = vmatpush2.bf16.msra.mxu1 %v7727_v56 }
 0x20b   : > { %v10237_v27 = vpop.f32.mrf.mxu0  ;;  %v10239_v33 = vpop.f32.mrf.mxu1  ;;  %5432 = vmatprep.subr.bf16.mxu1 %v14389_v17 }
 0x20c   : > { %14528 = vst [vmem:[#allocation205_spill] sm:$0xff] %v10237_v27  ;;  %14529 = vst [vmem:[#allocation206_spill] sm:$0xff] %v10239_v33 }
 0x20d   : > { %v10242_v28 = vpop.f32.mrf.mxu0  ;;  %v10244_v29 = vpop.f32.mrf.mxu1 }
 0x20e   : > { %14530 = vst [vmem:[#allocation207_spill] sm:$0xff] %v10242_v28  ;;  %14531 = vst [vmem:[#allocation208_spill] sm:$0xff] %v10244_v29 }
 0x20f   : > { %v10247_v34 = vpop.f32.mrf.mxu0  ;;  %7419 = vmatmul.mubr.msk.bf16.gmra.mxu0 %vm732_vm0, %v9580_v35  ;;  %v10252_v30 = vpop.f32.mrf.mxu1  ;;  %7451 = vmatmul.mubr.msk.bf16.gmra.mxu1 %vm732_vm0, %v9580_v35 }
 0x210   : > { %14532 = vst [vmem:[#allocation209_spill] sm:$0xff] %v10247_v34  ;;  %14533 = vst [vmem:[#allocation210_spill] sm:$0xff] %v10252_v30  ;;  %1757 = vmatprep.mubr.bf16.mxu0 %v14389_v17  ;;  %2110 = vmatprep.mubr.bf16.mxu1 %v14389_v17 }
 0x211   : > { %v10257_v31 = vpop.f32.mrf.mxu0  ;;  %v10260_v32 = vpop.f32.mrf.mxu1 }
 0x212   : > { %14534 = vst [vmem:[#allocation211_spill] sm:$0xff] %v10257_v31  ;;  %14535 = vst [vmem:[#allocation212_spill] sm:$0xff] %v10260_v32 }
 0x213   : > { %v10263_v29 = vpop.f32.mrf.mxu0  ;;  %v10265_v33 = vpop.f32.mrf.mxu1 }
 0x214   : > { %14536 = vst [vmem:[#allocation213_spill] sm:$0xff] %v10263_v29  ;;  %14537 = vst [vmem:[#allocation214_spill] sm:$0xff] %v10265_v33 }
 0x215   : > { %v10267_v30 = vpop.f32.mrf.mxu0  ;;  %v10269_v35 = vpop.f32.mrf.mxu1 }
 0x216   : > { %14538 = vst [vmem:[#allocation215_spill] sm:$0xff] %v10267_v30  ;;  %14539 = vst [vmem:[#allocation216_spill] sm:$0xff] %v10269_v35 }
 0x217   : > { %v10271_v34 = vpop.f32.mrf.mxu0  ;;  %7420 = vmatmul.mubr.msk.bf16.gmra.mxu0 %vm732_vm0, %v9589_v36  ;;  %v10275_v56 = vpop.f32.mrf.mxu1  ;;  %7452 = vmatmul.mubr.msk.bf16.gmra.mxu1 %vm732_vm0, %v9589_v36 }
 0x218   : > { %14540 = vst [vmem:[#allocation217_spill] sm:$0xff] %v10271_v34  ;;  %14541 = vst [vmem:[#allocation218_spill] sm:$0xff] %v10275_v56  ;;  %1767 = vmatprep.mubr.bf16.mxu0 %v14389_v17  ;;  %2120 = vmatprep.mubr.bf16.mxu1 %v14389_v17  ;;  %v7728_v34 = vld [vmem:[%s9445_s14 + $0x60] sm:$0xff]  }
 0x219   : > { %v10280_v32 = vpop.f32.mrf.mxu0  ;;  %v10283_v33 = vpop.f32.mrf.mxu1  ;;  %5144 = vmatpush2.bf16.msra.mxu0 %v7728_v34  ;;  %v7729_v56 = vld [vmem:[%s9445_s14 + $0xe0] sm:$0xff]  }
 0x21a   : > { %14542 = vst [vmem:[#allocation219_spill] sm:$0xff] %v10280_v32  ;;  %14543 = vst [vmem:[#allocation220_spill] sm:$0xff] %v10283_v33  ;;  %5145 = vmatprep.subr.bf16.mxu0 %v14389_v17  ;;  %5433 = vmatpush2.bf16.msra.mxu1 %v7729_v56 }
 0x21b   : > { %v10285_v29 = vpop.f32.mrf.mxu0  ;;  %v10287_v35 = vpop.f32.mrf.mxu1  ;;  %5434 = vmatprep.subr.bf16.mxu1 %v14389_v17 }
 0x21c   : > { %14544 = vst [vmem:[#allocation221_spill] sm:$0xff] %v10285_v29  ;;  %14545 = vst [vmem:[#allocation222_spill] sm:$0xff] %v10287_v35 }
 0x21d   : > { %v10290_v30 = vpop.f32.mrf.mxu0  ;;  %v10292_v31 = vpop.f32.mrf.mxu1 }
 0x21e   : > { %14546 = vst [vmem:[#allocation223_spill] sm:$0xff] %v10290_v30  ;;  %14547 = vst [vmem:[#allocation224_spill] sm:$0xff] %v10292_v31 }
 0x21f   : > { %v10295_v36 = vpop.f32.mrf.mxu0  ;;  %7421 = vmatmul.mubr.msk.bf16.gmra.mxu0 %vm732_vm0, %v9598_v37  ;;  %v10300_v32 = vpop.f32.mrf.mxu1  ;;  %7453 = vmatmul.mubr.msk.bf16.gmra.mxu1 %vm732_vm0, %v9598_v37 }
 0x220   : > { %14548 = vst [vmem:[#allocation225_spill] sm:$0xff] %v10295_v36  ;;  %14549 = vst [vmem:[#allocation226_spill] sm:$0xff] %v10300_v32  ;;  %1777 = vmatprep.mubr.bf16.mxu0 %v14389_v17  ;;  %2130 = vmatprep.mubr.bf16.mxu1 %v14389_v17 }
 0x221   : > { %v10305_v33 = vpop.f32.mrf.mxu0  ;;  %v10308_v34 = vpop.f32.mrf.mxu1 }
 0x222   : > { %14550 = vst [vmem:[#allocation227_spill] sm:$0xff] %v10305_v33  ;;  %14551 = vst [vmem:[#allocation228_spill] sm:$0xff] %v10308_v34 }
 0x223   : > { %v10311_v31 = vpop.f32.mrf.mxu0  ;;  %v10313_v35 = vpop.f32.mrf.mxu1 }
 0x224   : > { %14552 = vst [vmem:[#allocation229_spill] sm:$0xff] %v10311_v31  ;;  %14553 = vst [vmem:[#allocation230_spill] sm:$0xff] %v10313_v35 }
 0x225   : > { %v10315_v32 = vpop.f32.mrf.mxu0  ;;  %v10317_v37 = vpop.f32.mrf.mxu1 }
 0x226   : > { %14554 = vst [vmem:[#allocation231_spill] sm:$0xff] %v10315_v32  ;;  %14555 = vst [vmem:[#allocation232_spill] sm:$0xff] %v10317_v37 }
 0x227   : > { %v10319_v36 = vpop.f32.mrf.mxu0  ;;  %7422 = vmatmul.mubr.msk.bf16.gmra.mxu0 %vm732_vm0, %v9607_v38  ;;  %v10323_v56 = vpop.f32.mrf.mxu1  ;;  %7454 = vmatmul.mubr.msk.bf16.gmra.mxu1 %vm732_vm0, %v9607_v38 }
 0x228   : > { %14556 = vst [vmem:[#allocation233_spill] sm:$0xff] %v10319_v36  ;;  %14557 = vst [vmem:[#allocation234_spill] sm:$0xff] %v10323_v56  ;;  %1787 = vmatprep.mubr.bf16.mxu0 %v14389_v17  ;;  %2140 = vmatprep.mubr.bf16.mxu1 %v14389_v17  ;;  %v7730_v36 = vld [vmem:[%s9445_s14 + $0x58] sm:$0xff]  }
 0x229   : > { %v10328_v34 = vpop.f32.mrf.mxu0  ;;  %v10331_v35 = vpop.f32.mrf.mxu1  ;;  %5146 = vmatpush2.bf16.msra.mxu0 %v7730_v36  ;;  %v7731_v56 = vld [vmem:[%s9445_s14 + $0xd8] sm:$0xff]  }
 0x22a   : > { %14558 = vst [vmem:[#allocation235_spill] sm:$0xff] %v10328_v34  ;;  %14559 = vst [vmem:[#allocation236_spill] sm:$0xff] %v10331_v35  ;;  %5147 = vmatprep.subr.bf16.mxu0 %v14389_v17  ;;  %5435 = vmatpush2.bf16.msra.mxu1 %v7731_v56 }
 0x22b   : > { %v10333_v31 = vpop.f32.mrf.mxu0  ;;  %v10335_v37 = vpop.f32.mrf.mxu1  ;;  %5436 = vmatprep.subr.bf16.mxu1 %v14389_v17 }
 0x22c   : > { %14560 = vst [vmem:[#allocation237_spill] sm:$0xff] %v10333_v31  ;;  %14561 = vst [vmem:[#allocation238_spill] sm:$0xff] %v10335_v37 }
 0x22d   : > { %v10338_v32 = vpop.f32.mrf.mxu0  ;;  %v10340_v33 = vpop.f32.mrf.mxu1 }
 0x22e   : > { %14562 = vst [vmem:[#allocation239_spill] sm:$0xff] %v10338_v32  ;;  %14563 = vst [vmem:[#allocation240_spill] sm:$0xff] %v10340_v33  ;;  %v2259_v32 = vmax.f32 %v9661_v51, %v9670_v53 }
 0x22f   : > { %v10343_v38 = vpop.f32.mrf.mxu0  ;;  %7423 = vmatmul.mubr.msk.bf16.gmra.mxu0 %vm732_vm0, %v9616_v39  ;;  %v10348_v34 = vpop.f32.mrf.mxu1  ;;  %7455 = vmatmul.mubr.msk.bf16.gmra.mxu1 %vm732_vm0, %v9616_v39  ;;  %v2241_v39 = vmax.f32 %v9636_v42, %v9645_v44 }
 0x230   : > { %14564 = vst [vmem:[#allocation241_spill] sm:$0xff] %v10343_v38  ;;  %14565 = vst [vmem:[#allocation242_spill] sm:$0xff] %v10348_v34  ;;  %1797 = vmatprep.mubr.bf16.mxu0 %v14389_v17  ;;  %2150 = vmatprep.mubr.bf16.mxu1 %v14389_v17 }
 0x231   : > { %v10353_v37 = vpop.f32.mrf.mxu0  ;;  %v10356_v36 = vpop.f32.mrf.mxu1 }
 0x232   : > { %14566 = vst [vmem:[#allocation243_spill] sm:$0xff] %v10353_v37  ;;  %14567 = vst [vmem:[#allocation244_spill] sm:$0xff] %v10356_v36 }
 0x233   : > { %v10359_v33 = vpop.f32.mrf.mxu0  ;;  %v10361_v35 = vpop.f32.mrf.mxu1 }
 0x234   : > { %14568 = vst [vmem:[#allocation245_spill] sm:$0xff] %v10359_v33  ;;  %14569 = vst [vmem:[#allocation246_spill] sm:$0xff] %v10361_v35  ;;  %v2242_v35 = vmax.f32 %v2241_v39, %v9640_v43 }
 0x235   : > { %v10363_v34 = vpop.f32.mrf.mxu0  ;;  %v10367_v38 = vpop.f32.mrf.mxu1 }
 0x236   : > { %14570 = vst [vmem:[#allocation247_spill] sm:$0xff] %v10363_v34  ;;  %14571 = vst [vmem:[#allocation248_spill] sm:$0xff] %v10367_v38  ;;  %v2250_v38 = vmax.f32 %v9650_v46, %v9657_v49  ;;  %v7732_v34 = vld [vmem:[%s9445_s14 + $0x50] sm:$0xff]   ;;  %v2243_v31 = vmax.f32 %v2242_v35, %v9648_v45  ;;  %v2268_v35 = vmax.f32 %v9675_v55, %v9680_v58 }
 0x237   : > { %v10369_v37 = vpop.f32.mrf.mxu0  ;;  %7424 = vmatmul.mubr.msk.bf16.gmra.mxu0 %vm732_vm0, %v9625_v40  ;;  %v10373_v56 = vpop.f32.mrf.mxu1  ;;  %7456 = vmatmul.mubr.msk.bf16.gmra.mxu1 %vm732_vm0, %v9625_v40  ;;  %v7733_v49 = vld [vmem:[%s9445_s14 + $0xd0] sm:$0xff]  }
 0x238   : > { %14572 = vst [vmem:[#allocation249_spill] sm:$0xff] %v10369_v37  ;;  %14573 = vst [vmem:[#allocation250_spill] sm:$0xff] %v10373_v56  ;;  %1807 = vmatprep.mubr.bf16.mxu0 %v14389_v17  ;;  %2160 = vmatprep.mubr.bf16.mxu1 %v14389_v17 }
 0x239   : > { %v10378_v36 = vpop.f32.mrf.mxu0  ;;  %v10384_v37 = vpop.f32.mrf.mxu1  ;;  %5148 = vmatpush2.bf16.msra.mxu0 %v7732_v34  ;;  %5437 = vmatpush2.bf16.msra.mxu1 %v7733_v49  ;;  %v2269_v49 = vmax.f32 %v2268_v35, %v9678_v57 }
 0x23a   : > { %14574 = vst [vmem:[#allocation251_spill] sm:$0xff] %v10378_v36  ;;  %14575 = vst [vmem:[#allocation252_spill] sm:$0xff] %v10384_v37  ;;  %v2251_v36 = vmax.f32 %v2250_v38, %v9655_v48  ;;  %5149 = vmatprep.subr.bf16.mxu0 %v14389_v17  ;;  %5438 = vmatprep.subr.bf16.mxu1 %v14389_v17 }
 0x23b   : > { %v10386_v33 = vpop.f32.mrf.mxu0  ;;  %v10388_v56 = vpop.f32.mrf.mxu1 }
 0x23c   : > { %14576 = vst [vmem:[#allocation253_spill] sm:$0xff] %v10386_v33  ;;  %14577 = vst [vmem:[#allocation254_spill] sm:$0xff] %v10388_v56  ;;  %v2252_v38 = vmax.f32 %v2251_v36, %v9659_v50 }
 0x23d   : > { %v10391_v40 = vpop.f32.mrf.mxu0  ;;  %v10397_v39 = vpop.f32.mrf.mxu1 }
 0x23e   : > { %14578 = vst [vmem:[#allocation255_spill] sm:$0xff] %v10391_v40  ;;  %14579 = vst [vmem:[#allocation256_spill] sm:$0xff] %v10397_v39  ;;  %v2260_v39 = vmax.f32 %v2259_v32, %v9665_v52 }
 0x23f   : > { %v10400_v46 = vpop.f32.mrf.mxu0  ;;  %7425 = vmatmul.mubr.msk.bf16.gmra.mxu0 %vm732_vm0, %v9634_v41  ;;  %v10406_v56 = vpop.f32.mrf.mxu1  ;;  %7457 = vmatmul.mubr.msk.bf16.gmra.mxu1 %vm732_vm0, %v9634_v41 }
 0x240   : > { %14580 = vst [vmem:[#allocation257_spill] sm:$0xff] %v10400_v46  ;;  %v2244_v37 = vmax.f32 %v2243_v31, %v10400_v46  ;;  %14581 = vst [vmem:[#allocation258_spill] sm:$0xff] %v10406_v56  ;;  %1817 = vmatprep.mubr.bf16.mxu0 %v14389_v17  ;;  %2170 = vmatprep.mubr.bf16.mxu1 %v14389_v17  ;;  %v2261_v32 = vmax.f32 %v2260_v39, %v9673_v54 }
 0x241   : > { %v10413_v34 = vpop.f32.mrf.mxu0  ;;  %v10419_v46 = vpop.f32.mrf.mxu1  ;;  %v2270_v39 = vmax.f32 %v2269_v49, %v9682_v59 }
 0x242   : > { %14582 = vst [vmem:[#allocation259_spill] sm:$0xff] %v10413_v34  ;;  %v2245_v31 = vmax.f32 %v2244_v37, %v10413_v34  ;;  %14583 = vst [vmem:[#allocation260_spill] sm:$0xff] %v10419_v46  ;;  %v2277_v37 = vmax.f32 %v9684_v60, %v9691_v62 }
 0x243   : > { %v10422_v41 = vpop.f32.mrf.mxu0  ;;  %v10425_v40 = vpop.f32.mrf.mxu1 }
 0x244   : > { %14584 = vst [vmem:[#allocation261_spill] sm:$0xff] %v10422_v41  ;;  %v2253_v33 = vmax.f32 %v2252_v38, %v10422_v41  ;;  %14585 = vst [vmem:[#allocation262_spill] sm:$0xff] %v10425_v40  ;;  %v2246_v55 = vmax.f32 %v2245_v31, %v10406_v56  ;;  %v2295_v41 = vmax.f32 %v9705_v6, %v9712_v8  ;;  %v7737_v8 = vld [vmem:[%s9445_s14 + $0xc0] sm:$0xff]  }
 0x245   : > { %v10429_v51 = vpop.f32.mrf.mxu0  ;;  %v10435_v34 = vpop.f32.mrf.mxu1 }
 0x246   : > { %14586 = vst [vmem:[#allocation263_spill] sm:$0xff] %v10429_v51  ;;  %v2254_v36 = vmax.f32 %v2253_v33, %v10429_v51  ;;  %14587 = vst [vmem:[#allocation264_spill] sm:$0xff] %v10435_v34  ;;  %v2247_v52 = vmax.f32 %v2246_v55, %v10419_v46  ;;  %v2278_v55 = vmax.f32 %v2277_v37, %v9687_v61 }
 0x247   : > { %v10438_v38 = vpop.f32.mrf.mxu0  ;;  %7426 = vmatmul.mubr.msk.bf16.gmra.mxu0 %vm732_vm0, %v9653_v47  ;;  %v10443_v31 = vpop.f32.mrf.mxu1  ;;  %7458 = vmatmul.mubr.msk.bf16.gmra.mxu1 %vm732_vm0, %v9653_v47 }
 0x248   : > { %14588 = vst [vmem:[#allocation265_spill] sm:$0xff] %v10438_v38  ;;  %v2262_v35 = vmax.f32 %v2261_v32, %v10438_v38  ;;  %14589 = vst [vmem:[#allocation266_spill] sm:$0xff] %v10443_v31  ;;  %2248 = vmax.xlane.f32.xlu0 %v2247_v52  ;;  %v2255_v33 = vmax.f32 %v2254_v36, %v10425_v40  ;;  %1827 = vmatprep.mubr.bf16.mxu0 %v14389_v17  ;;  %v7734_v40 = vld [vmem:[%s9445_s14 + $0x48] sm:$0xff]  }
 0x249   : > { %v10449_v51 = vpop.f32.mrf.mxu0  ;;  %2180 = vmatprep.mubr.bf16.mxu1 %v14389_v17  ;;  %v2286_v32 = vmax.f32 %v9696_v1, %v9701_v4  ;;  %v10457_v47 = vpop.f32.mrf.mxu1  ;;  %5150 = vmatpush2.bf16.msra.mxu0 %v7734_v40 }
 0x24a   : > { %14590 = vst [vmem:[#allocation267_spill] sm:$0xff] %v10449_v51  ;;  %v2263_v38 = vmax.f32 %v2262_v35, %v10449_v51  ;;  %14591 = vst [vmem:[#allocation268_spill] sm:$0xff] %v10457_v47  ;;  %v2256_v52 = vmax.f32 %v2255_v33, %v10435_v34  ;;  %v2279_v51 = vmax.f32 %v2278_v55, %v9694_v63  ;;  %5151 = vmatprep.subr.bf16.mxu0 %v14389_v17 }
 0x24b   : > { %v10460_v36 = vpop.f32.mrf.mxu0  ;;  %v10463_v46 = vpop.f32.mrf.mxu1  ;;  %v2287_v33 = vmax.f32 %v2286_v32, %v9699_v3 }
 0x24c   : > { %14592 = vst [vmem:[#allocation269_spill] sm:$0xff] %v10460_v36  ;;  %v2271_v49 = vmax.f32 %v2270_v39, %v10460_v36  ;;  %14593 = vst [vmem:[#allocation270_spill] sm:$0xff] %v10463_v46  ;;  %2257 = vmax.xlane.f32.xlu0 %v2256_v52  ;;  %v2264_v37 = vmax.f32 %v2263_v38, %v10443_v31  ;;  %v7735_v52 = vld [vmem:[%s9445_s14 + $0xc8] sm:$0xff]   ;;  %v8922_v38 = vld [vmem:[%s9407_s4 + $0xd0] sm:$0xff]  }
 0x24d   : > { %v10469_v35 = vpop.f32.mrf.mxu0  ;;  %v10474_v56 = vpop.f32.mrf.mxu1  ;;  %5439 = vmatpush2.bf16.msra.mxu1 %v7735_v52 }
 0x24e   : > { %14594 = vst [vmem:[#allocation271_spill] sm:$0xff] %v10469_v35  ;;  %v2272_v34 = vmax.f32 %v2271_v49, %v10469_v35  ;;  %14595 = vst [vmem:[#allocation272_spill] sm:$0xff] %v10474_v56  ;;  %v2265_v39 = vmax.f32 %v2264_v37, %v10457_v47  ;;  %v2296_v49 = vmax.f32 %v2295_v41, %v9708_v7  ;;  %v14599_v47 = vld [vmem:[#allocation29_spill] sm:$0xff]  ;;  %5440 = vmatprep.subr.bf16.mxu1 %v14389_v17 }
 0x24f   : > { %v10478_v36 = vpop.f32.mrf.mxu0  ;;  %7427 = vmatmul.mubr.msk.bf16.gmra.mxu0 %vm732_vm0, %v8922_v38  ;;  %v10484_v55 = vpop.f32.mrf.mxu1  ;;  %7459 = vmatmul.mubr.msk.bf16.gmra.mxu1 %vm732_vm0, %v8922_v38  ;;  %v2288_v37 = vmax.f32 %v2287_v33, %v9703_v5 }
 0x250   : > { %14596 = vst [vmem:[#allocation273_spill] sm:$0xff] %v10478_v36  ;;  %v2280_v31 = vmax.f32 %v2279_v51, %v10478_v36  ;;  %14597 = vst [vmem:[#allocation274_spill] sm:$0xff] %v10484_v55  ;;  %2266 = vmax.xlane.f32.xlu1 %v2265_v39  ;;  %v2273_v32 = vmax.f32 %v2272_v34, %v10463_v46  ;;  %1837 = vmatprep.mubr.bf16.mxu0 %v14389_v17  ;;  %v14603_v46 = vld [vmem:[#allocation28_spill] sm:$0xff] }
 0x251   : > { %v10489_v40 = vpop.f32.mrf.mxu0  ;;  %2190 = vmatprep.mubr.bf16.mxu1 %v14389_v17  ;;  %v2304_v51 = vmax.f32 %v14599_v47, %v9722_v14  ;;  %v10497_v35 = vpop.f32.mrf.mxu1  ;;  %v2297_v7 = vmax.f32 %v2296_v49, %v14603_v46  ;;  %5441 = vmatpush2.bf16.msra.mxu1 %v7737_v8  ;;  %v14638_v8 = vld [vmem:[#allocation44_spill] sm:$0xff] }
 0x252   : > { %14598 = vst [vmem:[#allocation275_spill] sm:$0xff] %v10489_v40  ;;  %v2281_v36 = vmax.f32 %v2280_v31, %v10489_v40  ;;  %14600 = vst [vmem:[#allocation276_spill] sm:$0xff] %v10497_v35  ;;  %v2274_v39 = vmax.f32 %v2273_v32, %v10474_v56  ;;  %v14605_v40 = vld [vmem:[#allocation30_spill] sm:$0xff]  ;;  %v14606_v32 = vld [vmem:[#allocation35_spill] sm:$0xff]  ;;  %5988 = vmatprep.subr.bf16.mxu1 %v14389_v17 }
 0x253   : > { %v10500_v34 = vpop.f32.mrf.mxu0  ;;  %v10504_v38 = vpop.f32.mrf.mxu1  ;;  %v2305_v47 = vmax.f32 %v2304_v51, %v14605_v40  ;;  %v14607_v56 = vld [vmem:[#allocation33_spill] sm:$0xff] }
 0x254   : > { %14601 = vst [vmem:[#allocation277_spill] sm:$0xff] %v10500_v34  ;;  %v2289_v41 = vmax.f32 %v2288_v37, %v10500_v34  ;;  %14602 = vst [vmem:[#allocation278_spill] sm:$0xff] %v10504_v38  ;;  %2275 = vmax.xlane.f32.xlu1 %v2274_v39  ;;  %v2282_v33 = vmax.f32 %v2281_v36, %v10484_v55  ;;  %v2313_v52 = vmax.f32 %v14607_v56, %v14606_v32  ;;  %v8923_v39 = vld [vmem:[%s9407_s4 + $0xd8] sm:$0xff]   ;;  %v14615_v32 = vld [vmem:[#allocation34_spill] sm:$0xff] }
 0x255   : > { %v10508_v31 = vpop.f32.mrf.mxu0  ;;  %v10514_v14 = vpop.f32.mrf.mxu1  ;;  %v14611_v55 = vld [vmem:[#allocation39_spill] sm:$0xff]  ;;  %v14621_v40 = vld [vmem:[#allocation41_spill] sm:$0xff] }
 0x256   : > { %14604 = vst [vmem:[#allocation279_spill] sm:$0xff] %v10508_v31  ;;  %v2290_v6 = vmax.f32 %v2289_v41, %v10508_v31  ;;  %14608 = vst [vmem:[#allocation280_spill] sm:$0xff] %v10514_v14  ;;  %v2283_v37 = vmax.f32 %v2282_v33, %v10497_v35  ;;  %v14612_v41 = vld [vmem:[#allocation37_spill] sm:$0xff]  ;;  %v14614_v33 = vld [vmem:[#allocation32_spill] sm:$0xff] }
 0x257   : > { %v10517_v34 = vpop.f32.mrf.mxu0  ;;  %7428 = vmatmul.mubr.msk.bf16.gmra.mxu0 %vm732_vm0, %v8923_v39  ;;  %v10522_v49 = vpop.f32.mrf.mxu1  ;;  %7460 = vmatmul.mubr.msk.bf16.gmra.mxu1 %vm732_vm0, %v8923_v39  ;;  %v2322_v31 = vmax.f32 %v14612_v41, %v14611_v55  ;;  %v2306_v35 = vmax.f32 %v2305_v47, %v14614_v33  ;;  %v14619_v55 = vld [vmem:[#allocation38_spill] sm:$0xff]  ;;  %v14623_v33 = vld [vmem:[#allocation36_spill] sm:$0xff] }
 0x258   : > { %14609 = vst [vmem:[#allocation281_spill] sm:$0xff] %v10517_v34  ;;  %v2298_v36 = vmax.f32 %v2297_v7, %v10517_v34  ;;  %14610 = vst [vmem:[#allocation282_spill] sm:$0xff] %v10522_v49  ;;  %2284 = vmax.xlane.f32.xlu0 %v2283_v37  ;;  %v2291_v51 = vmax.f32 %v2290_v6, %v10504_v38  ;;  %1847 = vmatprep.mubr.bf16.mxu0 %v14389_v17 }
 0x259   : > { %v10528_v56 = vpop.f32.mrf.mxu0  ;;  %2200 = vmatprep.mubr.bf16.mxu1 %v14389_v17  ;;  %v2314_v7 = vmax.f32 %v2313_v52, %v14615_v32  ;;  %v10535_v37 = vpop.f32.mrf.mxu1  ;;  %v2323_v52 = vmax.f32 %v2322_v31, %v14619_v55  ;;  %v14620_v32 = vld [vmem:[#allocation43_spill] sm:$0xff]  ;;  %v14631_v55 = vld [vmem:[#allocation45_spill] sm:$0xff] }
 0x25a   : > { %14613 = vst [vmem:[#allocation283_spill] sm:$0xff] %v10528_v56  ;;  %v2299_v34 = vmax.f32 %v2298_v36, %v10528_v56  ;;  %14616 = vst [vmem:[#allocation284_spill] sm:$0xff] %v10535_v37  ;;  %v2292_v6 = vmax.f32 %v2291_v51, %v10514_v14  ;;  %v2331_v36 = vmax.f32 %v14621_v40, %v14620_v32  ;;  %v14628_v40 = vld [vmem:[#allocation42_spill] sm:$0xff]  ;;  %v14630_v32 = vld [vmem:[#allocation47_spill] sm:$0xff] }
 0x25b   : > { %v10538_v39 = vpop.f32.mrf.mxu0  ;;  %v10541_v41 = vpop.f32.mrf.mxu1  ;;  %v2315_v46 = vmax.f32 %v2314_v7, %v14623_v33  ;;  %v14627_v7 = vld [vmem:[#allocation40_spill] sm:$0xff] }
 0x25c   : > { %14617 = vst [vmem:[#allocation285_spill] sm:$0xff] %v10538_v39  ;;  %v2307_v38 = vmax.f32 %v2306_v35, %v10538_v39  ;;  %14618 = vst [vmem:[#allocation286_spill] sm:$0xff] %v10541_v41  ;;  %2293 = vmax.xlane.f32.xlu1 %v2292_v6  ;;  %v2300_v47 = vmax.f32 %v2299_v34, %v10522_v49  ;;  %v7736_v39 = vld [vmem:[%s9445_s14 + $0x40] sm:$0xff]  }
 0x25d   : > { %v10547_v56 = vpop.f32.mrf.mxu0  ;;  %v10551_v14 = vpop.f32.mrf.mxu1  ;;  %v8924_v34 = vld [vmem:[%s9407_s4 + $0xe0] sm:$0xff]   ;;  %5152 = vmatpush2.bf16.msra.mxu0 %v7736_v39 }
 0x25e   : > { %14622 = vst [vmem:[#allocation287_spill] sm:$0xff] %v10547_v56  ;;  %v2308_v51 = vmax.f32 %v2307_v38, %v10547_v56  ;;  %14624 = vst [vmem:[#allocation288_spill] sm:$0xff] %v10551_v14  ;;  %v2301_v35 = vmax.f32 %v2300_v47, %v10535_v37  ;;  %v2324_v56 = vmax.f32 %v2323_v52, %v14627_v7  ;;  %5699 = vmatprep.subr.bf16.mxu0 %v14389_v17 }
 0x25f   : > { %v10556_v6 = vpop.f32.mrf.mxu0  ;;  %7429 = vmatmul.mubr.msk.bf16.gmra.mxu0 %vm732_vm0, %v8924_v34  ;;  %v10561_v49 = vpop.f32.mrf.mxu1  ;;  %7461 = vmatmul.mubr.msk.bf16.gmra.mxu1 %vm732_vm0, %v8924_v34  ;;  %v2332_v47 = vmax.f32 %v2331_v36, %v14628_v40 }
 0x260   : > { %14625 = vst [vmem:[#allocation289_spill] sm:$0xff] %v10556_v6  ;;  %v2316_v31 = vmax.f32 %v2315_v46, %v10556_v6  ;;  %14626 = vst [vmem:[#allocation290_spill] sm:$0xff] %v10561_v49  ;;  %2302 = vmax.xlane.f32.xlu0 %v2301_v35  ;;  %v2309_v38 = vmax.f32 %v2308_v51, %v10541_v41  ;;  %1857 = vmatprep.mubr.bf16.mxu0 %v14389_v17 }
 0x261   : > { %v10567_v37 = vpop.f32.mrf.mxu0  ;;  %2210 = vmatprep.mubr.bf16.mxu1 %v14389_v17  ;;  %v2340_v46 = vmax.f32 %v14631_v55, %v14630_v32  ;;  %v10574_v33 = vpop.f32.mrf.mxu1  ;;  %v2333_v39 = vmax.f32 %v2332_v47, %v14638_v8 }
 0x262   : > { %14629 = vst [vmem:[#allocation291_spill] sm:$0xff] %v10567_v37  ;;  %v2317_v6 = vmax.f32 %v2316_v31, %v10567_v37  ;;  %14632 = vst [vmem:[#allocation292_spill] sm:$0xff] %v10574_v33  ;;  %v2310_v35 = vmax.f32 %v2309_v38, %v10551_v14  ;;  %v14635_v31 = vld [vmem:[#allocation51_spill] sm:$0xff]  ;;  %v14636_v37 = vld [vmem:[#allocation49_spill] sm:$0xff] }
 0x263   : > { %v10577_v52 = vpop.f32.mrf.mxu0  ;;  %v10582_v51 = vpop.f32.mrf.mxu1  ;;  %v2349_v41 = vmax.f32 %v14636_v37, %v14635_v31  ;;  %v14639_v14 = vld [vmem:[#allocation46_spill] sm:$0xff]  ;;  %v14646_v37 = vld [vmem:[#allocation55_spill] sm:$0xff]  ;;  %v14647_v31 = vld [vmem:[#allocation53_spill] sm:$0xff] }
 0x264   : > { %14633 = vst [vmem:[#allocation293_spill] sm:$0xff] %v10577_v52  ;;  %v2325_v36 = vmax.f32 %v2324_v56, %v10577_v52  ;;  %14634 = vst [vmem:[#allocation294_spill] sm:$0xff] %v10582_v51  ;;  %2311 = vmax.xlane.f32.xlu1 %v2310_v35  ;;  %v2318_v34 = vmax.f32 %v2317_v6, %v10561_v49  ;;  %v2341_v40 = vmax.f32 %v2340_v46, %v14639_v14  ;;  %v8925_v35 = vld [vmem:[%s9407_s4 + $0xe8] sm:$0xff]   ;;  %v14643_v46 = vld [vmem:[#allocation50_spill] sm:$0xff] }
 0x265   : > { %v10587_v38 = vpop.f32.mrf.mxu0  ;;  %v10592_v32 = vpop.f32.mrf.mxu1 }
 0x266   : > { %14637 = vst [vmem:[#allocation295_spill] sm:$0xff] %v10587_v38  ;;  %v2326_v55 = vmax.f32 %v2325_v36, %v10587_v38  ;;  %14640 = vst [vmem:[#allocation296_spill] sm:$0xff] %v10592_v32  ;;  %v2319_v56 = vmax.f32 %v2318_v34, %v10574_v33  ;;  %v2350_v36 = vmax.f32 %v2349_v41, %v14643_v46  ;;  %v14645_v34 = vld [vmem:[#allocation48_spill] sm:$0xff] }
 0x267   : > { %v10595_v52 = vpop.f32.mrf.mxu0  ;;  %7430 = vmatmul.mubr.msk.bf16.gmra.mxu0 %vm732_vm0, %v8925_v35  ;;  %v10600_v49 = vpop.f32.mrf.mxu1  ;;  %7462 = vmatmul.mubr.msk.bf16.gmra.mxu1 %vm732_vm0, %v8925_v35  ;;  %v2342_v33 = vmax.f32 %v2341_v40, %v14645_v34  ;;  %v14651_v40 = vld [vmem:[#allocation52_spill] sm:$0xff] }
 0x268   : > { %14641 = vst [vmem:[#allocation297_spill] sm:$0xff] %v10595_v52  ;;  %v2334_v6 = vmax.f32 %v2333_v39, %v10595_v52  ;;  %14642 = vst [vmem:[#allocation298_spill] sm:$0xff] %v10600_v49  ;;  %2320 = vmax.xlane.f32.xlu0 %v2319_v56  ;;  %v2327_v47 = vmax.f32 %v2326_v55, %v10582_v51  ;;  %1867 = vmatprep.mubr.bf16.mxu0 %v14389_v17 }
 0x269   : > { %v10605_v38 = vpop.f32.mrf.mxu0  ;;  %2220 = vmatprep.mubr.bf16.mxu1 %v14389_v17  ;;  %v2358_v39 = vmax.f32 %v14647_v31, %v14646_v37  ;;  %v10613_v35 = vpop.f32.mrf.mxu1  ;;  %v2351_v14 = vmax.f32 %v2350_v36, %v14651_v40  ;;  %v14653_v31 = vld [vmem:[#allocation54_spill] sm:$0xff] }
 0x26a   : > { %14644 = vst [vmem:[#allocation299_spill] sm:$0xff] %v10605_v38  ;;  %v2335_v52 = vmax.f32 %v2334_v6, %v10605_v38  ;;  %14648 = vst [vmem:[#allocation300_spill] sm:$0xff] %v10613_v35  ;;  %v2328_v55 = vmax.f32 %v2327_v47, %v10592_v32  ;;  %v14654_v38 = vld [vmem:[#allocation57_spill] sm:$0xff] }
 0x26b   : > { %v10616_v56 = vpop.f32.mrf.mxu0  ;;  %v10619_v51 = vpop.f32.mrf.mxu1  ;;  %v2359_v6 = vmax.f32 %v2358_v39, %v14653_v31  ;;  %v2367_v37 = vmax.f32 %v14654_v38, %v9796_v13  ;;  %v14662_v13 = vld [vmem:[#allocation58_spill] sm:$0xff] }
 0x26c   : > { %14649 = vst [vmem:[#allocation301_spill] sm:$0xff] %v10616_v56  ;;  %v2343_v41 = vmax.f32 %v2342_v33, %v10616_v56  ;;  %14650 = vst [vmem:[#allocation302_spill] sm:$0xff] %v10619_v51  ;;  %2329 = vmax.xlane.f32.xlu1 %v2328_v55  ;;  %v2336_v46 = vmax.f32 %v2335_v52, %v10600_v49  ;;  %v8926_v55 = vld [vmem:[%s9407_s4 + $0xf0] sm:$0xff]   ;;  %v14658_v49 = vld [vmem:[#allocation63_spill] sm:$0xff] }
 0x26d   : > { %v10623_v34 = vpop.f32.mrf.mxu0  ;;  %v10629_v32 = vpop.f32.mrf.mxu1  ;;  %v14666_v31 = vld [vmem:[#allocation62_spill] sm:$0xff] }
 0x26e   : > { %14652 = vst [vmem:[#allocation303_spill] sm:$0xff] %v10623_v34  ;;  %v2344_v47 = vmax.f32 %v2343_v41, %v10623_v34  ;;  %14655 = vst [vmem:[#allocation304_spill] sm:$0xff] %v10629_v32  ;;  %v2337_v33 = vmax.f32 %v2336_v46, %v10613_v35  ;;  %v14659_v41 = vld [vmem:[#allocation61_spill] sm:$0xff]  ;;  %v14661_v46 = vld [vmem:[#allocation56_spill] sm:$0xff] }
 0x26f   : > { %v10632_v56 = vpop.f32.mrf.mxu0  ;;  %7431 = vmatmul.mubr.msk.bf16.gmra.mxu0 %vm732_vm0, %v8926_v55  ;;  %v10637_v36 = vpop.f32.mrf.mxu1  ;;  %7463 = vmatmul.mubr.msk.bf16.gmra.mxu1 %vm732_vm0, %v8926_v55  ;;  %v2376_v34 = vmax.f32 %v14659_v41, %v14658_v49  ;;  %v2360_v35 = vmax.f32 %v2359_v6, %v14661_v46 }
 0x270   : > { %14656 = vst [vmem:[#allocation305_spill] sm:$0xff] %v10632_v56  ;;  %v2352_v52 = vmax.f32 %v2351_v14, %v10632_v56  ;;  %14657 = vst [vmem:[#allocation306_spill] sm:$0xff] %v10637_v36  ;;  %2338 = vmax.xlane.f32.xlu0 %v2337_v33  ;;  %v2345_v39 = vmax.f32 %v2344_v47, %v10619_v51  ;;  %1877 = vmatprep.mubr.bf16.mxu0 %v14389_v17 }
 0x271   : > { %v10643_v38 = vpop.f32.mrf.mxu0  ;;  %2230 = vmatprep.mubr.bf16.mxu1 %v14389_v17  ;;  %v2368_v14 = vmax.f32 %v2367_v37, %v14662_v13  ;;  %v10650_v55 = vpop.f32.mrf.mxu1  ;;  %v2377_v6 = vmax.f32 %v2376_v34, %v14666_v31  ;;  %v14668_v37 = vld [vmem:[#allocation60_spill] sm:$0xff]  ;;  %v14670_v13 = vld [vmem:[#allocation65_spill] sm:$0xff]  ;;  %v14873_v17 = vld [vmem:[#allocation194_spill] sm:$0xff] }
 0x272   : > { %14660 = vst [vmem:[#allocation307_spill] sm:$0xff] %v10643_v38  ;;  %v2353_v56 = vmax.f32 %v2352_v52, %v10643_v38  ;;  %14663 = vst [vmem:[#allocation308_spill] sm:$0xff] %v10650_v55  ;;  %v2346_v47 = vmax.f32 %v2345_v39, %v10629_v32  ;;  %v14669_v38 = vld [vmem:[#allocation67_spill] sm:$0xff] }
 0x273   : > { %v10653_v33 = vpop.f32.mrf.mxu0  ;;  %v10656_v41 = vpop.f32.mrf.mxu1  ;;  %v2369_v52 = vmax.f32 %v2368_v14, %v14668_v37  ;;  %v2385_v40 = vmax.f32 %v14670_v13, %v14669_v38  ;;  %v14676_v13 = vld [vmem:[#allocation66_spill] sm:$0xff] }
 0x274   : > { %14664 = vst [vmem:[#allocation309_spill] sm:$0xff] %v10653_v33  ;;  %v2361_v51 = vmax.f32 %v2360_v35, %v10653_v33  ;;  %14665 = vst [vmem:[#allocation310_spill] sm:$0xff] %v10656_v41  ;;  %2347 = vmax.xlane.f32.xlu1 %v2346_v47  ;;  %v2354_v49 = vmax.f32 %v2353_v56, %v10637_v36  ;;  %v8927_v47 = vld [vmem:[%s9407_s4 + $0xf8] sm:$0xff]   ;;  %v14674_v36 = vld [vmem:[#allocation64_spill] sm:$0xff]  ;;  %s9005_s4 = scalar_lea.vmem %s13619_s13, 1024 }
 0x275   : > { %v10660_v46 = vpop.f32.mrf.mxu0  ;;  %v10666_v32 = vpop.f32.mrf.mxu1  ;;  %p9006_p0 = scmp.ne.s32.totalorder %s13619_s13, %s9005_s4  ;;  %p9013_p12 = scmp.lt.s32.totalorder %s9011_s24, %s9005_s4 }
 0x276   : > { %14667 = vst [vmem:[#allocation311_spill] sm:$0xff] %v10660_v46  ;;  %v2362_v39 = vmax.f32 %v2361_v51, %v10660_v46  ;;  %14671 = vst [vmem:[#allocation312_spill] sm:$0xff] %v10666_v32  ;;  %v2355_v35 = vmax.f32 %v2354_v49, %v10650_v55  ;;  %v2378_v51 = vmax.f32 %v2377_v6, %v14674_v36  ;;  %v14677_v55 = vld [vmem:[#allocation69_spill] sm:$0xff] }
 0x277   : > { %v10669_v33 = vpop.f32.mrf.mxu0  ;;  %7432 = vmatmul.mubr.msk.bf16.gmra.mxu0 %vm732_vm0, %v8927_v47  ;;  %v10674_v56 = vpop.f32.mrf.mxu1  ;;  %7464 = vmatmul.mubr.msk.bf16.gmra.mxu1 %vm732_vm0, %v8927_v47  ;;  %v2386_v49 = vmax.f32 %v2385_v40, %v14676_v13  ;;  %v2394_v38 = vmax.f32 %v14677_v55, %v9833_v11  ;;  %v14681_v40 = vld [vmem:[#allocation73_spill] sm:$0xff]  ;;  %v14683_v13 = vld [vmem:[#allocation68_spill] sm:$0xff]  ;;  %p9007_p13 = pnand %p9006_p0, %p15765_p9  ;;  %p9014_p3 = por %p9013_p12, %p9012_p11 }
 0x278   : > { %14672 = vst [vmem:[#allocation313_spill] sm:$0xff] %v10669_v33  ;;  %v2370_v34 = vmax.f32 %v2369_v52, %v10669_v33  ;;  %14673 = vst [vmem:[#allocation314_spill] sm:$0xff] %v10674_v56  ;;  %2356 = vmax.xlane.f32.xlu0 %v2355_v35  ;;  %v2363_v14 = vmax.f32 %v2362_v39, %v10656_v41  ;;  %v2403_v47 = vmax.f32 %v14681_v40, %v9848_v16  ;;  %v14688_v40 = vld [vmem:[#allocation74_spill] sm:$0xff]  ;;  %v14865_v36 = vld [vmem:[#allocation201_spill] sm:$0xff] }
 0x279   : > { %v10679_v46 = vpop.f32.mrf.mxu0  ;;  %v10685_v37 = vpop.f32.mrf.mxu1  ;;  %p9008_p6 = pneg %p9007_p13 }
 0x27a   : > { %14675 = vst [vmem:[#allocation315_spill] sm:$0xff] %v10679_v46  ;;  %v2371_v31 = vmax.f32 %v2370_v34, %v10679_v46  ;;  %14678 = vst [vmem:[#allocation316_spill] sm:$0xff] %v10685_v37  ;;  %v2364_v52 = vmax.f32 %v2363_v14, %v10666_v32  ;;  %v2387_v34 = vmax.f32 %v2386_v49, %v14683_v13  ;;  %v14684_v46 = vld [vmem:[#allocation70_spill] sm:$0xff] }
 0x27b   : > { %v10688_v33 = vpop.f32.mrf.mxu0  ;;  %v10691_v39 = vpop.f32.mrf.mxu1  ;;  %v2395_v55 = vmax.f32 %v2394_v38, %v14684_v46  ;;  %v2404_v16 = vmax.f32 %v2403_v47, %v14688_v40  ;;  %v14690_v38 = vld [vmem:[#allocation72_spill] sm:$0xff]  ;;  %v2664_v13 = vmax.f32 %v10189_v25, %v10194_v26  ;;  %v14862_v25 = vld [vmem:[#allocation199_spill] sm:$0xff]  ;;  %p9015_p4 = pnand %p9014_p3, %p9008_p6 }
 0x27c   : > { %14679 = vst [vmem:[#allocation317_spill] sm:$0xff] %v10688_v33  ;;  %v2379_v35 = vmax.f32 %v2378_v51, %v10688_v33  ;;  %14680 = vst [vmem:[#allocation318_spill] sm:$0xff] %v10691_v39  ;;  %2365 = vmax.xlane.f32.xlu1 %v2364_v52  ;;  %v2372_v6 = vmax.f32 %v2371_v31, %v10674_v56 }
 0x27d   : > { %v10696_v41 = vpop.f32.mrf.mxu0  ;;  %v10701_v32 = vpop.f32.mrf.mxu1  ;;  %v2396_v46 = vmax.f32 %v2395_v55, %v14690_v38 }
 0x27e   : > { %14682 = vst [vmem:[#allocation319_spill] sm:$0xff] %v10696_v41  ;;  %v2380_v14 = vmax.f32 %v2379_v35, %v10696_v41  ;;  %14685 = vst [vmem:[#allocation320_spill] sm:$0xff] %v10701_v32  ;;  %v2373_v51 = vmax.f32 %v2372_v6, %v10685_v37  ;;  %v14691_v35 = vld [vmem:[#allocation77_spill] sm:$0xff] }
 0x27f   : > { %v10704_v33 = vpop.f32.mrf.mxu0  ;;  %v10707_v31 = vpop.f32.mrf.mxu1  ;;  %v2412_v41 = vmax.f32 %v14691_v35, %v9857_v9  ;;  %v14697_v35 = vld [vmem:[#allocation78_spill] sm:$0xff] }
 0x280   : > { %14686 = vst [vmem:[#allocation321_spill] sm:$0xff] %v10704_v33  ;;  %v2388_v52 = vmax.f32 %v2387_v34, %v10704_v33  ;;  %14687 = vst [vmem:[#allocation322_spill] sm:$0xff] %v10707_v31  ;;  %2374 = vmax.xlane.f32.xlu0 %v2373_v51  ;;  %v2381_v56 = vmax.f32 %v2380_v14, %v10691_v39  ;;  %v14695_v39 = vld [vmem:[#allocation76_spill] sm:$0xff] }
 0x281   : > { %v10711_v49 = vpop.f32.mrf.mxu0  ;;  %v10717_v37 = vpop.f32.mrf.mxu1  ;;  %v2405_v55 = vmax.f32 %v2404_v16, %v14695_v39  ;;  %v2413_v9 = vmax.f32 %v2412_v41, %v14697_v35  ;;  %v14704_v41 = vld [vmem:[#allocation85_spill] sm:$0xff] }
 0x282   : > { %14689 = vst [vmem:[#allocation323_spill] sm:$0xff] %v10711_v49  ;;  %v2389_v6 = vmax.f32 %v2388_v52, %v10711_v49  ;;  %14692 = vst [vmem:[#allocation324_spill] sm:$0xff] %v10717_v37  ;;  %v2382_v34 = vmax.f32 %v2381_v56, %v10701_v32  ;;  %v14698_v52 = vld [vmem:[#allocation83_spill] sm:$0xff]  ;;  %v14699_v49 = vld [vmem:[#allocation81_spill] sm:$0xff] }
 0x283   : > { %v10720_v33 = vpop.f32.mrf.mxu0  ;;  %v10723_v14 = vpop.f32.mrf.mxu1  ;;  %v2421_v38 = vmax.f32 %v14699_v49, %v14698_v52  ;;  %v14706_v49 = vld [vmem:[#allocation80_spill] sm:$0xff] }
 0x284   : > { %14693 = vst [vmem:[#allocation325_spill] sm:$0xff] %v10720_v33  ;;  %v2397_v51 = vmax.f32 %v2396_v46, %v10720_v33  ;;  %14694 = vst [vmem:[#allocation326_spill] sm:$0xff] %v10723_v14  ;;  %2383 = vmax.xlane.f32.xlu1 %v2382_v34  ;;  %v2390_v47 = vmax.f32 %v2389_v6, %v10707_v31  ;;  %v14703_v31 = vld [vmem:[#allocation87_spill] sm:$0xff] }
 0x285   : > { %v10727_v40 = vpop.f32.mrf.mxu0  ;;  %v10733_v32 = vpop.f32.mrf.mxu1  ;;  %v2430_v35 = vmax.f32 %v14704_v41, %v14703_v31  ;;  %v14711_v31 = vld [vmem:[#allocation86_spill] sm:$0xff] }
 0x286   : > { %14696 = vst [vmem:[#allocation327_spill] sm:$0xff] %v10727_v40  ;;  %v2398_v56 = vmax.f32 %v2397_v51, %v10727_v40  ;;  %14700 = vst [vmem:[#allocation328_spill] sm:$0xff] %v10733_v32  ;;  %v2391_v46 = vmax.f32 %v2390_v47, %v10717_v37  ;;  %v2414_v51 = vmax.f32 %v2413_v9, %v14706_v49  ;;  %v14707_v40 = vld [vmem:[#allocation82_spill] sm:$0xff]  ;;  %v14836_v49 = vld [vmem:[#allocation181_spill] sm:$0xff] }
 0x287   : > { %v10736_v33 = vpop.f32.mrf.mxu0  ;;  %v10739_v6 = vpop.f32.mrf.mxu1  ;;  %v2422_v52 = vmax.f32 %v2421_v38, %v14707_v40  ;;  %v2431_v41 = vmax.f32 %v2430_v35, %v14711_v31  ;;  %v14713_v38 = vld [vmem:[#allocation84_spill] sm:$0xff] }
 0x288   : > { %14701 = vst [vmem:[#allocation329_spill] sm:$0xff] %v10736_v33  ;;  %v2406_v34 = vmax.f32 %v2405_v55, %v10736_v33  ;;  %14702 = vst [vmem:[#allocation330_spill] sm:$0xff] %v10739_v6  ;;  %2392 = vmax.xlane.f32.xlu0 %v2391_v46  ;;  %v2399_v16 = vmax.f32 %v2398_v56, %v10723_v14 }
 0x289   : > { %v10744_v39 = vpop.f32.mrf.mxu0  ;;  %v10749_v37 = vpop.f32.mrf.mxu1  ;;  %v2423_v40 = vmax.f32 %v2422_v52, %v14713_v38 }
 0x28a   : > { %14705 = vst [vmem:[#allocation331_spill] sm:$0xff] %v10744_v39  ;;  %v2407_v47 = vmax.f32 %v2406_v34, %v10744_v39  ;;  %14708 = vst [vmem:[#allocation332_spill] sm:$0xff] %v10749_v37  ;;  %v2400_v55 = vmax.f32 %v2399_v16, %v10733_v32  ;;  %v14714_v34 = vld [vmem:[#allocation89_spill] sm:$0xff] }
 0x28b   : > { %v10752_v33 = vpop.f32.mrf.mxu0  ;;  %v10755_v56 = vpop.f32.mrf.mxu1  ;;  %v2439_v39 = vmax.f32 %v14714_v34, %v9896_v12  ;;  %v14720_v34 = vld [vmem:[#allocation90_spill] sm:$0xff] }
 0x28c   : > { %14709 = vst [vmem:[#allocation333_spill] sm:$0xff] %v10752_v33  ;;  %v2415_v46 = vmax.f32 %v2414_v51, %v10752_v33  ;;  %14710 = vst [vmem:[#allocation334_spill] sm:$0xff] %v10755_v56  ;;  %2401 = vmax.xlane.f32.xlu1 %v2400_v55  ;;  %v2408_v14 = vmax.f32 %v2407_v47, %v10739_v6  ;;  %v14718_v6 = vld [vmem:[#allocation88_spill] sm:$0xff] }
 0x28d   : > { %v10759_v9 = vpop.f32.mrf.mxu0  ;;  %v10765_v32 = vpop.f32.mrf.mxu1  ;;  %v2432_v52 = vmax.f32 %v2431_v41, %v14718_v6  ;;  %v2440_v12 = vmax.f32 %v2439_v39, %v14720_v34  ;;  %v14726_v39 = vld [vmem:[#allocation97_spill] sm:$0xff] }
 0x28e   : > { %14712 = vst [vmem:[#allocation335_spill] sm:$0xff] %v10759_v9  ;;  %v2416_v16 = vmax.f32 %v2415_v46, %v10759_v9  ;;  %14715 = vst [vmem:[#allocation336_spill] sm:$0xff] %v10765_v32  ;;  %v2409_v51 = vmax.f32 %v2408_v14, %v10749_v37  ;;  %v14721_v46 = vld [vmem:[#allocation93_spill] sm:$0xff] }
 0x28f   : > { %v10768_v33 = vpop.f32.mrf.mxu0  ;;  %v10771_v47 = vpop.f32.mrf.mxu1  ;;  %v2448_v9 = vmax.f32 %v14721_v46, %v9905_v15  ;;  %v14728_v46 = vld [vmem:[#allocation92_spill] sm:$0xff] }
 0x290   : > { %14716 = vst [vmem:[#allocation337_spill] sm:$0xff] %v10768_v33  ;;  %v2424_v55 = vmax.f32 %v2423_v40, %v10768_v33  ;;  %14717 = vst [vmem:[#allocation338_spill] sm:$0xff] %v10771_v47  ;;  %2410 = vmax.xlane.f32.xlu0 %v2409_v51  ;;  %v2417_v35 = vmax.f32 %v2416_v16, %v10755_v56  ;;  %v14725_v56 = vld [vmem:[#allocation99_spill] sm:$0xff] }
 0x291   : > { %v10775_v38 = vpop.f32.mrf.mxu0  ;;  %v10781_v37 = vpop.f32.mrf.mxu1  ;;  %v2457_v34 = vmax.f32 %v14726_v39, %v14725_v56  ;;  %v14733_v39 = vld [vmem:[#allocation98_spill] sm:$0xff] }
 0x292   : > { %14719 = vst [vmem:[#allocation339_spill] sm:$0xff] %v10775_v38  ;;  %v2425_v14 = vmax.f32 %v2424_v55, %v10775_v38  ;;  %14722 = vst [vmem:[#allocation340_spill] sm:$0xff] %v10781_v37  ;;  %v2418_v40 = vmax.f32 %v2417_v35, %v10765_v32  ;;  %v2441_v55 = vmax.f32 %v2440_v12, %v14728_v46  ;;  %v14729_v38 = vld [vmem:[#allocation94_spill] sm:$0xff] }
 0x293   : > { %v10784_v33 = vpop.f32.mrf.mxu0  ;;  %v10787_v16 = vpop.f32.mrf.mxu1  ;;  %v2449_v15 = vmax.f32 %v2448_v9, %v14729_v38  ;;  %v2458_v56 = vmax.f32 %v2457_v34, %v14733_v39  ;;  %v14735_v9 = vld [vmem:[#allocation96_spill] sm:$0xff] }
 0x294   : > { %14723 = vst [vmem:[#allocation341_spill] sm:$0xff] %v10784_v33  ;;  %v2433_v51 = vmax.f32 %v2432_v52, %v10784_v33  ;;  %14724 = vst [vmem:[#allocation342_spill] sm:$0xff] %v10787_v16  ;;  %2419 = vmax.xlane.f32.xlu1 %v2418_v40  ;;  %v2426_v41 = vmax.f32 %v2425_v14, %v10771_v47 }
 0x295   : > { %v10792_v6 = vpop.f32.mrf.mxu0  ;;  %v10797_v32 = vpop.f32.mrf.mxu1  ;;  %v2450_v38 = vmax.f32 %v2449_v15, %v14735_v9 }
 0x296   : > { %14727 = vst [vmem:[#allocation343_spill] sm:$0xff] %v10792_v6  ;;  %v2434_v35 = vmax.f32 %v2433_v51, %v10792_v6  ;;  %14730 = vst [vmem:[#allocation344_spill] sm:$0xff] %v10797_v32  ;;  %v2427_v52 = vmax.f32 %v2426_v41, %v10781_v37  ;;  %v14736_v51 = vld [vmem:[#allocation103_spill] sm:$0xff]  ;;  %v14737_v6 = vld [vmem:[#allocation101_spill] sm:$0xff] }
 0x297   : > { %v10800_v33 = vpop.f32.mrf.mxu0  ;;  %v10803_v14 = vpop.f32.mrf.mxu1  ;;  %v2466_v46 = vmax.f32 %v14737_v6, %v14736_v51  ;;  %v14743_v6 = vld [vmem:[#allocation102_spill] sm:$0xff] }
 0x298   : > { %14731 = vst [vmem:[#allocation345_spill] sm:$0xff] %v10800_v33  ;;  %v2442_v40 = vmax.f32 %v2441_v55, %v10800_v33  ;;  %14732 = vst [vmem:[#allocation346_spill] sm:$0xff] %v10803_v14  ;;  %2428 = vmax.xlane.f32.xlu0 %v2427_v52  ;;  %v2435_v47 = vmax.f32 %v2434_v35, %v10787_v16  ;;  %v14741_v16 = vld [vmem:[#allocation100_spill] sm:$0xff] }
 0x299   : > { %v10807_v12 = vpop.f32.mrf.mxu0  ;;  %v10813_v37 = vpop.f32.mrf.mxu1  ;;  %v2459_v15 = vmax.f32 %v2458_v56, %v14741_v16  ;;  %v2467_v51 = vmax.f32 %v2466_v46, %v14743_v6  ;;  %v14748_v46 = vld [vmem:[#allocation109_spill] sm:$0xff] }
 0x29a   : > { %14734 = vst [vmem:[#allocation347_spill] sm:$0xff] %v10807_v12  ;;  %v2443_v41 = vmax.f32 %v2442_v40, %v10807_v12  ;;  %14738 = vst [vmem:[#allocation348_spill] sm:$0xff] %v10813_v37  ;;  %v2436_v55 = vmax.f32 %v2435_v47, %v10797_v32  ;;  %v14744_v40 = vld [vmem:[#allocation105_spill] sm:$0xff] }
 0x29b   : > { %v10816_v33 = vpop.f32.mrf.mxu0  ;;  %v10819_v35 = vpop.f32.mrf.mxu1  ;;  %v2475_v12 = vmax.f32 %v14744_v40, %v9944_v10  ;;  %v14750_v40 = vld [vmem:[#allocation104_spill] sm:$0xff] }
 0x29c   : > { %14739 = vst [vmem:[#allocation349_spill] sm:$0xff] %v10816_v33  ;;  %v2451_v52 = vmax.f32 %v2450_v38, %v10816_v33  ;;  %14740 = vst [vmem:[#allocation350_spill] sm:$0xff] %v10819_v35  ;;  %2437 = vmax.xlane.f32.xlu1 %v2436_v55  ;;  %v2444_v34 = vmax.f32 %v2443_v41, %v10803_v14  ;;  %v2484_v14 = vmax.f32 %v14748_v46, %v9953_v2  ;;  %v14755_v46 = vld [vmem:[#allocation110_spill] sm:$0xff] }
 0x29d   : > { %v10823_v39 = vpop.f32.mrf.mxu0  ;;  %v10829_v32 = vpop.f32.mrf.mxu1 }
 0x29e   : > { %14742 = vst [vmem:[#allocation351_spill] sm:$0xff] %v10823_v39  ;;  %v2452_v47 = vmax.f32 %v2451_v52, %v10823_v39  ;;  %14745 = vst [vmem:[#allocation352_spill] sm:$0xff] %v10829_v32  ;;  %v2445_v38 = vmax.f32 %v2444_v34, %v10813_v37  ;;  %v2468_v52 = vmax.f32 %v2467_v51, %v14750_v40  ;;  %v14751_v39 = vld [vmem:[#allocation106_spill] sm:$0xff] }
 0x29f   : > { %v10832_v33 = vpop.f32.mrf.mxu0  ;;  %v10835_v41 = vpop.f32.mrf.mxu1  ;;  %v2476_v10 = vmax.f32 %v2475_v12, %v14751_v39  ;;  %v2485_v2 = vmax.f32 %v2484_v14, %v14755_v46  ;;  %v14757_v12 = vld [vmem:[#allocation108_spill] sm:$0xff] }
 0x2a0   : > { %14746 = vst [vmem:[#allocation353_spill] sm:$0xff] %v10832_v33  ;;  %v2460_v55 = vmax.f32 %v2459_v15, %v10832_v33  ;;  %14747 = vst [vmem:[#allocation354_spill] sm:$0xff] %v10835_v41  ;;  %2446 = vmax.xlane.f32.xlu0 %v2445_v38  ;;  %v2453_v56 = vmax.f32 %v2452_v47, %v10819_v35 }
 0x2a1   : > { %v10840_v6 = vpop.f32.mrf.mxu0  ;;  %v10845_v37 = vpop.f32.mrf.mxu1  ;;  %v2477_v39 = vmax.f32 %v2476_v10, %v14757_v12 }
 0x2a2   : > { %14749 = vst [vmem:[#allocation355_spill] sm:$0xff] %v10840_v6  ;;  %v2461_v34 = vmax.f32 %v2460_v55, %v10840_v6  ;;  %14752 = vst [vmem:[#allocation356_spill] sm:$0xff] %v10845_v37  ;;  %v2454_v15 = vmax.f32 %v2453_v56, %v10829_v32  ;;  %v14758_v55 = vld [vmem:[#allocation115_spill] sm:$0xff]  ;;  %v14759_v6 = vld [vmem:[#allocation113_spill] sm:$0xff] }
 0x2a3   : > { %v10848_v33 = vpop.f32.mrf.mxu0  ;;  %v10851_v47 = vpop.f32.mrf.mxu1  ;;  %v2493_v40 = vmax.f32 %v14759_v6, %v14758_v55  ;;  %v14765_v55 = vld [vmem:[#allocation114_spill] sm:$0xff] }
 0x2a4   : > { %14753 = vst [vmem:[#allocation357_spill] sm:$0xff] %v10848_v33  ;;  %v2469_v38 = vmax.f32 %v2468_v52, %v10848_v33  ;;  %14754 = vst [vmem:[#allocation358_spill] sm:$0xff] %v10851_v47  ;;  %2455 = vmax.xlane.f32.xlu1 %v2454_v15  ;;  %v2462_v35 = vmax.f32 %v2461_v34, %v10835_v41  ;;  %v14763_v41 = vld [vmem:[#allocation112_spill] sm:$0xff] }
 0x2a5   : > { %v10855_v51 = vpop.f32.mrf.mxu0  ;;  %v10861_v32 = vpop.f32.mrf.mxu1  ;;  %v2486_v10 = vmax.f32 %v2485_v2, %v14763_v41  ;;  %v2494_v6 = vmax.f32 %v2493_v40, %v14765_v55  ;;  %v14771_v40 = vld [vmem:[#allocation121_spill] sm:$0xff] }
 0x2a6   : > { %14756 = vst [vmem:[#allocation359_spill] sm:$0xff] %v10855_v51  ;;  %v2470_v56 = vmax.f32 %v2469_v38, %v10855_v51  ;;  %14760 = vst [vmem:[#allocation360_spill] sm:$0xff] %v10861_v32  ;;  %v2463_v52 = vmax.f32 %v2462_v35, %v10845_v37  ;;  %v14766_v38 = vld [vmem:[#allocation119_spill] sm:$0xff]  ;;  %v14767_v51 = vld [vmem:[#allocation117_spill] sm:$0xff] }
 0x2a7   : > { %v10864_v33 = vpop.f32.mrf.mxu0  ;;  %v10867_v34 = vpop.f32.mrf.mxu1  ;;  %v2502_v12 = vmax.f32 %v14767_v51, %v14766_v38  ;;  %v14773_v51 = vld [vmem:[#allocation116_spill] sm:$0xff] }
 0x2a8   : > { %14761 = vst [vmem:[#allocation361_spill] sm:$0xff] %v10864_v33  ;;  %v2478_v15 = vmax.f32 %v2477_v39, %v10864_v33  ;;  %14762 = vst [vmem:[#allocation362_spill] sm:$0xff] %v10867_v34  ;;  %2464 = vmax.xlane.f32.xlu0 %v2463_v52  ;;  %v2471_v14 = vmax.f32 %v2470_v56, %v10851_v47  ;;  %v2511_v47 = vmax.f32 %v14771_v40, %v9992_v18  ;;  %v14778_v40 = vld [vmem:[#allocation122_spill] sm:$0xff] }
 0x2a9   : > { %v10871_v46 = vpop.f32.mrf.mxu0  ;;  %v10877_v37 = vpop.f32.mrf.mxu1 }
 0x2aa   : > { %14764 = vst [vmem:[#allocation363_spill] sm:$0xff] %v10871_v46  ;;  %v2479_v35 = vmax.f32 %v2478_v15, %v10871_v46  ;;  %14768 = vst [vmem:[#allocation364_spill] sm:$0xff] %v10877_v37  ;;  %v2472_v39 = vmax.f32 %v2471_v14, %v10861_v32  ;;  %v2495_v15 = vmax.f32 %v2494_v6, %v14773_v51  ;;  %v14774_v46 = vld [vmem:[#allocation118_spill] sm:$0xff]  ;;  %v14792_v51 = vld [vmem:[#allocation133_spill] sm:$0xff] }
 0x2ab   : > { %v10880_v33 = vpop.f32.mrf.mxu0  ;;  %v10883_v56 = vpop.f32.mrf.mxu1  ;;  %v2503_v38 = vmax.f32 %v2502_v12, %v14774_v46  ;;  %v2512_v18 = vmax.f32 %v2511_v47, %v14778_v40  ;;  %v14780_v12 = vld [vmem:[#allocation120_spill] sm:$0xff] }
 0x2ac   : > { %14769 = vst [vmem:[#allocation365_spill] sm:$0xff] %v10880_v33  ;;  %v2487_v52 = vmax.f32 %v2486_v10, %v10880_v33  ;;  %14770 = vst [vmem:[#allocation366_spill] sm:$0xff] %v10883_v56  ;;  %2473 = vmax.xlane.f32.xlu1 %v2472_v39  ;;  %v2480_v2 = vmax.f32 %v2479_v35, %v10867_v34 }
 0x2ad   : > { %v10888_v55 = vpop.f32.mrf.mxu0  ;;  %v10893_v32 = vpop.f32.mrf.mxu1  ;;  %v2504_v46 = vmax.f32 %v2503_v38, %v14780_v12 }
 0x2ae   : > { %14772 = vst [vmem:[#allocation367_spill] sm:$0xff] %v10888_v55  ;;  %v2488_v14 = vmax.f32 %v2487_v52, %v10888_v55  ;;  %14775 = vst [vmem:[#allocation368_spill] sm:$0xff] %v10893_v32  ;;  %v2481_v10 = vmax.f32 %v2480_v2, %v10877_v37  ;;  %v14781_v52 = vld [vmem:[#allocation125_spill] sm:$0xff] }
 0x2af   : > { %v10896_v33 = vpop.f32.mrf.mxu0  ;;  %v10899_v35 = vpop.f32.mrf.mxu1  ;;  %v2520_v55 = vmax.f32 %v14781_v52, %v10001_v19  ;;  %v14787_v52 = vld [vmem:[#allocation126_spill] sm:$0xff] }
 0x2b0   : > { %14776 = vst [vmem:[#allocation369_spill] sm:$0xff] %v10896_v33  ;;  %v2496_v39 = vmax.f32 %v2495_v15, %v10896_v33  ;;  %14777 = vst [vmem:[#allocation370_spill] sm:$0xff] %v10899_v35  ;;  %2482 = vmax.xlane.f32.xlu0 %v2481_v10  ;;  %v2489_v34 = vmax.f32 %v2488_v14, %v10883_v56  ;;  %v14785_v56 = vld [vmem:[#allocation124_spill] sm:$0xff] }
 0x2b1   : > { %v10903_v6 = vpop.f32.mrf.mxu0  ;;  %v10909_v37 = vpop.f32.mrf.mxu1  ;;  %v2513_v38 = vmax.f32 %v2512_v18, %v14785_v56  ;;  %v2521_v19 = vmax.f32 %v2520_v55, %v14787_v52 }
 0x2b2   : > { %14779 = vst [vmem:[#allocation371_spill] sm:$0xff] %v10903_v6  ;;  %v2497_v2 = vmax.f32 %v2496_v39, %v10903_v6  ;;  %14782 = vst [vmem:[#allocation372_spill] sm:$0xff] %v10909_v37  ;;  %v2490_v15 = vmax.f32 %v2489_v34, %v10893_v32  ;;  %v14788_v39 = vld [vmem:[#allocation131_spill] sm:$0xff]  ;;  %v14789_v6 = vld [vmem:[#allocation129_spill] sm:$0xff] }
 0x2b3   : > { %v10912_v33 = vpop.f32.mrf.mxu0  ;;  %v10915_v14 = vpop.f32.mrf.mxu1  ;;  %v2529_v12 = vmax.f32 %v14789_v6, %v14788_v39  ;;  %v14796_v39 = vld [vmem:[#allocation128_spill] sm:$0xff] }
 0x2b4   : > { %14783 = vst [vmem:[#allocation373_spill] sm:$0xff] %v10912_v33  ;;  %v2505_v10 = vmax.f32 %v2504_v46, %v10912_v33  ;;  %14784 = vst [vmem:[#allocation374_spill] sm:$0xff] %v10915_v14  ;;  %2491 = vmax.xlane.f32.xlu1 %v2490_v15  ;;  %v2498_v47 = vmax.f32 %v2497_v2, %v10899_v35  ;;  %v14791_v33 = vld [vmem:[#allocation135_spill] sm:$0xff] }
 0x2b5   : > { %v10919_v40 = vpop.f32.mrf.mxu0  ;;  %v10925_v32 = vpop.f32.mrf.mxu1  ;;  %v2538_v15 = vmax.f32 %v14792_v51, %v14791_v33  ;;  %v14799_v33 = vld [vmem:[#allocation134_spill] sm:$0xff] }
 0x2b6   : > { %14786 = vst [vmem:[#allocation375_spill] sm:$0xff] %v10919_v40  ;;  %v2506_v34 = vmax.f32 %v2505_v10, %v10919_v40  ;;  %14790 = vst [vmem:[#allocation376_spill] sm:$0xff] %v10925_v32  ;;  %v2499_v46 = vmax.f32 %v2498_v47, %v10909_v37  ;;  %v2522_v10 = vmax.f32 %v2521_v19, %v14796_v39  ;;  %v14797_v40 = vld [vmem:[#allocation130_spill] sm:$0xff] }
 0x2b7   : > { %v10930_v41 = vpop.f32.mrf.mxu0  ;;  %v10933_v2 = vpop.f32.mrf.mxu1  ;;  %v2530_v6 = vmax.f32 %v2529_v12, %v14797_v40  ;;  %v2539_v52 = vmax.f32 %v2538_v15, %v14799_v33  ;;  %v14807_v15 = vld [vmem:[#allocation149_spill] sm:$0xff]  ;;  %v14808_v33 = vld [vmem:[#allocation155_spill] sm:$0xff]  ;;  %v14814_v40 = vld [vmem:[#allocation138_spill] sm:$0xff] }
 0x2b8   : > { %14793 = vst [vmem:[#allocation377_spill] sm:$0xff] %v10930_v41  ;;  %v2514_v18 = vmax.f32 %v2513_v38, %v10930_v41  ;;  %14794 = vst [vmem:[#allocation378_spill] sm:$0xff] %v10933_v2  ;;  %2500 = vmax.xlane.f32.xlu0 %v2499_v46  ;;  %v2507_v55 = vmax.f32 %v2506_v34, %v10915_v14  ;;  %v14800_v38 = vld [vmem:[#allocation139_spill] sm:$0xff]  ;;  %v14801_v41 = vld [vmem:[#allocation137_spill] sm:$0xff]  ;;  %v2556_v34 = vmax.f32 %v10045_v23, %v10050_v22 }
 0x2b9   : > { %v10936_v35 = vpop.f32.mrf.mxu0  ;;  %v10941_v37 = vpop.f32.mrf.mxu1  ;;  %v2547_v56 = vmax.f32 %v14801_v41, %v14800_v38  ;;  %v14802_v46 = vld [vmem:[#allocation147_spill] sm:$0xff]  ;;  %v14803_v14 = vld [vmem:[#allocation145_spill] sm:$0xff]  ;;  %v2592_v23 = vmax.f32 %v10093_v24, %v10098_v20 }
 0x2ba   : > { %14795 = vst [vmem:[#allocation379_spill] sm:$0xff] %v10936_v35  ;;  %v2515_v47 = vmax.f32 %v2514_v18, %v10936_v35  ;;  %14798 = vst [vmem:[#allocation380_spill] sm:$0xff] %v10941_v37  ;;  %v2508_v51 = vmax.f32 %v2507_v55, %v10925_v32  ;;  %v2565_v16 = vmax.f32 %v14803_v14, %v14802_v46  ;;  %v14806_v35 = vld [vmem:[#allocation151_spill] sm:$0xff]  ;;  %v14809_v38 = vld [vmem:[#allocation153_spill] sm:$0xff] }
 0x2bb   : > { %v10951_v19 = vpop.f32.mrf.mxu0  ;;  %v10954_v18 = vpop.f32.mrf.mxu1  ;;  %v2574_v32 = vmax.f32 %v14807_v15, %v14806_v35  ;;  %v2583_v41 = vmax.f32 %v14809_v38, %v14808_v33  ;;  %v14811_v46 = vld [vmem:[#allocation132_spill] sm:$0xff]  ;;  %v2548_v15 = vmax.f32 %v2547_v56, %v14814_v40  ;;  %v14815_v35 = vld [vmem:[#allocation142_spill] sm:$0xff]  ;;  %v14818_v20 = vld [vmem:[#allocation163_spill] sm:$0xff] }
 0x2bc   : > { %14804 = vst [vmem:[#allocation381_spill] sm:$0xff] %v10951_v19  ;;  %v2523_v12 = vmax.f32 %v2522_v10, %v10951_v19  ;;  %14805 = vst [vmem:[#allocation382_spill] sm:$0xff] %v10954_v18  ;;  %2509 = vmax.xlane.f32.xlu1 %v2508_v51  ;;  %v2516_v55 = vmax.f32 %v2515_v47, %v10933_v2  ;;  %v2531_v14 = vmax.f32 %v2530_v6, %v14811_v46  ;;  %v14813_v47 = vld [vmem:[#allocation136_spill] sm:$0xff]  ;;  %v14816_v33 = vld [vmem:[#allocation146_spill] sm:$0xff] }
 0x2bd   : > { %v10963_v22 = vpop.f32.mrf.mxu0  ;;  %v10967_v19 = vpop.f32.mrf.mxu1  ;;  %v2540_v2 = vmax.f32 %v2539_v52, %v14813_v47  ;;  %v10973_v39 = vmax.f32 %v2556_v34, %v14815_v35  ;;  %v10976_v38 = vmax.f32 %v2565_v16, %v14816_v33  ;;  %v14819_v6 = vld [vmem:[#allocation161_spill] sm:$0xff]  ;;  %v14823_v52 = vld [vmem:[#allocation150_spill] sm:$0xff] }
 0x2be   : > { %14810 = vst [vmem:[#allocation383_spill] sm:$0xff] %v10963_v22  ;;  %v2524_v10 = vmax.f32 %v2523_v12, %v10963_v22  ;;  %14812 = vst [vmem:[#allocation384_spill] sm:$0xff] %v10967_v19  ;;  %v2517_v51 = vmax.f32 %v2516_v55, %v10941_v37  ;;  %v2601_v46 = vmax.f32 %v14819_v6, %v14818_v20  ;;  %v14820_v12 = vld [vmem:[#allocation167_spill] sm:$0xff]  ;;  %v14821_v22 = vld [vmem:[#allocation165_spill] sm:$0xff] }
 0x2bf   : > { %v10978_v24 = vpop.f32.mrf.mxu0  ;;  %v2610_v9 = vmax.f32 %v14821_v22, %v14820_v12  ;;  %v10985_v37 = vpop.f32.mrf.mxu1  ;;  %v10989_v34 = vmax.f32 %v2574_v32, %v14823_v52  ;;  %v14824_v16 = vld [vmem:[#allocation154_spill] sm:$0xff]  ;;  %v14826_v20 = vld [vmem:[#allocation171_spill] sm:$0xff]  ;;  %v14827_v6 = vld [vmem:[#allocation169_spill] sm:$0xff] }
 0x2c0   : > { %14817 = vst [vmem:[#allocation385_spill] sm:$0xff] %v10978_v24  ;;  %v2532_v55 = vmax.f32 %v2531_v14, %v10978_v24  ;;  %14822 = vst [vmem:[#allocation386_spill] sm:$0xff] %v10985_v37  ;;  %2518 = vmax.xlane.f32.xlu0 %v2517_v51  ;;  %v2525_v56 = vmax.f32 %v2524_v10, %v10954_v18  ;;  %v10992_v33 = vmax.f32 %v2583_v41, %v14824_v16  ;;  %v14825_v35 = vld [vmem:[#allocation158_spill] sm:$0xff]  ;;  %v14829_v51 = vld [vmem:[#allocation179_spill] sm:$0xff] }
 0x2c1   : > { %v10995_v40 = vmax.f32 %v2592_v23, %v14825_v35  ;;  %v2619_v47 = vmax.f32 %v14827_v6, %v14826_v20  ;;  %v10999_v12 = vpop.f32.mrf.mxu0  ;;  %v2628_v14 = vmax.f32 %v10141_v0, %v10146_v21  ;;  %v14830_v24 = vld [vmem:[#allocation177_spill] sm:$0xff]  ;;  %v11006_v18 = vpop.f32.mrf.mxu1  ;;  %v14832_v22 = vld [vmem:[#allocation140_spill] sm:$0xff]  ;;  %v14835_v52 = vld [vmem:[#allocation183_spill] sm:$0xff] }
 0x2c2   : > { %14828 = vst [vmem:[#allocation387_spill] sm:$0xff] %v10999_v12  ;;  %v2637_v10 = vmax.f32 %v14830_v24, %v14829_v51  ;;  %v2533_v32 = vmax.f32 %v2532_v55, %v10999_v12  ;;  %14831 = vst [vmem:[#allocation388_spill] sm:$0xff] %v11006_v18  ;;  %v2526_v41 = vmax.f32 %v2525_v56, %v10967_v19  ;;  %v14833_v35 = vld [vmem:[#allocation144_spill] sm:$0xff]  ;;  %v14838_v51 = vld [vmem:[#allocation162_spill] sm:$0xff] }
 0x2c3   : > { %v2549_v23 = vmax.f32 %v2548_v15, %v14832_v22  ;;  %v2558_v16 = vmax.f32 %v10973_v39, %v14833_v35  ;;  %v14834_v20 = vld [vmem:[#allocation148_spill] sm:$0xff]  ;;  %v2646_v0 = vmax.f32 %v14836_v49, %v14835_v52  ;;  %v11016_v21 = vpop.f32.mrf.mxu0  ;;  %v11019_v24 = vmax.f32 %v2601_v46, %v14838_v51  ;;  %v14839_v55 = vld [vmem:[#allocation166_spill] sm:$0xff]  ;;  %v11025_v15 = vpop.f32.mrf.mxu1  ;;  %v14853_v46 = vld [vmem:[#allocation187_spill] sm:$0xff] }
 0x2c4   : > { %14837 = vst [vmem:[#allocation389_spill] sm:$0xff] %v11016_v21  ;;  %v11022_v12 = vmax.f32 %v2610_v9, %v14839_v55  ;;  %v2541_v56 = vmax.f32 %v2540_v2, %v11016_v21  ;;  %14840 = vst [vmem:[#allocation390_spill] sm:$0xff] %v11025_v15  ;;  %2527 = vmax.xlane.f32.xlu1 %v2526_v41  ;;  %v2534_v39 = vmax.f32 %v2533_v32, %v10985_v37  ;;  %v14841_v19 = vld [vmem:[#allocation152_spill] sm:$0xff]  ;;  %v14844_v51 = vld [vmem:[#allocation170_spill] sm:$0xff] }
 0x2c5   : > { %v14842_v35 = vld [vmem:[#allocation156_spill] sm:$0xff]  ;;  %v11035_v22 = vmax.f32 %v2619_v47, %v14844_v51  ;;  %v11037_v9 = vpop.f32.mrf.mxu0  ;;  %v14846_v2 = vld [vmem:[#allocation174_spill] sm:$0xff]  ;;  %v11046_v6 = vpop.f32.mrf.mxu1  ;;  %v14854_v47 = vld [vmem:[#allocation185_spill] sm:$0xff] }
 0x2c6   : > { %v14843_v49 = vld [vmem:[#allocation160_spill] sm:$0xff]  ;;  %14845 = vst [vmem:[#allocation156_spill] sm:$0xff] %v11037_v9  ;;  %v11040_v21 = vmax.f32 %v2628_v14, %v14846_v2  ;;  %v14848_v41 = vld [vmem:[#allocation178_spill] sm:$0xff]  ;;  %v2542_v32 = vmax.f32 %v2541_v56, %v11037_v9  ;;  %14850 = vst [vmem:[#allocation392_spill] sm:$0xff] %v11046_v6  ;;  %v2535_v52 = vmax.f32 %v2534_v39, %v11006_v18 }
 0x2c7   : > { %v11043_v55 = vmax.f32 %v2637_v10, %v14848_v41  ;;  %v14851_v37 = vld [vmem:[#allocation182_spill] sm:$0xff]  ;;  %v2655_v51 = vmax.f32 %v14854_v47, %v14853_v46  ;;  %v14855_v14 = vld [vmem:[#allocation195_spill] sm:$0xff]  ;;  %v14856_v2 = vld [vmem:[#allocation193_spill] sm:$0xff]  ;;  %v11058_v10 = vpop.f32.mrf.mxu0  ;;  %v11065_v18 = vpop.f32.mrf.mxu1  ;;  %v2700_v56 = vmax.f32 %v10237_v27, %v10242_v28 }
 0x2c8   : > { %14847 = vst [vmem:[#allocation160_spill] sm:$0xff] %v11040_v21  ;;  %v11050_v31 = vmax.f32 %v2646_v0, %v14851_v37  ;;  %v2673_v11 = vmax.f32 %v14856_v2, %v14855_v14  ;;  %14857 = vst [vmem:[#allocation394_spill] sm:$0xff] %v11058_v10  ;;  %v14858_v41 = vld [vmem:[#allocation164_spill] sm:$0xff]  ;;  %v2550_v0 = vmax.f32 %v2549_v23, %v11058_v10  ;;  %2536 = vmax.xlane.f32.xlu0 %v2535_v52  ;;  %v14863_v14 = vld [vmem:[#allocation197_spill] sm:$0xff] }
 0x2c9   : > { %14849 = vst [vmem:[#allocation391_spill] sm:$0xff] %v11043_v55  ;;  %v14859_v9 = vld [vmem:[#allocation168_spill] sm:$0xff]  ;;  %14860 = vst [vmem:[#allocation164_spill] sm:$0xff] %v11065_v18  ;;  %v2543_v46 = vmax.f32 %v2542_v32, %v11025_v15  ;;  %v2682_v2 = vmax.f32 %v14863_v14, %v14862_v25  ;;  %v14864_v37 = vld [vmem:[#allocation203_spill] sm:$0xff]  ;;  %v11076_v39 = vpop.f32.mrf.mxu0  ;;  %v11083_v26 = vpop.f32.mrf.mxu1 }
 0x2ca   : > { %14852 = vst [vmem:[#allocation393_spill] sm:$0xff] %v11050_v31  ;;  %v14861_v47 = vld [vmem:[#allocation172_spill] sm:$0xff]  ;;  %v2691_v8 = vmax.f32 %v14865_v36, %v14864_v37  ;;  %14866 = vst [vmem:[#allocation168_spill] sm:$0xff] %v11076_v39  ;;  %v2551_v15 = vmax.f32 %v2550_v0, %v11076_v39  ;;  %v14871_v36 = vld [vmem:[#allocation186_spill] sm:$0xff]  ;;  %v11095_v10 = vmax.f32 %v2673_v11, %v14873_v17 }
 0x2cb   : > { %14869 = vst [vmem:[#allocation172_spill] sm:$0xff] %v11083_v26  ;;  %v2544_v25 = vmax.f32 %v2543_v46, %v11046_v6  ;;  %v11089_v7 = vmax.f32 %v2655_v51, %v14871_v36  ;;  %v14872_v28 = vld [vmem:[#allocation190_spill] sm:$0xff]  ;;  %v11097_v23 = vpop.f32.mrf.mxu0  ;;  %v14876_v32 = vld [vmem:[#allocation211_spill] sm:$0xff]  ;;  %v14877_v0 = vld [vmem:[#allocation209_spill] sm:$0xff]  ;;  %v11104_v37 = vpop.f32.mrf.mxu1 }
 0x2cc   : > { %v11092_v27 = vmax.f32 %v2664_v13, %v14872_v28  ;;  %14874 = vst [vmem:[#allocation395_spill] sm:$0xff] %v11095_v10  ;;  %14875 = vst [vmem:[#allocation396_spill] sm:$0xff] %v11097_v23  ;;  %v2709_v39 = vmax.f32 %v14877_v0, %v14876_v32  ;;  %v14878_v52 = vld [vmem:[#allocation215_spill] sm:$0xff]  ;;  %v14879_v55 = vld [vmem:[#allocation213_spill] sm:$0xff]  ;;  %v2559_v6 = vmax.f32 %v2558_v16, %v11097_v23 }
 0x2cd   : > { %v2718_v46 = vmax.f32 %v14879_v55, %v14878_v52  ;;  %14880 = vst [vmem:[#allocation397_spill] sm:$0xff] %v11104_v37  ;;  %2545 = vmax.xlane.f32.xlu1 %v2544_v25  ;;  %v2552_v51 = vmax.f32 %v2551_v15, %v11065_v18  ;;  %v14881_v13 = vld [vmem:[#allocation198_spill] sm:$0xff]  ;;  %v14886_v32 = vld [vmem:[#allocation219_spill] sm:$0xff]  ;;  %v14887_v0 = vld [vmem:[#allocation217_spill] sm:$0xff]  ;;  %v11118_v52 = vpop.f32.mrf.mxu0  ;;  %v2736_v16 = vmax.f32 %v10285_v29, %v10290_v30  ;;  %v11125_v18 = vpop.f32.mrf.mxu1 }
 0x2ce   : > { %v11108_v28 = vmax.f32 %v2682_v2, %v14881_v13  ;;  %v14882_v11 = vld [vmem:[#allocation202_spill] sm:$0xff]  ;;  %v2727_v31 = vmax.f32 %v14887_v0, %v14886_v32  ;;  %14888 = vst [vmem:[#allocation400_spill] sm:$0xff] %v11118_v52  ;;  %v14889_v25 = vld [vmem:[#allocation227_spill] sm:$0xff]  ;;  %v14890_v23 = vld [vmem:[#allocation225_spill] sm:$0xff]  ;;  %v2560_v2 = vmax.f32 %v2559_v6, %v11118_v52 }
 0x2cf   : > { %v11111_v17 = vmax.f32 %v2691_v8, %v14882_v11  ;;  %v14884_v36 = vld [vmem:[#allocation206_spill] sm:$0xff]  ;;  %v2745_v15 = vmax.f32 %v14890_v23, %v14889_v25  ;;  %14891 = vst [vmem:[#allocation401_spill] sm:$0xff] %v11125_v18  ;;  %v2553_v8 = vmax.f32 %v2552_v51, %v11083_v26  ;;  %v14892_v55 = vld [vmem:[#allocation188_spill] sm:$0xff]  ;;  %v14895_v13 = vld [vmem:[#allocation231_spill] sm:$0xff]  ;;  %v11136_v21 = vpop.f32.mrf.mxu0  ;;  %v14900_v51 = vmax.f32 %v10976_v38, %v14834_v20  ;;  %v11148_v32 = vpop.f32.mrf.mxu1 }
 0x2d0   : > { %v11114_v14 = vmax.f32 %v2700_v56, %v14884_v36  ;;  %v14893_v36 = vld [vmem:[#allocation192_spill] sm:$0xff]  ;;  %v14896_v30 = vld [vmem:[#allocation229_spill] sm:$0xff]  ;;  %14897 = vst [vmem:[#allocation188_spill] sm:$0xff] %v11136_v21  ;;  %v14898_v25 = vld [vmem:[#allocation210_spill] sm:$0xff]  ;;  %v2561_v11 = vmax.f32 %v2560_v2, %v11104_v37 }
 0x2d1   : > { %14883 = vst [vmem:[#allocation398_spill] sm:$0xff] %v11111_v17  ;;  %v2754_v29 = vmax.f32 %v14896_v30, %v14895_v13  ;;  %v11139_v6 = vmax.f32 %v2709_v39, %v14898_v25  ;;  %v14899_v52 = vld [vmem:[#allocation214_spill] sm:$0xff]  ;;  %v2568_v56 = vmax.f32 %v14900_v51, %v11136_v21  ;;  %14901 = vst [vmem:[#allocation192_spill] sm:$0xff] %v11148_v32  ;;  %2554 = vmax.xlane.f32.xlu0 %v2553_v8  ;;  %v14902_v26 = vld [vmem:[#allocation200_spill] sm:$0xff]  ;;  %v11160_v10 = vpop.xlane.xlu0 %2248  ;;  %v11162_v38 = vpop.f32.mrf.mxu0 }
 0x2d2   : > { %14885 = vst [vmem:[#allocation399_spill] sm:$0xff] %v11114_v14  ;;  %v11142_v23 = vmax.f32 %v2718_v46, %v14899_v52  ;;  %v14905_v52 = vld [vmem:[#allocation218_spill] sm:$0xff]  ;;  %14906 = vst [vmem:[#allocation200_spill] sm:$0xff] %v11162_v38  ;;  %v11170_v13 = vpop.f32.mrf.mxu1  ;;  %v2817_v39 = vsub.f32 %v9636_v42, %v11160_v10  ;;  %v2819_v46 = vsub.f32 %v9640_v43, %v11160_v10  ;;  %v14913_v20 = vld [vmem:[#allocation233_spill] sm:$0xff] }
 0x2d3   : > { %v11158_v0 = vmax.f32 %v2727_v31, %v14905_v52  ;;  %v14907_v51 = vld [vmem:[#allocation222_spill] sm:$0xff]  ;;  %14910 = vst [vmem:[#allocation403_spill] sm:$0xff] %v11170_v13  ;;  %v14912_v52 = vld [vmem:[#allocation235_spill] sm:$0xff]  ;;  %v14916_v30 = vld [vmem:[#allocation216_spill] sm:$0xff]  ;;  %v14917_v43 = vmax.f32 %v10989_v34, %v14841_v19 }
 0x2d4   : > { %v11165_v8 = vmax.f32 %v2736_v16, %v14907_v51  ;;  %v14908_v2 = vld [vmem:[#allocation226_spill] sm:$0xff]  ;;  %v2763_v25 = vmax.f32 %v14913_v20, %v14912_v52  ;;  %v2569_v16 = vmax.f32 %v2568_v56, %v11162_v38  ;;  %v11182_v51 = vpop.f32.mrf.mxu0  ;;  %v3329_v17 = vmul.f32 1.442695, %v2817_v39  ;;  %v14925_v19 = vld [vmem:[#allocation232_spill] sm:$0xff] }
 0x2d5   : > { %v11168_v37 = vmax.f32 %v2745_v15, %v14908_v2  ;;  %v14911_v31 = vld [vmem:[#allocation230_spill] sm:$0xff]  ;;  %14914 = vst [vmem:[#allocation404_spill] sm:$0xff] %v11182_v51  ;;  %v2562_v15 = vmax.f32 %v2561_v11, %v11125_v18  ;;  %v14915_v2 = vld [vmem:[#allocation212_spill] sm:$0xff]  ;;  %v3333_v38 = vmul.f32 1.442695, %v2819_v46  ;;  %v11197_v11 = vpop.xlane.xlu0 %2257  ;;  %v2818_v39 = vsub.f32 %v9645_v44, %v11160_v10 }
 0x2d6   : > { %v11177_v21 = vmax.f32 %v2754_v29, %v14911_v31  ;;  %v2577_v29 = vmax.f32 %v14917_v43, %v11182_v51  ;;  %v11193_v31 = vpop.f32.mrf.mxu1  ;;  %v11199_v18 = vpop.f32.mrf.mxu0  ;;  %v2570_v14 = vmax.f32 %v2569_v16, %v11148_v32  ;;  %v14924_v46 = vld [vmem:[#allocation20_spill] sm:$0xff]  ;;  %v2827_v56 = vsub.f32 %v9655_v48, %v11197_v11  ;;  %v14926_v32 = vld [vmem:[#allocation234_spill] sm:$0xff] }
 0x2d7   : > { %14909 = vst [vmem:[#allocation402_spill] sm:$0xff] %v11168_v37  ;;  %14918 = vst [vmem:[#allocation212_spill] sm:$0xff] %v11193_v31  ;;  %2563 = vmax.xlane.f32.xlu1 %v2562_v15  ;;  %v2825_v15 = vsub.f32 %v14924_v46, %v11197_v11  ;;  %v11217_v52 = vmax.f32 %v2763_v25, %v14926_v32  ;;  %7770 = vpow2.f32 %v3329_v17 }
 0x2d8   : > { %14920 = vst [vmem:[#allocation216_spill] sm:$0xff] %v11199_v18  ;;  %v11208_v20 = vpop.f32.mrf.mxu1  ;;  %v2578_v44 = vmax.f32 %v2577_v29, %v11199_v18  ;;  %v11220_v34 = vpop.f32.mrf.mxu0  ;;  %v2571_v51 = vmax.f32 %v2570_v14, %v11170_v13  ;;  %v3349_v37 = vmul.f32 1.442695, %v2827_v56  ;;  %v2820_v48 = vsub.f32 %v9648_v45, %v11160_v10 }
 0x2d9   : > { %14923 = vst [vmem:[#allocation405_spill] sm:$0xff] %v11208_v20  ;;  %14927 = vst [vmem:[#allocation20_spill] sm:$0xff] %v11220_v34  ;;  %v3345_v43 = vmul.f32 1.442695, %v2825_v15  ;;  %7772 = vpow2.f32 %v3333_v38  ;;  %v14929_v25 = vmax.f32 %v10992_v33, %v14842_v35  ;;  %v11231_v29 = vpop.xlane.xlu1 %2266  ;;  %v3331_v14 = vmul.f32 1.442695, %v2818_v39 }
 0x2da   : > { %v11223_v42 = vpop.f32.mrf.mxu1  ;;  %2572 = vmax.xlane.f32.xlu0 %v2571_v51  ;;  %14930 = vst [vmem:[#allocation406_spill] sm:$0xff] %v11231_v29  ;;  %v11233_v16 = vpop.f32.mrf.mxu0  ;;  %v2579_v17 = vmax.f32 %v2578_v44, %v11193_v31  ;;  %v14933_v15 = vld [vmem:[#allocation21_spill] sm:$0xff]  ;;  %v2828_v38 = vsub.f32 %v9659_v50, %v11197_v11  ;;  %v2834_v33 = vsub.f32 %v9670_v53, %v11231_v29 }
 0x2db   : > { %14928 = vst [vmem:[#allocation232_spill] sm:$0xff] %v11223_v42  ;;  %v2586_v46 = vmax.f32 %v14929_v25, %v11220_v34  ;;  %14931 = vst [vmem:[#allocation407_spill] sm:$0xff] %v11233_v16  ;;  %7774 = vpow2.f32 %v3345_v43  ;;  %v2826_v45 = vsub.f32 %v14933_v15, %v11197_v11  ;;  %v2836_v39 = vsub.f32 %v9673_v54, %v11231_v29  ;;  %v14935_v43 = vld [vmem:[#allocation239_spill] sm:$0xff]  ;;  %v14936_v31 = vld [vmem:[#allocation237_spill] sm:$0xff] }
 0x2dc   : > { %v11236_v56 = vpop.f32.mrf.mxu1  ;;  %7776 = vpow2.f32 %v3349_v37  ;;  %v11245_v25 = vpop.f32.mrf.mxu0  ;;  %v2580_v44 = vmax.f32 %v2579_v17, %v11208_v20  ;;  %v14937_v50 = vmax.f32 %v10995_v40, %v14843_v49  ;;  %v3335_v37 = vmul.f32 1.442695, %v2820_v48 }
 0x2dd   : > { %14932 = vst [vmem:[#allocation408_spill] sm:$0xff] %v11236_v56  ;;  %v2587_v51 = vmax.f32 %v2586_v46, %v11233_v16  ;;  %14934 = vst [vmem:[#allocation21_spill] sm:$0xff] %v11245_v25  ;;  %v3347_v53 = vmul.f32 1.442695, %v2826_v45  ;;  %v11258_v46 = vpop.xlane.xlu1 %2275  ;;  %v3351_v54 = vmul.f32 1.442695, %v2828_v38  ;;  %7778 = vpow2.f32 %v3331_v14 }
 0x2de   : > { %v2595_v15 = vmax.f32 %v14937_v50, %v11245_v25  ;;  %v11256_v18 = vpop.f32.mrf.mxu1  ;;  %2581 = vmax.xlane.f32.xlu1 %v2580_v44  ;;  %14939 = vst [vmem:[#allocation409_spill] sm:$0xff] %v11258_v46  ;;  %v11260_v16 = vpop.f32.mrf.mxu0  ;;  %v3363_v20 = vmul.f32 1.442695, %v2834_v33  ;;  %v3367_v34 = vmul.f32 1.442695, %v2836_v39  ;;  %v2842_v40 = vsub.f32 %v9680_v58, %v11258_v46  ;;  %v14943_v38 = vld [vmem:[#allocation22_spill] sm:$0xff] }
 0x2df   : > { %14938 = vst [vmem:[#allocation237_spill] sm:$0xff] %v11256_v18  ;;  %14940 = vst [vmem:[#allocation410_spill] sm:$0xff] %v11260_v16  ;;  %v2588_v17 = vmax.f32 %v2587_v51, %v11223_v42  ;;  %v2844_v48 = vsub.f32 %v9682_v59, %v11258_v46  ;;  %7780 = vpow2.f32 %v3347_v53  ;;  %v2833_v33 = vsub.f32 %v14943_v38, %v11231_v29  ;;  %v14944_v51 = vld [vmem:[#allocation24_spill] sm:$0xff] }
 0x2e0   : > { %v11263_v13 = vpop.f32.mrf.mxu1  ;;  %v2596_v32 = vmax.f32 %v2595_v15, %v11260_v16  ;;  %v11270_v45 = vpop.f32.mrf.mxu0  ;;  %v2841_v39 = vsub.f32 %v14944_v51, %v11258_v46  ;;  %v14945_v14 = vmax.f32 %v11019_v24, %v14858_v41  ;;  %7782 = vpow2.f32 %v3335_v37  ;;  %v15048_v42 = vld [vmem:[#allocation52_spill] sm:$0xff] }
 0x2e1   : > { %14941 = vst [vmem:[#allocation411_spill] sm:$0xff] %v11263_v13  ;;  %14942 = vst [vmem:[#allocation412_spill] sm:$0xff] %v11270_v45  ;;  %v2589_v44 = vmax.f32 %v2588_v17, %v11236_v56  ;;  %v3379_v15 = vmul.f32 1.442695, %v2842_v40  ;;  %v11284_v17 = vpop.xlane.xlu0 %2284  ;;  %7784 = vpow2.f32 %v3351_v54  ;;  %v3383_v38 = vmul.f32 1.442695, %v2844_v48 }
 0x2e2   : > { %v2604_v50 = vmax.f32 %v14945_v14, %v11270_v45  ;;  %v11281_v58 = vpop.f32.mrf.mxu1  ;;  %v2597_v59 = vmax.f32 %v2596_v32, %v11256_v18  ;;  %14947 = vst [vmem:[#allocation24_spill] sm:$0xff] %v11284_v17  ;;  %v11286_v53 = vpop.f32.mrf.mxu0  ;;  %v3361_v25 = vmul.f32 1.442695, %v2833_v33  ;;  %v3377_v51 = vmul.f32 1.442695, %v2841_v39  ;;  %v14950_v32 = vld [vmem:[#allocation23_spill] sm:$0xff] }
 0x2e3   : > { %14946 = vst [vmem:[#allocation22_spill] sm:$0xff] %v11281_v58  ;;  %2590 = vmax.xlane.f32.xlu0 %v2589_v44  ;;  %14948 = vst [vmem:[#allocation413_spill] sm:$0xff] %v11286_v53  ;;  %7786 = vpow2.f32 %v3363_v20  ;;  %v2835_v37 = vsub.f32 %v14950_v32, %v11231_v29  ;;  %v2843_v44 = vsub.f32 %v9678_v57, %v11258_v46  ;;  %v15126_v46 = vld [vmem:[#allocation242_spill] sm:$0xff] }
 0x2e4   : > { %v11288_v56 = vpop.f32.mrf.mxu1  ;;  %v2605_v24 = vmax.f32 %v2604_v50, %v11286_v53  ;;  %v2598_v14 = vmax.f32 %v2597_v59, %v11263_v13  ;;  %v11294_v40 = vpop.f32.mrf.mxu0  ;;  %7788 = vpow2.f32 %v3379_v15  ;;  %v2850_v54 = vsub.f32 %v9691_v62, %v11284_v17 }
 0x2e5   : > { %14949 = vst [vmem:[#allocation414_spill] sm:$0xff] %v11288_v56  ;;  %14951 = vst [vmem:[#allocation23_spill] sm:$0xff] %v11294_v40  ;;  %v2852_v48 = vsub.f32 %v9694_v63, %v11284_v17  ;;  %v14952_v33 = vmax.f32 %v11022_v12, %v14859_v9  ;;  %7790 = vpow2.f32 %v3367_v34  ;;  %v3365_v59 = vmul.f32 1.442695, %v2835_v37  ;;  %v11309_v15 = vpop.eup %7770  ;;  %v11311_v57 = vpop.xlane.xlu1 %2293 }
 0x2e6   : > { %v11306_v39 = vpop.f32.mrf.mxu1  ;;  %2599 = vmax.xlane.f32.xlu1 %v2598_v14  ;;  %v2606_v50 = vmax.f32 %v2605_v24, %v11281_v58  ;;  %14954 = vst [vmem:[#allocation416_spill] sm:$0xff] %v11311_v57  ;;  %v11313_v62 = vpop.f32.mrf.mxu0  ;;  %7792 = vpow2.f32 %v3383_v38  ;;  %v3381_v63 = vmul.f32 1.442695, %v2843_v44  ;;  %v3395_v32 = vmul.f32 1.442695, %v2850_v54 }
 0x2e7   : > { %v2613_v20 = vmax.f32 %v14952_v33, %v11294_v40  ;;  %14953 = vst [vmem:[#allocation415_spill] sm:$0xff] %v11306_v39  ;;  %14955 = vst [vmem:[#allocation417_spill] sm:$0xff] %v11313_v62  ;;  %v3399_v53 = vmul.f32 1.442695, %v2852_v48  ;;  %v11315_v18 = vpop.eup %7772  ;;  %7794 = vpow2.f32 %v3361_v25  ;;  %v2858_v34 = vsub.f32 %v9701_v4, %v11311_v57  ;;  %v7743_v40 = vld [vmem:[%s9445_s14 + $0x1a8] sm:$0xff]  }
 0x2e8   : > { %v11317_v12 = vpop.f32.mrf.mxu1  ;;  %v2607_v24 = vmax.f32 %v2606_v50, %v11288_v56  ;;  %v7775_v37 = vpop.eup %7774  ;;  %7796 = vpow2.f32 %v3377_v51  ;;  %v2860_v38 = vsub.f32 %v9703_v5, %v11311_v57  ;;  %v2849_v44 = vsub.f32 %v9684_v60, %v11284_v17 }
 0x2e9   : > { %14956 = vst [vmem:[#allocation418_spill] sm:$0xff] %v11317_v12  ;;  %v2614_v14 = vmax.f32 %v2613_v20, %v11313_v62  ;;  %v11323_v33 = vpop.f32.mrf.mxu0  ;;  %v2857_v54 = vsub.f32 %v9696_v1, %v11311_v57  ;;  %v11331_v48 = vpop.eup %7776  ;;  %v14958_v25 = vmax.f32 %v11035_v22, %v14861_v47  ;;  %v4353_v51 = vpack.c.bf16 %v7775_v37, %v11309_v15 }
 0x2ea   : > { %14957 = vst [vmem:[#allocation419_spill] sm:$0xff] %v11323_v33  ;;  %v11337_v20 = vpop.f32.mrf.mxu1  ;;  %2608 = vmax.xlane.f32.xlu0 %v2607_v24  ;;  %7798 = vpow2.f32 %v3365_v59  ;;  %v11341_v50 = vpop.xlane.xlu0 %2302  ;;  %v4355_v1 = vpack.c.bf16 %v11331_v48, %v11315_v18  ;;  %v3411_v56 = vmul.f32 1.442695, %v2858_v34  ;;  %v3415_v62 = vmul.f32 1.442695, %v2860_v38  ;;  %v14964_v38 = vld [vmem:[#allocation160_spill] sm:$0xff] }
 0x2eb   : > { %v2622_v4 = vmax.f32 %v14958_v25, %v11323_v33  ;;  %14959 = vst [vmem:[#allocation420_spill] sm:$0xff] %v11337_v20  ;;  %v2615_v5 = vmax.f32 %v2614_v14, %v11306_v39  ;;  %14960 = vst [vmem:[#allocation421_spill] sm:$0xff] %v11341_v50  ;;  %v11343_v60 = vpop.f32.mrf.mxu0  ;;  %7800 = vpow2.f32 %v3381_v63  ;;  %v3393_v15 = vmul.f32 1.442695, %v2849_v44  ;;  %v7779_v59 = vpop.eup %7778  ;;  %v14965_v48 = vld [vmem:[#allocation176_spill] sm:$0xff] }
 0x2ec   : > { %14961 = vst [vmem:[#allocation422_spill] sm:$0xff] %v11343_v60  ;;  %v11347_v22 = vpop.f32.mrf.mxu1  ;;  %7802 = vpow2.f32 %v3395_v32  ;;  %v3409_v37 = vmul.f32 1.442695, %v2857_v54  ;;  %v2851_v18 = vsub.f32 %v9687_v61, %v11284_v17  ;;  %v2859_v63 = vsub.f32 %v9699_v3, %v11311_v57  ;;  %v7781_v34 = vpop.eup %7780 }
 0x2ed   : > { %14962 = vst [vmem:[#allocation423_spill] sm:$0xff] %v11347_v22  ;;  %v2623_v25 = vmax.f32 %v2622_v4, %v11343_v60  ;;  %v2616_v24 = vmax.f32 %v2615_v5, %v11317_v12  ;;  %v11351_v14 = vpop.f32.mrf.mxu0  ;;  %7804 = vpow2.f32 %v3411_v56  ;;  %v14966_v4 = vmax.f32 %v14964_v38, %v14965_v48  ;;  %v14968_v56 = vld [vmem:[#allocation27_spill] sm:$0xff]  ;;  %v7783_v60 = vpop.eup %7782 }
 0x2ee   : > { %14963 = vst [vmem:[#allocation424_spill] sm:$0xff] %v11351_v14  ;;  %v11361_v32 = vpop.f32.mrf.mxu1  ;;  %7806 = vpow2.f32 %v3399_v53  ;;  %v2866_v54 = vsub.f32 %v14968_v56, %v11341_v50  ;;  %v4354_v61 = vpack.c.bf16 %v7781_v34, %v7779_v59  ;;  %v7738_v12 = vld [vmem:[%s9445_s14 + $0x138] sm:$0xff]   ;;  %v11367_v3 = vpop.xlane.xlu1 %2311  ;;  %v3397_v38 = vmul.f32 1.442695, %v2851_v18  ;;  %v14974_v18 = vld [vmem:[#allocation28_spill] sm:$0xff] }
 0x2ef   : > { %v2631_v5 = vmax.f32 %v14966_v4, %v11351_v14  ;;  %14967 = vst [vmem:[#allocation160_spill] sm:$0xff] %v11361_v32  ;;  %2617 = vmax.xlane.f32.xlu1 %v2616_v24  ;;  %v2624_v44 = vmax.f32 %v2623_v25, %v11337_v20  ;;  %14969 = vst [vmem:[#allocation176_spill] sm:$0xff] %v11367_v3  ;;  %v11369_v13 = vpop.f32.mrf.mxu0  ;;  %7808 = vpow2.f32 %v3415_v62  ;;  %v3413_v4 = vmul.f32 1.442695, %v2859_v63  ;;  %v7785_v14 = vpop.eup %7784  ;;  %v14972_v24 = vld [vmem:[#allocation31_spill] sm:$0xff] }
 0x2f0   : > { %14970 = vst [vmem:[#allocation27_spill] sm:$0xff] %v11369_v13  ;;  %v11371_v16 = vpop.f32.mrf.mxu1  ;;  %7810 = vpow2.f32 %v3393_v15  ;;  %v2874_v59 = vsub.f32 %v14972_v24, %v11367_v3  ;;  %v7787_v34 = vpop.eup %7786  ;;  %5153 = vmatprep.mubr.bf16.mxu0 %v4354_v61  ;;  %v4356_v56 = vpack.c.bf16 %v7785_v14, %v7783_v60  ;;  %v7739_v20 = vld [vmem:[%s9445_s14 + $0x1b8] sm:$0xff]   ;;  %v3427_v62 = vmul.f32 1.442695, %v2866_v54  ;;  %v14976_v15 = vld [vmem:[#allocation180_spill] sm:$0xff] }
 0x2f1   : > { %14971 = vst [vmem:[#allocation425_spill] sm:$0xff] %v11371_v16  ;;  %v2632_v25 = vmax.f32 %v2631_v5, %v11369_v13  ;;  %v2625_v53 = vmax.f32 %v2624_v44, %v11347_v22  ;;  %v11378_v33 = vpop.f32.mrf.mxu0  ;;  %7812 = vpow2.f32 %v3409_v37  ;;  %v2868_v63 = vsub.f32 %v14974_v18, %v11341_v50  ;;  %v7789_v39 = vpop.eup %7788  ;;  %5154 = vmatmul.mubr.bf16.vlgmr.msra.gmra.mxu0 %v4353_v51  ;;  %v14975_v5 = vld [vmem:[#allocation391_spill] sm:$0xff]  ;;  %v7740_v51 = vld [vmem:[%s9445_s14 + $0x130] sm:$0xff]   ;;  %v14980_v18 = vld [vmem:[#allocation32_spill] sm:$0xff] }
 0x2f2   : > { %14973 = vst [vmem:[#allocation31_spill] sm:$0xff] %v11378_v33  ;;  %v14977_v44 = vmax.f32 %v14975_v5, %v14976_v15  ;;  %v11386_v24 = vpop.f32.mrf.mxu1  ;;  %7814 = vpow2.f32 %v3397_v38  ;;  %v3443_v14 = vmul.f32 1.442695, %v2874_v59  ;;  %v7791_v37 = vpop.eup %7790  ;;  %5442 = vmatprep.mubr.bf16.mxu1 %v4356_v56  ;;  %5700 = vmatpush1.bf16.msra.mxu0 %v7738_v12  ;;  %v4362_v61 = vpack.c.bf16 %v7789_v39, %v7787_v34  ;;  %v14983_v39 = vld [vmem:[#allocation25_spill] sm:$0xff] }
 0x2f3   : > { %14978 = vst [vmem:[#allocation28_spill] sm:$0xff] %v11386_v24  ;;  %2626 = vmax.xlane.f32.xlu0 %v2625_v53  ;;  %v2633_v60 = vmax.f32 %v2632_v25, %v11361_v32  ;;  %v11389_v54 = vpop.f32.mrf.mxu0  ;;  %7816 = vpow2.f32 %v3413_v4  ;;  %v2876_v5 = vsub.f32 %v14980_v18, %v11367_v3  ;;  %v7793_v13 = vpop.eup %7792  ;;  %5443 = vmatmul.mubr.bf16.vlgmr.msra.gmra.mxu1 %v4355_v1  ;;  %v14982_v59 = vmov 0   ;;  %v14985_v18 = vld [vmem:[#allocation29_spill] sm:$0xff]  ;;  %v14988_v32 = vld [vmem:[#allocation184_spill] sm:$0xff] }
 0x2f4   : > { %v2640_v22 = vmax.f32 %v14977_v44, %v11378_v33  ;;  %14979 = vst [vmem:[#allocation391_spill] sm:$0xff] %v11389_v54  ;;  %v3431_v44 = vmul.f32 1.442695, %v2868_v63  ;;  %v11394_v53 = vpop.f32.mrf.mxu1  ;;  %5701 = vmatprep.subr.bf16.mxu0 %v14982_v59  ;;  %7818 = vpow2.f32 %v3427_v62  ;;  %v2865_v12 = vsub.f32 %v14983_v39, %v11341_v50  ;;  %v7795_v4 = vpop.eup %7794  ;;  %5989 = vmatpush1.bf16.msra.mxu1 %v7739_v20  ;;  %v7741_v63 = vld [vmem:[%s9445_s14 + $0x1b0] sm:$0xff]   ;;  %v14987_v62 = vld [vmem:[#allocation393_spill] sm:$0xff] }
 0x2f5   : > { %14981 = vst [vmem:[#allocation180_spill] sm:$0xff] %v11394_v53  ;;  %v2634_v25 = vmax.f32 %v2633_v60, %v11371_v16  ;;  %5161 = vmatprep.mubr.bf16.mxu0 %v4362_v61  ;;  %v4364_v34 = vpack.c.bf16 %v7793_v13, %v7791_v37  ;;  %v11401_v56 = vpop.f32.mrf.mxu0  ;;  %7820 = vpow2.f32 %v3443_v14  ;;  %v3447_v1 = vmul.f32 1.442695, %v2876_v5  ;;  %v11406_v60 = vpop.xlane.xlu0 %2320  ;;  %5990 = vmatprep.subr.bf16.mxu1 %v14982_v59 }
 0x2f6   : > { %v2641_v38 = vmax.f32 %v2640_v22, %v11389_v54  ;;  %14984 = vst [vmem:[#allocation32_spill] sm:$0xff] %v11401_v56  ;;  %v2873_v22 = vsub.f32 %v14985_v18, %v11367_v3  ;;  %v7797_v54 = vpop.eup %7796  ;;  %14986 = vst [vmem:[#allocation25_spill] sm:$0xff] %v11406_v60  ;;  %v14989_v16 = vmax.f32 %v14987_v62, %v14988_v32  ;;  %v11412_v20 = vpop.f32.mrf.mxu1  ;;  %7822 = vpow2.f32 %v3431_v44  ;;  %v14993_v62 = vld [vmem:[#allocation26_spill] sm:$0xff] }
 0x2f7   : > { %14990 = vst [vmem:[#allocation29_spill] sm:$0xff] %v11412_v20  ;;  %2635 = vmax.xlane.f32.xlu1 %v2634_v25  ;;  %v3425_v14 = vmul.f32 1.442695, %v2865_v12  ;;  %v7799_v37 = vpop.eup %7798  ;;  %5450 = vmatprep.mubr.bf16.mxu1 %v4364_v34  ;;  %v4361_v61 = vpack.c.bf16 %v7797_v54, %v7795_v4  ;;  %v11416_v5 = vpop.xlane.xlu1 %2329  ;;  %7824 = vpow2.f32 %v3447_v1  ;;  %v7742_v25 = vld [vmem:[%s9445_s14 + $0x128] sm:$0xff]   ;;  %v14995_v54 = vld [vmem:[#allocation30_spill] sm:$0xff] }
 0x2f8   : > { %v2649_v39 = vmax.f32 %v14989_v16, %v11401_v56  ;;  %v2642_v13 = vmax.f32 %v2641_v38, %v11386_v24  ;;  %14991 = vst [vmem:[#allocation393_spill] sm:$0xff] %v11416_v5  ;;  %v11418_v18 = vpop.f32.mrf.mxu0  ;;  %5702 = vmatpush1.bf16.msra.mxu0 %v7740_v51  ;;  %v3441_v16 = vmul.f32 1.442695, %v2873_v22  ;;  %v2867_v56 = vsub.f32 %v14993_v62, %v11341_v50  ;;  %v7801_v38 = vpop.eup %7800  ;;  %v14997_v62 = vld [vmem:[#allocation35_spill] sm:$0xff] }
 0x2f9   : > { %14992 = vst [vmem:[#allocation184_spill] sm:$0xff] %v11418_v18  ;;  %v11423_v24 = vpop.f32.mrf.mxu1  ;;  %7826 = vpow2.f32 %v3425_v14  ;;  %v2875_v4 = vsub.f32 %v14995_v54, %v11367_v3  ;;  %5703 = vmatprep.subr.bf16.mxu0 %v14982_v59  ;;  %v7803_v51 = vpop.eup %7802  ;;  %v4363_v34 = vpack.c.bf16 %v7801_v38, %v7799_v37  ;;  %5991 = vmatpush1.bf16.msra.mxu1 %v7741_v63 }
 0x2fa   : > { %14994 = vst [vmem:[#allocation26_spill] sm:$0xff] %v11423_v24  ;;  %v2650_v44 = vmax.f32 %v2649_v39, %v11418_v18  ;;  %v2643_v12 = vmax.f32 %v2642_v13, %v11394_v53  ;;  %v11430_v1 = vpop.f32.mrf.mxu0  ;;  %7828 = vpow2.f32 %v3441_v16  ;;  %v3429_v22 = vmul.f32 1.442695, %v2867_v56  ;;  %v7805_v39 = vpop.eup %7804  ;;  %5162 = vmatmul.mubr.bf16.gmra.mxu0 %v4361_v61  ;;  %v15000_v56 = vld [vmem:[#allocation39_spill] sm:$0xff]  ;;  %v15002_v18 = vld [vmem:[#allocation36_spill] sm:$0xff]  ;;  %5992 = vmatprep.subr.bf16.mxu1 %v14982_v59 }
 0x2fb   : > { %14996 = vst [vmem:[#allocation30_spill] sm:$0xff] %v11430_v1  ;;  %v2882_v33 = vsub.f32 %v14997_v62, %v11406_v60  ;;  %v14998_v13 = vmax.f32 %v11089_v7, %v14892_v55  ;;  %v11439_v54 = vpop.f32.mrf.mxu1  ;;  %v3445_v63 = vmul.f32 1.442695, %v2875_v4  ;;  %v2890_v16 = vsub.f32 %v15000_v56, %v11416_v5  ;;  %v7807_v38 = vpop.eup %7806  ;;  %v7744_v7 = vld [vmem:[%s9445_s14 + $0x120] sm:$0xff]   ;;  %5451 = vmatmul.mubr.bf16.gmra.mxu1 %v4363_v34 }
 0x2fc   : > { %14999 = vst [vmem:[#allocation35_spill] sm:$0xff] %v11439_v54  ;;  %2644 = vmax.xlane.f32.xlu0 %v2643_v12  ;;  %v2651_v37 = vmax.f32 %v2650_v44, %v11412_v20  ;;  %v11444_v62 = vpop.f32.mrf.mxu0  ;;  %v4370_v53 = vpack.c.bf16 %v7805_v39, %v7803_v51  ;;  %7830 = vpow2.f32 %v3429_v22  ;;  %v2884_v58 = vsub.f32 %v15002_v18, %v11406_v60  ;;  %v7809_v12 = vpop.eup %7808  ;;  %v15005_v22 = vld [vmem:[#allocation40_spill] sm:$0xff] }
 0x2fd   : > { %v2658_v14 = vmax.f32 %v14998_v13, %v11430_v1  ;;  %15001 = vst [vmem:[#allocation39_spill] sm:$0xff] %v11444_v62  ;;  %v3459_v61 = vmul.f32 1.442695, %v2882_v33  ;;  %5704 = vmatpush1.bf16.msra.mxu0 %v7742_v25  ;;  %v11450_v44 = vpop.f32.mrf.mxu1  ;;  %7832 = vpow2.f32 %v3445_v63  ;;  %v3475_v51 = vmul.f32 1.442695, %v2890_v16  ;;  %v7811_v33 = vpop.eup %7810  ;;  %5993 = vmatpush1.bf16.msra.mxu1 %v7743_v40  ;;  %v7745_v56 = vld [vmem:[%s9445_s14 + $0x1a0] sm:$0xff]  }
 0x2fe   : > { %15003 = vst [vmem:[#allocation36_spill] sm:$0xff] %v11450_v44  ;;  %v2652_v13 = vmax.f32 %v2651_v37, %v11423_v24  ;;  %5705 = vmatprep.subr.bf16.mxu0 %v14982_v59  ;;  %5169 = vmatprep.mubr.bf16.mxu0 %v4370_v53  ;;  %v4372_v18 = vpack.c.bf16 %v7809_v12, %v7807_v38  ;;  %v11455_v25 = vpop.f32.mrf.mxu0  ;;  %v3463_v34 = vmul.f32 1.442695, %v2884_v58  ;;  %v7813_v1 = vpop.eup %7812  ;;  %v15008_v16 = vld [vmem:[#allocation33_spill] sm:$0xff] }
 0x2ff   : > { %v2659_v4 = vmax.f32 %v2658_v14, %v11444_v62  ;;  %15004 = vst [vmem:[#allocation426_spill] sm:$0xff] %v11455_v25  ;;  %7834 = vpow2.f32 %v3459_v61  ;;  %v2892_v39 = vsub.f32 %v15005_v22, %v11416_v5  ;;  %v15006_v14 = vmax.f32 %v11092_v27, %v14893_v36  ;;  %v11464_v63 = vpop.f32.mrf.mxu1  ;;  %5994 = vmatprep.subr.bf16.mxu1 %v14982_v59  ;;  %v7815_v58 = vpop.eup %7814  ;;  %v15010_v12 = vld [vmem:[#allocation37_spill] sm:$0xff] }
 0x300   : > { %15007 = vst [vmem:[#allocation40_spill] sm:$0xff] %v11464_v63  ;;  %2653 = vmax.xlane.f32.xlu1 %v2652_v13  ;;  %7836 = vpow2.f32 %v3475_v51  ;;  %v2881_v38 = vsub.f32 %v15008_v16, %v11406_v60  ;;  %5458 = vmatprep.mubr.bf16.mxu1 %v4372_v18  ;;  %v4369_v40 = vpack.c.bf16 %v7813_v1, %v7811_v33  ;;  %v11470_v61 = vpop.f32.mrf.mxu0  ;;  %v7746_v13 = vld [vmem:[%s9445_s14 + $0x118] sm:$0xff]   ;;  %v15013_v33 = vld [vmem:[#allocation34_spill] sm:$0xff] }
 0x301   : > { %v2667_v37 = vmax.f32 %v15006_v14, %v11455_v25  ;;  %v2660_v53 = vmax.f32 %v2659_v4, %v11439_v54  ;;  %15009 = vst [vmem:[#allocation33_spill] sm:$0xff] %v11470_v61  ;;  %7838 = vpow2.f32 %v3463_v34  ;;  %v3479_v27 = vmul.f32 1.442695, %v2892_v39  ;;  %5706 = vmatpush1.bf16.msra.mxu0 %v7744_v7  ;;  %v7817_v14 = vpop.eup %7816  ;;  %v11475_v4 = vpop.xlane.xlu0 %2338  ;;  %v15016_v25 = vld [vmem:[#allocation38_spill] sm:$0xff]  ;;  %5995 = vmatpush1.bf16.msra.mxu1 %v7745_v56 }
 0x302   : > { %v2889_v22 = vsub.f32 %v15010_v12, %v11416_v5  ;;  %15011 = vst [vmem:[#allocation37_spill] sm:$0xff] %v11475_v4  ;;  %v11477_v51 = vpop.f32.mrf.mxu1  ;;  %v3457_v1 = vmul.f32 1.442695, %v2881_v38  ;;  %v2883_v34 = vsub.f32 %v15013_v33, %v11406_v60  ;;  %5707 = vmatprep.subr.bf16.mxu0 %v14982_v59  ;;  %v7819_v39 = vpop.eup %7818  ;;  %v4371_v12 = vpack.c.bf16 %v7817_v14, %v7815_v58  ;;  %v15017_v38 = vld [vmem:[#allocation395_spill] sm:$0xff]  ;;  %v15018_v33 = vld [vmem:[#allocation196_spill] sm:$0xff]  ;;  %v15113_v60 = vld [vmem:[#allocation249_spill] sm:$0xff] }
 0x303   : > { %15012 = vst [vmem:[#allocation427_spill] sm:$0xff] %v11477_v51  ;;  %v2668_v16 = vmax.f32 %v2667_v37, %v11470_v61  ;;  %v2661_v18 = vmax.f32 %v2660_v53, %v11450_v44  ;;  %v11484_v7 = vpop.xlane.xlu1 %2347  ;;  %v11486_v62 = vpop.f32.mrf.mxu0  ;;  %7840 = vpow2.f32 %v3479_v27  ;;  %v2891_v54 = vsub.f32 %v15016_v25, %v11416_v5  ;;  %v7747_v37 = vld [vmem:[%s9445_s14 + $0x198] sm:$0xff]   ;;  %5170 = vmatmul.mubr.bf16.gmra.mxu0 %v4369_v40 }
 0x304   : > { %15014 = vst [vmem:[#allocation34_spill] sm:$0xff] %v11484_v7  ;;  %15015 = vst [vmem:[#allocation428_spill] sm:$0xff] %v11486_v62  ;;  %v3473_v24 = vmul.f32 1.442695, %v2889_v22  ;;  %v7821_v53 = vpop.eup %7820  ;;  %v15019_v44 = vmax.f32 %v15017_v38, %v15018_v33  ;;  %v11495_v58 = vpop.f32.mrf.mxu1  ;;  %7842 = vpow2.f32 %v3457_v1  ;;  %v3461_v27 = vmul.f32 1.442695, %v2883_v34  ;;  %5996 = vmatprep.subr.bf16.mxu1 %v14982_v59  ;;  %5459 = vmatmul.mubr.bf16.gmra.mxu1 %v4371_v12 }
 0x305   : > { %15020 = vst [vmem:[#allocation38_spill] sm:$0xff] %v11495_v58  ;;  %2662 = vmax.xlane.f32.xlu0 %v2661_v18  ;;  %v2669_v14 = vmax.f32 %v2668_v16, %v11464_v63  ;;  %v7823_v22 = vpop.eup %7822  ;;  %v11498_v20 = vpop.f32.mrf.mxu0  ;;  %v4378_v25 = vpack.c.bf16 %v7821_v53, %v7819_v39  ;;  %v3477_v56 = vmul.f32 1.442695, %v2891_v54  ;;  %v15022_v40 = vld [vmem:[#allocation43_spill] sm:$0xff]  ;;  %5708 = vmatpush1.bf16.msra.mxu0 %v7746_v13  ;;  %v15026_v12 = vld [vmem:[#allocation44_spill] sm:$0xff] }
 0x306   : > { %v2676_v61 = vmax.f32 %v15019_v44, %v11486_v62  ;;  %15021 = vst [vmem:[#allocation395_spill] sm:$0xff] %v11498_v20  ;;  %7844 = vpow2.f32 %v3473_v24  ;;  %v2898_v45 = vsub.f32 %v15022_v40, %v11475_v4  ;;  %v7748_v44 = vld [vmem:[%s9445_s14 + $0x110] sm:$0xff]   ;;  %v7825_v38 = vpop.eup %7824  ;;  %v11504_v18 = vpop.f32.mrf.mxu1  ;;  %v15024_v24 = vld [vmem:[#allocation47_spill] sm:$0xff]  ;;  %5709 = vmatprep.subr.bf16.mxu0 %v14982_v59  ;;  %v2900_v40 = vsub.f32 %v15026_v12, %v11475_v4 }
 0x307   : > { %15023 = vst [vmem:[#allocation196_spill] sm:$0xff] %v11504_v18  ;;  %v2670_v1 = vmax.f32 %v2669_v14, %v11477_v51  ;;  %7846 = vpow2.f32 %v3461_v27  ;;  %v2906_v54 = vsub.f32 %v15024_v24, %v11484_v7  ;;  %v7827_v34 = vpop.eup %7826  ;;  %5177 = vmatprep.mubr.bf16.mxu0 %v4378_v25  ;;  %v4380_v13 = vpack.c.bf16 %v7825_v38, %v7823_v22  ;;  %v11511_v39 = vpop.f32.mrf.mxu0  ;;  %v7750_v51 = vld [vmem:[%s9445_s14 + $0x108] sm:$0xff]  }
 0x308   : > { %v2677_v16 = vmax.f32 %v2676_v61, %v11498_v20  ;;  %15025 = vst [vmem:[#allocation43_spill] sm:$0xff] %v11511_v39  ;;  %7848 = vpow2.f32 %v3477_v56  ;;  %v3491_v53 = vmul.f32 1.442695, %v2898_v45  ;;  %5997 = vmatpush1.bf16.msra.mxu1 %v7747_v37  ;;  %v7749_v61 = vld [vmem:[%s9445_s14 + $0x190] sm:$0xff]   ;;  %v7829_v14 = vpop.eup %7828  ;;  %v15027_v27 = vmax.f32 %v11108_v28, %v14902_v26  ;;  %v11520_v20 = vpop.f32.mrf.mxu1  ;;  %v15029_v45 = vld [vmem:[#allocation48_spill] sm:$0xff]  ;;  %v15031_v28 = vld [vmem:[#allocation41_spill] sm:$0xff] }
 0x309   : > { %15028 = vst [vmem:[#allocation47_spill] sm:$0xff] %v11520_v20  ;;  %2671 = vmax.xlane.f32.xlu1 %v2670_v1  ;;  %v3507_v25 = vmul.f32 1.442695, %v2906_v54  ;;  %v2908_v56 = vsub.f32 %v15029_v45, %v11484_v7  ;;  %5998 = vmatprep.subr.bf16.mxu1 %v14982_v59  ;;  %v4377_v37 = vpack.c.bf16 %v7829_v14, %v7827_v34  ;;  %v11526_v38 = vpop.f32.mrf.mxu0  ;;  %v3495_v12 = vmul.f32 1.442695, %v2900_v40  ;;  %v7831_v1 = vpop.eup %7830 }
 0x30a   : > { %v2685_v24 = vmax.f32 %v15027_v27, %v11511_v39  ;;  %v2678_v22 = vmax.f32 %v2677_v16, %v11495_v58  ;;  %5466 = vmatprep.mubr.bf16.mxu1 %v4380_v13  ;;  %15030 = vst [vmem:[#allocation44_spill] sm:$0xff] %v11526_v38  ;;  %7850 = vpow2.f32 %v3491_v53  ;;  %v2897_v27 = vsub.f32 %v15031_v28, %v11475_v4  ;;  %v11531_v16 = vpop.f32.mrf.mxu1  ;;  %v7833_v34 = vpop.eup %7832  ;;  %v15036_v39 = vld [vmem:[#allocation42_spill] sm:$0xff] }
 0x30b   : > { %5710 = vmatpush1.bf16.msra.mxu0 %v7748_v44  ;;  %15032 = vst [vmem:[#allocation48_spill] sm:$0xff] %v11531_v16  ;;  %7852 = vpow2.f32 %v3507_v25  ;;  %v3511_v13 = vmul.f32 1.442695, %v2908_v56  ;;  %v11536_v53 = vpop.xlane.xlu0 %2356  ;;  %v11538_v40 = vpop.f32.mrf.mxu0  ;;  %v15035_v44 = vld [vmem:[#allocation45_spill] sm:$0xff]  ;;  %v2899_v58 = vsub.f32 %v15036_v39, %v11475_v4  ;;  %v4379_v25 = vpack.c.bf16 %v7833_v34, %v7831_v1  ;;  %v15043_v1 = vld [vmem:[#allocation46_spill] sm:$0xff] }
 0x30c   : > { %v2686_v54 = vmax.f32 %v2685_v24, %v11526_v38  ;;  %v2679_v45 = vmax.f32 %v2678_v22, %v11504_v18  ;;  %5711 = vmatprep.subr.bf16.mxu0 %v14982_v59  ;;  %15033 = vst [vmem:[#allocation41_spill] sm:$0xff] %v11536_v53  ;;  %15034 = vst [vmem:[#allocation429_spill] sm:$0xff] %v11538_v40  ;;  %7854 = vpow2.f32 %v3495_v12  ;;  %v3489_v28 = vmul.f32 1.442695, %v2897_v27  ;;  %v7751_v24 = vld [vmem:[%s9445_s14 + $0x188] sm:$0xff]   ;;  %v7835_v22 = vpop.eup %7834  ;;  %v11545_v56 = vpop.xlane.xlu1 %2365  ;;  %v15038_v18 = vld [vmem:[#allocation398_spill] sm:$0xff] }
 0x30d   : > { %v2905_v14 = vsub.f32 %v15035_v44, %v11484_v7  ;;  %5999 = vmatpush1.bf16.msra.mxu1 %v7749_v61  ;;  %5178 = vmatmul.mubr.bf16.gmra.mxu0 %v4377_v37  ;;  %15037 = vst [vmem:[#allocation45_spill] sm:$0xff] %v11545_v56  ;;  %v15039_v38 = vld [vmem:[#allocation204_spill] sm:$0xff]  ;;  %v11551_v63 = vpop.f32.mrf.mxu1  ;;  %7856 = vpow2.f32 %v3511_v13  ;;  %v7837_v39 = vpop.eup %7836  ;;  %v2907_v34 = vsub.f32 %v15043_v1, %v11484_v7  ;;  %v3493_v44 = vmul.f32 1.442695, %v2899_v58  ;;  %v15047_v58 = vld [vmem:[#allocation55_spill] sm:$0xff] }
 0x30e   : > { %v15040_v62 = vmax.f32 %v15038_v18, %v15039_v38  ;;  %15041 = vst [vmem:[#allocation42_spill] sm:$0xff] %v11551_v63  ;;  %2680 = vmax.xlane.f32.xlu0 %v2679_v45  ;;  %v2687_v27 = vmax.f32 %v2686_v54, %v11520_v20  ;;  %v11554_v61 = vpop.f32.mrf.mxu0  ;;  %7858 = vpow2.f32 %v3489_v28  ;;  %6000 = vmatprep.subr.bf16.mxu1 %v14982_v59  ;;  %v7839_v18 = vpop.eup %7838 }
 0x30f   : > { %15042 = vst [vmem:[#allocation398_spill] sm:$0xff] %v11554_v61  ;;  %v3505_v37 = vmul.f32 1.442695, %v2905_v14  ;;  %5712 = vmatpush1.bf16.msra.mxu0 %v7750_v51  ;;  %5467 = vmatmul.mubr.bf16.gmra.mxu1 %v4379_v25  ;;  %v11560_v45 = vpop.f32.mrf.mxu1  ;;  %v4386_v13 = vpack.c.bf16 %v7837_v39, %v7835_v22  ;;  %v15045_v14 = vld [vmem:[#allocation51_spill] sm:$0xff]  ;;  %v3509_v51 = vmul.f32 1.442695, %v2907_v34  ;;  %v2922_v1 = vsub.f32 %v15047_v58, %v11545_v56 }
 0x310   : > { %v2694_v12 = vmax.f32 %v15040_v62, %v11538_v40  ;;  %v7752_v62 = vld [vmem:[%s9445_s14 + $0x100] sm:$0xff]   ;;  %15044 = vst [vmem:[#allocation204_spill] sm:$0xff] %v11560_v45  ;;  %v2688_v40 = vmax.f32 %v2687_v27, %v11531_v16  ;;  %v2914_v28 = vsub.f32 %v15045_v14, %v11536_v53  ;;  %v11566_v20 = vpop.f32.mrf.mxu0  ;;  %v2916_v25 = vsub.f32 %v15048_v42, %v11536_v53  ;;  %v7841_v22 = vpop.eup %7840  ;;  %v15049_v27 = vld [vmem:[#allocation399_spill] sm:$0xff] }
 0x311   : > { %15046 = vst [vmem:[#allocation46_spill] sm:$0xff] %v11566_v20  ;;  %7860 = vpow2.f32 %v3505_v37  ;;  %6001 = vmatpush1.bf16.msra.mxu1 %v7751_v24  ;;  %5713 = vmatprep.subr.bf16.mxu0 %v14982_v59  ;;  %v15050_v39 = vld [vmem:[#allocation208_spill] sm:$0xff]  ;;  %v11578_v16 = vpop.f32.mrf.mxu1  ;;  %v7843_v58 = vpop.eup %7842  ;;  %v4388_v42 = vpack.c.bf16 %v7841_v22, %v7839_v18  ;;  %v3539_v7 = vmul.f32 1.442695, %v2922_v1  ;;  %v15058_v22 = vld [vmem:[#allocation49_spill] sm:$0xff] }
 0x312   : > { %v2695_v54 = vmax.f32 %v2694_v12, %v11554_v61  ;;  %v7753_v12 = vld [vmem:[%s9445_s14 + $0x180] sm:$0xff]   ;;  %5185 = vmatprep.mubr.bf16.mxu0 %v4386_v13  ;;  %v15051_v14 = vmax.f32 %v15049_v27, %v15050_v39  ;;  %15052 = vst [vmem:[#allocation51_spill] sm:$0xff] %v11578_v16  ;;  %2689 = vmax.xlane.f32.xlu1 %v2688_v40  ;;  %7862 = vpow2.f32 %v3493_v44  ;;  %v3523_v34 = vmul.f32 1.442695, %v2914_v28  ;;  %v11581_v24 = vpop.f32.mrf.mxu0  ;;  %v11591_v28 = vpop.xlane.xlu0 %2374 }
 0x313   : > { %15053 = vst [vmem:[#allocation55_spill] sm:$0xff] %v11581_v24  ;;  %7864 = vpow2.f32 %v3509_v51  ;;  %v15054_v13 = vld [vmem:[#allocation56_spill] sm:$0xff]  ;;  %5714 = vmatpush1.bf16.msra.mxu0 %v7752_v62  ;;  %6002 = vmatprep.subr.bf16.mxu1 %v14982_v59  ;;  %v7845_v27 = vpop.eup %7844  ;;  %15056 = vst [vmem:[#allocation399_spill] sm:$0xff] %v11591_v28 }
 0x314   : > { %v2703_v61 = vmax.f32 %v15051_v14, %v11566_v20  ;;  %v2696_v37 = vmax.f32 %v2695_v54, %v11551_v63  ;;  %v2924_v4 = vsub.f32 %v15054_v13, %v11545_v56  ;;  %v11586_v14 = vpop.f32.mrf.mxu1  ;;  %7866 = vpow2.f32 %v3523_v34  ;;  %5715 = vmatprep.subr.bf16.mxu0 %v14982_v59  ;;  %v7847_v18 = vpop.eup %7846  ;;  %5474 = vmatprep.mubr.bf16.mxu1 %v4388_v42  ;;  %v15069_v20 = vld [vmem:[#allocation63_spill] sm:$0xff] }
 0x315   : > { %15055 = vst [vmem:[#allocation52_spill] sm:$0xff] %v11586_v14  ;;  %v3527_v54 = vmul.f32 1.442695, %v2916_v25  ;;  %v4385_v51 = vpack.c.bf16 %v7845_v27, %v7843_v58  ;;  %v11593_v1 = vpop.f32.mrf.mxu0  ;;  %7868 = vpow2.f32 %v3539_v7  ;;  %v2913_v13 = vsub.f32 %v15058_v22, %v11536_v53  ;;  %6003 = vmatpush1.bf16.msra.mxu1 %v7753_v12 }
 0x316   : > { %v2704_v40 = vmax.f32 %v2703_v61, %v11581_v24  ;;  %v2697_v44 = vmax.f32 %v2696_v37, %v11560_v45  ;;  %15057 = vst [vmem:[#allocation208_spill] sm:$0xff] %v11593_v1  ;;  %v3543_v62 = vmul.f32 1.442695, %v2924_v4  ;;  %v7849_v61 = vpop.eup %7848  ;;  %v11597_v37 = vpop.xlane.xlu1 %2383  ;;  %v15060_v25 = vmax.f32 %v11139_v6, %v14915_v2  ;;  %v15062_v4 = vld [vmem:[#allocation53_spill] sm:$0xff]  ;;  %6004 = vmatprep.subr.bf16.mxu1 %v14982_v59  ;;  %v15064_v6 = vld [vmem:[#allocation50_spill] sm:$0xff]  ;;  %v7754_v45 = vld [vmem:[%s9445_s14 + $0x178] sm:$0xff]  }
 0x317   : > { %15059 = vst [vmem:[#allocation56_spill] sm:$0xff] %v11597_v37  ;;  %v11603_v42 = vpop.f32.mrf.mxu1  ;;  %7870 = vpow2.f32 %v3527_v54  ;;  %v2921_v58 = vsub.f32 %v15062_v4, %v11545_v56  ;;  %5186 = vmatmul.mubr.bf16.gmra.mxu0 %v4385_v51  ;;  %v4387_v12 = vpack.c.bf16 %v7849_v61, %v7847_v18  ;;  %v11609_v27 = vpop.f32.mrf.mxu0  ;;  %v3521_v22 = vmul.f32 1.442695, %v2913_v13  ;;  %v7755_v24 = vld [vmem:[%s9445_s14 + $0x1f8] sm:$0xff]   ;;  %v15066_v51 = vld [vmem:[#allocation54_spill] sm:$0xff] }
 0x318   : > { %v2712_v34 = vmax.f32 %v15060_v25, %v11593_v1  ;;  %15061 = vst [vmem:[#allocation49_spill] sm:$0xff] %v11603_v42  ;;  %2698 = vmax.xlane.f32.xlu0 %v2697_v44  ;;  %v2705_v7 = vmax.f32 %v2704_v40, %v11578_v16  ;;  %15063 = vst [vmem:[#allocation53_spill] sm:$0xff] %v11609_v27  ;;  %7872 = vpow2.f32 %v3543_v62  ;;  %v7851_v44 = vpop.eup %7850  ;;  %5716 = vmatpush2.bf16.msra.mxu0 %v7754_v45 }
 0x319   : > { %v2915_v25 = vsub.f32 %v15064_v6, %v11536_v53  ;;  %v11615_v1 = vpop.f32.mrf.mxu1  ;;  %v3537_v4 = vmul.f32 1.442695, %v2921_v58  ;;  %v2923_v18 = vsub.f32 %v15066_v51, %v11545_v56  ;;  %v7853_v61 = vpop.eup %7852  ;;  %5475 = vmatmul.mubr.bf16.gmra.mxu1 %v4387_v12  ;;  %7874 = vpow2.f32 %v3521_v22  ;;  %v15068_v6 = vld [vmem:[#allocation59_spill] sm:$0xff]  ;;  %5717 = vmatprep.subr.bf16.mxu0 %v14982_v59 }
 0x31a   : > { %15065 = vst [vmem:[#allocation50_spill] sm:$0xff] %v11615_v1  ;;  %v2713_v40 = vmax.f32 %v2712_v34, %v11609_v27  ;;  %v2706_v54 = vmax.f32 %v2705_v7, %v11586_v14  ;;  %v11621_v62 = vpop.f32.mrf.mxu0  ;;  %v2930_v16 = vsub.f32 %v15068_v6, %v11591_v28  ;;  %v2938_v63 = vsub.f32 %v15069_v20, %v11597_v37  ;;  %v7855_v34 = vpop.eup %7854  ;;  %v15112_v56 = vld [vmem:[#allocation251_spill] sm:$0xff] }
 0x31b   : > { %15067 = vst [vmem:[#allocation54_spill] sm:$0xff] %v11621_v62  ;;  %v3525_v13 = vmul.f32 1.442695, %v2915_v25  ;;  %v4394_v27 = vpack.c.bf16 %v7853_v61, %v7851_v44  ;;  %v15070_v7 = vmax.f32 %v11142_v23, %v14916_v30  ;;  %v11631_v51 = vpop.f32.mrf.mxu1  ;;  %7876 = vpow2.f32 %v3537_v4  ;;  %6005 = vmatpush2.bf16.msra.mxu1 %v7755_v24  ;;  %v7857_v22 = vpop.eup %7856 }
 0x31c   : > { %15071 = vst [vmem:[#allocation59_spill] sm:$0xff] %v11631_v51  ;;  %2707 = vmax.xlane.f32.xlu1 %v2706_v54  ;;  %v2714_v12 = vmax.f32 %v2713_v40, %v11603_v42  ;;  %v11634_v25 = vpop.f32.mrf.mxu0  ;;  %v3541_v20 = vmul.f32 1.442695, %v2923_v18  ;;  %v3555_v45 = vmul.f32 1.442695, %v2930_v16  ;;  %6006 = vmatprep.subr.bf16.mxu1 %v14982_v59  ;;  %v7859_v23 = vpop.eup %7858  ;;  %v4396_v44 = vpack.c.bf16 %v7857_v22, %v7855_v34  ;;  %v15074_v54 = vld [vmem:[#allocation60_spill] sm:$0xff] }
 0x31d   : > { %v2721_v58 = vmax.f32 %v15070_v7, %v11621_v62  ;;  %15072 = vst [vmem:[#allocation63_spill] sm:$0xff] %v11634_v25  ;;  %7878 = vpow2.f32 %v3525_v13  ;;  %v3571_v6 = vmul.f32 1.442695, %v2938_v63  ;;  %5193 = vmatprep.mubr.bf16.mxu0 %v4394_v27  ;;  %v11638_v61 = vpop.f32.mrf.mxu1  ;;  %v2932_v4 = vsub.f32 %v15074_v54, %v11591_v28  ;;  %v15076_v63 = vld [vmem:[#allocation64_spill] sm:$0xff]  ;;  %v15077_v18 = vld [vmem:[#allocation57_spill] sm:$0xff]  ;;  %v11659_v14 = vpop.xlane.xlu0 %2392 }
 0x31e   : > { %15073 = vst [vmem:[#allocation430_spill] sm:$0xff] %v11638_v61  ;;  %v2715_v24 = vmax.f32 %v2714_v12, %v11615_v1  ;;  %v11644_v13 = vpop.f32.mrf.mxu0  ;;  %7880 = vpow2.f32 %v3541_v20  ;;  %v2940_v16 = vsub.f32 %v15076_v63, %v11597_v37  ;;  %v2929_v7 = vsub.f32 %v15077_v18, %v11591_v28  ;;  %v15078_v27 = vld [vmem:[#allocation61_spill] sm:$0xff]  ;;  %v7861_v22 = vpop.eup %7860  ;;  %5482 = vmatprep.mubr.bf16.mxu1 %v4396_v44 }
 0x31f   : > { %v2722_v40 = vmax.f32 %v2721_v58, %v11634_v25  ;;  %15075 = vst [vmem:[#allocation60_spill] sm:$0xff] %v11644_v13  ;;  %v2937_v34 = vsub.f32 %v15078_v27, %v11597_v37  ;;  %v15079_v58 = vld [vmem:[#allocation220_spill] sm:$0xff]  ;;  %v11656_v54 = vpop.f32.mrf.mxu1  ;;  %7882 = vpow2.f32 %v3555_v45  ;;  %v3559_v63 = vmul.f32 1.442695, %v2932_v4  ;;  %v7863_v25 = vpop.eup %7862  ;;  %15082 = vst [vmem:[#allocation57_spill] sm:$0xff] %v11659_v14 }
 0x320   : > { %v15080_v12 = vmax.f32 %v11158_v0, %v15079_v58  ;;  %15081 = vst [vmem:[#allocation64_spill] sm:$0xff] %v11656_v54  ;;  %2716 = vmax.xlane.f32.xlu0 %v2715_v24  ;;  %v4393_v18 = vpack.c.bf16 %v7861_v22, %v7859_v23  ;;  %v11661_v62 = vpop.f32.mrf.mxu0  ;;  %7884 = vpow2.f32 %v3571_v6  ;;  %v3575_v44 = vmul.f32 1.442695, %v2940_v16  ;;  %v7865_v42 = vpop.eup %7864  ;;  %v15087_v6 = vld [vmem:[#allocation58_spill] sm:$0xff] }
 0x321   : > { %v2723_v20 = vmax.f32 %v2722_v40, %v11631_v51  ;;  %15083 = vst [vmem:[#allocation61_spill] sm:$0xff] %v11661_v62  ;;  %v3553_v27 = vmul.f32 1.442695, %v2929_v7  ;;  %v11663_v53 = vpop.f32.mrf.mxu1  ;;  %7886 = vpow2.f32 %v3559_v63  ;;  %v3569_v40 = vmul.f32 1.442695, %v2937_v34  ;;  %v7867_v45 = vpop.eup %7866  ;;  %v15088_v7 = vld [vmem:[#allocation62_spill] sm:$0xff] }
 0x322   : > { %v2730_v1 = vmax.f32 %v15080_v12, %v11644_v13  ;;  %15084 = vst [vmem:[#allocation220_spill] sm:$0xff] %v11663_v53  ;;  %5194 = vmatmul.mubr.bf16.gmra.mxu0 %v4393_v18  ;;  %v4395_v4 = vpack.c.bf16 %v7865_v42, %v7863_v25  ;;  %v11667_v12 = vpop.xlane.xlu1 %2401  ;;  %v11669_v23 = vpop.f32.mrf.mxu0  ;;  %7888 = vpow2.f32 %v3575_v44  ;;  %v2931_v16 = vsub.f32 %v15087_v6, %v11591_v28  ;;  %v15092_v25 = vld [vmem:[#allocation67_spill] sm:$0xff] }
 0x323   : > { %v2724_v24 = vmax.f32 %v2723_v20, %v11638_v61  ;;  %15085 = vst [vmem:[#allocation431_spill] sm:$0xff] %v11667_v12  ;;  %15086 = vst [vmem:[#allocation432_spill] sm:$0xff] %v11669_v23  ;;  %v2939_v22 = vsub.f32 %v15088_v7, %v11597_v37  ;;  %v7869_v13 = vpop.eup %7868  ;;  %v11679_v63 = vpop.f32.mrf.mxu1  ;;  %7890 = vpow2.f32 %v3553_v27  ;;  %v2946_v18 = vsub.f32 %v15092_v25, %v11659_v14  ;;  %v15095_v27 = vld [vmem:[#allocation71_spill] sm:$0xff] }
 0x324   : > { %v2731_v0 = vmax.f32 %v2730_v1, %v11661_v62  ;;  %v15089_v1 = vld [vmem:[#allocation224_spill] sm:$0xff]  ;;  %15091 = vst [vmem:[#allocation58_spill] sm:$0xff] %v11679_v63  ;;  %v7871_v44 = vpop.eup %7870  ;;  %5483 = vmatmul.mubr.bf16.gmra.mxu1 %v4395_v4  ;;  %v4402_v6 = vpack.c.bf16 %v7869_v13, %v7867_v45  ;;  %v11684_v62 = vpop.f32.mrf.mxu0  ;;  %7892 = vpow2.f32 %v3569_v40  ;;  %v3557_v7 = vmul.f32 1.442695, %v2931_v16  ;;  %v15110_v37 = vld [vmem:[#allocation247_spill] sm:$0xff] }
 0x325   : > { %v15090_v20 = vmax.f32 %v11165_v8, %v15089_v1  ;;  %2725 = vmax.xlane.f32.xlu1 %v2724_v24  ;;  %15093 = vst [vmem:[#allocation62_spill] sm:$0xff] %v11684_v62  ;;  %v3573_v61 = vmul.f32 1.442695, %v2939_v22  ;;  %v7873_v51 = vpop.eup %7872  ;;  %v11686_v8 = vpop.f32.mrf.mxu1  ;;  %v15097_v13 = vld [vmem:[#allocation68_spill] sm:$0xff] }
 0x326   : > { %v2732_v42 = vmax.f32 %v2731_v0, %v11656_v54  ;;  %15094 = vst [vmem:[#allocation224_spill] sm:$0xff] %v11686_v8  ;;  %v2954_v0 = vsub.f32 %v15095_v27, %v11667_v12  ;;  %5201 = vmatprep.mubr.bf16.mxu0 %v4402_v6  ;;  %v4404_v25 = vpack.c.bf16 %v7873_v51, %v7871_v44  ;;  %v11692_v4 = vpop.f32.mrf.mxu0  ;;  %7894 = vpow2.f32 %v3557_v7  ;;  %v15098_v45 = vld [vmem:[#allocation72_spill] sm:$0xff]  ;;  %v7875_v22 = vpop.eup %7874 }
 0x327   : > { %v2739_v34 = vmax.f32 %v15090_v20, %v11669_v23  ;;  %v3587_v23 = vmul.f32 1.442695, %v2946_v18  ;;  %15096 = vst [vmem:[#allocation67_spill] sm:$0xff] %v11692_v4  ;;  %v2948_v40 = vsub.f32 %v15097_v13, %v11659_v14  ;;  %v2956_v16 = vsub.f32 %v15098_v45, %v11667_v12  ;;  %v11702_v54 = vpop.f32.mrf.mxu1  ;;  %v11705_v6 = vpop.xlane.xlu1 %2419  ;;  %v15104_v45 = vld [vmem:[#allocation65_spill] sm:$0xff] }
 0x328   : > { %v2733_v24 = vmax.f32 %v2732_v42, %v11663_v53  ;;  %15102 = vst [vmem:[#allocation71_spill] sm:$0xff] %v11702_v54  ;;  %7896 = vpow2.f32 %v3573_v61  ;;  %v3603_v18 = vmul.f32 1.442695, %v2954_v0  ;;  %v7877_v44 = vpop.eup %7876  ;;  %5490 = vmatprep.mubr.bf16.mxu1 %v4404_v25  ;;  %v11707_v7 = vpop.f32.mrf.mxu0  ;;  %v15107_v0 = vld [vmem:[#allocation241_spill] sm:$0xff] }
 0x329   : > { %v2740_v20 = vmax.f32 %v2739_v34, %v11684_v62  ;;  %v15099_v34 = vld [vmem:[#allocation402_spill] sm:$0xff]  ;;  %v15100_v62 = vld [vmem:[#allocation228_spill] sm:$0xff]  ;;  %15103 = vst [vmem:[#allocation68_spill] sm:$0xff] %v11707_v7  ;;  %7898 = vpow2.f32 %v3587_v23  ;;  %v3591_v27 = vmul.f32 1.442695, %v2948_v40  ;;  %v11711_v28 = vpop.f32.mrf.mxu1  ;;  %v15109_v23 = vld [vmem:[#allocation69_spill] sm:$0xff] }
 0x32a   : > { %v15101_v42 = vmax.f32 %v15099_v34, %v15100_v62  ;;  %2734 = vmax.xlane.f32.xlu0 %v2733_v24  ;;  %v3607_v13 = vmul.f32 1.442695, %v2956_v16  ;;  %v2945_v34 = vsub.f32 %v15104_v45, %v11659_v14  ;;  %15105 = vst [vmem:[#allocation72_spill] sm:$0xff] %v11711_v28  ;;  %7900 = vpow2.f32 %v3603_v18  ;;  %v15106_v24 = vld [vmem:[#allocation243_spill] sm:$0xff] }
 0x32b   : > { %v2741_v51 = vmax.f32 %v2740_v20, %v11679_v63  ;;  %v2781_v25 = vmax.f32 %v15107_v0, %v15106_v24  ;;  %v11717_v63 = vpop.f32.mrf.mxu0  ;;  %7902 = vpow2.f32 %v3591_v27  ;;  %v2953_v40 = vsub.f32 %v15109_v23, %v11667_v12  ;;  %v7757_v24 = vld [vmem:[%s9445_s14 + $0x1f0] sm:$0xff]  }
 0x32c   : > { %v2748_v53 = vmax.f32 %v15101_v42, %v11692_v4  ;;  %v7879_v42 = vpop.eup %7878  ;;  %v4401_v4 = vpack.c.bf16 %v7877_v44, %v7875_v22  ;;  %15108 = vst [vmem:[#allocation402_spill] sm:$0xff] %v11717_v63  ;;  %v3585_v16 = vmul.f32 1.442695, %v2945_v34  ;;  %v15111_v22 = vld [vmem:[#allocation245_spill] sm:$0xff]  ;;  %7904 = vpow2.f32 %v3607_v13  ;;  %v15119_v13 = vld [vmem:[#allocation238_spill] sm:$0xff]  ;;  %6007 = vmatpush2.bf16.msra.mxu1 %v7757_v24 }
 0x32d   : > { %v2742_v20 = vmax.f32 %v2741_v51, %v11686_v8  ;;  %v7881_v45 = vpop.eup %7880  ;;  %v2790_v44 = vmax.f32 %v15111_v22, %v15110_v37  ;;  %v11725_v51 = vpop.f32.mrf.mxu1  ;;  %v15115_v34 = vmax.f32 %v11177_v21, %v14925_v19  ;;  %v3601_v50 = vmul.f32 1.442695, %v2953_v40  ;;  %v15122_v21 = vld [vmem:[#allocation253_spill] sm:$0xff]  ;;  %6008 = vmatprep.subr.bf16.mxu1 %v14982_v59 }
 0x32e   : > { %v2749_v61 = vmax.f32 %v2748_v53, %v11707_v7  ;;  %v2799_v53 = vmax.f32 %v15113_v60, %v15112_v56  ;;  %5202 = vmatmul.mubr.bf16.gmra.mxu0 %v4401_v4  ;;  %15114 = vst [vmem:[#allocation228_spill] sm:$0xff] %v11725_v51  ;;  %v7883_v7 = vpop.eup %7882  ;;  %v4403_v27 = vpack.c.bf16 %v7881_v45, %v7879_v42  ;;  %v11732_v8 = vpop.xlane.xlu1 %2437  ;;  %v15117_v4 = vld [vmem:[#allocation66_spill] sm:$0xff]  ;;  %7906 = vpow2.f32 %v3585_v16 }
 0x32f   : > { %2743 = vmax.xlane.f32.xlu1 %v2742_v20  ;;  %v2757_v23 = vmax.f32 %v15115_v34, %v11717_v63  ;;  %v11734_v5 = vpop.f32.mrf.mxu0  ;;  %v2947_v3 = vsub.f32 %v15117_v4, %v11659_v14  ;;  %v7885_v17 = vpop.eup %7884  ;;  %v15118_v20 = vld [vmem:[#allocation236_spill] sm:$0xff]  ;;  %v15120_v42 = vmax.f32 %v14936_v31, %v14935_v43  ;;  %v15124_v4 = vld [vmem:[#allocation85_spill] sm:$0xff]  ;;  %7908 = vpow2.f32 %v3601_v50  ;;  %v15128_v16 = vld [vmem:[#allocation86_spill] sm:$0xff] }
 0x330   : > { %v2750_v18 = vmax.f32 %v2749_v61, %v11702_v54  ;;  %15116 = vst [vmem:[#allocation65_spill] sm:$0xff] %v11734_v5  ;;  %v2765_v61 = vmax.f32 %v11217_v52, %v15118_v20  ;;  %v15121_v54 = vld [vmem:[#allocation255_spill] sm:$0xff]  ;;  %v11746_v63 = vpop.f32.mrf.mxu1  ;;  %v7887_v57 = vpop.eup %7886  ;;  %5491 = vmatmul.mubr.bf16.gmra.mxu1 %v4403_v27  ;;  %v4410_v40 = vpack.c.bf16 %v7885_v17, %v7883_v7  ;;  %v15130_v56 = vld [vmem:[#allocation250_spill] sm:$0xff] }
 0x331   : > { %v2773_v45 = vmax.f32 %v15120_v42, %v15119_v13  ;;  %v2808_v34 = vmax.f32 %v15122_v21, %v15121_v54  ;;  %15123 = vst [vmem:[#allocation241_spill] sm:$0xff] %v11746_v63  ;;  %v2985_v14 = vsub.f32 %v15124_v4, %v11732_v8  ;;  %v11750_v29 = vpop.f32.mrf.mxu0  ;;  %v7889_v42 = vpop.eup %7888  ;;  %v2782_v60 = vmax.f32 %v2781_v25, %v15126_v46  ;;  %v15127_v21 = vld [vmem:[#allocation246_spill] sm:$0xff] }
 0x332   : > { %15125 = vst [vmem:[#allocation69_spill] sm:$0xff] %v11750_v29  ;;  %v2751_v52 = vmax.f32 %v2750_v18, %v11711_v28  ;;  %v11755_v54 = vmax.f32 %v2790_v44, %v15127_v21  ;;  %v2987_v27 = vsub.f32 %v15128_v16, %v11732_v8  ;;  %v2766_v17 = vmax.f32 %v2765_v61, %v11750_v29  ;;  %v11760_v7 = vpop.f32.mrf.mxu1  ;;  %v7891_v4 = vpop.eup %7890  ;;  %v7756_v28 = vld [vmem:[%s9445_s14 + $0x170] sm:$0xff]   ;;  %v15132_v16 = vld [vmem:[#allocation240_spill] sm:$0xff] }
 0x333   : > { %15129 = vst [vmem:[#allocation66_spill] sm:$0xff] %v11760_v7  ;;  %v11763_v37 = vmax.f32 %v2799_v53, %v15130_v56  ;;  %5209 = vmatprep.mubr.bf16.mxu0 %v4410_v40  ;;  %v4412_v50 = vpack.c.bf16 %v7889_v42, %v7887_v57  ;;  %v2758_v18 = vmax.f32 %v2757_v23, %v11734_v5  ;;  %v11766_v25 = vpop.f32.mrf.mxu0  ;;  %v3589_v44 = vmul.f32 1.442695, %v2947_v3  ;;  %v7893_v20 = vpop.eup %7892  ;;  %v15134_v29 = vld [vmem:[#allocation70_spill] sm:$0xff] }
 0x334   : > { %2752 = vmax.xlane.f32.xlu0 %v2751_v52  ;;  %15131 = vst [vmem:[#allocation238_spill] sm:$0xff] %v11766_v25  ;;  %v2774_v43 = vmax.f32 %v2773_v45, %v15132_v16  ;;  %v11771_v61 = vpop.f32.mrf.mxu1  ;;  %v2955_v21 = vsub.f32 %v15134_v29, %v11667_v12  ;;  %v15135_v53 = vld [vmem:[#allocation254_spill] sm:$0xff]  ;;  %v11778_v57 = vpop.xlane.xlu0 %2410  ;;  %v4409_v23 = vpack.c.bf16 %v7893_v20, %v7891_v4  ;;  %v3665_v40 = vmul.f32 1.442695, %v2985_v14  ;;  %v15137_v45 = vld [vmem:[#allocation244_spill] sm:$0xff] }
 0x335   : > { %15133 = vst [vmem:[#allocation85_spill] sm:$0xff] %v11771_v61  ;;  %v11776_v56 = vmax.f32 %v2808_v34, %v15135_v53  ;;  %5498 = vmatprep.mubr.bf16.mxu1 %v4412_v50  ;;  %v2767_v3 = vmax.f32 %v2766_v17, %v11766_v25  ;;  %v11781_v52 = vpop.f32.mrf.mxu0  ;;  %5718 = vmatpush2.bf16.msra.mxu0 %v7756_v28  ;;  %v7895_v42 = vpop.eup %7894  ;;  %v15138_v16 = vld [vmem:[#allocation248_spill] sm:$0xff]  ;;  %v3669_v29 = vmul.f32 1.442695, %v2987_v27  ;;  %7910 = vpow2.f32 %v3589_v44  ;;  %v15143_v25 = vld [vmem:[#allocation75_spill] sm:$0xff] }
 0x336   : > { %15136 = vst [vmem:[#allocation242_spill] sm:$0xff] %v11781_v52  ;;  %v2783_v5 = vmax.f32 %v2782_v60, %v15137_v45  ;;  %v2792_v22 = vmax.f32 %v11755_v54, %v15138_v16  ;;  %v11786_v12 = vpop.f32.mrf.mxu1  ;;  %5719 = vmatprep.subr.bf16.mxu0 %v14982_v59  ;;  %v7897_v34 = vpop.eup %7896  ;;  %v15140_v20 = vld [vmem:[#allocation252_spill] sm:$0xff]  ;;  %5210 = vmatmul.mubr.bf16.gmra.mxu0 %v4409_v23  ;;  %v3605_v4 = vmul.f32 1.442695, %v2955_v21  ;;  %7912 = vpow2.f32 %v3665_v40 }
 0x337   : > { %15139 = vst [vmem:[#allocation86_spill] sm:$0xff] %v11786_v12  ;;  %v2775_v17 = vmax.f32 %v2774_v43, %v11781_v52  ;;  %v2759_v28 = vmax.f32 %v2758_v18, %v11725_v51  ;;  %v11793_v60 = vpop.f32.mrf.mxu0  ;;  %v7899_v54 = vpop.eup %7898  ;;  %v4411_v27 = vpack.c.bf16 %v7897_v34, %v7895_v42  ;;  %v2768_v50 = vmax.f32 %v2767_v3, %v11760_v7  ;;  %v15144_v53 = vld [vmem:[#allocation256_spill] sm:$0xff]  ;;  %v15146_v52 = vld [vmem:[#allocation79_spill] sm:$0xff] }
 0x338   : > { %15141 = vst [vmem:[#allocation70_spill] sm:$0xff] %v11793_v60  ;;  %v11796_v24 = vpop.f32.mrf.mxu1  ;;  %v2962_v14 = vsub.f32 %v15143_v25, %v11778_v57  ;;  %v7901_v23 = vpop.eup %7900  ;;  %v2970_v42 = vsub.f32 %v15146_v52, %v11705_v6  ;;  %7914 = vpow2.f32 %v3669_v29  ;;  %v15149_v52 = vld [vmem:[#allocation76_spill] sm:$0xff] }
 0x339   : > { %15142 = vst [vmem:[#allocation244_spill] sm:$0xff] %v11796_v24  ;;  %v2760_v18 = vmax.f32 %v2759_v28, %v11746_v63  ;;  %v11804_v44 = vpop.f32.mrf.mxu0  ;;  %v7903_v21 = vpop.eup %7902  ;;  %5499 = vmatmul.mubr.bf16.gmra.mxu1 %v4411_v27  ;;  %v4418_v34 = vpack.c.bf16 %v7901_v23, %v7899_v54  ;;  %v2769_v25 = vmax.f32 %v2768_v50, %v11771_v61  ;;  %7916 = vpow2.f32 %v3605_v4  ;;  %v15151_v27 = vld [vmem:[#allocation80_spill] sm:$0xff] }
 0x33a   : > { %15145 = vst [vmem:[#allocation252_spill] sm:$0xff] %v11804_v44  ;;  %v2784_v3 = vmax.f32 %v2783_v5, %v11804_v44  ;;  %v11809_v7 = vpop.f32.mrf.mxu1  ;;  %v7905_v51 = vpop.eup %7904  ;;  %v2776_v40 = vmax.f32 %v2775_v17, %v11793_v60  ;;  %v3619_v43 = vmul.f32 1.442695, %v2962_v14  ;;  %v3635_v63 = vmul.f32 1.442695, %v2970_v42  ;;  %v15153_v14 = vld [vmem:[#allocation73_spill] sm:$0xff] }
 0x33b   : > { %15147 = vst [vmem:[#allocation75_spill] sm:$0xff] %v11809_v7  ;;  %2761 = vmax.xlane.f32.xlu1 %v2760_v18  ;;  %v11813_v28 = vpop.f32.mrf.mxu0  ;;  %v2964_v16 = vsub.f32 %v15149_v52, %v11778_v57  ;;  %5217 = vmatprep.mubr.bf16.mxu0 %v4418_v34  ;;  %v4420_v29 = vpack.c.bf16 %v7905_v51, %v7903_v21  ;;  %v7907_v23 = vpop.eup %7906  ;;  %v15154_v34 = vld [vmem:[#allocation77_spill] sm:$0xff] }
 0x33c   : > { %15148 = vst [vmem:[#allocation256_spill] sm:$0xff] %v11813_v28  ;;  %2770 = vmax.xlane.f32.xlu0 %v2769_v25  ;;  %v11817_v5 = vpop.f32.mrf.mxu1  ;;  %v2785_v54 = vmax.f32 %v2784_v3, %v11813_v28  ;;  %v2972_v50 = vsub.f32 %v15151_v27, %v11705_v6  ;;  %7918 = vpow2.f32 %v3619_v43  ;;  %v2961_v42 = vsub.f32 %v15153_v14, %v11778_v57  ;;  %v7909_v4 = vpop.eup %7908 }
 0x33d   : > { %15150 = vst [vmem:[#allocation79_spill] sm:$0xff] %v11817_v5  ;;  %v3623_v17 = vmul.f32 1.442695, %v2964_v16  ;;  %v11822_v18 = vpop.f32.mrf.mxu0  ;;  %v2969_v51 = vsub.f32 %v15154_v34, %v11705_v6  ;;  %v11828_v21 = vpop.xlane.xlu0 %2428  ;;  %5506 = vmatprep.mubr.bf16.mxu1 %v4420_v29  ;;  %7920 = vpow2.f32 %v3635_v63  ;;  %v15157_v16 = vld [vmem:[#allocation74_spill] sm:$0xff]  ;;  %v4417_v27 = vpack.c.bf16 %v7909_v4, %v7907_v23 }
 0x33e   : > { %15152 = vst [vmem:[#allocation76_spill] sm:$0xff] %v11822_v18  ;;  %15155 = vst [vmem:[#allocation80_spill] sm:$0xff] %v11828_v21  ;;  %v3639_v3 = vmul.f32 1.442695, %v2972_v50  ;;  %v2793_v25 = vmax.f32 %v2792_v22, %v11822_v18  ;;  %v11831_v52 = vpop.f32.mrf.mxu1  ;;  %v2963_v43 = vsub.f32 %v15157_v16, %v11778_v57  ;;  %v3617_v28 = vmul.f32 1.442695, %v2961_v42 }
 0x33f   : > { %15156 = vst [vmem:[#allocation73_spill] sm:$0xff] %v11831_v52  ;;  %7922 = vpow2.f32 %v3623_v17  ;;  %v3633_v14 = vmul.f32 1.442695, %v2969_v51  ;;  %v11835_v44 = vpop.f32.mrf.mxu0  ;;  %v15159_v34 = vld [vmem:[#allocation78_spill] sm:$0xff]  ;;  %v2777_v63 = vmax.f32 %v2776_v40, %v11786_v12  ;;  %5218 = vmatmul.mubr.bf16.gmra.mxu0 %v4417_v27  ;;  %v2786_v23 = vmax.f32 %v2785_v54, %v11809_v7  ;;  %v15162_v17 = vld [vmem:[#allocation83_spill] sm:$0xff]  ;;  %v11875_v7 = vpop.xlane.xlu1 %2455 }
 0x340   : > { %15158 = vst [vmem:[#allocation77_spill] sm:$0xff] %v11835_v44  ;;  %7924 = vpow2.f32 %v3639_v3  ;;  %v2971_v61 = vsub.f32 %v15159_v34, %v11705_v6  ;;  %v3621_v29 = vmul.f32 1.442695, %v2963_v43  ;;  %v11840_v50 = vpop.f32.mrf.mxu1  ;;  %v2794_v22 = vmax.f32 %v2793_v25, %v11835_v44  ;;  %v15165_v43 = vld [vmem:[#allocation87_spill] sm:$0xff] }
 0x341   : > { %15160 = vst [vmem:[#allocation74_spill] sm:$0xff] %v11840_v50  ;;  %7926 = vpow2.f32 %v3617_v28  ;;  %v11843_v16 = vpop.f32.mrf.mxu0  ;;  %v2978_v42 = vsub.f32 %v15162_v17, %v11828_v21  ;;  %v2778_v4 = vmax.f32 %v2777_v63, %v11796_v24  ;;  %v15163_v40 = vmax.f32 %v11763_v37, %v15140_v20  ;;  %v15167_v63 = vld [vmem:[#allocation84_spill] sm:$0xff] }
 0x342   : > { %15161 = vst [vmem:[#allocation78_spill] sm:$0xff] %v11843_v16  ;;  %7928 = vpow2.f32 %v3633_v14  ;;  %v3637_v51 = vmul.f32 1.442695, %v2971_v61  ;;  %v2787_v28 = vmax.f32 %v2786_v23, %v11817_v5  ;;  %v2986_v54 = vsub.f32 %v15165_v43, %v11732_v8  ;;  %v7911_v34 = vpop.eup %7910  ;;  %v11858_v61 = vpop.f32.mrf.mxu1 }
 0x343   : > { %v2802_v3 = vmax.f32 %v15163_v40, %v11843_v16  ;;  %7930 = vpow2.f32 %v3621_v29  ;;  %v11854_v25 = vpop.f32.mrf.mxu0  ;;  %v3651_v27 = vmul.f32 1.442695, %v2978_v42  ;;  %2779 = vmax.xlane.f32.xlu1 %v2778_v4  ;;  %15166 = vst [vmem:[#allocation87_spill] sm:$0xff] %v11858_v61  ;;  %v2980_v37 = vsub.f32 %v15167_v63, %v11828_v21  ;;  %v15168_v29 = vld [vmem:[#allocation88_spill] sm:$0xff]  ;;  %v11865_v23 = vpop.xlane.xlu0 %2446  ;;  %v15170_v42 = vld [vmem:[#allocation81_spill] sm:$0xff]  ;;  %v15171_v4 = vld [vmem:[#allocation82_spill] sm:$0xff] }
 0x344   : > { %15164 = vst [vmem:[#allocation83_spill] sm:$0xff] %v11854_v25  ;;  %7932 = vpow2.f32 %v3637_v51  ;;  %v2988_v17 = vsub.f32 %v15168_v29, %v11732_v8  ;;  %2788 = vmax.xlane.f32.xlu0 %v2787_v28  ;;  %v3667_v40 = vmul.f32 1.442695, %v2986_v54  ;;  %v2977_v51 = vsub.f32 %v15170_v42, %v11828_v21  ;;  %15172 = vst [vmem:[#allocation88_spill] sm:$0xff] %v11875_v7  ;;  %v11885_v18 = vpop.f32.mrf.mxu1 }
 0x345   : > { %v2803_v14 = vmax.f32 %v2802_v3, %v11854_v25  ;;  %7934 = vpow2.f32 %v3651_v27  ;;  %v11867_v43 = vpop.f32.mrf.mxu0  ;;  %v2979_v16 = vsub.f32 %v15171_v4, %v11828_v21  ;;  %v11873_v3 = vpop.eup %7912  ;;  %v3655_v63 = vmul.f32 1.442695, %v2980_v37  ;;  %15174 = vst [vmem:[#allocation81_spill] sm:$0xff] %v11885_v18 }
 0x346   : > { %15169 = vst [vmem:[#allocation84_spill] sm:$0xff] %v11867_v43  ;;  %v3671_v25 = vmul.f32 1.442695, %v2988_v17  ;;  %v15173_v28 = vmax.f32 %v11776_v56, %v15144_v53  ;;  %v2795_v54 = vmax.f32 %v2794_v22, %v11831_v52  ;;  %v11882_v29 = vpop.eup %7914  ;;  %7936 = vpow2.f32 %v3667_v40  ;;  %v15176_v56 = vld [vmem:[#allocation91_spill] sm:$0xff]  ;;  %v11902_v24 = vpop.f32.mrf.mxu1 }
 0x347   : > { %v3649_v42 = vmul.f32 1.442695, %v2977_v51  ;;  %v3653_v5 = vmul.f32 1.442695, %v2979_v16  ;;  %v2804_v4 = vmax.f32 %v2803_v14, %v11858_v61  ;;  %7938 = vpow2.f32 %v3655_v63  ;;  %v11888_v17 = vpop.f32.mrf.mxu0  ;;  %v7917_v22 = vpop.eup %7916  ;;  %v15177_v16 = vld [vmem:[#allocation95_spill] sm:$0xff]  ;;  %v15178_v61 = vld [vmem:[#allocation89_spill] sm:$0xff] }
 0x348   : > { %v2811_v27 = vmax.f32 %v15173_v28, %v11867_v43  ;;  %v2796_v37 = vmax.f32 %v2795_v54, %v11840_v50  ;;  %15175 = vst [vmem:[#allocation82_spill] sm:$0xff] %v11888_v17  ;;  %v2994_v28 = vsub.f32 %v15176_v56, %v11865_v23  ;;  %7940 = vpow2.f32 %v3671_v25  ;;  %v7758_v54 = vld [vmem:[%s9445_s14 + $0x168] sm:$0xff]   ;;  %v15179_v56 = vld [vmem:[#allocation90_spill] sm:$0xff]  ;;  %15180 = vst [vmem:[#allocation91_spill] sm:$0xff] %v11902_v24 }
 0x349   : > { %v2805_v40 = vmax.f32 %v2804_v4, %v11885_v18  ;;  %v3002_v51 = vsub.f32 %v15177_v16, %v11875_v7  ;;  %v7919_v14 = vpop.eup %7918  ;;  %v2993_v43 = vsub.f32 %v15178_v61, %v11865_v23  ;;  %v4419_v52 = vpack.c.bf16 %v7917_v22, %v7911_v34  ;;  %v7759_v50 = vld [vmem:[%s9445_s14 + $0x1e8] sm:$0xff]   ;;  %v15181_v34 = vld [vmem:[#allocation92_spill] sm:$0xff]  ;;  %5720 = vmatpush2.bf16.msra.mxu0 %v7758_v54  ;;  %v11919_v54 = vpop.f32.mrf.mxu1 }
 0x34a   : > { %7942 = vpow2.f32 %v3649_v42  ;;  %2797 = vmax.xlane.f32.xlu1 %v2796_v37  ;;  %v3683_v63 = vmul.f32 1.442695, %v2994_v28  ;;  %v7921_v44 = vpop.eup %7920  ;;  %v2995_v12 = vsub.f32 %v15179_v56, %v11865_v23  ;;  %v2812_v25 = vmax.f32 %v2811_v27, %v11888_v17  ;;  %v11906_v37 = vpop.xlane.xlu0 %2464  ;;  %v15183_v28 = vld [vmem:[#allocation96_spill] sm:$0xff]  ;;  %6009 = vmatpush2.bf16.msra.mxu1 %v7759_v50  ;;  %15187 = vst [vmem:[#allocation90_spill] sm:$0xff] %v11919_v54 }
 0x34b   : > { %7944 = vpow2.f32 %v3653_v5  ;;  %2806 = vmax.xlane.f32.xlu0 %v2805_v40  ;;  %v3699_v4 = vmul.f32 1.442695, %v3002_v51  ;;  %5507 = vmatmul.mubr.bf16.gmra.mxu1 %v4419_v52  ;;  %v4426_v18 = vpack.c.bf16 %v7921_v44, %v7919_v14  ;;  %v2996_v61 = vsub.f32 %v15181_v34, %v11865_v23  ;;  %15182 = vst [vmem:[#allocation95_spill] sm:$0xff] %v11906_v37  ;;  %v11910_v51 = vpop.xlane.xlu1 %2473  ;;  %v15185_v44 = vld [vmem:[#allocation93_spill] sm:$0xff]  ;;  %v15186_v34 = vld [vmem:[#allocation94_spill] sm:$0xff] }
 0x34c   : > { %v7923_v16 = vpop.eup %7922  ;;  %v3004_v22 = vsub.f32 %v15183_v28, %v11875_v7  ;;  %v3681_v27 = vmul.f32 1.442695, %v2993_v43  ;;  %15184 = vst [vmem:[#allocation89_spill] sm:$0xff] %v11910_v51  ;;  %7946 = vpow2.f32 %v3683_v63  ;;  %v3001_v52 = vsub.f32 %v15185_v44, %v11875_v7  ;;  %5721 = vmatprep.subr.bf16.mxu0 %v14982_v59  ;;  %6010 = vmatprep.subr.bf16.mxu1 %v14982_v59 }
 0x34d   : > { %v7925_v42 = vpop.eup %7924  ;;  %5225 = vmatprep.mubr.bf16.mxu0 %v4426_v18  ;;  %v3685_v56 = vmul.f32 1.442695, %v2995_v12  ;;  %7948 = vpow2.f32 %v3699_v4  ;;  %v3003_v28 = vsub.f32 %v15186_v34, %v11875_v7  ;;  %v2813_v50 = vmax.f32 %v2812_v25, %v11902_v24  ;;  %v15189_v4 = vld [vmem:[#allocation103_spill] sm:$0xff] }
 0x34e   : > { %v7927_v5 = vpop.eup %7926  ;;  %v4428_v40 = vpack.c.bf16 %v7925_v42, %v7923_v16  ;;  %v3687_v63 = vmul.f32 1.442695, %v2996_v61  ;;  %v15188_v16 = vld [vmem:[#allocation99_spill] sm:$0xff]  ;;  %v3703_v17 = vmul.f32 1.442695, %v3004_v22  ;;  %v3018_v34 = vsub.f32 %v15189_v4, %v11910_v51  ;;  %v15192_v4 = vld [vmem:[#allocation97_spill] sm:$0xff] }
 0x34f   : > { %v7929_v14 = vpop.eup %7928  ;;  %v3010_v42 = vsub.f32 %v15188_v16, %v11906_v37  ;;  %v2814_v12 = vmax.f32 %v2813_v50, %v11919_v54  ;;  %7950 = vpow2.f32 %v3681_v27  ;;  %v3697_v24 = vmul.f32 1.442695, %v3001_v52 }
 0x350   : > { %v7931_v18 = vpop.eup %7930  ;;  %5514 = vmatprep.mubr.bf16.mxu1 %v4428_v40  ;;  %v4425_v43 = vpack.c.bf16 %v7929_v14, %v7927_v5  ;;  %v15190_v5 = vld [vmem:[#allocation100_spill] sm:$0xff]  ;;  %7952 = vpow2.f32 %v3685_v56  ;;  %v3701_v61 = vmul.f32 1.442695, %v3003_v28  ;;  %v3009_v54 = vsub.f32 %v15192_v4, %v11906_v37 }
 0x351   : > { %v7933_v44 = vpop.eup %7932  ;;  %v3012_v40 = vsub.f32 %v15190_v5, %v11906_v37  ;;  %2815 = vmax.xlane.f32.xlu1 %v2814_v12  ;;  %v15191_v14 = vld [vmem:[#allocation104_spill] sm:$0xff]  ;;  %7954 = vpow2.f32 %v3687_v63  ;;  %v3715_v50 = vmul.f32 1.442695, %v3010_v42  ;;  %v3731_v52 = vmul.f32 1.442695, %v3018_v34  ;;  %v15194_v12 = vld [vmem:[#allocation98_spill] sm:$0xff] }
 0x352   : > { %v7935_v60 = vpop.eup %7934  ;;  %5226 = vmatmul.mubr.bf16.gmra.mxu0 %v4425_v43  ;;  %v4427_v25 = vpack.c.bf16 %v7933_v44, %v7931_v18  ;;  %v3020_v16 = vsub.f32 %v15191_v14, %v11910_v51  ;;  %7956 = vpow2.f32 %v3703_v17  ;;  %v15193_v18 = vld [vmem:[#allocation101_spill] sm:$0xff]  ;;  %v3011_v5 = vsub.f32 %v15194_v12, %v11906_v37  ;;  %v15201_v12 = vld [vmem:[#allocation112_spill] sm:$0xff] }
 0x353   : > { %v7937_v22 = vpop.eup %7936  ;;  %v3017_v44 = vsub.f32 %v15193_v18, %v11910_v51  ;;  %7958 = vpow2.f32 %v3697_v24  ;;  %v3719_v28 = vmul.f32 1.442695, %v3012_v40  ;;  %v3713_v34 = vmul.f32 1.442695, %v3009_v54  ;;  %v7761_v37 = vld [vmem:[%s9445_s14 + $0x1e0] sm:$0xff]  }
 0x354   : > { %5515 = vmatmul.mubr.bf16.gmra.mxu1 %v4427_v25  ;;  %v7939_v27 = vpop.eup %7938  ;;  %v4434_v43 = vpack.c.bf16 %v7937_v22, %v7935_v60  ;;  %7960 = vpow2.f32 %v3701_v61  ;;  %v3735_v42 = vmul.f32 1.442695, %v3020_v16  ;;  %v15195_v25 = vld [vmem:[#allocation102_spill] sm:$0xff]  ;;  %v11939_v22 = vpop.xlane.xlu0 %2482  ;;  %v3717_v61 = vmul.f32 1.442695, %v3011_v5 }
 0x355   : > { %v7941_v56 = vpop.eup %7940  ;;  %v3019_v4 = vsub.f32 %v15195_v25, %v11910_v51  ;;  %7962 = vpow2.f32 %v3715_v50  ;;  %15196 = vst [vmem:[#allocation92_spill] sm:$0xff] %v11939_v22  ;;  %v3729_v40 = vmul.f32 1.442695, %v3017_v44  ;;  %v15200_v44 = vld [vmem:[#allocation108_spill] sm:$0xff]  ;;  %6011 = vmatpush2.bf16.msra.mxu1 %v7761_v37 }
 0x356   : > { %5233 = vmatprep.mubr.bf16.mxu0 %v4434_v43  ;;  %v4436_v63 = vpack.c.bf16 %v7941_v56, %v7939_v27  ;;  %7964 = vpow2.f32 %v3731_v52  ;;  %v11942_v43 = vpop.xlane.xlu1 %2491  ;;  %v3028_v56 = vsub.f32 %v15200_v44, %v11939_v22  ;;  %6012 = vmatprep.subr.bf16.mxu1 %v14982_v59 }
 0x357   : > { %v7943_v14 = vpop.eup %7942  ;;  %15197 = vst [vmem:[#allocation96_spill] sm:$0xff] %v11942_v43  ;;  %7966 = vpow2.f32 %v3719_v28  ;;  %v3733_v27 = vmul.f32 1.442695, %v3019_v4  ;;  %v3036_v5 = vsub.f32 %v15201_v12, %v11942_v43 }
 0x358   : > { %v7945_v60 = vpop.eup %7944  ;;  %v4433_v17 = vpack.c.bf16 %v11873_v3, %v7943_v14  ;;  %5522 = vmatprep.mubr.bf16.mxu1 %v4436_v63  ;;  %7968 = vpow2.f32 %v3735_v42  ;;  %v15198_v3 = vld [vmem:[#allocation107_spill] sm:$0xff]  ;;  %v15202_v42 = vld [vmem:[#allocation105_spill] sm:$0xff] }
 0x359   : > { %v4435_v24 = vpack.c.bf16 %v11882_v29, %v7945_v60  ;;  %v7947_v16 = vpop.eup %7946  ;;  %7970 = vpow2.f32 %v3713_v34  ;;  %v3026_v54 = vsub.f32 %v15198_v3, %v11939_v22  ;;  %v15199_v29 = vld [vmem:[#allocation111_spill] sm:$0xff]  ;;  %v3025_v25 = vsub.f32 %v15202_v42, %v11939_v22  ;;  %v7760_v42 = vld [vmem:[%s9445_s14 + $0x160] sm:$0xff]  }
 0x35a   : > { %5234 = vmatmul.mubr.bf16.gmra.mxu0 %v4433_v17  ;;  %v7949_v18 = vpop.eup %7948  ;;  %7972 = vpow2.f32 %v3729_v40  ;;  %v3034_v52 = vsub.f32 %v15199_v29, %v11942_v43  ;;  %v15203_v17 = vld [vmem:[#allocation109_spill] sm:$0xff]  ;;  %v3751_v40 = vmul.f32 1.442695, %v3028_v56 }
 0x35b   : > { %v4442_v50 = vpack.c.bf16 %v7949_v18, %v7947_v16  ;;  %7974 = vpow2.f32 %v3717_v61  ;;  %v3747_v63 = vmul.f32 1.442695, %v3026_v54  ;;  %v3033_v34 = vsub.f32 %v15203_v17, %v11942_v43  ;;  %v15204_v61 = vld [vmem:[#allocation106_spill] sm:$0xff]  ;;  %v11958_v18 = vpop.xlane.xlu0 %2500  ;;  %5722 = vmatpush2.bf16.msra.mxu0 %v7760_v42  ;;  %v15212_v42 = vld [vmem:[#allocation120_spill] sm:$0xff] }
 0x35c   : > { %5523 = vmatmul.mubr.bf16.gmra.mxu1 %v4435_v24  ;;  %v7951_v28 = vpop.eup %7950  ;;  %7976 = vpow2.f32 %v3733_v27  ;;  %v3763_v60 = vmul.f32 1.442695, %v3034_v52  ;;  %v3027_v16 = vsub.f32 %v15204_v61, %v11939_v22  ;;  %v3767_v54 = vmul.f32 1.442695, %v3036_v5  ;;  %v15206_v22 = vld [vmem:[#allocation113_spill] sm:$0xff]  ;;  %v11966_v5 = vpop.xlane.xlu1 %2509  ;;  %5723 = vmatprep.subr.bf16.mxu0 %v14982_v59 }
 0x35d   : > { %5241 = vmatprep.mubr.bf16.mxu0 %v4442_v50  ;;  %v7953_v14 = vpop.eup %7952  ;;  %v15205_v50 = vld [vmem:[#allocation110_spill] sm:$0xff]  ;;  %7978 = vpow2.f32 %v3747_v63  ;;  %v3745_v52 = vmul.f32 1.442695, %v3025_v25  ;;  %v3761_v51 = vmul.f32 1.442695, %v3033_v34  ;;  %v3041_v7 = vsub.f32 %v15206_v22, %v11958_v18  ;;  %15207 = vst [vmem:[#allocation93_spill] sm:$0xff] %v11966_v5 }
 0x35e   : > { %v7955_v4 = vpop.eup %7954  ;;  %v3035_v29 = vsub.f32 %v15205_v50, %v11942_v43  ;;  %7980 = vpow2.f32 %v3763_v60  ;;  %v15208_v63 = vld [vmem:[#allocation114_spill] sm:$0xff]  ;;  %v15209_v34 = vld [vmem:[#allocation115_spill] sm:$0xff]  ;;  %v15211_v50 = vld [vmem:[#allocation116_spill] sm:$0xff] }
 0x35f   : > { %v7957_v24 = vpop.eup %7956  ;;  %7982 = vpow2.f32 %v3751_v40  ;;  %v3043_v25 = vsub.f32 %v15208_v63, %v11958_v18  ;;  %v3042_v22 = vsub.f32 %v15209_v34, %v11958_v18 }
 0x360   : > { %v7959_v27 = vpop.eup %7958  ;;  %v4444_v3 = vpack.c.bf16 %v7957_v24, %v7955_v4  ;;  %v3749_v4 = vmul.f32 1.442695, %v3027_v16  ;;  %7984 = vpow2.f32 %v3767_v54  ;;  %v15210_v16 = vld [vmem:[#allocation119_spill] sm:$0xff]  ;;  %v3777_v54 = vmul.f32 1.442695, %v3041_v7  ;;  %v15214_v7 = vld [vmem:[#allocation118_spill] sm:$0xff]  ;;  %v11986_v34 = vpop.xlane.xlu1 %2527 }
 0x361   : > { %v7961_v44 = vpop.eup %7960  ;;  %v4441_v12 = vpack.c.bf16 %v7959_v27, %v7951_v28  ;;  %7986 = vpow2.f32 %v3745_v52  ;;  %v3050_v27 = vsub.f32 %v15210_v16, %v11966_v5  ;;  %15216 = vst [vmem:[#allocation99_spill] sm:$0xff] %v11986_v34 }
 0x362   : > { %v7963_v17 = vpop.eup %7962  ;;  %5530 = vmatprep.mubr.bf16.mxu1 %v4444_v3  ;;  %v4443_v56 = vpack.c.bf16 %v7961_v44, %v7953_v14  ;;  %v3765_v14 = vmul.f32 1.442695, %v3035_v29  ;;  %7988 = vpow2.f32 %v3761_v51  ;;  %v3044_v29 = vsub.f32 %v15211_v50, %v11958_v18  ;;  %v15213_v51 = vld [vmem:[#allocation117_spill] sm:$0xff] }
 0x363   : > { %v7965_v61 = vpop.eup %7964  ;;  %5242 = vmatmul.mubr.bf16.gmra.mxu0 %v4441_v12  ;;  %7990 = vpow2.f32 %v3749_v4  ;;  %v3781_v12 = vmul.f32 1.442695, %v3043_v25  ;;  %v3051_v4 = vsub.f32 %v15214_v7, %v11966_v5  ;;  %v11984_v25 = vpop.xlane.xlu0 %2518 }
 0x364   : > { %v7967_v28 = vpop.eup %7966  ;;  %5531 = vmatmul.mubr.bf16.gmra.mxu1 %v4443_v56  ;;  %v4450_v24 = vpack.c.bf16 %v7965_v61, %v7963_v17  ;;  %7992 = vpow2.f32 %v3765_v14  ;;  %v3052_v17 = vsub.f32 %v15212_v42, %v11966_v5  ;;  %v3779_v61 = vmul.f32 1.442695, %v3042_v22  ;;  %15215 = vst [vmem:[#allocation94_spill] sm:$0xff] %v11984_v25 }
 0x365   : > { %v7969_v60 = vpop.eup %7968  ;;  %7994 = vpow2.f32 %v3777_v54 }
 0x366   : > { %v7971_v40 = vpop.eup %7970  ;;  %5249 = vmatprep.mubr.bf16.mxu0 %v4450_v24  ;;  %v4452_v37 = vpack.c.bf16 %v7969_v60, %v7967_v28  ;;  %v3049_v28 = vsub.f32 %v15213_v51, %v11966_v5  ;;  %v3795_v24 = vmul.f32 1.442695, %v3050_v27  ;;  %v3783_v60 = vmul.f32 1.442695, %v3044_v29  ;;  %v15217_v27 = vld [vmem:[#allocation123_spill] sm:$0xff] }
 0x367   : > { %v7973_v3 = vpop.eup %7972  ;;  %7996 = vpow2.f32 %v3781_v12  ;;  %v3799_v14 = vmul.f32 1.442695, %v3052_v17  ;;  %v15218_v29 = vld [vmem:[#allocation127_spill] sm:$0xff] }
 0x368   : > { %v7975_v44 = vpop.eup %7974  ;;  %5538 = vmatprep.mubr.bf16.mxu1 %v4452_v37  ;;  %v4449_v52 = vpack.c.bf16 %v7973_v3, %v7971_v40  ;;  %7998 = vpow2.f32 %v3779_v61  ;;  %v3793_v22 = vmul.f32 1.442695, %v3049_v28  ;;  %v3797_v37 = vmul.f32 1.442695, %v3051_v4  ;;  %v15220_v61 = vld [vmem:[#allocation128_spill] sm:$0xff] }
 0x369   : > { %v7977_v56 = vpop.eup %7976  ;;  %8000 = vpow2.f32 %v3795_v24  ;;  %v3058_v3 = vsub.f32 %v15217_v27, %v11984_v25  ;;  %v3068_v51 = vsub.f32 %v15220_v61, %v11986_v34  ;;  %v15221_v24 = vld [vmem:[#allocation121_spill] sm:$0xff] }
 0x36a   : > { %v4451_v63 = vpack.c.bf16 %v7977_v56, %v7975_v44  ;;  %v7979_v40 = vpop.eup %7978  ;;  %8002 = vpow2.f32 %v3783_v60  ;;  %v3066_v44 = vsub.f32 %v15218_v29, %v11986_v34  ;;  %v3057_v7 = vsub.f32 %v15221_v24, %v11984_v25  ;;  %v15225_v61 = vld [vmem:[#allocation129_spill] sm:$0xff]  ;;  %v12008_v24 = vpop.xlane.xlu1 %2545 }
 0x36b   : > { %5250 = vmatmul.mubr.bf16.gmra.mxu0 %v4449_v52  ;;  %v7981_v16 = vpop.eup %7980  ;;  %8004 = vpow2.f32 %v3799_v14  ;;  %v15219_v52 = vld [vmem:[#allocation124_spill] sm:$0xff]  ;;  %v3831_v29 = vmul.f32 1.442695, %v3068_v51  ;;  %15226 = vst [vmem:[#allocation103_spill] sm:$0xff] %v12008_v24 }
 0x36c   : > { %5539 = vmatmul.mubr.bf16.gmra.mxu1 %v4451_v63  ;;  %v7983_v54 = vpop.eup %7982  ;;  %v4458_v50 = vpack.c.bf16 %v7981_v16, %v7979_v40  ;;  %8006 = vpow2.f32 %v3793_v22  ;;  %v3060_v42 = vsub.f32 %v15219_v52, %v11984_v25  ;;  %v3811_v63 = vmul.f32 1.442695, %v3058_v3  ;;  %v15222_v22 = vld [vmem:[#allocation125_spill] sm:$0xff] }
 0x36d   : > { %v7985_v12 = vpop.eup %7984  ;;  %8008 = vpow2.f32 %v3797_v37  ;;  %v3827_v14 = vmul.f32 1.442695, %v3066_v44  ;;  %v3065_v40 = vsub.f32 %v15222_v22, %v11986_v34  ;;  %v3809_v44 = vmul.f32 1.442695, %v3057_v7  ;;  %v7762_v22 = vld [vmem:[%s9445_s14 + $0x158] sm:$0xff]  }
 0x36e   : > { %v7987_v17 = vpop.eup %7986  ;;  %5257 = vmatprep.mubr.bf16.mxu0 %v4458_v50  ;;  %v4460_v56 = vpack.c.bf16 %v7985_v12, %v7983_v54  ;;  %v3815_v27 = vmul.f32 1.442695, %v3060_v42  ;;  %v15223_v54 = vld [vmem:[#allocation122_spill] sm:$0xff]  ;;  %v12002_v50 = vpop.xlane.xlu0 %2536  ;;  %8010 = vpow2.f32 %v3811_v63  ;;  %5724 = vmatpush2.bf16.msra.mxu0 %v7762_v22 }
 0x36f   : > { %v7989_v28 = vpop.eup %7988  ;;  %v3059_v37 = vsub.f32 %v15223_v54, %v11984_v25  ;;  %v15224_v12 = vld [vmem:[#allocation126_spill] sm:$0xff]  ;;  %8012 = vpow2.f32 %v3827_v14  ;;  %v15228_v14 = vld [vmem:[#allocation131_spill] sm:$0xff]  ;;  %5725 = vmatprep.subr.bf16.mxu0 %v14982_v59  ;;  %v15232_v25 = vld [vmem:[#allocation133_spill] sm:$0xff] }
 0x370   : > { %v7991_v4 = vpop.eup %7990  ;;  %5546 = vmatprep.mubr.bf16.mxu1 %v4460_v56  ;;  %v4457_v60 = vpack.c.bf16 %v7989_v28, %v7987_v17  ;;  %v3067_v52 = vsub.f32 %v15224_v12, %v11986_v34  ;;  %v3825_v56 = vmul.f32 1.442695, %v3065_v40  ;;  %v3073_v28 = vsub.f32 %v15225_v61, %v12002_v50 }
 0x371   : > { %v7993_v16 = vpop.eup %7992  ;;  %8014 = vpow2.f32 %v3815_v27  ;;  %v3074_v40 = vsub.f32 %v15228_v14, %v12002_v50  ;;  %v15229_v27 = vld [vmem:[#allocation135_spill] sm:$0xff]  ;;  %v3081_v34 = vsub.f32 %v15232_v25, %v12008_v24 }
 0x372   : > { %v4459_v3 = vpack.c.bf16 %v7993_v16, %v7991_v4  ;;  %v7995_v17 = vpop.eup %7994  ;;  %v7763_v4 = vld [vmem:[%s9445_s14 + $0x1d8] sm:$0xff]   ;;  %v15227_v16 = vld [vmem:[#allocation130_spill] sm:$0xff]  ;;  %8016 = vpow2.f32 %v3831_v29  ;;  %v3829_v63 = vmul.f32 1.442695, %v3067_v52  ;;  %v3841_v29 = vmul.f32 1.442695, %v3073_v28  ;;  %v12026_v5 = vpop.xlane.xlu0 %2554 }
 0x373   : > { %5258 = vmatmul.mubr.bf16.gmra.mxu0 %v4457_v60  ;;  %v3813_v60 = vmul.f32 1.442695, %v3059_v37  ;;  %v3075_v54 = vsub.f32 %v15227_v16, %v12002_v50  ;;  %8018 = vpow2.f32 %v3809_v44  ;;  %6013 = vmatpush2.bf16.msra.mxu1 %v7763_v4  ;;  %v3082_v37 = vsub.f32 %v15229_v27, %v12008_v24  ;;  %v15230_v52 = vld [vmem:[#allocation132_spill] sm:$0xff] }
 0x374   : > { %5547 = vmatmul.mubr.bf16.gmra.mxu1 %v4459_v3  ;;  %v7997_v42 = vpop.eup %7996  ;;  %8020 = vpow2.f32 %v3825_v56  ;;  %6014 = vmatprep.subr.bf16.mxu1 %v14982_v59  ;;  %v3076_v44 = vsub.f32 %v15230_v52, %v12002_v50  ;;  %v15231_v56 = vld [vmem:[#allocation136_spill] sm:$0xff]  ;;  %v3843_v27 = vmul.f32 1.442695, %v3074_v40  ;;  %v15233_v52 = vld [vmem:[#allocation134_spill] sm:$0xff]  ;;  %v3857_v25 = vmul.f32 1.442695, %v3081_v34 }
 0x375   : > { %v7999_v51 = vpop.eup %7998  ;;  %8022 = vpow2.f32 %v3813_v60  ;;  %v3845_v14 = vmul.f32 1.442695, %v3075_v54  ;;  %v3084_v4 = vsub.f32 %v15231_v56, %v12008_v24  ;;  %v3859_v60 = vmul.f32 1.442695, %v3082_v37  ;;  %v15239_v34 = vld [vmem:[#allocation140_spill] sm:$0xff] }
 0x376   : > { %v8001_v7 = vpop.eup %8000  ;;  %8024 = vpow2.f32 %v3829_v63  ;;  %v3083_v54 = vsub.f32 %v15233_v52, %v12008_v24  ;;  %v3847_v63 = vmul.f32 1.442695, %v3076_v44 }
 0x377   : > { %v8003_v3 = vpop.eup %8002  ;;  %v4466_v12 = vpack.c.bf16 %v8001_v7, %v7999_v51  ;;  %8026 = vpow2.f32 %v3841_v29  ;;  %v15237_v29 = vld [vmem:[#allocation139_spill] sm:$0xff] }
 0x378   : > { %v8005_v61 = vpop.eup %8004  ;;  %8028 = vpow2.f32 %v3845_v14  ;;  %v3090_v44 = vsub.f32 %v15237_v29, %v12026_v5 }
 0x379   : > { %v8007_v16 = vpop.eup %8006  ;;  %5265 = vmatprep.mubr.bf16.mxu0 %v4466_v12  ;;  %v4468_v22 = vpack.c.bf16 %v8005_v61, %v8003_v3  ;;  %v3863_v3 = vmul.f32 1.442695, %v3084_v4  ;;  %v12032_v12 = vpop.xlane.xlu1 %2563  ;;  %8030 = vpow2.f32 %v3843_v27  ;;  %v15238_v4 = vld [vmem:[#allocation143_spill] sm:$0xff] }
 0x37a   : > { %v8009_v51 = vpop.eup %8008  ;;  %v4465_v7 = vpack.c.bf16 %v8007_v16, %v7995_v17  ;;  %v15234_v17 = vld [vmem:[#allocation137_spill] sm:$0xff]  ;;  %15235 = vst [vmem:[#allocation100_spill] sm:$0xff] %v12032_v12  ;;  %8032 = vpow2.f32 %v3859_v60  ;;  %v3861_v16 = vmul.f32 1.442695, %v3083_v54 }
 0x37b   : > { %5554 = vmatprep.mubr.bf16.mxu1 %v4468_v22  ;;  %v4467_v28 = vpack.c.bf16 %v8009_v51, %v7997_v42  ;;  %v3089_v40 = vsub.f32 %v15234_v17, %v12026_v5  ;;  %v8011_v61 = vpop.eup %8010  ;;  %v15236_v42 = vld [vmem:[#allocation138_spill] sm:$0xff]  ;;  %8034 = vpow2.f32 %v3847_v63  ;;  %v3098_v51 = vsub.f32 %v15238_v4, %v12032_v12  ;;  %v15240_v63 = vld [vmem:[#allocation144_spill] sm:$0xff] }
 0x37c   : > { %5266 = vmatmul.mubr.bf16.gmra.mxu0 %v4465_v7  ;;  %v3091_v37 = vsub.f32 %v15236_v42, %v12026_v5  ;;  %v8013_v22 = vpop.eup %8012  ;;  %8036 = vpow2.f32 %v3863_v3  ;;  %v3100_v17 = vsub.f32 %v15240_v63, %v12032_v12  ;;  %v15241_v3 = vld [vmem:[#allocation141_spill] sm:$0xff]  ;;  %v15242_v4 = vld [vmem:[#allocation142_spill] sm:$0xff] }
 0x37d   : > { %5555 = vmatmul.mubr.bf16.gmra.mxu1 %v4467_v28  ;;  %v4474_v56 = vpack.c.bf16 %v8013_v22, %v8011_v61  ;;  %v3873_v27 = vmul.f32 1.442695, %v3089_v40  ;;  %8038 = vpow2.f32 %v3857_v25  ;;  %v3092_v28 = vsub.f32 %v15239_v34, %v12026_v5  ;;  %v7764_v63 = vld [vmem:[%s9445_s14 + $0x150] sm:$0xff]  }
 0x37e   : > { %v8015_v14 = vpop.eup %8014  ;;  %v3877_v60 = vmul.f32 1.442695, %v3091_v37  ;;  %8040 = vpow2.f32 %v3861_v16  ;;  %v3875_v61 = vmul.f32 1.442695, %v3090_v44  ;;  %v3097_v22 = vsub.f32 %v15241_v3, %v12032_v12  ;;  %5726 = vmatpush2.bf16.msra.mxu0 %v7764_v63 }
 0x37f   : > { %v8017_v7 = vpop.eup %8016  ;;  %5273 = vmatprep.mubr.bf16.mxu0 %v4474_v56  ;;  %v3891_v25 = vmul.f32 1.442695, %v3098_v51  ;;  %v3099_v34 = vsub.f32 %v15242_v4, %v12032_v12  ;;  %8042 = vpow2.f32 %v3873_v27  ;;  %v3879_v37 = vmul.f32 1.442695, %v3092_v28  ;;  %v15244_v28 = vld [vmem:[#allocation145_spill] sm:$0xff]  ;;  %5727 = vmatprep.subr.bf16.mxu0 %v14982_v59 }
 0x380   : > { %v8019_v52 = vpop.eup %8018  ;;  %v4476_v54 = vpack.c.bf16 %v8017_v7, %v8015_v14  ;;  %8044 = vpow2.f32 %v3877_v60  ;;  %v3895_v14 = vmul.f32 1.442695, %v3100_v17  ;;  %v3889_v44 = vmul.f32 1.442695, %v3097_v22  ;;  %v12048_v7 = vpop.xlane.xlu0 %2572  ;;  %v7765_v17 = vld [vmem:[%s9445_s14 + $0x1d0] sm:$0xff]  }
 0x381   : > { %v8021_v42 = vpop.eup %8020  ;;  %8046 = vpow2.f32 %v3875_v61  ;;  %15243 = vst [vmem:[#allocation104_spill] sm:$0xff] %v12048_v7  ;;  %v3893_v51 = vmul.f32 1.442695, %v3099_v34  ;;  %v3105_v60 = vsub.f32 %v15244_v28, %v12048_v7  ;;  %v15246_v61 = vld [vmem:[#allocation146_spill] sm:$0xff]  ;;  %6015 = vmatpush2.bf16.msra.mxu1 %v7765_v17  ;;  %v15250_v17 = vld [vmem:[#allocation152_spill] sm:$0xff] }
 0x382   : > { %v8023_v29 = vpop.eup %8022  ;;  %5562 = vmatprep.mubr.bf16.mxu1 %v4476_v54  ;;  %v4473_v40 = vpack.c.bf16 %v8021_v42, %v8019_v52  ;;  %8048 = vpow2.f32 %v3891_v25  ;;  %v3107_v3 = vsub.f32 %v15246_v61, %v12048_v7  ;;  %6016 = vmatprep.subr.bf16.mxu1 %v14982_v59 }
 0x383   : > { %v8025_v24 = vpop.eup %8024  ;;  %8050 = vpow2.f32 %v3879_v37  ;;  %v15248_v37 = vld [vmem:[#allocation151_spill] sm:$0xff] }
 0x384   : > { %5274 = vmatmul.mubr.bf16.gmra.mxu0 %v4473_v40  ;;  %v4475_v16 = vpack.c.bf16 %v8025_v24, %v8023_v29  ;;  %v8027_v56 = vpop.eup %8026  ;;  %8052 = vpow2.f32 %v3895_v14  ;;  %v12052_v24 = vpop.xlane.xlu1 %2581  ;;  %v15247_v40 = vld [vmem:[#allocation147_spill] sm:$0xff] }
 0x385   : > { %v8029_v52 = vpop.eup %8028  ;;  %15245 = vst [vmem:[#allocation97_spill] sm:$0xff] %v12052_v24  ;;  %8054 = vpow2.f32 %v3889_v44  ;;  %v3106_v25 = vsub.f32 %v15247_v40, %v12048_v7  ;;  %v3905_v44 = vmul.f32 1.442695, %v3105_v60  ;;  %v3116_v61 = vsub.f32 %v15250_v17, %v12052_v24  ;;  %v15252_v60 = vld [vmem:[#allocation150_spill] sm:$0xff] }
 0x386   : > { %5563 = vmatmul.mubr.bf16.gmra.mxu1 %v4475_v16  ;;  %v8031_v54 = vpop.eup %8030  ;;  %8056 = vpow2.f32 %v3893_v51  ;;  %v3114_v16 = vsub.f32 %v15248_v37, %v12052_v24  ;;  %v12070_v37 = vpop.xlane.xlu0 %2590 }
 0x387   : > { %v8033_v27 = vpop.eup %8032  ;;  %8058 = vpow2.f32 %v3905_v44 }
 0x388   : > { %v8035_v42 = vpop.eup %8034  ;;  %v4482_v22 = vpack.c.bf16 %v8033_v27, %v8031_v54  ;;  %v15249_v54 = vld [vmem:[#allocation148_spill] sm:$0xff]  ;;  %v3909_v27 = vmul.f32 1.442695, %v3107_v3  ;;  %v12076_v17 = vpop.xlane.xlu1 %2599 }
 0x389   : > { %v8037_v29 = vpop.eup %8036  ;;  %v3108_v51 = vsub.f32 %v15249_v54, %v12048_v7  ;;  %15254 = vst [vmem:[#allocation101_spill] sm:$0xff] %v12076_v17 }
 0x38a   : > { %v8039_v4 = vpop.eup %8038  ;;  %5281 = vmatprep.mubr.bf16.mxu0 %v4482_v22  ;;  %v4484_v34 = vpack.c.bf16 %v8037_v29, %v8035_v42  ;;  %v3907_v42 = vmul.f32 1.442695, %v3106_v25  ;;  %v15251_v22 = vld [vmem:[#allocation149_spill] sm:$0xff]  ;;  %8060 = vpow2.f32 %v3909_v27 }
 0x38b   : > { %v8041_v14 = vpop.eup %8040  ;;  %v4481_v28 = vpack.c.bf16 %v8039_v4, %v8027_v56  ;;  %v3113_v29 = vsub.f32 %v15251_v22, %v12052_v24  ;;  %v3923_v56 = vmul.f32 1.442695, %v3114_v16  ;;  %v3115_v4 = vsub.f32 %v15252_v60, %v12052_v24  ;;  %v15253_v25 = vld [vmem:[#allocation153_spill] sm:$0xff]  ;;  %v15255_v16 = vld [vmem:[#allocation154_spill] sm:$0xff] }
 0x38c   : > { %5570 = vmatprep.mubr.bf16.mxu1 %v4484_v34  ;;  %v4483_v63 = vpack.c.bf16 %v8041_v14, %v8029_v52  ;;  %v8043_v40 = vpop.eup %8042  ;;  %v3911_v3 = vmul.f32 1.442695, %v3108_v51  ;;  %v3927_v34 = vmul.f32 1.442695, %v3116_v61  ;;  %8062 = vpow2.f32 %v3907_v42  ;;  %v15256_v51 = vld [vmem:[#allocation155_spill] sm:$0xff] }
 0x38d   : > { %5282 = vmatmul.mubr.bf16.gmra.mxu0 %v4481_v28  ;;  %v8045_v54 = vpop.eup %8044  ;;  %v3121_v28 = vsub.f32 %v15253_v25, %v12070_v37  ;;  %v3921_v22 = vmul.f32 1.442695, %v3113_v29  ;;  %8064 = vpow2.f32 %v3923_v56  ;;  %v3925_v60 = vmul.f32 1.442695, %v3115_v4  ;;  %v15257_v25 = vld [vmem:[#allocation159_spill] sm:$0xff] }
 0x38e   : > { %5571 = vmatmul.mubr.bf16.gmra.mxu1 %v4483_v63  ;;  %v8047_v52 = vpop.eup %8046  ;;  %v3123_v63 = vsub.f32 %v15255_v16, %v12070_v37  ;;  %8066 = vpow2.f32 %v3911_v3  ;;  %v3122_v27 = vsub.f32 %v15256_v51, %v12070_v37  ;;  %v3130_v42 = vsub.f32 %v15257_v25, %v12076_v17  ;;  %v15261_v51 = vld [vmem:[#allocation162_spill] sm:$0xff]  ;;  %v15262_v25 = vld [vmem:[#allocation165_spill] sm:$0xff] }
 0x38f   : > { %v8049_v14 = vpop.eup %8048  ;;  %8068 = vpow2.f32 %v3927_v34  ;;  %v3937_v7 = vmul.f32 1.442695, %v3121_v28  ;;  %v3124_v56 = vsub.f32 %v14842_v35, %v12070_v37  ;;  %v12092_v35 = vpop.xlane.xlu0 %2608 }
 0x390   : > { %v8051_v12 = vpop.eup %8050  ;;  %v4490_v43 = vpack.c.bf16 %v8049_v14, %v8047_v52  ;;  %8070 = vpow2.f32 %v3921_v22  ;;  %v3941_v4 = vmul.f32 1.442695, %v3123_v63  ;;  %v3132_v52 = vsub.f32 %v14843_v49, %v12076_v17 }
 0x391   : > { %v8053_v44 = vpop.eup %8052  ;;  %8072 = vpow2.f32 %v3925_v60  ;;  %v3955_v14 = vmul.f32 1.442695, %v3130_v42  ;;  %v3943_v22 = vmul.f32 1.442695, %v3124_v56  ;;  %v15260_v60 = vld [vmem:[#allocation161_spill] sm:$0xff] }
 0x392   : > { %v8055_v61 = vpop.eup %8054  ;;  %5289 = vmatprep.mubr.bf16.mxu0 %v4490_v43  ;;  %v4492_v24 = vpack.c.bf16 %v8053_v44, %v8051_v12  ;;  %v3939_v43 = vmul.f32 1.442695, %v3122_v27  ;;  %v15258_v12 = vld [vmem:[#allocation157_spill] sm:$0xff]  ;;  %8074 = vpow2.f32 %v3937_v7  ;;  %v3137_v44 = vsub.f32 %v15260_v60, %v12092_v35 }
 0x393   : > { %v8057_v29 = vpop.eup %8056  ;;  %v4489_v21 = vpack.c.bf16 %v8055_v61, %v8043_v40  ;;  %v3129_v34 = vsub.f32 %v15258_v12, %v12076_v17  ;;  %v15259_v40 = vld [vmem:[#allocation158_spill] sm:$0xff]  ;;  %8076 = vpow2.f32 %v3941_v4  ;;  %v3139_v27 = vsub.f32 %v15261_v51, %v12092_v35  ;;  %v7767_v56 = vld [vmem:[%s9445_s14 + $0x1c8] sm:$0xff]  }
 0x394   : > { %5578 = vmatprep.mubr.bf16.mxu1 %v4492_v24  ;;  %v4491_v3 = vpack.c.bf16 %v8057_v29, %v8045_v54  ;;  %v3131_v28 = vsub.f32 %v15259_v40, %v12076_v17  ;;  %v3959_v24 = vmul.f32 1.442695, %v3132_v52  ;;  %8078 = vpow2.f32 %v3939_v43  ;;  %v12094_v54 = vpop.xlane.xlu1 %2617  ;;  %v7766_v29 = vld [vmem:[%s9445_s14 + $0x148] sm:$0xff]   ;;  %6017 = vmatpush2.bf16.msra.mxu1 %v7767_v56 }
 0x395   : > { %5290 = vmatmul.mubr.bf16.gmra.mxu0 %v4489_v21  ;;  %v3953_v49 = vmul.f32 1.442695, %v3129_v34  ;;  %v8059_v21 = vpop.eup %8058  ;;  %8080 = vpow2.f32 %v3955_v14  ;;  %v3145_v42 = vsub.f32 %v15262_v25, %v12094_v54  ;;  %v3969_v34 = vmul.f32 1.442695, %v3137_v44  ;;  %v15264_v14 = vld [vmem:[#allocation163_spill] sm:$0xff]  ;;  %6018 = vmatprep.subr.bf16.mxu1 %v14982_v59 }
 0x396   : > { %5579 = vmatmul.mubr.bf16.gmra.mxu1 %v4491_v3  ;;  %v3957_v16 = vmul.f32 1.442695, %v3131_v28  ;;  %8082 = vpow2.f32 %v3943_v22  ;;  %v15263_v3 = vld [vmem:[#allocation166_spill] sm:$0xff]  ;;  %v3138_v40 = vsub.f32 %v15264_v14, %v12092_v35  ;;  %5728 = vmatpush2.bf16.msra.mxu0 %v7766_v29  ;;  %v3973_v22 = vmul.f32 1.442695, %v3139_v27 }
 0x397   : > { %v8061_v63 = vpop.eup %8060  ;;  %8084 = vpow2.f32 %v3959_v24  ;;  %v3147_v52 = vsub.f32 %v15263_v3, %v12094_v54  ;;  %5729 = vmatprep.subr.bf16.mxu0 %v14982_v59  ;;  %v3985_v25 = vmul.f32 1.442695, %v3145_v42  ;;  %v3148_v27 = vsub.f32 %v14859_v9, %v12094_v54 }
 0x398   : > { %8086 = vpow2.f32 %v3953_v49  ;;  %v15265_v49 = vld [vmem:[#allocation167_spill] sm:$0xff]  ;;  %v3971_v29 = vmul.f32 1.442695, %v3138_v40  ;;  %v12120_v14 = vpop.xlane.xlu1 %2635 }
 0x399   : > { %v8063_v7 = vpop.eup %8062  ;;  %8088 = vpow2.f32 %v3957_v16  ;;  %v3146_v60 = vsub.f32 %v15265_v49, %v12094_v54  ;;  %v3140_v16 = vsub.f32 %v14858_v41, %v12092_v35  ;;  %v3989_v44 = vmul.f32 1.442695, %v3147_v52  ;;  %v12116_v41 = vpop.xlane.xlu0 %2626  ;;  %15267 = vst [vmem:[#allocation98_spill] sm:$0xff] %v12120_v14 }
 0x39a   : > { %v8065_v61 = vpop.eup %8064  ;;  %8090 = vpow2.f32 %v3969_v34  ;;  %v3991_v59 = vmul.f32 1.442695, %v3148_v27 }
 0x39b   : > { %v8067_v4 = vpop.eup %8066  ;;  %v4498_v43 = vpack.c.bf16 %v8065_v61, %v8063_v7  ;;  %8092 = vpow2.f32 %v3973_v22 }
 0x39c   : > { %v8069_v12 = vpop.eup %8068  ;;  %8094 = vpow2.f32 %v3985_v25 }
 0x39d   : > { %v8071_v28 = vpop.eup %8070  ;;  %5297 = vmatprep.mubr.bf16.mxu0 %v4498_v43  ;;  %v4500_v24 = vpack.c.bf16 %v8069_v12, %v8067_v4  ;;  %v3987_v4 = vmul.f32 1.442695, %v3146_v60  ;;  %8096 = vpow2.f32 %v3989_v44  ;;  %v15266_v12 = vld [vmem:[#allocation169_spill] sm:$0xff]  ;;  %v15270_v44 = vld [vmem:[#allocation175_spill] sm:$0xff] }
 0x39e   : > { %v8073_v51 = vpop.eup %8072  ;;  %v4497_v7 = vpack.c.bf16 %v8071_v28, %v8059_v21  ;;  %v3975_v21 = vmul.f32 1.442695, %v3140_v16  ;;  %8098 = vpow2.f32 %v3971_v29  ;;  %v3153_v34 = vsub.f32 %v15266_v12, %v12116_v41  ;;  %v15268_v28 = vld [vmem:[#allocation170_spill] sm:$0xff] }
 0x39f   : > { %5586 = vmatprep.mubr.bf16.mxu1 %v4500_v24  ;;  %v4499_v61 = vpack.c.bf16 %v8073_v51, %v8061_v63  ;;  %v8075_v56 = vpop.eup %8074  ;;  %8100 = vpow2.f32 %v3987_v4  ;;  %v3155_v22 = vsub.f32 %v15268_v28, %v12116_v41  ;;  %v15269_v51 = vld [vmem:[#allocation171_spill] sm:$0xff]  ;;  %v3156_v29 = vsub.f32 %v14861_v47, %v12116_v41  ;;  %v15272_v47 = vld [vmem:[#allocation174_spill] sm:$0xff] }
 0x3a0   : > { %5298 = vmatmul.mubr.bf16.gmra.mxu0 %v4497_v7  ;;  %v8077_v42 = vpop.eup %8076  ;;  %8102 = vpow2.f32 %v3975_v21  ;;  %v3154_v25 = vsub.f32 %v15269_v51, %v12116_v41  ;;  %v4001_v27 = vmul.f32 1.442695, %v3153_v34  ;;  %v3163_v28 = vsub.f32 %v15272_v47, %v12120_v14 }
 0x3a1   : > { %5587 = vmatmul.mubr.bf16.gmra.mxu1 %v4499_v61  ;;  %v8079_v3 = vpop.eup %8078  ;;  %8104 = vpow2.f32 %v3991_v59  ;;  %v3162_v61 = vsub.f32 %v15270_v44, %v12120_v14  ;;  %v7769_v59 = vld [vmem:[%s9445_s14 + $0x1c0] sm:$0xff]  }
 0x3a2   : > { %v8081_v52 = vpop.eup %8080  ;;  %6019 = vmatpush2.bf16.msra.mxu1 %v7769_v59  ;;  %8106 = vpow2.f32 %v4001_v27  ;;  %v4021_v27 = vmul.f32 1.442695, %v3163_v28 }
 0x3a3   : > { %v8083_v63 = vpop.eup %8082  ;;  %v4506_v43 = vpack.c.bf16 %v8081_v52, %v8079_v3  ;;  %v7768_v3 = vld [vmem:[%s9445_s14 + $0x140] sm:$0xff]   ;;  %v4005_v52 = vmul.f32 1.442695, %v3155_v22  ;;  %v4007_v22 = vmul.f32 1.442695, %v3156_v29 }
 0x3a4   : > { %v8085_v9 = vpop.eup %8084  ;;  %5730 = vmatpush2.bf16.msra.mxu0 %v7768_v3 }
 0x3a5   : > { %v8087_v40 = vpop.eup %8086  ;;  %5305 = vmatprep.mubr.bf16.mxu0 %v4506_v43  ;;  %v4508_v24 = vpack.c.bf16 %v8085_v9, %v8083_v63  ;;  %v4003_v63 = vmul.f32 1.442695, %v3154_v25  ;;  %8108 = vpow2.f32 %v4005_v52 }
 0x3a6   : > { %v8089_v49 = vpop.eup %8088  ;;  %v4505_v60 = vpack.c.bf16 %v8087_v40, %v8075_v56  ;;  %v3164_v56 = vsub.f32 %v14965_v48, %v12120_v14  ;;  %v4019_v40 = vmul.f32 1.442695, %v3162_v61  ;;  %v12138_v48 = vpop.xlane.xlu0 %2644 }
 0x3a7   : > { %5594 = vmatprep.mubr.bf16.mxu1 %v4508_v24  ;;  %v4507_v16 = vpack.c.bf16 %v8089_v49, %v8077_v42  ;;  %v15271_v42 = vld [vmem:[#allocation173_spill] sm:$0xff]  ;;  %v8091_v34 = vpop.eup %8090  ;;  %15273 = vst [vmem:[#allocation102_spill] sm:$0xff] %v12138_v48  ;;  %8110 = vpow2.f32 %v4003_v63  ;;  %v15277_v63 = vld [vmem:[#allocation178_spill] sm:$0xff] }
 0x3a8   : > { %5306 = vmatmul.mubr.bf16.gmra.mxu0 %v4505_v60  ;;  %v3161_v43 = vsub.f32 %v15271_v42, %v12120_v14  ;;  %v8093_v24 = vpop.eup %8092  ;;  %v4023_v25 = vmul.f32 1.442695, %v3164_v56  ;;  %v12142_v42 = vpop.xlane.xlu1 %2653  ;;  %8112 = vpow2.f32 %v4019_v40  ;;  %v15279_v40 = vld [vmem:[#allocation181_spill] sm:$0xff] }
 0x3a9   : > { %5595 = vmatmul.mubr.bf16.gmra.mxu1 %v4507_v16  ;;  %v8095_v51 = vpop.eup %8094  ;;  %15275 = vst [vmem:[#allocation111_spill] sm:$0xff] %v12142_v42  ;;  %8114 = vpow2.f32 %v4007_v22  ;;  %v3177_v28 = vsub.f32 %v15279_v40, %v12142_v42 }
 0x3aa   : > { %v8097_v16 = vpop.eup %8096  ;;  %v4017_v44 = vmul.f32 1.442695, %v3161_v43  ;;  %v4513_v52 = vpack.c.bf16 %v8095_v51, %v8091_v34  ;;  %v3171_v43 = vsub.f32 %v15277_v63, %v12138_v48  ;;  %8116 = vpow2.f32 %v4023_v25  ;;  %v15280_v34 = vld [vmem:[#allocation182_spill] sm:$0xff]  ;;  %v12164_v40 = vpop.xlane.xlu0 %2662 }
 0x3ab   : > { %v8099_v59 = vpop.eup %8098  ;;  %v4515_v14 = vpack.c.bf16 %v8097_v16, %v8093_v24  ;;  %v3179_v22 = vsub.f32 %v15280_v34, %v12142_v42 }
 0x3ac   : > { %v8101_v29 = vpop.eup %8100  ;;  %8118 = vpow2.f32 %v4017_v44  ;;  %v3172_v44 = vsub.f32 %v14976_v15, %v12138_v48 }
 0x3ad   : > { %v8103_v56 = vpop.eup %8102  ;;  %8120 = vpow2.f32 %v4021_v27  ;;  %v4053_v27 = vmul.f32 1.442695, %v3179_v22 }
 0x3ae   : > { %v4039_v15 = vmul.f32 1.442695, %v3172_v44 }
 0x3b1   : > { %v5155_v7 = vpop.f32.mrf.mxu0 }
 0x3b3   : > { %v5444_v4 = vpop.f32.mrf.mxu1  ;;  %v5157_v21 = vpop.f32.mrf.mxu0 }
 0x3b4   : > { %v12140_v21 = vadd.f32 %v5444_v4, %v5155_v7  ;;  %v4514_v7 = vpack.c.bf16 %v8101_v29, %v8099_v59  ;;  %v4037_v59 = vmul.f32 1.442695, %v3171_v43  ;;  %v15282_v29 = vld [vmem:[#allocation183_spill] sm:$0xff] }
 0x3b5   : > { %v5446_v9 = vpop.f32.mrf.mxu1  ;;  %v5158_v12 = vpop.f32.mrf.mxu0  ;;  %v3178_v24 = vsub.f32 %v15282_v29, %v12142_v42 }
 0x3b6   : > { %15274 = vst [vmem:[#allocation107_spill] sm:$0xff] %v12140_v21  ;;  %v15276_v9 = vld [vmem:[#allocation177_spill] sm:$0xff]  ;;  %v8105_v21 = vpop.eup %8104  ;;  %5313 = vmatprep.mubr.bf16.mxu0 %v4514_v7 }
 0x3b7   : > { %v5447_v49 = vpop.f32.mrf.mxu1  ;;  %v5160_v60 = vpop.f32.mrf.mxu0  ;;  %v3169_v47 = vsub.f32 %v15276_v9, %v12138_v48  ;;  %v4516_v51 = vpack.c.bf16 %v8105_v21, %v8103_v56  ;;  %5314 = vmatmul.mubr.bf16.gmra.mxu0 %v4513_v52 }
 0x3b8   : > { %v12148_v4 = vadd.f32 %v5447_v49, %v5158_v12  ;;  %v15281_v12 = vld [vmem:[#allocation179_spill] sm:$0xff] }
 0x3b9   : > { %v5449_v3 = vpop.f32.mrf.mxu1  ;;  %v4033_v63 = vmul.f32 1.442695, %v3169_v47  ;;  %v3170_v49 = vsub.f32 %v15281_v12, %v12138_v48  ;;  %5602 = vmatprep.mubr.bf16.mxu1 %v4516_v51  ;;  %v3180_v47 = vsub.f32 %v14988_v32, %v12142_v42  ;;  %v12168_v32 = vpop.xlane.xlu1 %2671 }
 0x3ba   : > { %v5163_v61 = vpop.f32.mrf.mxu0  ;;  %15278 = vst [vmem:[#allocation108_spill] sm:$0xff] %v12148_v4  ;;  %5603 = vmatmul.mubr.bf16.gmra.mxu1 %v4515_v14  ;;  %15285 = vst [vmem:[#allocation109_spill] sm:$0xff] %v12168_v32 }
 0x3bb   : > { %v5452_v60 = vpop.f32.mrf.mxu1  ;;  %8122 = vpow2.f32 %v4033_v63  ;;  %v4035_v43 = vmul.f32 1.442695, %v3170_v49  ;;  %v15286_v49 = vld [vmem:[#allocation185_spill] sm:$0xff] }
 0x3bc   : > { %v5165_v3 = vpop.f32.mrf.mxu0  ;;  %v12162_v52 = vadd.f32 %v5452_v60, %v5163_v61  ;;  %8124 = vpow2.f32 %v4037_v59  ;;  %v4055_v61 = vmul.f32 1.442695, %v3180_v47  ;;  %v3185_v59 = vsub.f32 %v15286_v49, %v12164_v40 }
 0x3bd   : > { %v5454_v17 = vpop.f32.mrf.mxu1  ;;  %v8107_v3 = vpop.eup %8106 }
 0x3be   : > { %v5166_v9 = vpop.f32.mrf.mxu0  ;;  %v4049_v17 = vmul.f32 1.442695, %v3177_v28  ;;  %15283 = vst [vmem:[#allocation112_spill] sm:$0xff] %v12162_v52  ;;  %v4051_v28 = vmul.f32 1.442695, %v3178_v24  ;;  %v8109_v34 = vpop.eup %8108 }
 0x3bf   : > { %v5455_v25 = vpop.f32.mrf.mxu1  ;;  %v8111_v12 = vpop.eup %8110  ;;  %v4065_v4 = vmul.f32 1.442695, %v3185_v59 }
 0x3c0   : > { %v5168_v16 = vpop.f32.mrf.mxu0  ;;  %8126 = vpow2.f32 %v4049_v17  ;;  %v12166_v51 = vadd.f32 %v5455_v25, %v5166_v9  ;;  %v8113_v63 = vpop.eup %8112 }
 0x3c1   : > { %v5457_v21 = vpop.f32.mrf.mxu1  ;;  %8128 = vpow2.f32 %v4053_v27  ;;  %v8115_v24 = vpop.eup %8114  ;;  %v15287_v16 = vld [vmem:[#allocation186_spill] sm:$0xff]  ;;  %v4522_v44 = vpack.c.bf16 %v8113_v63, %v8111_v12 }
 0x3c2   : > { %15284 = vst [vmem:[#allocation105_spill] sm:$0xff] %v12166_v51  ;;  %8130 = vpow2.f32 %v4035_v43  ;;  %v3187_v17 = vsub.f32 %v15287_v16, %v12164_v40  ;;  %v8117_v25 = vpop.eup %8116  ;;  %v15288_v21 = vld [vmem:[#allocation189_spill] sm:$0xff] }
 0x3c3   : > { %v5171_v56 = vpop.f32.mrf.mxu0  ;;  %8132 = vpow2.f32 %v4051_v28  ;;  %v3193_v27 = vsub.f32 %v15288_v21, %v12168_v32  ;;  %5321 = vmatprep.mubr.bf16.mxu0 %v4522_v44  ;;  %v4524_v43 = vpack.c.bf16 %v8117_v25, %v8115_v24  ;;  %v15290_v28 = vld [vmem:[#allocation187_spill] sm:$0xff]  ;;  %v3196_v44 = vsub.f32 %v14893_v36, %v12168_v32 }
 0x3c4   : > { %v5460_v7 = vpop.f32.mrf.mxu1  ;;  %8134 = vpow2.f32 %v4039_v15  ;;  %v3186_v12 = vsub.f32 %v15290_v28, %v12164_v40  ;;  %v15291_v15 = vld [vmem:[#allocation191_spill] sm:$0xff]  ;;  %v15294_v28 = vld [vmem:[#allocation193_spill] sm:$0xff] }
 0x3c5   : > { %v5173_v14 = vpop.f32.mrf.mxu0  ;;  %8136 = vpow2.f32 %v4055_v61  ;;  %5610 = vmatprep.mubr.bf16.mxu1 %v4524_v43  ;;  %v4081_v48 = vmul.f32 1.442695, %v3193_v27  ;;  %v3188_v61 = vsub.f32 %v14892_v55, %v12164_v40  ;;  %v12184_v24 = vadd.f32 %v5460_v7, %v5171_v56  ;;  %v12192_v43 = vpop.xlane.xlu1 %2689 }
 0x3c6   : > { %v5462_v22 = vpop.f32.mrf.mxu1  ;;  %v8119_v14 = vpop.eup %8118  ;;  %8138 = vpow2.f32 %v4065_v4  ;;  %v4087_v36 = vmul.f32 1.442695, %v3196_v44  ;;  %v15297_v44 = vld [vmem:[#allocation198_spill] sm:$0xff] }
 0x3c7   : > { %v5174_v60 = vpop.f32.mrf.mxu0  ;;  %v15289_v22 = vld [vmem:[#allocation190_spill] sm:$0xff]  ;;  %v8121_v52 = vpop.eup %8120  ;;  %v4521_v16 = vpack.c.bf16 %v8119_v14, %v8107_v3  ;;  %15292 = vst [vmem:[#allocation106_spill] sm:$0xff] %v12184_v24  ;;  %v4071_v7 = vmul.f32 1.442695, %v3188_v61  ;;  %v15299_v24 = vld [vmem:[#allocation195_spill] sm:$0xff] }
 0x3c8   : > { %v5463_v29 = vpop.f32.mrf.mxu1  ;;  %v3195_v51 = vsub.f32 %v15289_v22, %v12168_v32  ;;  %v4523_v21 = vpack.c.bf16 %v8121_v52, %v8109_v34  ;;  %v4067_v52 = vmul.f32 1.442695, %v3186_v12  ;;  %v8123_v25 = vpop.eup %8122 }
 0x3c9   : > { %v5176_v9 = vpop.f32.mrf.mxu0  ;;  %5322 = vmatmul.mubr.bf16.gmra.mxu0 %v4521_v16  ;;  %v12190_v14 = vadd.f32 %v5463_v29, %v5174_v60  ;;  %v8125_v56 = vpop.eup %8124  ;;  %v15295_v60 = vld [vmem:[#allocation194_spill] sm:$0xff] }
 0x3ca   : > { %v5465_v47 = vpop.f32.mrf.mxu1  ;;  %v4069_v9 = vmul.f32 1.442695, %v3187_v17  ;;  %v4085_v3 = vmul.f32 1.442695, %v3195_v51  ;;  %5611 = vmatmul.mubr.bf16.gmra.mxu1 %v4523_v21 }
 0x3cb   : > { %v3194_v47 = vsub.f32 %v15291_v15, %v12168_v32  ;;  %15293 = vst [vmem:[#allocation110_spill] sm:$0xff] %v12190_v14 }
 0x3cc   : > { %8140 = vpow2.f32 %v4069_v9 }
 0x3cd   : > { %v5179_v49 = vpop.f32.mrf.mxu0  ;;  %v4083_v27 = vmul.f32 1.442695, %v3194_v47  ;;  %8142 = vpow2.f32 %v4081_v48  ;;  %v8127_v22 = vpop.eup %8126  ;;  %v15296_v47 = vld [vmem:[#allocation197_spill] sm:$0xff] }
 0x3ce   : > { %8144 = vpow2.f32 %v4085_v3  ;;  %v8129_v16 = vpop.eup %8128  ;;  %v3209_v61 = vsub.f32 %v15296_v47, %v12192_v43 }
 0x3cf   : > { %v5468_v63 = vpop.f32.mrf.mxu1  ;;  %v5181_v42 = vpop.f32.mrf.mxu0  ;;  %8146 = vpow2.f32 %v4067_v52 }
 0x3d0   : > { %v12188_v42 = vpop.xlane.xlu0 %2680  ;;  %v8131_v9 = vpop.eup %8130  ;;  %8148 = vpow2.f32 %v4083_v27  ;;  %v12202_v52 = vadd.f32 %v5468_v63, %v5179_v49 }
 0x3d1   : > { %v5470_v59 = vpop.f32.mrf.mxu1  ;;  %v5182_v17 = vpop.f32.mrf.mxu0  ;;  %v3201_v12 = vsub.f32 %v15294_v28, %v12188_v42  ;;  %v3203_v29 = vsub.f32 %v15295_v60, %v12188_v42  ;;  %8150 = vpow2.f32 %v4071_v7  ;;  %v3202_v32 = vsub.f32 %v15299_v24, %v12188_v42  ;;  %v15300_v7 = vld [vmem:[#allocation199_spill] sm:$0xff] }
 0x3d2   : > { %v8133_v15 = vpop.eup %8132  ;;  %v4529_v59 = vpack.c.bf16 %v8127_v22, %v8123_v25  ;;  %8152 = vpow2.f32 %v4087_v36  ;;  %15298 = vst [vmem:[#allocation113_spill] sm:$0xff] %v12202_v52  ;;  %v3210_v22 = vsub.f32 %v15300_v7, %v12192_v43  ;;  %v4113_v36 = vmul.f32 1.442695, %v3209_v61 }
 0x3d3   : > { %v5471_v34 = vpop.f32.mrf.mxu1  ;;  %v5184_v55 = vpop.f32.mrf.mxu0  ;;  %v4097_v60 = vmul.f32 1.442695, %v3201_v12  ;;  %v4101_v47 = vmul.f32 1.442695, %v3203_v29  ;;  %v3204_v49 = vsub.f32 %v15018_v33, %v12188_v42  ;;  %v4099_v24 = vmul.f32 1.442695, %v3202_v32 }
 0x3d4   : > { %v8135_v3 = vpop.eup %8134  ;;  %v3211_v55 = vsub.f32 %v15297_v44, %v12192_v43  ;;  %v12214_v12 = vadd.f32 %v5471_v34, %v5182_v17  ;;  %v4115_v61 = vmul.f32 1.442695, %v3210_v22  ;;  %v12218_v33 = vpop.xlane.xlu1 %2707  ;;  %v15302_v32 = vld [vmem:[#allocation201_spill] sm:$0xff] }
 0x3d5   : > { %v5473_v51 = vpop.f32.mrf.mxu1  ;;  %v8137_v27 = vpop.eup %8136  ;;  %8154 = vpow2.f32 %v4097_v60 }
 0x3d6   : > { %v4530_v51 = vpack.c.bf16 %v8133_v15, %v8131_v9  ;;  %v4532_v25 = vpack.c.bf16 %v8137_v27, %v8135_v3  ;;  %v4117_v63 = vmul.f32 1.442695, %v3211_v55  ;;  %15301 = vst [vmem:[#allocation114_spill] sm:$0xff] %v12214_v12  ;;  %v8139_v29 = vpop.eup %8138  ;;  %8156 = vpow2.f32 %v4101_v47  ;;  %v12216_v15 = vpop.xlane.xlu0 %2698 }
 0x3d7   : > { %v5187_v4 = vpop.f32.mrf.mxu0  ;;  %8158 = vpow2.f32 %v4113_v36  ;;  %v4103_v55 = vmul.f32 1.442695, %v3204_v49  ;;  %v3217_v17 = vsub.f32 %v15302_v32, %v12216_v15  ;;  %v15305_v36 = vld [vmem:[#allocation205_spill] sm:$0xff] }
 0x3d8   : > { %5329 = vmatprep.mubr.bf16.mxu0 %v4530_v51  ;;  %5618 = vmatprep.mubr.bf16.mxu1 %v4532_v25  ;;  %8160 = vpow2.f32 %v4117_v63  ;;  %v3225_v49 = vsub.f32 %v15305_v36, %v12218_v33 }
 0x3d9   : > { %v5476_v21 = vpop.f32.mrf.mxu1  ;;  %v5189_v48 = vpop.f32.mrf.mxu0  ;;  %5330 = vmatmul.mubr.bf16.gmra.mxu0 %v4529_v59  ;;  %8162 = vpow2.f32 %v4099_v24 }
 0x3da   : > { %v4531_v48 = vpack.c.bf16 %v8129_v16, %v8125_v56  ;;  %v3212_v56 = vsub.f32 %v14902_v26, %v12192_v43  ;;  %v8141_v3 = vpop.eup %8140  ;;  %8164 = vpow2.f32 %v4115_v61  ;;  %v12224_v25 = vadd.f32 %v5476_v21, %v5187_v4  ;;  %v15307_v21 = vld [vmem:[#allocation203_spill] sm:$0xff] }
 0x3db   : > { %v5478_v28 = vpop.f32.mrf.mxu1  ;;  %v12204_v14 = vpop.f32.mrf.mxu0  ;;  %8166 = vpow2.f32 %v4103_v55  ;;  %v4129_v61 = vmul.f32 1.442695, %v3217_v17 }
 0x3dc   : > { %5619 = vmatmul.mubr.bf16.gmra.mxu1 %v4531_v48  ;;  %v8143_v51 = vpop.eup %8142  ;;  %v4119_v26 = vmul.f32 1.442695, %v3212_v56  ;;  %v15303_v48 = vld [vmem:[#allocation202_spill] sm:$0xff]  ;;  %15304 = vst [vmem:[#allocation115_spill] sm:$0xff] %v12224_v25 }
 0x3dd   : > { %v5479_v44 = vpop.f32.mrf.mxu1  ;;  %v5192_v9 = vpop.f32.mrf.mxu0  ;;  %v3219_v47 = vsub.f32 %v15303_v48, %v12216_v15  ;;  %v4537_v63 = vpack.c.bf16 %v8143_v51, %v8139_v29  ;;  %v15308_v29 = vld [vmem:[#allocation207_spill] sm:$0xff] }
 0x3de   : > { %v8145_v60 = vpop.eup %8144  ;;  %8168 = vpow2.f32 %v4119_v26  ;;  %v3226_v55 = vsub.f32 %v15308_v29, %v12218_v33  ;;  %v12235_v51 = vadd.f32 %v5479_v44, %v12204_v14  ;;  %v15311_v44 = vld [vmem:[#allocation257_spill] sm:$0xff] }
 0x3df   : > { %v5481_v16 = vpop.f32.mrf.mxu1  ;;  %v8147_v34 = vpop.eup %8146  ;;  %v4539_v4 = vpack.c.bf16 %v8145_v60, %v8141_v3  ;;  %v4133_v25 = vmul.f32 1.442695, %v3219_v47  ;;  %v3228_v60 = vsub.f32 %v15050_v39, %v12218_v33  ;;  %8170 = vpow2.f32 %v4129_v61 }
 0x3e0   : > { %v8149_v9 = vpop.eup %8148  ;;  %v15306_v16 = vld [vmem:[#allocation206_spill] sm:$0xff]  ;;  %15309 = vst [vmem:[#allocation119_spill] sm:$0xff] %v12235_v51 }
 0x3e1   : > { %v8151_v56 = vpop.eup %8150  ;;  %v4538_v24 = vpack.c.bf16 %v8149_v9, %v8147_v34  ;;  %v4145_v34 = vmul.f32 1.442695, %v3225_v49  ;;  %v2821_v49 = vsub.f32 %v15311_v44, %v11160_v10  ;;  %8172 = vpow2.f32 %v4133_v25 }
 0x3e2   : > { %v5195_v59 = vpop.f32.mrf.mxu0  ;;  %v8153_v48 = vpop.eup %8152  ;;  %v4151_v61 = vmul.f32 1.442695, %v3228_v60 }
 0x3e3   : > { %5337 = vmatprep.mubr.bf16.mxu0 %v4538_v24  ;;  %v4540_v52 = vpack.c.bf16 %v8153_v48, %v8151_v56  ;;  %v8155_v14 = vpop.eup %8154  ;;  %8174 = vpow2.f32 %v4145_v34  ;;  %v12251_v48 = vpop.xlane.xlu1 %2725 }
 0x3e4   : > { %v5484_v28 = vpop.f32.mrf.mxu1  ;;  %v5197_v27 = vpop.f32.mrf.mxu0  ;;  %5338 = vmatmul.mubr.bf16.gmra.mxu0 %v4537_v63 }
 0x3e5   : > { %v3227_v27 = vsub.f32 %v15306_v16, %v12218_v33  ;;  %5626 = vmatprep.mubr.bf16.mxu1 %v4540_v52  ;;  %v12241_v47 = vadd.f32 %v5484_v28, %v5195_v59  ;;  %v12245_v63 = vpop.xlane.xlu0 %2716  ;;  %v8157_v16 = vpop.eup %8156  ;;  %v15313_v59 = vld [vmem:[#allocation258_spill] sm:$0xff] }
 0x3e6   : > { %v5486_v7 = vpop.f32.mrf.mxu1  ;;  %v5198_v22 = vpop.f32.mrf.mxu0  ;;  %5627 = vmatmul.mubr.bf16.gmra.mxu1 %v4539_v4  ;;  %v2823_v28 = vsub.f32 %v15313_v59, %v11160_v10 }
 0x3e7   : > { %v3218_v7 = vsub.f32 %v15307_v21, %v12216_v15  ;;  %v4149_v3 = vmul.f32 1.442695, %v3227_v27  ;;  %15310 = vst [vmem:[#allocation116_spill] sm:$0xff] %v12241_v47  ;;  %v8159_v24 = vpop.eup %8158 }
 0x3e8   : > { %v5487_v32 = vpop.f32.mrf.mxu1  ;;  %v5200_v12 = vpop.f32.mrf.mxu0  ;;  %v3341_v59 = vmul.f32 1.442695, %v2823_v28 }
 0x3e9   : > { %v3220_v12 = vsub.f32 %v15039_v38, %v12216_v15  ;;  %v4131_v17 = vmul.f32 1.442695, %v3218_v7  ;;  %v4147_v38 = vmul.f32 1.442695, %v3226_v55  ;;  %v12247_v56 = vadd.f32 %v5487_v32, %v5198_v22  ;;  %v8161_v21 = vpop.eup %8160  ;;  %v15315_v22 = vld [vmem:[#allocation209_spill] sm:$0xff] }
 0x3ea   : > { %v5489_v36 = vpop.f32.mrf.mxu1  ;;  %8176 = vpow2.f32 %v4149_v3  ;;  %v3233_v32 = vsub.f32 %v15315_v22, %v12245_v63  ;;  %v8163_v29 = vpop.eup %8162  ;;  %v3337_v55 = vmul.f32 1.442695, %v2821_v49 }
 0x3eb   : > { %15312 = vst [vmem:[#allocation120_spill] sm:$0xff] %v12247_v56  ;;  %v4135_v39 = vmul.f32 1.442695, %v3220_v12  ;;  %8178 = vpow2.f32 %v4131_v17  ;;  %v15316_v36 = vld [vmem:[#allocation210_spill] sm:$0xff]  ;;  %v8165_v3 = vpop.eup %8164  ;;  %v15320_v56 = vld [vmem:[#allocation211_spill] sm:$0xff] }
 0x3ec   : > { %v3235_v34 = vsub.f32 %v15316_v36, %v12245_v63  ;;  %8180 = vpow2.f32 %v4147_v38  ;;  %v15319_v17 = vld [vmem:[#allocation214_spill] sm:$0xff]  ;;  %v4546_v22 = vpack.c.bf16 %v8165_v3, %v8163_v29  ;;  %v4161_v38 = vmul.f32 1.442695, %v3233_v32 }
 0x3ed   : > { %8182 = vpow2.f32 %v4135_v39  ;;  %v3234_v47 = vsub.f32 %v15320_v56, %v12245_v63  ;;  %v15321_v39 = vld [vmem:[#allocation215_spill] sm:$0xff]  ;;  %v3244_v56 = vsub.f32 %v14916_v30, %v12251_v48 }
 0x3ee   : > { %v5203_v26 = vpop.f32.mrf.mxu0  ;;  %8184 = vpow2.f32 %v4151_v61  ;;  %5345 = vmatprep.mubr.bf16.mxu0 %v4546_v22  ;;  %v3236_v61 = vsub.f32 %v14915_v2, %v12245_v63  ;;  %v15324_v2 = vld [vmem:[#allocation262_spill] sm:$0xff] }
 0x3ef   : > { %8186 = vpow2.f32 %v3337_v55  ;;  %v4163_v55 = vmul.f32 1.442695, %v3234_v47  ;;  %v15327_v47 = vld [vmem:[#allocation342_spill] sm:$0xff] }
 0x3f0   : > { %v5205_v9 = vpop.f32.mrf.mxu0  ;;  %v5492_v52 = vpop.f32.mrf.mxu1  ;;  %8188 = vpow2.f32 %v3341_v59 }
 0x3f1   : > { %v12253_v4 = vadd.f32 %v5492_v52, %v5203_v26  ;;  %v15317_v9 = vld [vmem:[#allocation213_spill] sm:$0xff]  ;;  %v4545_v26 = vpack.c.bf16 %v8159_v24, %v8155_v14  ;;  %v8167_v52 = vpop.eup %8166  ;;  %8190 = vpow2.f32 %v4161_v38  ;;  %v12285_v38 = vpop.xlane.xlu1 %2743 }
 0x3f2   : > { %v5206_v27 = vpop.f32.mrf.mxu0  ;;  %v5494_v25 = vpop.f32.mrf.mxu1  ;;  %v3241_v60 = vsub.f32 %v15317_v9, %v12251_v48  ;;  %v4165_v9 = vmul.f32 1.442695, %v3235_v34  ;;  %v15323_v34 = vld [vmem:[#allocation261_spill] sm:$0xff]  ;;  %15328 = vst [vmem:[#allocation124_spill] sm:$0xff] %v12285_v38 }
 0x3f3   : > { %15314 = vst [vmem:[#allocation117_spill] sm:$0xff] %v12253_v4  ;;  %v3243_v25 = vsub.f32 %v15319_v17, %v12251_v48  ;;  %v8169_v36 = vpop.eup %8168  ;;  %v4547_v4 = vpack.c.bf16 %v8161_v21, %v8157_v16  ;;  %5346 = vmatmul.mubr.bf16.gmra.mxu0 %v4545_v26  ;;  %v2831_v26 = vsub.f32 %v15324_v2, %v11197_v11 }
 0x3f4   : > { %v5208_v7 = vpop.f32.mrf.mxu0  ;;  %v5495_v12 = vpop.f32.mrf.mxu1  ;;  %v4548_v14 = vpack.c.bf16 %v8169_v36, %v8167_v52  ;;  %v4177_v28 = vmul.f32 1.442695, %v3241_v60  ;;  %8192 = vpow2.f32 %v4165_v9 }
 0x3f5   : > { %v12261_v44 = vadd.f32 %v5495_v12, %v5206_v27  ;;  %v3242_v27 = vsub.f32 %v15321_v39, %v12251_v48  ;;  %v4181_v32 = vmul.f32 1.442695, %v3243_v25  ;;  %v2829_v12 = vsub.f32 %v15323_v34, %v11197_v11  ;;  %v8171_v60 = vpop.eup %8170  ;;  %v12279_v52 = vpop.xlane.xlu0 %2734  ;;  %v15326_v25 = vld [vmem:[#allocation341_spill] sm:$0xff] }
 0x3f6   : > { %v5497_v49 = vpop.f32.mrf.mxu1  ;;  %v5211_v7 = vpop.f32.mrf.mxu0  ;;  %5634 = vmatprep.mubr.bf16.mxu1 %v4548_v14  ;;  %15325 = vst [vmem:[#allocation127_spill] sm:$0xff] %v12279_v52  ;;  %v2989_v22 = vsub.f32 %v15326_v25, %v11732_v8  ;;  %8194 = vpow2.f32 %v4177_v28  ;;  %v4183_v14 = vmul.f32 1.442695, %v3244_v56  ;;  %v15332_v56 = vld [vmem:[#allocation221_spill] sm:$0xff] }
 0x3f7   : > { %15318 = vst [vmem:[#allocation118_spill] sm:$0xff] %v12261_v44  ;;  %5635 = vmatmul.mubr.bf16.gmra.mxu1 %v4547_v4  ;;  %v4179_v59 = vmul.f32 1.442695, %v3242_v27  ;;  %v8173_v30 = vpop.eup %8172  ;;  %v4167_v49 = vmul.f32 1.442695, %v3236_v61  ;;  %v2991_v4 = vsub.f32 %v15327_v47, %v11732_v8  ;;  %8196 = vpow2.f32 %v4181_v32 }
 0x3f8   : > { %v5213_v24 = vpop.f32.mrf.mxu0  ;;  %v8175_v36 = vpop.eup %8174  ;;  %v3353_v27 = vmul.f32 1.442695, %v2829_v12  ;;  %8198 = vpow2.f32 %v4163_v55  ;;  %v3357_v61 = vmul.f32 1.442695, %v2831_v26  ;;  %v3673_v25 = vmul.f32 1.442695, %v2989_v22 }
 0x3f9   : > { %v5500_v29 = vpop.f32.mrf.mxu1  ;;  %v8177_v39 = vpop.eup %8176  ;;  %v15330_v24 = vld [vmem:[#allocation217_spill] sm:$0xff]  ;;  %8200 = vpow2.f32 %v4179_v59  ;;  %v3677_v47 = vmul.f32 1.442695, %v2991_v4  ;;  %v15333_v55 = vld [vmem:[#allocation222_spill] sm:$0xff]  ;;  %v15334_v22 = vld [vmem:[#allocation219_spill] sm:$0xff] }
 0x3fa   : > { %v12273_v16 = vadd.f32 %v5500_v29, %v5211_v7  ;;  %v5214_v21 = vpop.f32.mrf.mxu0  ;;  %v3249_v29 = vsub.f32 %v15330_v24, %v12279_v52  ;;  %v8179_v28 = vpop.eup %8178  ;;  %8202 = vpow2.f32 %v4167_v49  ;;  %v3259_v24 = vsub.f32 %v15333_v55, %v12285_v38 }
 0x3fb   : > { %v5502_v3 = vpop.f32.mrf.mxu1  ;;  %v8181_v32 = vpop.eup %8180  ;;  %8204 = vpow2.f32 %v4183_v14  ;;  %v3250_v44 = vsub.f32 %v15334_v22, %v12279_v52 }
 0x3fc   : > { %15322 = vst [vmem:[#allocation123_spill] sm:$0xff] %v12273_v16  ;;  %v5216_v17 = vpop.f32.mrf.mxu0  ;;  %v15331_v3 = vld [vmem:[#allocation218_spill] sm:$0xff]  ;;  %v8183_v12 = vpop.eup %8182  ;;  %8206 = vpow2.f32 %v3353_v27  ;;  %v4193_v59 = vmul.f32 1.442695, %v3249_v29  ;;  %v4555_v16 = vpack.c.bf16 %v8177_v39, %v8173_v30  ;;  %v3252_v30 = vsub.f32 %v15079_v58, %v12279_v52 }
 0x3fd   : > { %v5503_v7 = vpop.f32.mrf.mxu1  ;;  %v3251_v2 = vsub.f32 %v15331_v3, %v12279_v52  ;;  %v12299_v3 = vpop.xlane.xlu0 %2752  ;;  %8208 = vpow2.f32 %v3357_v61  ;;  %v4213_v29 = vmul.f32 1.442695, %v3259_v24 }
 0x3fe   : > { %v12287_v9 = vadd.f32 %v5503_v7, %v5214_v21  ;;  %v3257_v21 = vsub.f32 %v15332_v56, %v12285_v38  ;;  %v4553_v7 = vpack.c.bf16 %v8175_v36, %v8171_v60  ;;  %v15335_v36 = vld [vmem:[#allocation223_spill] sm:$0xff]  ;;  %8210 = vpow2.f32 %v3673_v25  ;;  %v12307_v27 = vpop.xlane.xlu1 %2761 }
 0x3ff   : > { %v5505_v34 = vpop.f32.mrf.mxu1  ;;  %v12293_v17 = vpop.f32.mrf.mxu0  ;;  %v4197_v60 = vmul.f32 1.442695, %v3251_v2  ;;  %v3258_v4 = vsub.f32 %v15335_v36, %v12285_v38  ;;  %15336 = vst [vmem:[#allocation121_spill] sm:$0xff] %v12307_v27  ;;  %8212 = vpow2.f32 %v3677_v47  ;;  %v15337_v2 = vld [vmem:[#allocation225_spill] sm:$0xff] }
 0x400   : > { %15329 = vst [vmem:[#allocation128_spill] sm:$0xff] %v12287_v9  ;;  %v4554_v34 = vpack.c.bf16 %v8181_v32, %v8179_v28  ;;  %v8185_v9 = vpop.eup %8184  ;;  %v4209_v14 = vmul.f32 1.442695, %v3257_v21  ;;  %8214 = vpow2.f32 %v4193_v59  ;;  %v3265_v32 = vsub.f32 %v15337_v2, %v12299_v3  ;;  %v15339_v47 = vld [vmem:[#allocation229_spill] sm:$0xff]  ;;  %v15342_v2 = vld [vmem:[#allocation234_spill] sm:$0xff] }
 0x401   : > { %v5221_v26 = vpop.f32.mrf.mxu0  ;;  %v4556_v49 = vpack.c.bf16 %v8185_v9, %v8183_v12  ;;  %v12311_v39 = vpop.eup %8186  ;;  %v3260_v9 = vsub.f32 %v15089_v1, %v12285_v38  ;;  %v4195_v21 = vmul.f32 1.442695, %v3250_v44  ;;  %8216 = vpow2.f32 %v4197_v60 }
 0x402   : > { %5353 = vmatprep.mubr.bf16.mxu0 %v4554_v34  ;;  %v12315_v61 = vpop.eup %8188  ;;  %v12319_v25 = vpop.xlane.xlu0 %2770  ;;  %v3273_v55 = vsub.f32 %v15339_v47, %v12307_v27  ;;  %v4211_v1 = vmul.f32 1.442695, %v3258_v4  ;;  %8218 = vpow2.f32 %v4209_v14  ;;  %v15340_v34 = vld [vmem:[#allocation230_spill] sm:$0xff]  ;;  %v4199_v59 = vmul.f32 1.442695, %v3252_v30 }
 0x403   : > { %v12305_v56 = vpop.f32.mrf.mxu0  ;;  %5354 = vmatmul.mubr.bf16.gmra.mxu0 %v4553_v7  ;;  %5642 = vmatprep.mubr.bf16.mxu1 %v4556_v49  ;;  %v8191_v58 = vpop.eup %8190  ;;  %v15338_v7 = vld [vmem:[#allocation226_spill] sm:$0xff]  ;;  %v3275_v26 = vsub.f32 %v15340_v34, %v12307_v27  ;;  %8220 = vpow2.f32 %v4213_v29  ;;  %v4215_v60 = vmul.f32 1.442695, %v3260_v9 }
 0x404   : > { %5643 = vmatmul.mubr.bf16.gmra.mxu1 %v4555_v16  ;;  %v3267_v12 = vsub.f32 %v15338_v7, %v12299_v3  ;;  %v8193_v24 = vpop.eup %8192  ;;  %v15341_v16 = vld [vmem:[#allocation233_spill] sm:$0xff]  ;;  %v12329_v49 = vpop.xlane.xlu1 %2779  ;;  %v3283_v7 = vsub.f32 %v15342_v2, %v12319_v25  ;;  %8222 = vpow2.f32 %v4195_v21  ;;  %v4241_v51 = vmul.f32 1.442695, %v3273_v55 }
 0x405   : > { %v5224_v28 = vpop.f32.mrf.mxu0  ;;  %v8195_v22 = vpop.eup %8194  ;;  %v3281_v44 = vsub.f32 %v15341_v16, %v12319_v25  ;;  %8224 = vpow2.f32 %v4211_v1  ;;  %v4245_v34 = vmul.f32 1.442695, %v3275_v26  ;;  %v3289_v9 = vsub.f32 %v14936_v31, %v12329_v49  ;;  %v15344_v1 = vld [vmem:[#allocation227_spill] sm:$0xff] }
 0x406   : > { %v8197_v36 = vpop.eup %8196  ;;  %v4225_v28 = vmul.f32 1.442695, %v3265_v32  ;;  %v4229_v47 = vmul.f32 1.442695, %v3267_v12  ;;  %v4561_v16 = vpack.c.bf16 %v8195_v22, %v8191_v58  ;;  %8226 = vpow2.f32 %v4199_v59  ;;  %v12344_v59 = vpop.xlane.xlu0 %2788 }
 0x407   : > { %v8199_v14 = vpop.eup %8198  ;;  %v4257_v52 = vmul.f32 1.442695, %v3281_v44  ;;  %v3291_v21 = vsub.f32 %v15119_v13, %v12329_v49  ;;  %8228 = vpow2.f32 %v4215_v60  ;;  %v4261_v55 = vmul.f32 1.442695, %v3283_v7  ;;  %15345 = vst [vmem:[#allocation122_spill] sm:$0xff] %v12344_v59  ;;  %v15347_v13 = vld [vmem:[#allocation231_spill] sm:$0xff] }
 0x408   : > { %v8201_v29 = vpop.eup %8200  ;;  %8230 = vpow2.f32 %v4225_v28  ;;  %v3266_v26 = vsub.f32 %v15344_v1, %v12299_v3  ;;  %v12346_v44 = vpop.xlane.xlu1 %2797  ;;  %v3274_v60 = vsub.f32 %v15347_v13, %v12307_v27  ;;  %v3268_v7 = vsub.f32 %v15100_v62, %v12299_v3  ;;  %v15352_v13 = vld [vmem:[#allocation235_spill] sm:$0xff] }
 0x409   : > { %v8203_v38 = vpop.eup %8202  ;;  %v4562_v2 = vpack.c.bf16 %v8201_v29, %v8199_v14  ;;  %8232 = vpow2.f32 %v4229_v47  ;;  %15346 = vst [vmem:[#allocation126_spill] sm:$0xff] %v12346_v44  ;;  %v4277_v47 = vmul.f32 1.442695, %v3291_v21  ;;  %v3276_v29 = vsub.f32 %v14925_v19, %v12307_v27 }
 0x40a   : > { %v8205_v12 = vpop.eup %8204  ;;  %8234 = vpow2.f32 %v4241_v51  ;;  %v3297_v51 = vsub.f32 %v15107_v0, %v12344_v59  ;;  %v3299_v62 = vsub.f32 %v15126_v46, %v12344_v59  ;;  %v4231_v0 = vmul.f32 1.442695, %v3268_v7 }
 0x40b   : > { %v5508_v4 = vpop.f32.mrf.mxu1  ;;  %v12342_v22 = vpop.eup %8206  ;;  %5361 = vmatprep.mubr.bf16.mxu0 %v4562_v2  ;;  %v4564_v31 = vpack.c.bf16 %v8205_v12, %v8203_v38  ;;  %8236 = vpow2.f32 %v4245_v34  ;;  %v15349_v34 = vld [vmem:[#allocation245_spill] sm:$0xff]  ;;  %v4243_v12 = vmul.f32 1.442695, %v3274_v60  ;;  %v15353_v60 = vld [vmem:[#allocation239_spill] sm:$0xff] }
 0x40c   : > { %v12334_v30 = vadd.f32 %v5508_v4, %v12293_v17  ;;  %v4563_v17 = vpack.c.bf16 %v8197_v36, %v8193_v24  ;;  %v12353_v24 = vpop.eup %8208  ;;  %5362 = vmatmul.mubr.bf16.gmra.mxu0 %v4561_v16  ;;  %v4273_v36 = vmul.f32 1.442695, %v3289_v9  ;;  %8238 = vpow2.f32 %v4257_v52  ;;  %v15351_v52 = vld [vmem:[#allocation246_spill] sm:$0xff] }
 0x40d   : > { %v5510_v32 = vpop.f32.mrf.mxu1  ;;  %v12357_v14 = vpop.eup %8210  ;;  %5650 = vmatprep.mubr.bf16.mxu1 %v4564_v31  ;;  %v4227_v16 = vmul.f32 1.442695, %v3266_v26  ;;  %8240 = vpow2.f32 %v4261_v55  ;;  %v3305_v21 = vsub.f32 %v15349_v34, %v12346_v44  ;;  %v4247_v26 = vmul.f32 1.442695, %v3276_v29 }
 0x40e   : > { %15343 = vst [vmem:[#allocation125_spill] sm:$0xff] %v12334_v30  ;;  %5651 = vmatmul.mubr.bf16.gmra.mxu1 %v4563_v17  ;;  %8242 = vpow2.f32 %v4273_v36  ;;  %v3307_v17 = vsub.f32 %v15351_v52, %v12346_v44  ;;  %v3282_v55 = vsub.f32 %v15352_v13, %v12319_v25  ;;  %v15355_v13 = vld [vmem:[#allocation236_spill] sm:$0xff] }
 0x40f   : > { %v5511_v58 = vpop.f32.mrf.mxu1  ;;  %v4305_v52 = vmul.f32 1.442695, %v3305_v21 }
 0x410   : > { %v12351_v28 = vadd.f32 %v5511_v58, %v12305_v56  ;;  %v12361_v56 = vpop.eup %8212  ;;  %8244 = vpow2.f32 %v4277_v47  ;;  %v4309_v29 = vmul.f32 1.442695, %v3307_v17 }
 0x411   : > { %v5513_v4 = vpop.f32.mrf.mxu1  ;;  %v8215_v2 = vpop.eup %8214  ;;  %8246 = vpow2.f32 %v4227_v16 }
 0x412   : > { %15348 = vst [vmem:[#allocation129_spill] sm:$0xff] %v12351_v28  ;;  %v5227_v38 = vpop.f32.mrf.mxu0  ;;  %v8217_v1 = vpop.eup %8216  ;;  %8248 = vpow2.f32 %v4243_v12  ;;  %v3284_v28 = vsub.f32 %v15355_v13, %v12319_v25 }
 0x413   : > { %v8219_v46 = vpop.eup %8218  ;;  %8250 = vpow2.f32 %v4231_v0 }
 0x414   : > { %v5516_v9 = vpop.f32.mrf.mxu1  ;;  %v5229_v32 = vpop.f32.mrf.mxu0  ;;  %v4569_v47 = vpack.c.bf16 %v8219_v46, %v8215_v2  ;;  %v15357_v2 = vld [vmem:[#allocation243_spill] sm:$0xff] }
 0x415   : > { %v12369_v19 = vadd.f32 %v5516_v9, %v5227_v38  ;;  %v8221_v4 = vpop.eup %8220  ;;  %v4289_v32 = vmul.f32 1.442695, %v3297_v51  ;;  %v3290_v38 = vsub.f32 %v15353_v60, %v12329_v49  ;;  %8252 = vpow2.f32 %v4247_v26  ;;  %v12389_v26 = vpop.xlane.xlu1 %2815 }
 0x416   : > { %v5518_v58 = vpop.f32.mrf.mxu1  ;;  %v5230_v31 = vpop.f32.mrf.mxu0  ;;  %v4259_v60 = vmul.f32 1.442695, %v3282_v55  ;;  %v4571_v12 = vpack.c.bf16 %v8221_v4, %v8217_v1  ;;  %v3298_v17 = vsub.f32 %v15357_v2, %v12344_v59  ;;  %v15358_v55 = vld [vmem:[#allocation247_spill] sm:$0xff]  ;;  %v4263_v4 = vmul.f32 1.442695, %v3284_v28 }
 0x417   : > { %15350 = vst [vmem:[#allocation130_spill] sm:$0xff] %v12369_v19  ;;  %v8223_v34 = vpop.eup %8222  ;;  %v4293_v19 = vmul.f32 1.442695, %v3299_v62  ;;  %8254 = vpow2.f32 %v4289_v32 }
 0x418   : > { %v5519_v9 = vpop.f32.mrf.mxu1  ;;  %v5232_v36 = vpop.f32.mrf.mxu0  ;;  %v4291_v28 = vmul.f32 1.442695, %v3298_v17 }
 0x419   : > { %v12377_v7 = vadd.f32 %v5519_v9, %v5230_v31  ;;  %v8225_v58 = vpop.eup %8224  ;;  %v15356_v36 = vld [vmem:[#allocation240_spill] sm:$0xff]  ;;  %v4275_v31 = vmul.f32 1.442695, %v3290_v38  ;;  %8256 = vpow2.f32 %v4293_v19  ;;  %v3300_v38 = vsub.f32 %v15137_v45, %v12344_v59 }
 0x41a   : > { %v5521_v51 = vpop.f32.mrf.mxu1  ;;  %v5235_v16 = vpop.f32.mrf.mxu0  ;;  %v4570_v27 = vpack.c.bf16 %v8225_v58, %v8223_v34  ;;  %v3292_v62 = vsub.f32 %v15356_v36, %v12329_v49  ;;  %v3306_v58 = vsub.f32 %v15358_v55, %v12346_v44  ;;  %v15360_v36 = vld [vmem:[#allocation248_spill] sm:$0xff] }
 0x41b   : > { %15354 = vst [vmem:[#allocation131_spill] sm:$0xff] %v12377_v7  ;;  %v8227_v30 = vpop.eup %8226  ;;  %v12387_v34 = vpop.xlane.xlu0 %2806  ;;  %8258 = vpow2.f32 %v4305_v52  ;;  %v15362_v52 = vld [vmem:[#allocation251_spill] sm:$0xff] }
 0x41c   : > { %v8229_v21 = vpop.eup %8228  ;;  %v5524_v0 = vpop.f32.mrf.mxu1  ;;  %5369 = vmatprep.mubr.bf16.mxu0 %v4570_v27  ;;  %8260 = vpow2.f32 %v4309_v29  ;;  %v4279_v51 = vmul.f32 1.442695, %v3292_v62  ;;  %v3314_v45 = vsub.f32 %v15362_v52, %v12387_v34  ;;  %v4307_v29 = vmul.f32 1.442695, %v3306_v58  ;;  %v15363_v62 = vld [vmem:[#allocation255_spill] sm:$0xff] }
 0x41d   : > { %v5237_v46 = vpop.f32.mrf.mxu0  ;;  %v12385_v9 = vpop.eup %8230  ;;  %v4572_v13 = vpack.c.bf16 %v8229_v21, %v8227_v30  ;;  %v12393_v32 = vadd.f32 %v5524_v0, %v5235_v16  ;;  %5370 = vmatmul.mubr.bf16.gmra.mxu0 %v4569_v47  ;;  %v3308_v21 = vsub.f32 %v15360_v36, %v12346_v44  ;;  %v15361_v16 = vld [vmem:[#allocation345_spill] sm:$0xff]  ;;  %8262 = vpow2.f32 %v4259_v60 }
 0x41e   : > { %v12395_v1 = vpop.eup %8232  ;;  %v5526_v19 = vpop.f32.mrf.mxu1  ;;  %v2997_v0 = vsub.f32 %v15361_v16, %v11865_v23  ;;  %8264 = vpow2.f32 %v4275_v31  ;;  %v3316_v60 = vsub.f32 %v15140_v20, %v12387_v34  ;;  %v3324_v31 = vsub.f32 %v15144_v53, %v12389_v26 }
 0x41f   : > { %15359 = vst [vmem:[#allocation135_spill] sm:$0xff] %v12393_v32  ;;  %v5238_v27 = vpop.f32.mrf.mxu0  ;;  %v8235_v30 = vpop.eup %8234  ;;  %5658 = vmatprep.mubr.bf16.mxu1 %v4572_v13  ;;  %v3322_v13 = vsub.f32 %v15363_v62, %v12389_v26  ;;  %8266 = vpow2.f32 %v4263_v4  ;;  %v4311_v52 = vmul.f32 1.442695, %v3308_v21  ;;  %v15366_v62 = vld [vmem:[#allocation249_spill] sm:$0xff] }
 0x420   : > { %v12401_v2 = vpop.eup %8236  ;;  %5659 = vmatmul.mubr.bf16.gmra.mxu1 %v4571_v12  ;;  %v5527_v47 = vpop.f32.mrf.mxu1  ;;  %v4295_v12 = vmul.f32 1.442695, %v3300_v38  ;;  %8268 = vpow2.f32 %v4279_v51  ;;  %v3689_v38 = vmul.f32 1.442695, %v2997_v0  ;;  %v3313_v20 = vsub.f32 %v15366_v62, %v12387_v34  ;;  %v15367_v21 = vld [vmem:[#allocation253_spill] sm:$0xff] }
 0x421   : > { %v5240_v46 = vpop.f32.mrf.mxu0  ;;  %v12407_v55 = vpop.eup %8238  ;;  %v12411_v19 = vadd.f32 %v5527_v47, %v5238_v27  ;;  %v15365_v27 = vld [vmem:[#allocation346_spill] sm:$0xff]  ;;  %8270 = vpow2.f32 %v4291_v28  ;;  %v4577_v51 = vpack.c.bf16 %v8235_v30, %v12385_v9  ;;  %v3321_v53 = vsub.f32 %v15367_v21, %v12389_v26 }
 0x422   : > { %v12413_v36 = vpop.eup %8240  ;;  %v5529_v17 = vpop.f32.mrf.mxu1  ;;  %v2999_v47 = vsub.f32 %v15365_v27, %v11865_v23  ;;  %v4323_v46 = vmul.f32 1.442695, %v3314_v45  ;;  %8272 = vpow2.f32 %v4307_v29  ;;  %v4327_v32 = vmul.f32 1.442695, %v3316_v60  ;;  %v15368_v28 = vld [vmem:[#allocation250_spill] sm:$0xff] }
 0x423   : > { %15364 = vst [vmem:[#allocation132_spill] sm:$0xff] %v12411_v19  ;;  %v12417_v16 = vpop.eup %8242  ;;  %v4339_v17 = vmul.f32 1.442695, %v3322_v13  ;;  %8274 = vpow2.f32 %v4295_v12  ;;  %v5243_v7 = vpop.f32.mrf.mxu0  ;;  %v3315_v45 = vsub.f32 %v15368_v28, %v12387_v34  ;;  %v4343_v0 = vmul.f32 1.442695, %v3324_v31  ;;  %v15369_v9 = vld [vmem:[#allocation254_spill] sm:$0xff] }
 0x424   : > { %v12421_v58 = vpop.eup %8244  ;;  %8276 = vpow2.f32 %v4311_v52  ;;  %v5532_v59 = vpop.f32.mrf.mxu1  ;;  %v4579_v29 = vpack.c.bf16 %v12401_v2, %v12395_v1  ;;  %v3323_v30 = vsub.f32 %v15369_v9, %v12389_v26  ;;  %v4321_v21 = vmul.f32 1.442695, %v3313_v20  ;;  %v15372_v2 = vld [vmem:[#allocation259_spill] sm:$0xff] }
 0x425   : > { %v8247_v4 = vpop.eup %8246  ;;  %8278 = vpow2.f32 %v4323_v46  ;;  %v12436_v13 = vadd.f32 %v5532_v59, %v5243_v7  ;;  %v5245_v12 = vpop.f32.mrf.mxu0  ;;  %v4337_v1 = vmul.f32 1.442695, %v3321_v53  ;;  %v2822_v59 = vsub.f32 %v15372_v2, %v11160_v10 }
 0x426   : > { %v8249_v19 = vpop.eup %8248  ;;  %8280 = vpow2.f32 %v4339_v17  ;;  %v5534_v31 = vpop.f32.mrf.mxu1  ;;  %v4325_v9 = vmul.f32 1.442695, %v3315_v45  ;;  %v3693_v12 = vmul.f32 1.442695, %v2999_v47  ;;  %v15375_v45 = vld [vmem:[#allocation260_spill] sm:$0xff] }
 0x427   : > { %v8251_v44 = vpop.eup %8250  ;;  %v4578_v27 = vpack.c.bf16 %v8249_v19, %v8247_v4  ;;  %15370 = vst [vmem:[#allocation136_spill] sm:$0xff] %v12436_v13  ;;  %v15371_v19 = vld [vmem:[#allocation263_spill] sm:$0xff]  ;;  %8282 = vpow2.f32 %v4327_v32  ;;  %v5246_v7 = vpop.f32.mrf.mxu0 }
 0x428   : > { %v8253_v62 = vpop.eup %8252  ;;  %v2830_v52 = vsub.f32 %v15371_v19, %v11197_v11  ;;  %8284 = vpow2.f32 %v4343_v0  ;;  %v5535_v17 = vpop.f32.mrf.mxu1 }
 0x429   : > { %v12438_v60 = vpop.eup %8254  ;;  %5377 = vmatprep.mubr.bf16.mxu0 %v4578_v27  ;;  %v4580_v28 = vpack.c.bf16 %v8253_v62, %v8251_v44  ;;  %v15373_v44 = vld [vmem:[#allocation264_spill] sm:$0xff]  ;;  %8286 = vpow2.f32 %v3689_v38  ;;  %v12452_v53 = vadd.f32 %v5535_v17, %v5246_v7  ;;  %v5248_v32 = vpop.f32.mrf.mxu0  ;;  %v4585_v38 = vpack.c.bf16 %v12417_v16, %v12407_v55 }
 0x42a   : > { %v12442_v4 = vpop.eup %8256  ;;  %5378 = vmatmul.mubr.bf16.gmra.mxu0 %v4577_v51  ;;  %v2832_v20 = vsub.f32 %v15373_v44, %v11197_v11  ;;  %v4341_v51 = vmul.f32 1.442695, %v3323_v30  ;;  %8288 = vpow2.f32 %v4321_v21  ;;  %v3355_v19 = vmul.f32 1.442695, %v2830_v52  ;;  %v5537_v0 = vpop.f32.mrf.mxu1  ;;  %v15376_v11 = vld [vmem:[#allocation369_spill] sm:$0xff]  ;;  %v15377_v44 = vld [vmem:[#allocation370_spill] sm:$0xff] }
 0x42b   : > { %v12446_v46 = vpop.eup %8258  ;;  %5666 = vmatprep.mubr.bf16.mxu1 %v4580_v28  ;;  %15374 = vst [vmem:[#allocation133_spill] sm:$0xff] %v12452_v53  ;;  %v2824_v28 = vsub.f32 %v15375_v45, %v11160_v10  ;;  %v3045_v2 = vsub.f32 %v15376_v11, %v11958_v18  ;;  %8290 = vpow2.f32 %v4337_v1  ;;  %v5251_v30 = vpop.f32.mrf.mxu0  ;;  %v3047_v47 = vsub.f32 %v15377_v44, %v11958_v18  ;;  %v15378_v32 = vld [vmem:[#allocation385_spill] sm:$0xff] }
 0x42c   : > { %v12450_v27 = vpop.eup %8260  ;;  %5667 = vmatmul.mubr.bf16.gmra.mxu1 %v4579_v29  ;;  %v3339_v29 = vmul.f32 1.442695, %v2822_v59  ;;  %8292 = vpow2.f32 %v4325_v9  ;;  %v3359_v52 = vmul.f32 1.442695, %v2832_v20  ;;  %v5540_v17 = vpop.f32.mrf.mxu1  ;;  %v3077_v45 = vsub.f32 %v15378_v32, %v12002_v50  ;;  %v15380_v9 = vld [vmem:[#allocation409_spill] sm:$0xff]  ;;  %v15383_v32 = vld [vmem:[#allocation267_spill] sm:$0xff] }
 0x42d   : > { %v8263_v62 = vpop.eup %8262  ;;  %8294 = vpow2.f32 %v4341_v51  ;;  %v4587_v1 = vpack.c.bf16 %v12421_v58, %v12413_v36  ;;  %v12466_v0 = vadd.f32 %v5540_v17, %v5251_v30  ;;  %v5253_v55 = vpop.f32.mrf.mxu0  ;;  %v3343_v11 = vmul.f32 1.442695, %v2824_v28  ;;  %v15382_v51 = vld [vmem:[#allocation406_spill] sm:$0xff] }
 0x42e   : > { %v8265_v31 = vpop.eup %8264  ;;  %8296 = vpow2.f32 %v3355_v19  ;;  %v3785_v53 = vmul.f32 1.442695, %v3045_v2  ;;  %v2838_v13 = vsub.f32 %v15383_v32, %v15382_v51  ;;  %v3789_v30 = vmul.f32 1.442695, %v3047_v47  ;;  %v15384_v19 = vld [vmem:[#allocation272_spill] sm:$0xff] }
 0x42f   : > { %v8267_v7 = vpop.eup %8266  ;;  %v4586_v21 = vpack.c.bf16 %v8265_v31, %v8263_v62  ;;  %15379 = vst [vmem:[#allocation134_spill] sm:$0xff] %v12466_v0  ;;  %v15381_v62 = vld [vmem:[#allocation271_spill] sm:$0xff]  ;;  %v5542_v31 = vpop.f32.mrf.mxu1  ;;  %8298 = vpow2.f32 %v3339_v29  ;;  %v2848_v28 = vsub.f32 %v15384_v19, %v15380_v9 }
 0x430   : > { %v8269_v10 = vpop.eup %8268  ;;  %v2846_v20 = vsub.f32 %v15381_v62, %v15380_v9  ;;  %v5254_v36 = vpop.f32.mrf.mxu0  ;;  %8300 = vpow2.f32 %v3359_v52  ;;  %v15387_v52 = vld [vmem:[#allocation268_spill] sm:$0xff]  ;;  %v3371_v32 = vmul.f32 1.442695, %v2838_v13 }
 0x431   : > { %v8271_v16 = vpop.eup %8270  ;;  %5385 = vmatprep.mubr.bf16.mxu0 %v4586_v21  ;;  %v4588_v59 = vpack.c.bf16 %v8269_v10, %v8267_v7  ;;  %v5543_v7 = vpop.f32.mrf.mxu1  ;;  %8302 = vpow2.f32 %v3693_v12  ;;  %v15385_v10 = vld [vmem:[#allocation386_spill] sm:$0xff]  ;;  %v4593_v12 = vpack.c.bf16 %v12446_v46, %v12438_v60 }
 0x432   : > { %v8273_v44 = vpop.eup %8272  ;;  %5386 = vmatmul.mubr.bf16.gmra.mxu0 %v4585_v38  ;;  %v3079_v2 = vsub.f32 %v15385_v10, %v12002_v50  ;;  %v3849_v38 = vmul.f32 1.442695, %v3077_v45  ;;  %v12476_v29 = vadd.f32 %v5543_v7, %v5254_v36  ;;  %v5256_v55 = vpop.f32.mrf.mxu0  ;;  %8304 = vpow2.f32 %v3343_v11  ;;  %v15388_v45 = vld [vmem:[#allocation265_spill] sm:$0xff]  ;;  %v15390_v60 = vld [vmem:[#allocation270_spill] sm:$0xff]  ;;  %v15391_v10 = vld [vmem:[#allocation416_spill] sm:$0xff] }
 0x433   : > { %v8275_v58 = vpop.eup %8274  ;;  %5674 = vmatprep.mubr.bf16.mxu1 %v4588_v59  ;;  %v4594_v17 = vpack.c.bf16 %v8273_v44, %v8271_v16  ;;  %v3387_v16 = vmul.f32 1.442695, %v2846_v20  ;;  %v2840_v59 = vsub.f32 %v15387_v52, %v15382_v51  ;;  %v5545_v31 = vpop.f32.mrf.mxu1  ;;  %8306 = vpow2.f32 %v3785_v53  ;;  %v15389_v11 = vld [vmem:[#allocation269_spill] sm:$0xff]  ;;  %v15392_v55 = vld [vmem:[#allocation279_spill] sm:$0xff] }
 0x434   : > { %v8277_v21 = vpop.eup %8276  ;;  %5675 = vmatmul.mubr.bf16.gmra.mxu1 %v4587_v1  ;;  %15386 = vst [vmem:[#allocation137_spill] sm:$0xff] %v12476_v29  ;;  %v2837_v1 = vsub.f32 %v15388_v45, %v15382_v51  ;;  %8308 = vpow2.f32 %v3789_v30  ;;  %v2845_v20 = vsub.f32 %v15389_v11, %v15380_v9  ;;  %v3853_v7 = vmul.f32 1.442695, %v3079_v2  ;;  %v15393_v2 = vld [vmem:[#allocation24_spill] sm:$0xff]  ;;  %v15394_v52 = vld [vmem:[#allocation275_spill] sm:$0xff] }
 0x435   : > { %v8279_v62 = vpop.eup %8278  ;;  %5393 = vmatprep.mubr.bf16.mxu0 %v4594_v17  ;;  %v4596_v47 = vpack.c.bf16 %v8277_v21, %v8275_v58  ;;  %v3391_v58 = vmul.f32 1.442695, %v2848_v28  ;;  %8310 = vpow2.f32 %v3849_v38  ;;  %v4595_v53 = vpack.c.bf16 %v12450_v27, %v12442_v4  ;;  %v5548_v45 = vpop.f32.mrf.mxu1 }
 0x436   : > { %v8281_v44 = vpop.eup %8280  ;;  %v2847_v13 = vsub.f32 %v15390_v60, %v15380_v9  ;;  %8312 = vpow2.f32 %v3387_v16  ;;  %v3375_v30 = vmul.f32 1.442695, %v2840_v59  ;;  %v2862_v28 = vsub.f32 %v15392_v55, %v15391_v10  ;;  %v15395_v9 = vld [vmem:[#allocation266_spill] sm:$0xff]  ;;  %v15396_v16 = vld [vmem:[#allocation280_spill] sm:$0xff] }
 0x437   : > { %v8283_v36 = vpop.eup %8282  ;;  %5682 = vmatprep.mubr.bf16.mxu1 %v4596_v47  ;;  %v4602_v17 = vpack.c.bf16 %v8281_v44, %v8279_v62  ;;  %v5259_v62 = vpop.f32.mrf.mxu0  ;;  %8314 = vpow2.f32 %v3371_v32  ;;  %v3369_v38 = vmul.f32 1.442695, %v2837_v1  ;;  %v2854_v31 = vsub.f32 %v15394_v52, %v15393_v2 }
 0x438   : > { %v8285_v19 = vpop.eup %8284  ;;  %8316 = vpow2.f32 %v3391_v58  ;;  %v3385_v27 = vmul.f32 1.442695, %v2845_v20  ;;  %v2839_v44 = vsub.f32 %v15395_v9, %v15382_v51  ;;  %v2864_v59 = vsub.f32 %v15396_v16, %v15391_v10  ;;  %v15398_v58 = vld [vmem:[#allocation276_spill] sm:$0xff]  ;;  %v15399_v9 = vld [vmem:[#allocation273_spill] sm:$0xff] }
 0x439   : > { %v12490_v46 = vpop.eup %8286  ;;  %v4604_v21 = vpack.c.bf16 %v8285_v19, %v8283_v36  ;;  %v5261_v36 = vpop.f32.mrf.mxu0  ;;  %8318 = vpow2.f32 %v3853_v7  ;;  %v12500_v32 = vadd.f32 %v5548_v45, %v5259_v62  ;;  %v2856_v20 = vsub.f32 %v15398_v58, %v15393_v2  ;;  %v15401_v58 = vld [vmem:[#allocation278_spill] sm:$0xff] }
 0x43a   : > { %v8289_v47 = vpop.eup %8288  ;;  %5394 = vmatmul.mubr.bf16.gmra.mxu0 %v4593_v12  ;;  %v3389_v12 = vmul.f32 1.442695, %v2847_v13  ;;  %8320 = vpow2.f32 %v3375_v30  ;;  %v5550_v19 = vpop.f32.mrf.mxu1  ;;  %v3403_v52 = vmul.f32 1.442695, %v2854_v31  ;;  %v2853_v7 = vsub.f32 %v15399_v9, %v15393_v2 }
 0x43b   : > { %v8291_v4 = vpop.eup %8290  ;;  %5401 = vmatprep.mubr.bf16.mxu0 %v4602_v17  ;;  %15397 = vst [vmem:[#allocation138_spill] sm:$0xff] %v12500_v32  ;;  %v3419_v17 = vmul.f32 1.442695, %v2862_v28  ;;  %v5262_v51 = vpop.f32.mrf.mxu0  ;;  %8322 = vpow2.f32 %v3369_v38  ;;  %v3373_v13 = vmul.f32 1.442695, %v2839_v44  ;;  %v15403_v44 = vld [vmem:[#allocation176_spill] sm:$0xff] }
 0x43c   : > { %v8293_v11 = vpop.eup %8292  ;;  %5683 = vmatmul.mubr.bf16.gmra.mxu1 %v4595_v53  ;;  %v4601_v55 = vpack.c.bf16 %v8291_v4, %v8289_v47  ;;  %8324 = vpow2.f32 %v3385_v27  ;;  %v3423_v62 = vmul.f32 1.442695, %v2864_v59  ;;  %v5551_v28 = vpop.f32.mrf.mxu1  ;;  %v2863_v47 = vsub.f32 %v15401_v58, %v15391_v10  ;;  %v15404_v59 = vld [vmem:[#allocation287_spill] sm:$0xff] }
 0x43d   : > { %v8295_v1 = vpop.eup %8294  ;;  %5690 = vmatprep.mubr.bf16.mxu1 %v4604_v21  ;;  %v15400_v21 = vld [vmem:[#allocation277_spill] sm:$0xff]  ;;  %v5264_v16 = vpop.f32.mrf.mxu0  ;;  %8326 = vpow2.f32 %v3389_v12  ;;  %v12510_v38 = vadd.f32 %v5551_v28, %v5262_v51  ;;  %v3407_v27 = vmul.f32 1.442695, %v2856_v20  ;;  %v2878_v19 = vsub.f32 %v15404_v59, %v15403_v44  ;;  %v15408_v20 = vld [vmem:[#allocation288_spill] sm:$0xff] }
 0x43e   : > { %v8297_v60 = vpop.eup %8296  ;;  %v2861_v30 = vsub.f32 %v15400_v21, %v15391_v10  ;;  %v4603_v36 = vpack.c.bf16 %v8295_v1, %v8293_v11  ;;  %8328 = vpow2.f32 %v3419_v17  ;;  %v5553_v9 = vpop.f32.mrf.mxu1  ;;  %v3401_v16 = vmul.f32 1.442695, %v2853_v7  ;;  %v15405_v11 = vld [vmem:[#allocation274_spill] sm:$0xff]  ;;  %v15406_v1 = vld [vmem:[#allocation421_spill] sm:$0xff]  ;;  %v15407_v10 = vld [vmem:[#allocation283_spill] sm:$0xff] }
 0x43f   : > { %v8299_v53 = vpop.eup %8298  ;;  %15402 = vst [vmem:[#allocation139_spill] sm:$0xff] %v12510_v38  ;;  %8330 = vpow2.f32 %v3403_v52  ;;  %v2855_v12 = vsub.f32 %v15405_v11, %v15393_v2  ;;  %v2870_v51 = vsub.f32 %v15407_v10, %v15406_v1  ;;  %v15409_v52 = vld [vmem:[#allocation284_spill] sm:$0xff]  ;;  %v5267_v7 = vpop.f32.mrf.mxu0 }
 0x440   : > { %v8301_v45 = vpop.eup %8300  ;;  %v4358_v4 = vpack.c.bf16 %v8297_v60, %v8299_v53  ;;  %8332 = vpow2.f32 %v3423_v62  ;;  %v3417_v17 = vmul.f32 1.442695, %v2861_v30  ;;  %v2880_v53 = vsub.f32 %v15408_v20, %v15403_v44  ;;  %v15410_v30 = vld [vmem:[#allocation281_spill] sm:$0xff]  ;;  %v5556_v9 = vpop.f32.mrf.mxu1 }
 0x441   : > { %v12512_v31 = vpop.eup %8302  ;;  %8334 = vpow2.f32 %v3373_v13  ;;  %v2872_v2 = vsub.f32 %v15409_v52, %v15406_v1  ;;  %v3451_v62 = vmul.f32 1.442695, %v2878_v19  ;;  %v3435_v13 = vmul.f32 1.442695, %v2870_v51  ;;  %v5269_v10 = vpop.f32.mrf.mxu0 }
 0x442   : > { %v8305_v21 = vpop.eup %8304  ;;  %5402 = vmatmul.mubr.bf16.gmra.mxu0 %v4601_v55  ;;  %v3421_v55 = vmul.f32 1.442695, %v2863_v47  ;;  %8336 = vpow2.f32 %v3407_v27  ;;  %v12536_v11 = vadd.f32 %v5556_v9, %v5267_v7  ;;  %v5558_v27 = vpop.f32.mrf.mxu1 }
 0x443   : > { %v12520_v28 = vpop.eup %8306  ;;  %5731 = vmatprep.mubr.bf16.mxu0 %v4358_v4  ;;  %v4360_v60 = vpack.c.bf16 %v8301_v45, %v8305_v21  ;;  %v4357_v45 = vpack.c.bf16 %v12342_v22, %v12311_v39  ;;  %v2869_v4 = vsub.f32 %v15410_v30, %v15406_v1  ;;  %8338 = vpow2.f32 %v3401_v16  ;;  %v15413_v16 = vld [vmem:[#allocation282_spill] sm:$0xff]  ;;  %v5270_v7 = vpop.f32.mrf.mxu0  ;;  %v15418_v27 = vld [vmem:[#allocation291_spill] sm:$0xff] }
 0x444   : > { %v12524_v58 = vpop.eup %8308  ;;  %5691 = vmatmul.mubr.bf16.gmra.mxu1 %v4603_v36  ;;  %v15411_v36 = vld [vmem:[#allocation285_spill] sm:$0xff]  ;;  %15412 = vst [vmem:[#allocation143_spill] sm:$0xff] %v12536_v11  ;;  %8340 = vpow2.f32 %v3417_v17  ;;  %v3405_v39 = vmul.f32 1.442695, %v2855_v12  ;;  %v3455_v22 = vmul.f32 1.442695, %v2880_v53  ;;  %v2871_v51 = vsub.f32 %v15413_v16, %v15406_v1  ;;  %v5559_v17 = vpop.f32.mrf.mxu1 }
 0x445   : > { %v12528_v59 = vpop.eup %8310  ;;  %6020 = vmatprep.mubr.bf16.mxu1 %v4360_v60  ;;  %v2877_v47 = vsub.f32 %v15411_v36, %v15403_v44  ;;  %v4359_v60 = vpack.c.bf16 %v12353_v24, %v12315_v61  ;;  %8342 = vpow2.f32 %v3421_v55  ;;  %v3439_v52 = vmul.f32 1.442695, %v2872_v2  ;;  %v15414_v30 = vld [vmem:[#allocation286_spill] sm:$0xff]  ;;  %v15415_v61 = vld [vmem:[#allocation393_spill] sm:$0xff]  ;;  %v15416_v24 = vld [vmem:[#allocation295_spill] sm:$0xff] }
 0x446   : > { %v8313_v21 = vpop.eup %8312  ;;  %v2879_v36 = vsub.f32 %v15414_v30, %v15403_v44  ;;  %8344 = vpow2.f32 %v3451_v62  ;;  %v3433_v11 = vmul.f32 1.442695, %v2869_v4  ;;  %v2894_v12 = vsub.f32 %v15416_v24, %v15415_v61  ;;  %v15417_v2 = vld [vmem:[#allocation25_spill] sm:$0xff]  ;;  %v5272_v44 = vpop.f32.mrf.mxu0  ;;  %v15420_v62 = vld [vmem:[#allocation292_spill] sm:$0xff] }
 0x447   : > { %v8315_v20 = vpop.eup %8314  ;;  %8346 = vpow2.f32 %v3435_v13  ;;  %v3449_v55 = vmul.f32 1.442695, %v2877_v47  ;;  %v2886_v1 = vsub.f32 %v15418_v27, %v15417_v2  ;;  %v12550_v16 = vadd.f32 %v5559_v17, %v5270_v7  ;;  %v5561_v24 = vpop.f32.mrf.mxu1  ;;  %v15422_v17 = vld [vmem:[#allocation289_spill] sm:$0xff] }
 0x448   : > { %v8317_v19 = vpop.eup %8316  ;;  %v4366_v10 = vpack.c.bf16 %v8313_v21, %v8315_v20  ;;  %8348 = vpow2.f32 %v3455_v22  ;;  %v2888_v4 = vsub.f32 %v15420_v62, %v15417_v2  ;;  %v15421_v21 = vld [vmem:[#allocation296_spill] sm:$0xff]  ;;  %v3453_v13 = vmul.f32 1.442695, %v2879_v36  ;;  %v15423_v27 = vld [vmem:[#allocation293_spill] sm:$0xff]  ;;  %v15425_v24 = vld [vmem:[#allocation294_spill] sm:$0xff] }
 0x449   : > { %v12544_v9 = vpop.eup %8318  ;;  %15419 = vst [vmem:[#allocation140_spill] sm:$0xff] %v12550_v16  ;;  %v2896_v20 = vsub.f32 %v15421_v21, %v15415_v61  ;;  %8350 = vpow2.f32 %v3405_v39  ;;  %v3483_v7 = vmul.f32 1.442695, %v2894_v12  ;;  %v3437_v22 = vmul.f32 1.442695, %v2871_v51  ;;  %v15424_v39 = vld [vmem:[#allocation290_spill] sm:$0xff]  ;;  %v5564_v29 = vpop.f32.mrf.mxu1 }
 0x44a   : > { %v8321_v53 = vpop.eup %8320  ;;  %5732 = vmatmul.mubr.bf16.vlgmr.msra.gmra.mxu0 %v4357_v45  ;;  %8352 = vpow2.f32 %v3439_v52  ;;  %v2893_v44 = vsub.f32 %v15423_v27, %v15415_v61  ;;  %v3471_v21 = vmul.f32 1.442695, %v2888_v4  ;;  %v2887_v36 = vsub.f32 %v15424_v39, %v15417_v2  ;;  %v15427_v51 = vld [vmem:[#allocation299_spill] sm:$0xff] }
 0x44b   : > { %v8323_v30 = vpop.eup %8322  ;;  %5739 = vmatprep.mubr.bf16.mxu0 %v4366_v10  ;;  %v4368_v38 = vpack.c.bf16 %v8317_v19, %v8321_v53  ;;  %v2885_v10 = vsub.f32 %v15422_v17, %v15417_v2  ;;  %8354 = vpow2.f32 %v3433_v11  ;;  %v3467_v53 = vmul.f32 1.442695, %v2886_v1  ;;  %v15426_v11 = vld [vmem:[#allocation37_spill] sm:$0xff]  ;;  %v15429_v4 = vld [vmem:[#allocation303_spill] sm:$0xff] }
 0x44c   : > { %v8325_v45 = vpop.eup %8324  ;;  %6021 = vmatmul.mubr.bf16.vlgmr.msra.gmra.mxu1 %v4359_v60  ;;  %8356 = vpow2.f32 %v3449_v55  ;;  %v3487_v60 = vmul.f32 1.442695, %v2896_v20  ;;  %v2895_v17 = vsub.f32 %v15425_v24, %v15415_v61  ;;  %v2902_v1 = vsub.f32 %v15427_v51, %v15426_v11  ;;  %v15428_v55 = vld [vmem:[#allocation34_spill] sm:$0xff]  ;;  %v5566_v24 = vpop.f32.mrf.mxu1 }
 0x44d   : > { %v8327_v47 = vpop.eup %8326  ;;  %6028 = vmatprep.mubr.bf16.mxu1 %v4368_v38  ;;  %v5275_v38 = vpop.f32.mrf.mxu0  ;;  %v4365_v12 = vpack.c.bf16 %v8325_v45, %v8323_v30  ;;  %8358 = vpow2.f32 %v3453_v13  ;;  %v3465_v27 = vmul.f32 1.442695, %v2885_v10  ;;  %v2910_v20 = vsub.f32 %v15429_v4, %v15428_v55  ;;  %v15432_v10 = vld [vmem:[#allocation304_spill] sm:$0xff] }
 0x44e   : > { %v8329_v19 = vpop.eup %8328  ;;  %8360 = vpow2.f32 %v3483_v7  ;;  %v3481_v30 = vmul.f32 1.442695, %v2893_v44  ;;  %v12568_v45 = vadd.f32 %v5564_v29, %v5275_v38  ;;  %v15434_v44 = vld [vmem:[#allocation301_spill] sm:$0xff]  ;;  %v5567_v38 = vpop.f32.mrf.mxu1  ;;  %v3499_v4 = vmul.f32 1.442695, %v2902_v1 }
 0x44f   : > { %v8331_v62 = vpop.eup %8330  ;;  %v5277_v0 = vpop.f32.mrf.mxu0  ;;  %8362 = vpow2.f32 %v3467_v53  ;;  %v15437_v1 = vld [vmem:[#allocation45_spill] sm:$0xff] }
 0x450   : > { %v8333_v52 = vpop.eup %8332  ;;  %v4374_v32 = vpack.c.bf16 %v8329_v19, %v8331_v62  ;;  %15430 = vst [vmem:[#allocation144_spill] sm:$0xff] %v12568_v45  ;;  %8364 = vpow2.f32 %v3487_v60  ;;  %v15431_v19 = vld [vmem:[#allocation300_spill] sm:$0xff]  ;;  %v2912_v62 = vsub.f32 %v15432_v10, %v15428_v55  ;;  %v2909_v60 = vsub.f32 %v15434_v44, %v15428_v55  ;;  %v5569_v10 = vpop.f32.mrf.mxu1 }
 0x451   : > { %v8335_v16 = vpop.eup %8334  ;;  %v2904_v7 = vsub.f32 %v15431_v19, %v15426_v11  ;;  %v5278_v51 = vpop.f32.mrf.mxu0  ;;  %8366 = vpow2.f32 %v3437_v22  ;;  %v3469_v22 = vmul.f32 1.442695, %v2887_v36 }
 0x452   : > { %v8337_v2 = vpop.eup %8336  ;;  %5740 = vmatmul.mubr.bf16.gmra.mxu0 %v4365_v12  ;;  %v4367_v39 = vpack.c.bf16 %v8327_v47, %v8335_v16  ;;  %v3485_v16 = vmul.f32 1.442695, %v2895_v17  ;;  %v15433_v47 = vld [vmem:[#allocation297_spill] sm:$0xff]  ;;  %8368 = vpow2.f32 %v3471_v21  ;;  %v3519_v19 = vmul.f32 1.442695, %v2912_v62  ;;  %v15441_v62 = vld [vmem:[#allocation307_spill] sm:$0xff]  ;;  %v5572_v10 = vpop.f32.mrf.mxu1 }
 0x453   : > { %v8339_v61 = vpop.eup %8338  ;;  %5747 = vmatprep.mubr.bf16.mxu0 %v4374_v32  ;;  %v4376_v13 = vpack.c.bf16 %v8333_v52, %v8337_v2  ;;  %v2901_v29 = vsub.f32 %v15433_v47, %v15426_v11  ;;  %v3515_v32 = vmul.f32 1.442695, %v2910_v20  ;;  %v5280_v52 = vpop.f32.mrf.mxu0  ;;  %8370 = vpow2.f32 %v3465_v27  ;;  %v15436_v20 = vld [vmem:[#allocation302_spill] sm:$0xff] }
 0x454   : > { %v8341_v0 = vpop.eup %8340  ;;  %6029 = vmatmul.mubr.bf16.gmra.mxu1 %v4367_v39  ;;  %v12578_v2 = vadd.f32 %v5567_v38, %v5278_v51  ;;  %8372 = vpow2.f32 %v3481_v30  ;;  %v3503_v17 = vmul.f32 1.442695, %v2904_v7  ;;  %v2911_v47 = vsub.f32 %v15436_v20, %v15428_v55  ;;  %v15438_v51 = vld [vmem:[#allocation311_spill] sm:$0xff]  ;;  %v15439_v30 = vld [vmem:[#allocation298_spill] sm:$0xff] }
 0x455   : > { %v8343_v53 = vpop.eup %8342  ;;  %6036 = vmatprep.mubr.bf16.mxu1 %v4376_v13  ;;  %v4373_v13 = vpack.c.bf16 %v8341_v0, %v8339_v61  ;;  %8374 = vpow2.f32 %v3485_v16  ;;  %v3497_v21 = vmul.f32 1.442695, %v2901_v29  ;;  %v3513_v27 = vmul.f32 1.442695, %v2909_v60  ;;  %v15440_v61 = vld [vmem:[#allocation41_spill] sm:$0xff]  ;;  %v5283_v16 = vpop.f32.mrf.mxu0 }
 0x456   : > { %v8345_v12 = vpop.eup %8344  ;;  %15435 = vst [vmem:[#allocation141_spill] sm:$0xff] %v12578_v2  ;;  %8376 = vpow2.f32 %v3515_v32  ;;  %v2926_v38 = vsub.f32 %v15438_v51, %v15437_v1  ;;  %v2903_v7 = vsub.f32 %v15439_v30, %v15426_v11  ;;  %v2918_v0 = vsub.f32 %v15441_v62, %v15440_v61  ;;  %v15442_v32 = vld [vmem:[#allocation308_spill] sm:$0xff]  ;;  %v15446_v62 = vld [vmem:[#allocation309_spill] sm:$0xff] }
 0x457   : > { %v8347_v39 = vpop.eup %8346  ;;  %8378 = vpow2.f32 %v3499_v4  ;;  %v2920_v60 = vsub.f32 %v15442_v32, %v15440_v61  ;;  %v3517_v4 = vmul.f32 1.442695, %v2911_v47  ;;  %v12592_v11 = vadd.f32 %v5572_v10, %v5283_v16 }
 0x458   : > { %v8349_v24 = vpop.eup %8348  ;;  %v4382_v52 = vpack.c.bf16 %v8345_v12, %v8347_v39  ;;  %8380 = vpow2.f32 %v3519_v19  ;;  %v15443_v12 = vld [vmem:[#allocation312_spill] sm:$0xff]  ;;  %v3501_v51 = vmul.f32 1.442695, %v2903_v7  ;;  %v3531_v30 = vmul.f32 1.442695, %v2918_v0 }
 0x459   : > { %v8351_v44 = vpop.eup %8350  ;;  %v2928_v39 = vsub.f32 %v15443_v12, %v15437_v1  ;;  %8382 = vpow2.f32 %v3469_v22  ;;  %15444 = vst [vmem:[#allocation142_spill] sm:$0xff] %v12592_v11  ;;  %v3535_v16 = vmul.f32 1.442695, %v2920_v60  ;;  %v15451_v60 = vld [vmem:[#allocation319_spill] sm:$0xff] }
 0x45a   : > { %v8353_v2 = vpop.eup %8352  ;;  %5748 = vmatmul.mubr.bf16.gmra.mxu0 %v4373_v13  ;;  %v4375_v36 = vpack.c.bf16 %v8343_v53, %v8351_v44  ;;  %v5285_v13 = vpop.f32.mrf.mxu0  ;;  %8384 = vpow2.f32 %v3503_v17  ;;  %v3547_v44 = vmul.f32 1.442695, %v2926_v38 }
 0x45b   : > { %v8355_v29 = vpop.eup %8354  ;;  %5755 = vmatprep.mubr.bf16.mxu0 %v4382_v52  ;;  %v4384_v55 = vpack.c.bf16 %v8349_v24, %v8353_v2  ;;  %v15445_v2 = vld [vmem:[#allocation305_spill] sm:$0xff]  ;;  %v5574_v24 = vpop.f32.mrf.mxu1  ;;  %8386 = vpow2.f32 %v3497_v21  ;;  %v3551_v32 = vmul.f32 1.442695, %v2928_v39  ;;  %v15448_v13 = vld [vmem:[#allocation310_spill] sm:$0xff] }
 0x45c   : > { %v8357_v53 = vpop.eup %8356  ;;  %6037 = vmatmul.mubr.bf16.gmra.mxu1 %v4375_v36  ;;  %v2917_v19 = vsub.f32 %v15445_v2, %v15440_v61  ;;  %v2925_v36 = vsub.f32 %v15446_v62, %v15437_v1  ;;  %v5286_v22 = vpop.f32.mrf.mxu0  ;;  %8388 = vpow2.f32 %v3513_v27  ;;  %v2927_v21 = vsub.f32 %v15448_v13, %v15437_v1  ;;  %v15450_v27 = vld [vmem:[#allocation56_spill] sm:$0xff] }
 0x45d   : > { %v8359_v20 = vpop.eup %8358  ;;  %6044 = vmatprep.mubr.bf16.mxu1 %v4384_v55  ;;  %v15447_v55 = vld [vmem:[#allocation306_spill] sm:$0xff]  ;;  %v5575_v38 = vpop.f32.mrf.mxu1  ;;  %v4381_v10 = vpack.c.bf16 %v8357_v53, %v8355_v29  ;;  %8390 = vpow2.f32 %v3517_v4  ;;  %v2942_v39 = vsub.f32 %v15451_v60, %v15450_v27  ;;  %v15452_v53 = vld [vmem:[#allocation399_spill] sm:$0xff] }
 0x45e   : > { %v8361_v52 = vpop.eup %8360  ;;  %v2919_v17 = vsub.f32 %v15447_v55, %v15440_v61  ;;  %v12602_v7 = vadd.f32 %v5575_v38, %v5286_v22  ;;  %v5288_v0 = vpop.f32.mrf.mxu0  ;;  %8392 = vpow2.f32 %v3547_v44  ;;  %v3529_v62 = vmul.f32 1.442695, %v2917_v19  ;;  %v15453_v4 = vld [vmem:[#allocation315_spill] sm:$0xff]  ;;  %v15455_v19 = vld [vmem:[#allocation320_spill] sm:$0xff] }
 0x45f   : > { %v8363_v47 = vpop.eup %8362  ;;  %v5577_v11 = vpop.f32.mrf.mxu1  ;;  %8394 = vpow2.f32 %v3531_v30  ;;  %v3545_v29 = vmul.f32 1.442695, %v2925_v36  ;;  %v2934_v55 = vsub.f32 %v15453_v4, %v15452_v53  ;;  %v3579_v13 = vmul.f32 1.442695, %v2942_v39  ;;  %v15458_v39 = vld [vmem:[#allocation318_spill] sm:$0xff] }
 0x460   : > { %v8365_v12 = vpop.eup %8364  ;;  %15449 = vst [vmem:[#allocation145_spill] sm:$0xff] %v12602_v7  ;;  %v4390_v24 = vpack.c.bf16 %v8361_v52, %v8363_v47  ;;  %8396 = vpow2.f32 %v3551_v32  ;;  %v15454_v52 = vld [vmem:[#allocation316_spill] sm:$0xff]  ;;  %v2944_v47 = vsub.f32 %v15455_v19, %v15450_v27  ;;  %v3549_v11 = vmul.f32 1.442695, %v2927_v21  ;;  %v5291_v36 = vpop.f32.mrf.mxu0 }
 0x461   : > { %v8367_v2 = vpop.eup %8366  ;;  %v2936_v44 = vsub.f32 %v15454_v52, %v15452_v53  ;;  %8398 = vpow2.f32 %v3501_v51  ;;  %v3533_v21 = vmul.f32 1.442695, %v2919_v17 }
 0x462   : > { %v8369_v45 = vpop.eup %8368  ;;  %5756 = vmatmul.mubr.bf16.gmra.mxu0 %v4381_v10  ;;  %v4383_v61 = vpack.c.bf16 %v8359_v20, %v8367_v2  ;;  %v15456_v20 = vld [vmem:[#allocation313_spill] sm:$0xff]  ;;  %8400 = vpow2.f32 %v3535_v16  ;;  %v3563_v2 = vmul.f32 1.442695, %v2934_v55  ;;  %v5293_v60 = vpop.f32.mrf.mxu0  ;;  %v3583_v4 = vmul.f32 1.442695, %v2944_v47 }
 0x463   : > { %v8371_v1 = vpop.eup %8370  ;;  %5763 = vmatprep.mubr.bf16.mxu0 %v4390_v24  ;;  %v4392_v22 = vpack.c.bf16 %v8365_v12, %v8369_v45  ;;  %v2933_v30 = vsub.f32 %v15456_v20, %v15452_v53  ;;  %v15457_v45 = vld [vmem:[#allocation317_spill] sm:$0xff]  ;;  %v5580_v12 = vpop.f32.mrf.mxu1  ;;  %8402 = vpow2.f32 %v3529_v62  ;;  %v2943_v20 = vsub.f32 %v15458_v39, %v15450_v27 }
 0x464   : > { %v8373_v38 = vpop.eup %8372  ;;  %6045 = vmatmul.mubr.bf16.gmra.mxu1 %v4383_v61  ;;  %v2941_v32 = vsub.f32 %v15457_v45, %v15450_v27  ;;  %v12616_v24 = vadd.f32 %v5580_v12, %v5291_v36  ;;  %8404 = vpow2.f32 %v3545_v29  ;;  %v3567_v61 = vmul.f32 1.442695, %v2936_v44  ;;  %v5294_v45 = vpop.f32.mrf.mxu0  ;;  %v15459_v36 = vld [vmem:[#allocation431_spill] sm:$0xff]  ;;  %v15461_v47 = vld [vmem:[#allocation57_spill] sm:$0xff] }
 0x465   : > { %v8375_v10 = vpop.eup %8374  ;;  %6052 = vmatprep.mubr.bf16.mxu1 %v4392_v22  ;;  %v5582_v52 = vpop.f32.mrf.mxu1  ;;  %v4389_v22 = vpack.c.bf16 %v8373_v38, %v8371_v1  ;;  %8406 = vpow2.f32 %v3549_v11  ;;  %v3561_v16 = vmul.f32 1.442695, %v2933_v30  ;;  %v15460_v12 = vld [vmem:[#allocation327_spill] sm:$0xff] }
 0x466   : > { %v8377_v0 = vpop.eup %8376  ;;  %8408 = vpow2.f32 %v3579_v13  ;;  %v3577_v55 = vmul.f32 1.442695, %v2941_v32  ;;  %v2958_v60 = vsub.f32 %v15460_v12, %v15459_v36  ;;  %v15462_v1 = vld [vmem:[#allocation323_spill] sm:$0xff]  ;;  %v5296_v30 = vpop.f32.mrf.mxu0  ;;  %v15464_v13 = vld [vmem:[#allocation314_spill] sm:$0xff] }
 0x467   : > { %v8379_v51 = vpop.eup %8378  ;;  %v5583_v29 = vpop.f32.mrf.mxu1  ;;  %8410 = vpow2.f32 %v3563_v2  ;;  %v2950_v38 = vsub.f32 %v15462_v1, %v15461_v47  ;;  %v2935_v32 = vsub.f32 %v15464_v13, %v15452_v53  ;;  %v15467_v53 = vld [vmem:[#allocation321_spill] sm:$0xff] }
 0x468   : > { %v8381_v19 = vpop.eup %8380  ;;  %v4398_v62 = vpack.c.bf16 %v8377_v0, %v8379_v51  ;;  %v12624_v11 = vadd.f32 %v5583_v29, %v5294_v45  ;;  %8412 = vpow2.f32 %v3583_v4  ;;  %v15465_v0 = vld [vmem:[#allocation328_spill] sm:$0xff]  ;;  %v2949_v12 = vsub.f32 %v15467_v53, %v15461_v47 }
 0x469   : > { %v8383_v7 = vpop.eup %8382  ;;  %v2960_v51 = vsub.f32 %v15465_v0, %v15459_v36  ;;  %v5585_v39 = vpop.f32.mrf.mxu1  ;;  %8414 = vpow2.f32 %v3533_v21  ;;  %v3595_v4 = vmul.f32 1.442695, %v2950_v38  ;;  %v15468_v21 = vld [vmem:[#allocation325_spill] sm:$0xff]  ;;  %v15470_v38 = vld [vmem:[#allocation322_spill] sm:$0xff] }
 0x46a   : > { %v8385_v17 = vpop.eup %8384  ;;  %5764 = vmatmul.mubr.bf16.gmra.mxu0 %v4389_v22  ;;  %v4391_v44 = vpack.c.bf16 %v8375_v10, %v8383_v7  ;;  %15463 = vst [vmem:[#allocation146_spill] sm:$0xff] %v12624_v11  ;;  %v3581_v7 = vmul.f32 1.442695, %v2943_v20  ;;  %v15466_v10 = vld [vmem:[#allocation324_spill] sm:$0xff]  ;;  %8416 = vpow2.f32 %v3567_v61  ;;  %v2957_v20 = vsub.f32 %v15468_v21, %v15459_v36  ;;  %v15469_v61 = vld [vmem:[#allocation326_spill] sm:$0xff] }
 0x46b   : > { %v8387_v27 = vpop.eup %8386  ;;  %5771 = vmatprep.mubr.bf16.mxu0 %v4398_v62  ;;  %v4400_v52 = vpack.c.bf16 %v8381_v19, %v8385_v17  ;;  %v2952_v2 = vsub.f32 %v15466_v10, %v15461_v47  ;;  %v3611_v62 = vmul.f32 1.442695, %v2958_v60  ;;  %8418 = vpow2.f32 %v3561_v16  ;;  %v5588_v53 = vpop.f32.mrf.mxu1 }
 0x46c   : > { %v8389_v22 = vpop.eup %8388  ;;  %6053 = vmatmul.mubr.bf16.gmra.mxu1 %v4391_v44  ;;  %8420 = vpow2.f32 %v3577_v55  ;;  %v3565_v17 = vmul.f32 1.442695, %v2935_v32  ;;  %v3615_v1 = vmul.f32 1.442695, %v2960_v51  ;;  %v2959_v60 = vsub.f32 %v15469_v61, %v15459_v36  ;;  %v15471_v55 = vld [vmem:[#allocation335_spill] sm:$0xff] }
 0x46d   : > { %v8391_v45 = vpop.eup %8390  ;;  %6060 = vmatprep.mubr.bf16.mxu1 %v4400_v52  ;;  %v4397_v30 = vpack.c.bf16 %v8389_v22, %v8387_v27  ;;  %8422 = vpow2.f32 %v3581_v7  ;;  %v3599_v13 = vmul.f32 1.442695, %v2952_v2  ;;  %v2951_v0 = vsub.f32 %v15470_v38, %v15461_v47  ;;  %v15472_v27 = vld [vmem:[#allocation331_spill] sm:$0xff]  ;;  %v5299_v7 = vpop.f32.mrf.mxu0  ;;  %v15477_v38 = vld [vmem:[#allocation164_spill] sm:$0xff] }
 0x46e   : > { %v8393_v19 = vpop.eup %8392  ;;  %8424 = vpow2.f32 %v3611_v62  ;;  %v2974_v32 = vsub.f32 %v15471_v55, %v11705_v6  ;;  %v3593_v10 = vmul.f32 1.442695, %v2949_v12  ;;  %v2966_v22 = vsub.f32 %v15472_v27, %v11778_v57 }
 0x46f   : > { %v8395_v29 = vpop.eup %8394  ;;  %8426 = vpow2.f32 %v3595_v4  ;;  %v3609_v62 = vmul.f32 1.442695, %v2957_v20  ;;  %v3613_v21 = vmul.f32 1.442695, %v2959_v60  ;;  %v5301_v4 = vpop.f32.mrf.mxu0  ;;  %v3095_v55 = vsub.f32 %v15477_v38, %v12026_v5  ;;  %v15478_v60 = vld [vmem:[#allocation329_spill] sm:$0xff] }
 0x470   : > { %v8397_v44 = vpop.eup %8396  ;;  %v4406_v16 = vpack.c.bf16 %v8393_v19, %v8395_v29  ;;  %8428 = vpow2.f32 %v3615_v1  ;;  %v15473_v19 = vld [vmem:[#allocation336_spill] sm:$0xff] }
 0x471   : > { %v8399_v52 = vpop.eup %8398  ;;  %v2976_v47 = vsub.f32 %v15473_v19, %v11705_v6  ;;  %8430 = vpow2.f32 %v3565_v17  ;;  %v15476_v1 = vld [vmem:[#allocation332_spill] sm:$0xff]  ;;  %v3627_v17 = vmul.f32 1.442695, %v2966_v22 }
 0x472   : > { %v8401_v51 = vpop.eup %8400  ;;  %5772 = vmatmul.mubr.bf16.gmra.mxu0 %v4397_v30  ;;  %v4399_v39 = vpack.c.bf16 %v8391_v45, %v8399_v52  ;;  %v12646_v45 = vadd.f32 %v5588_v53, %v5299_v7  ;;  %v15475_v30 = vld [vmem:[#allocation394_spill] sm:$0xff]  ;;  %8432 = vpow2.f32 %v3599_v13  ;;  %v2968_v20 = vsub.f32 %v15476_v1, %v11778_v57  ;;  %v5590_v52 = vpop.f32.mrf.mxu1  ;;  %v15479_v13 = vld [vmem:[#allocation333_spill] sm:$0xff] }
 0x473   : > { %v8403_v2 = vpop.eup %8402  ;;  %5779 = vmatprep.mubr.bf16.mxu0 %v4406_v16  ;;  %v4408_v36 = vpack.c.bf16 %v8397_v44, %v8401_v51  ;;  %v3093_v61 = vsub.f32 %v15475_v30, %v12026_v5  ;;  %v3643_v44 = vmul.f32 1.442695, %v2974_v32  ;;  %8434 = vpow2.f32 %v3593_v10  ;;  %v15480_v30 = vld [vmem:[#allocation334_spill] sm:$0xff] }
 0x474   : > { %v8405_v29 = vpop.eup %8404  ;;  %6061 = vmatmul.mubr.bf16.gmra.mxu1 %v4399_v39  ;;  %15474 = vst [vmem:[#allocation147_spill] sm:$0xff] %v12646_v45  ;;  %v2965_v51 = vsub.f32 %v15478_v60, %v11778_v57  ;;  %v5302_v39 = vpop.f32.mrf.mxu0  ;;  %8436 = vpow2.f32 %v3609_v62  ;;  %v3597_v7 = vmul.f32 1.442695, %v2951_v0  ;;  %v2973_v32 = vsub.f32 %v15479_v13, %v11705_v6  ;;  %v15481_v0 = vld [vmem:[#allocation343_spill] sm:$0xff] }
 0x475   : > { %v8407_v12 = vpop.eup %8406  ;;  %6068 = vmatprep.mubr.bf16.mxu1 %v4408_v36  ;;  %v3647_v36 = vmul.f32 1.442695, %v2976_v47  ;;  %v5591_v19 = vpop.f32.mrf.mxu1  ;;  %v4405_v4 = vpack.c.bf16 %v8405_v29, %v8403_v2  ;;  %8438 = vpow2.f32 %v3613_v21  ;;  %v2975_v1 = vsub.f32 %v15480_v30, %v11705_v6  ;;  %v15482_v29 = vld [vmem:[#allocation80_spill] sm:$0xff]  ;;  %v15483_v21 = vld [vmem:[#allocation339_spill] sm:$0xff] }
 0x476   : > { %v8409_v16 = vpop.eup %8408  ;;  %v12660_v10 = vadd.f32 %v5591_v19, %v5302_v39  ;;  %v5304_v22 = vpop.f32.mrf.mxu0  ;;  %8440 = vpow2.f32 %v3643_v44  ;;  %v3631_v60 = vmul.f32 1.442695, %v2968_v20  ;;  %v2990_v62 = vsub.f32 %v15481_v0, %v11732_v8  ;;  %v15484_v44 = vld [vmem:[#allocation344_spill] sm:$0xff] }
 0x477   : > { %v8411_v27 = vpop.eup %8410  ;;  %v5593_v47 = vpop.f32.mrf.mxu1  ;;  %8442 = vpow2.f32 %v3627_v17  ;;  %v3625_v2 = vmul.f32 1.442695, %v2965_v51  ;;  %v2982_v11 = vsub.f32 %v15483_v21, %v15482_v29  ;;  %v3641_v19 = vmul.f32 1.442695, %v2973_v32  ;;  %v15486_v22 = vld [vmem:[#allocation340_spill] sm:$0xff] }
 0x478   : > { %v8413_v53 = vpop.eup %8412  ;;  %v4414_v38 = vpack.c.bf16 %v8409_v16, %v8411_v27  ;;  %8444 = vpow2.f32 %v3647_v36  ;;  %v2992_v20 = vsub.f32 %v15484_v44, %v11732_v8  ;;  %v15485_v27 = vld [vmem:[#allocation330_spill] sm:$0xff]  ;;  %v5307_v17 = vpop.f32.mrf.mxu0  ;;  %v3675_v30 = vmul.f32 1.442695, %v2990_v62  ;;  %v15487_v62 = vld [vmem:[#allocation337_spill] sm:$0xff] }
 0x479   : > { %v8415_v52 = vpop.eup %8414  ;;  %8446 = vpow2.f32 %v3597_v7  ;;  %v5596_v36 = vpop.f32.mrf.mxu1  ;;  %v3885_v0 = vmul.f32 1.442695, %v3095_v55  ;;  %v2981_v21 = vsub.f32 %v15487_v62, %v15482_v29 }
 0x47a   : > { %v8417_v45 = vpop.eup %8416  ;;  %5780 = vmatmul.mubr.bf16.gmra.mxu0 %v4405_v4  ;;  %v4407_v13 = vpack.c.bf16 %v8407_v12, %v8415_v52  ;;  %v2967_v4 = vsub.f32 %v15485_v27, %v11778_v57  ;;  %v3645_v12 = vmul.f32 1.442695, %v2975_v1  ;;  %8448 = vpow2.f32 %v3631_v60  ;;  %v5309_v52 = vpop.f32.mrf.mxu0  ;;  %v15488_v27 = vld [vmem:[#allocation88_spill] sm:$0xff] }
 0x47b   : > { %v8419_v6 = vpop.eup %8418  ;;  %5787 = vmatprep.mubr.bf16.mxu0 %v4414_v38  ;;  %v4416_v39 = vpack.c.bf16 %v8413_v53, %v8417_v45  ;;  %v2984_v45 = vsub.f32 %v15486_v22, %v15482_v29  ;;  %8450 = vpow2.f32 %v3625_v2  ;;  %v3659_v53 = vmul.f32 1.442695, %v2982_v11  ;;  %v5598_v1 = vpop.f32.mrf.mxu1  ;;  %v15493_v52 = vld [vmem:[#allocation188_spill] sm:$0xff] }
 0x47c   : > { %v8421_v16 = vpop.eup %8420  ;;  %6069 = vmatmul.mubr.bf16.gmra.mxu1 %v4407_v13  ;;  %v12672_v8 = vadd.f32 %v5596_v36, %v5307_v17  ;;  %v3881_v38 = vmul.f32 1.442695, %v3093_v61  ;;  %8452 = vpow2.f32 %v3641_v19  ;;  %v3679_v57 = vmul.f32 1.442695, %v2992_v20  ;;  %v15489_v17 = vld [vmem:[#allocation351_spill] sm:$0xff]  ;;  %v15492_v36 = vld [vmem:[#allocation104_spill] sm:$0xff] }
 0x47d   : > { %v8423_v51 = vpop.eup %8422  ;;  %6076 = vmatprep.mubr.bf16.mxu1 %v4416_v39  ;;  %v4413_v13 = vpack.c.bf16 %v8421_v16, %v8419_v6  ;;  %v3629_v60 = vmul.f32 1.442695, %v2967_v4  ;;  %8454 = vpow2.f32 %v3645_v12  ;;  %v5310_v39 = vpop.f32.mrf.mxu0  ;;  %v3663_v11 = vmul.f32 1.442695, %v2984_v45  ;;  %v15490_v6 = vld [vmem:[#allocation347_spill] sm:$0xff]  ;;  %v15494_v45 = vld [vmem:[#allocation352_spill] sm:$0xff] }
 0x47e   : > { %v8425_v32 = vpop.eup %8424  ;;  %8456 = vpow2.f32 %v3675_v30  ;;  %v3006_v22 = vsub.f32 %v15489_v17, %v15488_v27  ;;  %v5599_v61 = vpop.f32.mrf.mxu1  ;;  %v2998_v20 = vsub.f32 %v15490_v6, %v11865_v23  ;;  %v15496_v17 = vld [vmem:[#allocation348_spill] sm:$0xff] }
 0x47f   : > { %v8427_v7 = vpop.eup %8426  ;;  %8458 = vpow2.f32 %v3659_v53  ;;  %v12680_v16 = vadd.f32 %v5599_v61, %v5310_v39  ;;  %v5312_v4 = vpop.f32.mrf.mxu0  ;;  %v15495_v53 = vld [vmem:[#allocation338_spill] sm:$0xff]  ;;  %v15497_v61 = vld [vmem:[#allocation349_spill] sm:$0xff] }
 0x480   : > { %v8429_v47 = vpop.eup %8428  ;;  %v4422_v2 = vpack.c.bf16 %v8425_v32, %v8427_v7  ;;  %v3109_v32 = vsub.f32 %v15493_v52, %v15492_v36  ;;  %8460 = vpow2.f32 %v3679_v57  ;;  %v3008_v7 = vsub.f32 %v15494_v45, %v15488_v27  ;;  %v5601_v1 = vpop.f32.mrf.mxu1 }
 0x481   : > { %v8431_v44 = vpop.eup %8430  ;;  %15491 = vst [vmem:[#allocation151_spill] sm:$0xff] %v12680_v16  ;;  %8462 = vpow2.f32 %v3629_v60  ;;  %v2983_v62 = vsub.f32 %v15495_v53, %v15482_v29  ;;  %v3691_v57 = vmul.f32 1.442695, %v2998_v20  ;;  %v15498_v60 = vld [vmem:[#allocation192_spill] sm:$0xff]  ;;  %v15500_v1 = vld [vmem:[#allocation89_spill] sm:$0xff]  ;;  %v15501_v53 = vld [vmem:[#allocation359_spill] sm:$0xff] }
 0x482   : > { %v8433_v55 = vpop.eup %8432  ;;  %5788 = vmatmul.mubr.bf16.gmra.mxu0 %v4413_v13  ;;  %v4415_v19 = vpack.c.bf16 %v8423_v51, %v8431_v44  ;;  %v3657_v51 = vmul.f32 1.442695, %v2981_v21  ;;  %8464 = vpow2.f32 %v3663_v11  ;;  %v3707_v44 = vmul.f32 1.442695, %v3006_v22  ;;  %v15499_v22 = vld [vmem:[#allocation350_spill] sm:$0xff] }
 0x483   : > { %v8435_v12 = vpop.eup %8434  ;;  %5795 = vmatprep.mubr.bf16.mxu0 %v4422_v2  ;;  %v4424_v30 = vpack.c.bf16 %v8429_v47, %v8433_v55  ;;  %v3000_v2 = vsub.f32 %v15496_v17, %v11865_v23  ;;  %8466 = vpow2.f32 %v3881_v38  ;;  %v3005_v55 = vsub.f32 %v15497_v61, %v15488_v27 }
 0x484   : > { %v8437_v13 = vpop.eup %8436  ;;  %6077 = vmatmul.mubr.bf16.gmra.mxu1 %v4415_v19  ;;  %8468 = vpow2.f32 %v3885_v0  ;;  %v3111_v21 = vsub.f32 %v15498_v60, %v15492_v36  ;;  %v3913_v19 = vmul.f32 1.442695, %v3109_v32  ;;  %v3711_v29 = vmul.f32 1.442695, %v3008_v7  ;;  %v15502_v7 = vld [vmem:[#allocation95_spill] sm:$0xff] }
 0x485   : > { %v8439_v39 = vpop.eup %8438  ;;  %6084 = vmatprep.mubr.bf16.mxu1 %v4424_v30  ;;  %v4421_v52 = vpack.c.bf16 %v8437_v13, %v8435_v12  ;;  %8470 = vpow2.f32 %v3657_v51  ;;  %v3661_v11 = vmul.f32 1.442695, %v2983_v62  ;;  %v3007_v23 = vsub.f32 %v15499_v22, %v15488_v27  ;;  %v5315_v30 = vpop.f32.mrf.mxu0  ;;  %v15503_v12 = vld [vmem:[#allocation355_spill] sm:$0xff] }
 0x486   : > { %v8441_v47 = vpop.eup %8440  ;;  %8472 = vpow2.f32 %v3707_v44  ;;  %v3695_v45 = vmul.f32 1.442695, %v3000_v2  ;;  %v3022_v0 = vsub.f32 %v15501_v53, %v15500_v1  ;;  %v3705_v32 = vmul.f32 1.442695, %v3005_v55  ;;  %v5604_v51 = vpop.f32.mrf.mxu1  ;;  %v15504_v44 = vld [vmem:[#allocation360_spill] sm:$0xff] }
 0x487   : > { %v8443_v6 = vpop.eup %8442  ;;  %8474 = vpow2.f32 %v3691_v57  ;;  %v3014_v13 = vsub.f32 %v15503_v12, %v15502_v7  ;;  %v5317_v62 = vpop.f32.mrf.mxu0  ;;  %v3024_v2 = vsub.f32 %v15504_v44, %v15500_v1  ;;  %v15506_v57 = vld [vmem:[#allocation356_spill] sm:$0xff] }
 0x488   : > { %v8445_v4 = vpop.eup %8444  ;;  %v4430_v20 = vpack.c.bf16 %v8441_v47, %v8443_v6  ;;  %8476 = vpow2.f32 %v3711_v29  ;;  %v12702_v47 = vadd.f32 %v5604_v51, %v5315_v30  ;;  %v3016_v55 = vsub.f32 %v15506_v57, %v15502_v7  ;;  %v15507_v29 = vld [vmem:[#allocation353_spill] sm:$0xff]  ;;  %v15510_v57 = vld [vmem:[#allocation358_spill] sm:$0xff] }
 0x489   : > { %v8447_v38 = vpop.eup %8446  ;;  %8478 = vpow2.f32 %v3661_v11  ;;  %v5318_v22 = vpop.f32.mrf.mxu0  ;;  %v3917_v30 = vmul.f32 1.442695, %v3111_v21  ;;  %v15508_v51 = vld [vmem:[#allocation357_spill] sm:$0xff] }
 0x48a   : > { %v8449_v17 = vpop.eup %8448  ;;  %5796 = vmatmul.mubr.bf16.gmra.mxu0 %v4421_v52  ;;  %v4423_v61 = vpack.c.bf16 %v8439_v39, %v8447_v38  ;;  %15505 = vst [vmem:[#allocation148_spill] sm:$0xff] %v12702_v47  ;;  %v3709_v39 = vmul.f32 1.442695, %v3007_v23  ;;  %v5606_v52 = vpop.f32.mrf.mxu1  ;;  %8480 = vpow2.f32 %v3695_v45  ;;  %v3743_v23 = vmul.f32 1.442695, %v3024_v2 }
 0x48b   : > { %v8451_v60 = vpop.eup %8450  ;;  %5803 = vmatprep.mubr.bf16.mxu0 %v4430_v20  ;;  %v4432_v27 = vpack.c.bf16 %v8445_v4, %v8449_v17  ;;  %v3739_v20 = vmul.f32 1.442695, %v3022_v0  ;;  %v3013_v4 = vsub.f32 %v15507_v29, %v15502_v7  ;;  %8482 = vpow2.f32 %v3913_v19 }
 0x48c   : > { %v8453_v6 = vpop.eup %8452  ;;  %6085 = vmatmul.mubr.bf16.gmra.mxu1 %v4423_v61  ;;  %v3723_v17 = vmul.f32 1.442695, %v3014_v13  ;;  %v5607_v12 = vpop.f32.mrf.mxu1  ;;  %8484 = vpow2.f32 %v3705_v32  ;;  %v3021_v62 = vsub.f32 %v15508_v51, %v15500_v1  ;;  %v3727_v0 = vmul.f32 1.442695, %v3016_v55  ;;  %v15512_v32 = vld [vmem:[#allocation367_spill] sm:$0xff] }
 0x48d   : > { %v8455_v38 = vpop.eup %8454  ;;  %6092 = vmatprep.mubr.bf16.mxu1 %v4432_v27  ;;  %v5320_v61 = vpop.f32.mrf.mxu0  ;;  %v12710_v44 = vadd.f32 %v5607_v12, %v5318_v22  ;;  %v4429_v45 = vpack.c.bf16 %v8453_v6, %v8451_v60  ;;  %8486 = vpow2.f32 %v3709_v39  ;;  %v3023_v52 = vsub.f32 %v15510_v57, %v15500_v1  ;;  %v15513_v22 = vld [vmem:[#allocation354_spill] sm:$0xff]  ;;  %v15514_v6 = vld [vmem:[#allocation92_spill] sm:$0xff]  ;;  %v15515_v39 = vld [vmem:[#allocation363_spill] sm:$0xff] }
 0x48e   : > { %v8457_v53 = vpop.eup %8456  ;;  %v5609_v19 = vpop.f32.mrf.mxu1  ;;  %8488 = vpow2.f32 %v3739_v20  ;;  %v3721_v29 = vmul.f32 1.442695, %v3013_v4  ;;  %v15511_v61 = vld [vmem:[#allocation96_spill] sm:$0xff]  ;;  %v3015_v60 = vsub.f32 %v15513_v22, %v15502_v7  ;;  %v3030_v55 = vsub.f32 %v15515_v39, %v15514_v6 }
 0x48f   : > { %v8459_v11 = vpop.eup %8458  ;;  %15509 = vst [vmem:[#allocation152_spill] sm:$0xff] %v12710_v44  ;;  %v3038_v2 = vsub.f32 %v15512_v32, %v15511_v61  ;;  %8490 = vpow2.f32 %v3723_v17  ;;  %v3737_v20 = vmul.f32 1.442695, %v3021_v62  ;;  %v15516_v4 = vld [vmem:[#allocation368_spill] sm:$0xff] }
 0x490   : > { %v8461_v27 = vpop.eup %8460  ;;  %v4438_v13 = vpack.c.bf16 %v8457_v53, %v8459_v11  ;;  %8492 = vpow2.f32 %v3743_v23  ;;  %v3040_v53 = vsub.f32 %v15516_v4, %v15511_v61  ;;  %v3755_v62 = vmul.f32 1.442695, %v3030_v55 }
 0x491   : > { %v8463_v21 = vpop.eup %8462  ;;  %8494 = vpow2.f32 %v3917_v30  ;;  %v3771_v7 = vmul.f32 1.442695, %v3038_v2 }
 0x492   : > { %v8465_v47 = vpop.eup %8464  ;;  %5804 = vmatmul.mubr.bf16.gmra.mxu0 %v4429_v45  ;;  %v4431_v51 = vpack.c.bf16 %v8455_v38, %v8463_v21  ;;  %v3741_v38 = vmul.f32 1.442695, %v3023_v52  ;;  %8496 = vpow2.f32 %v3727_v0  ;;  %v15517_v45 = vld [vmem:[#allocation364_spill] sm:$0xff]  ;;  %v15519_v21 = vld [vmem:[#allocation361_spill] sm:$0xff]  ;;  %v3725_v52 = vmul.f32 1.442695, %v3015_v60 }
 0x493   : > { %v12720_v12 = vpop.eup %8466  ;;  %5811 = vmatprep.mubr.bf16.mxu0 %v4438_v13  ;;  %v4440_v1 = vpack.c.bf16 %v8461_v27, %v8465_v47  ;;  %v3032_v57 = vsub.f32 %v15517_v45, %v15514_v6  ;;  %v15518_v47 = vld [vmem:[#allocation20_spill] sm:$0xff]  ;;  %8498 = vpow2.f32 %v3721_v29  ;;  %v5323_v27 = vpop.f32.mrf.mxu0  ;;  %v3029_v13 = vsub.f32 %v15519_v21, %v15514_v6  ;;  %v15520_v0 = vld [vmem:[#allocation365_spill] sm:$0xff]  ;;  %v15521_v29 = vld [vmem:[#allocation366_spill] sm:$0xff] }
 0x494   : > { %v12724_v11 = vpop.eup %8468  ;;  %6093 = vmatmul.mubr.bf16.gmra.mxu1 %v4431_v51  ;;  %v3125_v23 = vsub.f32 %v15518_v47, %v12070_v37  ;;  %8500 = vpow2.f32 %v3737_v20  ;;  %v3775_v32 = vmul.f32 1.442695, %v3040_v53  ;;  %v5612_v51 = vpop.f32.mrf.mxu1  ;;  %v3037_v2 = vsub.f32 %v15520_v0, %v15511_v61  ;;  %v15522_v60 = vld [vmem:[#allocation93_spill] sm:$0xff]  ;;  %v15523_v53 = vld [vmem:[#allocation375_spill] sm:$0xff] }
 0x495   : > { %v8471_v17 = vpop.eup %8470  ;;  %6100 = vmatprep.mubr.bf16.mxu1 %v4440_v1  ;;  %8502 = vpow2.f32 %v3741_v38  ;;  %v12735_v1 = vadd.f32 %v5612_v51, %v5323_v27  ;;  %v3039_v55 = vsub.f32 %v15521_v29, %v15511_v61  ;;  %v5325_v4 = vpop.f32.mrf.mxu0  ;;  %v3759_v20 = vmul.f32 1.442695, %v3032_v57  ;;  %v15524_v38 = vld [vmem:[#allocation371_spill] sm:$0xff]  ;;  %v15525_v57 = vld [vmem:[#allocation376_spill] sm:$0xff] }
 0x496   : > { %v8473_v19 = vpop.eup %8472  ;;  %v4437_v39 = vpack.c.bf16 %v12357_v14, %v8471_v17  ;;  %8504 = vpow2.f32 %v3771_v7  ;;  %v3054_v21 = vsub.f32 %v15523_v53, %v15522_v60  ;;  %v5614_v44 = vpop.f32.mrf.mxu1  ;;  %v3753_v14 = vmul.f32 1.442695, %v3029_v13 }
 0x497   : > { %v8475_v30 = vpop.eup %8474  ;;  %8506 = vpow2.f32 %v3755_v62  ;;  %v3046_v17 = vsub.f32 %v15524_v38, %v11958_v18  ;;  %v5326_v27 = vpop.f32.mrf.mxu0  ;;  %v3769_v7 = vmul.f32 1.442695, %v3037_v2  ;;  %v3773_v13 = vmul.f32 1.442695, %v3039_v55 }
 0x498   : > { %v8477_v22 = vpop.eup %8476  ;;  %v4446_v47 = vpack.c.bf16 %v8473_v19, %v8475_v30  ;;  %8508 = vpow2.f32 %v3775_v32  ;;  %v3056_v30 = vsub.f32 %v15525_v57, %v15522_v60  ;;  %v5615_v44 = vpop.f32.mrf.mxu1  ;;  %v15527_v32 = vld [vmem:[#allocation372_spill] sm:$0xff]  ;;  %v3945_v38 = vmul.f32 1.442695, %v3125_v23  ;;  %v15532_v23 = vld [vmem:[#allocation383_spill] sm:$0xff] }
 0x499   : > { %v8479_v45 = vpop.eup %8478  ;;  %8510 = vpow2.f32 %v3725_v52  ;;  %v5328_v29 = vpop.f32.mrf.mxu0  ;;  %v3048_v2 = vsub.f32 %v15527_v32, %v11958_v18  ;;  %v3787_v52 = vmul.f32 1.442695, %v3046_v17  ;;  %v15530_v18 = vld [vmem:[#allocation374_spill] sm:$0xff] }
 0x49a   : > { %v8481_v16 = vpop.eup %8480  ;;  %5812 = vmatmul.mubr.bf16.gmra.mxu0 %v4437_v39  ;;  %v4439_v0 = vpack.c.bf16 %v12361_v56, %v8479_v45  ;;  %v15526_v56 = vld [vmem:[#allocation362_spill] sm:$0xff]  ;;  %v12750_v39 = vadd.f32 %v5615_v44, %v5326_v27  ;;  %8512 = vpow2.f32 %v3759_v20  ;;  %v3807_v27 = vmul.f32 1.442695, %v3056_v30  ;;  %v15531_v29 = vld [vmem:[#allocation99_spill] sm:$0xff] }
 0x49b   : > { %v12744_v61 = vpop.eup %8482  ;;  %5819 = vmatprep.mubr.bf16.mxu0 %v4446_v47  ;;  %v4448_v19 = vpack.c.bf16 %v8477_v22, %v8481_v16  ;;  %v3031_v62 = vsub.f32 %v15526_v56, %v15514_v6  ;;  %v3803_v16 = vmul.f32 1.442695, %v3054_v21  ;;  %v5617_v22 = vpop.f32.mrf.mxu1  ;;  %v15528_v47 = vld [vmem:[#allocation232_spill] sm:$0xff]  ;;  %8514 = vpow2.f32 %v3753_v14  ;;  %v15529_v6 = vld [vmem:[#allocation373_spill] sm:$0xff] }
 0x49c   : > { %v8485_v51 = vpop.eup %8484  ;;  %6101 = vmatmul.mubr.bf16.gmra.mxu1 %v4439_v0  ;;  %v3127_v53 = vsub.f32 %v15528_v47, %v12070_v37  ;;  %v3053_v55 = vsub.f32 %v15529_v6, %v15522_v60  ;;  %8516 = vpow2.f32 %v3769_v7  ;;  %v3055_v57 = vsub.f32 %v15530_v18, %v15522_v60  ;;  %v15534_v60 = vld [vmem:[#allocation379_spill] sm:$0xff] }
 0x49d   : > { %v8487_v4 = vpop.eup %8486  ;;  %6108 = vmatprep.mubr.bf16.mxu1 %v4448_v19  ;;  %v4445_v20 = vpack.c.bf16 %v8485_v51, %v12490_v46  ;;  %v3757_v21 = vmul.f32 1.442695, %v3031_v62  ;;  %8518 = vpow2.f32 %v3773_v13  ;;  %v9144_v44 = vmov 16   ;;  %v5331_v51 = vpop.f32.mrf.mxu0  ;;  %v15533_v13 = vld [vmem:[#allocation94_spill] sm:$0xff] }
 0x49e   : > { %v8489_v45 = vpop.eup %8488  ;;  %7672 = vset.pattern.permute.xlu0 %v9144_v44  ;;  %7673 = vset.pattern.permute.xlu1 %v9144_v44  ;;  %8520 = vpow2.f32 %v3803_v16  ;;  %v3791_v56 = vmul.f32 1.442695, %v3048_v2  ;;  %v3070_v7 = vsub.f32 %v15532_v23, %v15531_v29  ;;  %v4447_v46 = vpack.c.bf16 %v8487_v4, %v12512_v31  ;;  %v15535_v16 = vld [vmem:[#allocation380_spill] sm:$0xff]  ;;  %v5620_v31 = vpop.f32.mrf.mxu1 }
 0x49f   : > { %v8491_v0 = vpop.eup %8490  ;;  %8522 = vpow2.f32 %v3787_v52  ;;  %v3801_v62 = vmul.f32 1.442695, %v3053_v55  ;;  %v3062_v32 = vsub.f32 %v15534_v60, %v15533_v13  ;;  %v3064_v2 = vsub.f32 %v15535_v16, %v15533_v13  ;;  %v5333_v52 = vpop.f32.mrf.mxu0  ;;  %v15538_v16 = vld [vmem:[#allocation381_spill] sm:$0xff] }
 0x4a0   : > { %v8493_v19 = vpop.eup %8492  ;;  %v4454_v17 = vpack.c.bf16 %v8489_v45, %v8491_v0  ;;  %8524 = vpow2.f32 %v3807_v27  ;;  %v15536_v45 = vld [vmem:[#allocation384_spill] sm:$0xff]  ;;  %v3805_v4 = vmul.f32 1.442695, %v3055_v57  ;;  %v3835_v18 = vmul.f32 1.442695, %v3070_v7 }
 0x4a1   : > { %v12761_v14 = vpop.eup %8494  ;;  %v3072_v6 = vsub.f32 %v15536_v45, %v15531_v29  ;;  %8526 = vpow2.f32 %v3757_v21  ;;  %v3949_v27 = vmul.f32 1.442695, %v3127_v53  ;;  %v3819_v44 = vmul.f32 1.442695, %v3062_v32  ;;  %v5334_v23 = vpop.f32.mrf.mxu0  ;;  %v15539_v53 = vld [vmem:[#allocation378_spill] sm:$0xff] }
 0x4a2   : > { %v8497_v30 = vpop.eup %8496  ;;  %5820 = vmatmul.mubr.bf16.gmra.mxu0 %v4445_v20  ;;  %8528 = vpow2.f32 %v3791_v56  ;;  %v12772_v20 = vadd.f32 %v5620_v31, %v5331_v51  ;;  %v3823_v21 = vmul.f32 1.442695, %v3064_v2  ;;  %v15540_v32 = vld [vmem:[#allocation382_spill] sm:$0xff]  ;;  %v15542_v2 = vld [vmem:[#allocation103_spill] sm:$0xff] }
 0x4a3   : > { %v8499_v22 = vpop.eup %8498  ;;  %5827 = vmatprep.mubr.bf16.mxu0 %v4454_v17  ;;  %v4456_v47 = vpack.c.bf16 %v8493_v19, %v8497_v30  ;;  %8530 = vpow2.f32 %v3945_v38  ;;  %v5622_v17 = vpop.f32.mrf.mxu1  ;;  %v15537_v30 = vld [vmem:[#allocation377_spill] sm:$0xff]  ;;  %v3839_v57 = vmul.f32 1.442695, %v3072_v6  ;;  %v3063_v38 = vsub.f32 %v15539_v53, %v15533_v13  ;;  %v15543_v6 = vld [vmem:[#allocation156_spill] sm:$0xff] }
 0x4a4   : > { %v8501_v0 = vpop.eup %8500  ;;  %6109 = vmatmul.mubr.bf16.gmra.mxu1 %v4447_v46  ;;  %v3061_v60 = vsub.f32 %v15537_v30, %v15533_v13  ;;  %8532 = vpow2.f32 %v3801_v62  ;;  %v5336_v45 = vpop.f32.mrf.mxu0  ;;  %v3071_v31 = vsub.f32 %v15540_v32, %v15531_v29  ;;  %v3086_v30 = vsub.f32 %v15543_v6, %v15542_v2 }
 0x4a5   : > { %v8503_v55 = vpop.eup %8502  ;;  %6116 = vmatprep.mubr.bf16.mxu1 %v4456_v47  ;;  %v3069_v47 = vsub.f32 %v15538_v16, %v15531_v29  ;;  %v4453_v51 = vpack.c.bf16 %v8501_v0, %v8499_v22  ;;  %8534 = vpow2.f32 %v3805_v4  ;;  %v5623_v7 = vpop.f32.mrf.mxu1  ;;  %v15544_v45 = vld [vmem:[#allocation387_spill] sm:$0xff] }
 0x4a6   : > { %v8505_v19 = vpop.eup %8504  ;;  %8536 = vpow2.f32 %v3835_v18  ;;  %v12782_v62 = vadd.f32 %v5623_v7, %v5334_v23  ;;  %v3817_v4 = vmul.f32 1.442695, %v3061_v60  ;;  %v3078_v13 = vsub.f32 %v15544_v45, %v12002_v50  ;;  %v15545_v18 = vld [vmem:[#allocation392_spill] sm:$0xff] }
 0x4a7   : > { %v8507_v46 = vpop.eup %8506  ;;  %8538 = vpow2.f32 %v3819_v44  ;;  %v5625_v0 = vpop.f32.mrf.mxu1  ;;  %v3088_v23 = vsub.f32 %v15545_v18, %v15542_v2  ;;  %v3837_v7 = vmul.f32 1.442695, %v3071_v31  ;;  %v3867_v60 = vmul.f32 1.442695, %v3086_v30  ;;  %v15550_v18 = vld [vmem:[#allocation390_spill] sm:$0xff] }
 0x4a8   : > { %v8509_v56 = vpop.eup %8508  ;;  %v4462_v17 = vpack.c.bf16 %v8505_v19, %v8507_v46  ;;  %15541 = vst [vmem:[#allocation149_spill] sm:$0xff] %v12782_v62  ;;  %8540 = vpow2.f32 %v3839_v57  ;;  %v3833_v19 = vmul.f32 1.442695, %v3069_v47  ;;  %v15548_v57 = vld [vmem:[#allocation22_spill] sm:$0xff]  ;;  %v3851_v6 = vmul.f32 1.442695, %v3078_v13 }
 0x4a9   : > { %v8511_v52 = vpop.eup %8510  ;;  %8542 = vpow2.f32 %v3949_v27  ;;  %v3143_v47 = vsub.f32 %v15548_v57, %v12092_v35  ;;  %v3821_v31 = vmul.f32 1.442695, %v3063_v38  ;;  %v5628_v30 = vpop.f32.mrf.mxu1  ;;  %v15551_v13 = vld [vmem:[#allocation100_spill] sm:$0xff] }
 0x4aa   : > { %v8513_v16 = vpop.eup %8512  ;;  %5828 = vmatmul.mubr.bf16.gmra.mxu0 %v4453_v51  ;;  %v4455_v22 = vpack.c.bf16 %v8503_v55, %v8511_v52  ;;  %v15546_v55 = vld [vmem:[#allocation388_spill] sm:$0xff]  ;;  %8544 = vpow2.f32 %v3823_v21 }
 0x4ab   : > { %v8515_v53 = vpop.eup %8514  ;;  %5835 = vmatprep.mubr.bf16.mxu0 %v4462_v17  ;;  %v4464_v29 = vpack.c.bf16 %v8509_v56, %v8513_v16  ;;  %v3080_v44 = vsub.f32 %v15546_v55, %v12002_v50  ;;  %v15547_v52 = vld [vmem:[#allocation412_spill] sm:$0xff]  ;;  %v5339_v17 = vpop.f32.mrf.mxu0  ;;  %8546 = vpow2.f32 %v3817_v4  ;;  %v3871_v16 = vmul.f32 1.442695, %v3088_v23  ;;  %v15549_v50 = vld [vmem:[#allocation389_spill] sm:$0xff] }
 0x4ac   : > { %v8517_v46 = vpop.eup %8516  ;;  %6117 = vmatmul.mubr.bf16.gmra.mxu1 %v4455_v22  ;;  %v3141_v56 = vsub.f32 %v15547_v52, %v12092_v35  ;;  %8548 = vpow2.f32 %v3833_v19  ;;  %v3085_v22 = vsub.f32 %v15549_v50, %v15542_v2  ;;  %v3087_v55 = vsub.f32 %v15550_v18, %v15542_v2  ;;  %v15552_v38 = vld [vmem:[#allocation400_spill] sm:$0xff] }
 0x4ad   : > { %v8519_v51 = vpop.eup %8518  ;;  %6124 = vmatprep.mubr.bf16.mxu1 %v4464_v29  ;;  %v4461_v21 = vpack.c.bf16 %v8517_v46, %v8515_v53  ;;  %8550 = vpow2.f32 %v3837_v7  ;;  %v3855_v45 = vmul.f32 1.442695, %v3080_v44  ;;  %v5341_v29 = vpop.f32.mrf.mxu0  ;;  %v12800_v4 = vadd.f32 %v5628_v30, %v5339_v17  ;;  %v15553_v7 = vld [vmem:[#allocation168_spill] sm:$0xff] }
 0x4ae   : > { %v8521_v32 = vpop.eup %8520  ;;  %8552 = vpow2.f32 %v3867_v60  ;;  %v3102_v19 = vsub.f32 %v15552_v38, %v15551_v13  ;;  %v3977_v62 = vmul.f32 1.442695, %v3141_v56  ;;  %v5630_v53 = vpop.f32.mrf.mxu1  ;;  %v3094_v44 = vsub.f32 %v15553_v7, %v12026_v5  ;;  %v15554_v60 = vld [vmem:[#allocation401_spill] sm:$0xff]  ;;  %v15555_v56 = vld [vmem:[#allocation23_spill] sm:$0xff] }
 0x4af   : > { %v8523_v27 = vpop.eup %8522  ;;  %8554 = vpow2.f32 %v3851_v6  ;;  %v5342_v46 = vpop.f32.mrf.mxu0  ;;  %v3104_v17 = vsub.f32 %v15554_v60, %v15551_v13  ;;  %v3869_v30 = vmul.f32 1.442695, %v3087_v55  ;;  %v3981_v38 = vmul.f32 1.442695, %v3143_v47 }
 0x4b0   : > { %v8525_v0 = vpop.eup %8524  ;;  %v4470_v57 = vpack.c.bf16 %v8521_v32, %v8523_v27  ;;  %8556 = vpow2.f32 %v3871_v16  ;;  %v3865_v32 = vmul.f32 1.442695, %v3085_v22  ;;  %v15557_v16 = vld [vmem:[#allocation172_spill] sm:$0xff]  ;;  %v3883_v53 = vmul.f32 1.442695, %v3094_v44 }
 0x4b1   : > { %v8527_v52 = vpop.eup %8526  ;;  %8558 = vpow2.f32 %v3821_v31  ;;  %v5344_v6 = vpop.f32.mrf.mxu0  ;;  %v3096_v22 = vsub.f32 %v15557_v16, %v12026_v5  ;;  %v15558_v31 = vld [vmem:[#allocation415_spill] sm:$0xff]  ;;  %v3903_v55 = vmul.f32 1.442695, %v3104_v17  ;;  %v15560_v5 = vld [vmem:[#allocation397_spill] sm:$0xff] }
 0x4b2   : > { %v8529_v23 = vpop.eup %8528  ;;  %5836 = vmatmul.mubr.bf16.gmra.mxu0 %v4461_v21  ;;  %v4463_v50 = vpack.c.bf16 %v8519_v51, %v8527_v52  ;;  %v3149_v21 = vsub.f32 %v15555_v56, %v12094_v54  ;;  %v5631_v51 = vpop.f32.mrf.mxu1  ;;  %8560 = vpow2.f32 %v3855_v45  ;;  %v15562_v6 = vld [vmem:[#allocation216_spill] sm:$0xff]  ;;  %v15563_v16 = vld [vmem:[#allocation419_spill] sm:$0xff] }
 0x4b3   : > { %v12806_v29 = vpop.eup %8530  ;;  %5843 = vmatprep.mubr.bf16.mxu0 %v4470_v57  ;;  %v4472_v2 = vpack.c.bf16 %v8525_v0, %v8529_v23  ;;  %v12812_v52 = vadd.f32 %v5631_v51, %v5342_v46  ;;  %v3899_v0 = vmul.f32 1.442695, %v3102_v19  ;;  %8562 = vpow2.f32 %v3977_v62  ;;  %v15561_v51 = vld [vmem:[#allocation97_spill] sm:$0xff] }
 0x4b4   : > { %v8533_v27 = vpop.eup %8532  ;;  %6125 = vmatmul.mubr.bf16.gmra.mxu1 %v4463_v50  ;;  %v5633_v23 = vpop.f32.mrf.mxu1  ;;  %v3151_v50 = vsub.f32 %v15558_v31, %v12094_v54  ;;  %8564 = vpow2.f32 %v3865_v32  ;;  %v3993_v60 = vmul.f32 1.442695, %v3149_v21  ;;  %v3103_v62 = vsub.f32 %v15560_v5, %v15551_v13 }
 0x4b5   : > { %v8535_v18 = vpop.eup %8534  ;;  %6132 = vmatprep.mubr.bf16.mxu1 %v4472_v2  ;;  %15556 = vst [vmem:[#allocation150_spill] sm:$0xff] %v12812_v52  ;;  %v15559_v2 = vld [vmem:[#allocation396_spill] sm:$0xff]  ;;  %v4469_v19 = vpack.c.bf16 %v8533_v27, %v12520_v28  ;;  %8566 = vpow2.f32 %v3869_v30  ;;  %v3887_v56 = vmul.f32 1.442695, %v3096_v22  ;;  %v3118_v32 = vsub.f32 %v15562_v6, %v15561_v51  ;;  %v5347_v28 = vpop.f32.mrf.mxu0  ;;  %v15565_v22 = vld [vmem:[#allocation405_spill] sm:$0xff] }
 0x4b6   : > { %v8537_v57 = vpop.eup %8536  ;;  %v3101_v45 = vsub.f32 %v15559_v2, %v15551_v13  ;;  %8568 = vpow2.f32 %v3899_v0  ;;  %v3157_v23 = vsub.f32 %v15563_v16, %v12116_v41  ;;  %v4471_v21 = vpack.c.bf16 %v8535_v18, %v12524_v58  ;;  %v15564_v27 = vld [vmem:[#allocation200_spill] sm:$0xff]  ;;  %v15566_v58 = vld [vmem:[#allocation403_spill] sm:$0xff] }
 0x4b7   : > { %v8539_v7 = vpop.eup %8538  ;;  %8570 = vpow2.f32 %v3883_v53  ;;  %v3110_v13 = vsub.f32 %v15564_v27, %v15492_v36  ;;  %v5636_v2 = vpop.f32.mrf.mxu1  ;;  %v3901_v5 = vmul.f32 1.442695, %v3103_v62  ;;  %v3112_v18 = vsub.f32 %v15566_v58, %v15492_v36  ;;  %v15569_v36 = vld [vmem:[#allocation404_spill] sm:$0xff] }
 0x4b8   : > { %v8541_v46 = vpop.eup %8540  ;;  %v4478_v44 = vpack.c.bf16 %v8537_v57, %v8539_v7  ;;  %8572 = vpow2.f32 %v3903_v55  ;;  %v3897_v0 = vmul.f32 1.442695, %v3101_v45  ;;  %v3120_v7 = vsub.f32 %v15565_v22, %v15561_v51 }
 0x4b9   : > { %v12823_v47 = vpop.eup %8542  ;;  %8574 = vpow2.f32 %v3981_v38  ;;  %v12836_v6 = vadd.f32 %v5636_v2, %v5347_v28  ;;  %v3997_v45 = vmul.f32 1.442695, %v3151_v50  ;;  %v5638_v38 = vpop.f32.mrf.mxu1  ;;  %v4009_v62 = vmul.f32 1.442695, %v3157_v23  ;;  %v15570_v50 = vld [vmem:[#allocation212_spill] sm:$0xff]  ;;  %v15571_v23 = vld [vmem:[#allocation101_spill] sm:$0xff] }
 0x4ba   : > { %v8545_v17 = vpop.eup %8544  ;;  %5844 = vmatmul.mubr.bf16.gmra.mxu0 %v4469_v19  ;;  %v5349_v19 = vpop.f32.mrf.mxu0  ;;  %8576 = vpow2.f32 %v3887_v56  ;;  %v3935_v22 = vmul.f32 1.442695, %v3120_v7 }
 0x4bb   : > { %v8547_v30 = vpop.eup %8546  ;;  %5851 = vmatprep.mubr.bf16.mxu0 %v4478_v44  ;;  %v4480_v57 = vpack.c.bf16 %v8541_v46, %v8545_v17  ;;  %15567 = vst [vmem:[#allocation153_spill] sm:$0xff] %v12836_v6  ;;  %v3931_v46 = vmul.f32 1.442695, %v3118_v32  ;;  %8578 = vpow2.f32 %v3993_v60  ;;  %v15568_v44 = vld [vmem:[#allocation420_spill] sm:$0xff]  ;;  %v5639_v56 = vpop.f32.mrf.mxu1  ;;  %v3919_v60 = vmul.f32 1.442695, %v3112_v18 }
 0x4bc   : > { %v8549_v31 = vpop.eup %8548  ;;  %6133 = vmatmul.mubr.bf16.gmra.mxu1 %v4471_v21  ;;  %v3159_v17 = vsub.f32 %v15568_v44, %v12116_v41  ;;  %v5350_v16 = vpop.f32.mrf.mxu0  ;;  %v3915_v21 = vmul.f32 1.442695, %v3110_v13  ;;  %8580 = vpow2.f32 %v3897_v0  ;;  %v3119_v19 = vsub.f32 %v15570_v50, %v15561_v51  ;;  %v15572_v13 = vld [vmem:[#allocation410_spill] sm:$0xff] }
 0x4bd   : > { %v8551_v53 = vpop.eup %8550  ;;  %6140 = vmatprep.mubr.bf16.mxu1 %v4480_v57  ;;  %v3117_v57 = vsub.f32 %v15569_v36, %v15561_v51  ;;  %v4477_v2 = vpack.c.bf16 %v8549_v31, %v8547_v30  ;;  %8582 = vpow2.f32 %v3901_v5  ;;  %v12844_v38 = vadd.f32 %v5639_v56, %v5350_v16  ;;  %v15573_v6 = vld [vmem:[#allocation102_spill] sm:$0xff]  ;;  %v15574_v36 = vld [vmem:[#allocation31_spill] sm:$0xff]  ;;  %v5641_v31 = vpop.f32.mrf.mxu1 }
 0x4be   : > { %v8553_v55 = vpop.eup %8552  ;;  %v5352_v32 = vpop.f32.mrf.mxu0  ;;  %8584 = vpow2.f32 %v3931_v46  ;;  %v3134_v0 = vsub.f32 %v15572_v13, %v15571_v23  ;;  %v3173_v52 = vsub.f32 %v15574_v36, %v15573_v6  ;;  %v15575_v5 = vld [vmem:[#allocation407_spill] sm:$0xff] }
 0x4bf   : > { %v8555_v27 = vpop.eup %8554  ;;  %8586 = vpow2.f32 %v3915_v21  ;;  %v3126_v18 = vsub.f32 %v15575_v5, %v12070_v37  ;;  %v3929_v46 = vmul.f32 1.442695, %v3117_v57  ;;  %v15576_v16 = vld [vmem:[#allocation411_spill] sm:$0xff]  ;;  %v3933_v32 = vmul.f32 1.442695, %v3119_v19  ;;  %v15579_v19 = vld [vmem:[#allocation21_spill] sm:$0xff] }
 0x4c0   : > { %v8557_v28 = vpop.eup %8556  ;;  %v4486_v44 = vpack.c.bf16 %v8553_v55, %v8555_v27  ;;  %8588 = vpow2.f32 %v3935_v22  ;;  %v3136_v27 = vsub.f32 %v15576_v16, %v15571_v23  ;;  %v3963_v50 = vmul.f32 1.442695, %v3134_v0  ;;  %v15578_v22 = vld [vmem:[#allocation28_spill] sm:$0xff] }
 0x4c1   : > { %v8559_v58 = vpop.eup %8558  ;;  %8590 = vpow2.f32 %v3997_v45  ;;  %v3175_v57 = vsub.f32 %v15578_v22, %v15573_v6  ;;  %v3947_v13 = vmul.f32 1.442695, %v3126_v18  ;;  %v4041_v36 = vmul.f32 1.442695, %v3173_v52  ;;  %v15581_v52 = vld [vmem:[#allocation417_spill] sm:$0xff]  ;;  %v15583_v22 = vld [vmem:[#allocation32_spill] sm:$0xff] }
 0x4c2   : > { %v8561_v7 = vpop.eup %8560  ;;  %5852 = vmatmul.mubr.bf16.gmra.mxu0 %v4477_v2  ;;  %v4479_v30 = vpack.c.bf16 %v8551_v53, %v8559_v58  ;;  %v15577_v53 = vld [vmem:[#allocation408_spill] sm:$0xff]  ;;  %8592 = vpow2.f32 %v3919_v60  ;;  %v3967_v45 = vmul.f32 1.442695, %v3136_v27 }
 0x4c3   : > { %v12852_v51 = vpop.eup %8562  ;;  %5859 = vmatprep.mubr.bf16.mxu0 %v4486_v44  ;;  %v4488_v55 = vpack.c.bf16 %v8557_v28, %v8561_v7  ;;  %v3128_v2 = vsub.f32 %v15577_v53, %v12070_v37  ;;  %8594 = vpow2.f32 %v4009_v62  ;;  %v4013_v44 = vmul.f32 1.442695, %v3159_v17  ;;  %v5355_v28 = vpop.f32.mrf.mxu0  ;;  %v15580_v17 = vld [vmem:[#allocation237_spill] sm:$0xff]  ;;  %v15582_v53 = vld [vmem:[#allocation111_spill] sm:$0xff] }
 0x4c4   : > { %v8565_v56 = vpop.eup %8564  ;;  %6141 = vmatmul.mubr.bf16.gmra.mxu1 %v4479_v30  ;;  %8596 = vpow2.f32 %v3929_v46  ;;  %v3133_v30 = vsub.f32 %v15579_v19, %v15571_v23  ;;  %v5644_v60 = vpop.f32.mrf.mxu1  ;;  %v3135_v5 = vsub.f32 %v15580_v17, %v15571_v23  ;;  %v3150_v46 = vsub.f32 %v15581_v52, %v12094_v54  ;;  %v15584_v23 = vld [vmem:[#allocation413_spill] sm:$0xff] }
 0x4c5   : > { %v8567_v21 = vpop.eup %8566  ;;  %6148 = vmatprep.mubr.bf16.mxu1 %v4488_v55  ;;  %v4485_v31 = vpack.c.bf16 %v8565_v56, %v12528_v59  ;;  %v5357_v0 = vpop.f32.mrf.mxu0  ;;  %8598 = vpow2.f32 %v3933_v32  ;;  %v3951_v62 = vmul.f32 1.442695, %v3128_v2  ;;  %v12867_v16 = vadd.f32 %v5644_v60, %v5355_v28 }
 0x4c6   : > { %v8569_v58 = vpop.eup %8568  ;;  %8600 = vpow2.f32 %v3963_v50  ;;  %v3181_v59 = vsub.f32 %v15583_v22, %v15582_v53  ;;  %v4487_v56 = vpack.c.bf16 %v8567_v21, %v12544_v9  ;;  %v5646_v32 = vpop.f32.mrf.mxu1  ;;  %v3142_v19 = vsub.f32 %v15584_v23, %v12092_v35 }
 0x4c7   : > { %v8571_v7 = vpop.eup %8570  ;;  %v5358_v2 = vpop.f32.mrf.mxu0  ;;  %8602 = vpow2.f32 %v3947_v13  ;;  %v3961_v28 = vmul.f32 1.442695, %v3133_v30  ;;  %v3965_v21 = vmul.f32 1.442695, %v3135_v5  ;;  %v3995_v52 = vmul.f32 1.442695, %v3150_v46 }
 0x4c8   : > { %v8573_v37 = vpop.eup %8572  ;;  %v4494_v18 = vpack.c.bf16 %v8569_v58, %v8571_v7  ;;  %8604 = vpow2.f32 %v3967_v45  ;;  %v15585_v7 = vld [vmem:[#allocation418_spill] sm:$0xff]  ;;  %v4045_v30 = vmul.f32 1.442695, %v3175_v57  ;;  %v4057_v32 = vmul.f32 1.442695, %v3181_v59  ;;  %v15589_v46 = vld [vmem:[#allocation35_spill] sm:$0xff] }
 0x4c9   : > { %v12865_v55 = vpop.eup %8574  ;;  %v3152_v60 = vsub.f32 %v15585_v7, %v12094_v54  ;;  %8606 = vpow2.f32 %v4013_v44  ;;  %v5360_v9 = vpop.f32.mrf.mxu0  ;;  %v3979_v54 = vmul.f32 1.442695, %v3142_v19  ;;  %v15587_v44 = vld [vmem:[#allocation29_spill] sm:$0xff]  ;;  %v15590_v7 = vld [vmem:[#allocation98_spill] sm:$0xff] }
 0x4ca   : > { %v8577_v27 = vpop.eup %8576  ;;  %5860 = vmatmul.mubr.bf16.gmra.mxu0 %v4485_v31  ;;  %v5647_v31 = vpop.f32.mrf.mxu1  ;;  %8608 = vpow2.f32 %v3951_v62  ;;  %v15593_v9 = vld [vmem:[#allocation426_spill] sm:$0xff] }
 0x4cb   : > { %v12876_v58 = vpop.eup %8578  ;;  %5867 = vmatprep.mubr.bf16.mxu0 %v4494_v18  ;;  %v4496_v50 = vpack.c.bf16 %v8573_v37, %v8577_v27  ;;  %v12880_v13 = vadd.f32 %v5647_v31, %v5358_v2  ;;  %v15586_v18 = vld [vmem:[#allocation414_spill] sm:$0xff]  ;;  %8610 = vpow2.f32 %v4041_v36  ;;  %v3999_v5 = vmul.f32 1.442695, %v3152_v60  ;;  %v15591_v31 = vld [vmem:[#allocation27_spill] sm:$0xff]  ;;  %v15592_v60 = vld [vmem:[#allocation109_spill] sm:$0xff] }
 0x4cc   : > { %v8581_v0 = vpop.eup %8580  ;;  %6149 = vmatmul.mubr.bf16.gmra.mxu1 %v4487_v56  ;;  %v3144_v37 = vsub.f32 %v15586_v18, %v12092_v35  ;;  %v5649_v27 = vpop.f32.mrf.mxu1  ;;  %v3183_v56 = vsub.f32 %v15587_v44, %v15582_v53  ;;  %8612 = vpow2.f32 %v3961_v28  ;;  %v15588_v2 = vld [vmem:[#allocation30_spill] sm:$0xff]  ;;  %v3166_v59 = vsub.f32 %v15591_v31, %v15590_v7 }
 0x4cd   : > { %v8583_v17 = vpop.eup %8582  ;;  %6156 = vmatprep.mubr.bf16.mxu1 %v4496_v50  ;;  %v3189_v62 = vsub.f32 %v15588_v2, %v12164_v40  ;;  %v3191_v50 = vsub.f32 %v15589_v46, %v12164_v40  ;;  %v4493_v35 = vpack.c.bf16 %v8581_v0, %v12720_v12  ;;  %8614 = vpow2.f32 %v3965_v21  ;;  %v5363_v44 = vpop.f32.mrf.mxu0  ;;  %v15594_v12 = vld [vmem:[#allocation422_spill] sm:$0xff] }
 0x4ce   : > { %v8585_v45 = vpop.eup %8584  ;;  %8616 = vpow2.f32 %v3995_v52  ;;  %v3983_v19 = vmul.f32 1.442695, %v3144_v37  ;;  %v3197_v18 = vsub.f32 %v15593_v9, %v15592_v60  ;;  %v4495_v27 = vpack.c.bf16 %v8583_v17, %v12724_v11  ;;  %v15595_v37 = vld [vmem:[#allocation425_spill] sm:$0xff]  ;;  %v15596_v17 = vld [vmem:[#allocation423_spill] sm:$0xff] }
 0x4cf   : > { %v8587_v22 = vpop.eup %8586  ;;  %8618 = vpow2.f32 %v3979_v54  ;;  %v3158_v0 = vsub.f32 %v15594_v12, %v12116_v41  ;;  %v4073_v46 = vmul.f32 1.442695, %v3189_v62  ;;  %v5365_v11 = vpop.f32.mrf.mxu0  ;;  %v3160_v54 = vsub.f32 %v15596_v17, %v12116_v41  ;;  %v15599_v41 = vld [vmem:[#allocation428_spill] sm:$0xff] }
 0x4d0   : > { %v8589_v23 = vpop.eup %8588  ;;  %v4502_v36 = vpack.c.bf16 %v8585_v45, %v8587_v22  ;;  %v4061_v45 = vmul.f32 1.442695, %v3183_v56  ;;  %8620 = vpow2.f32 %v3999_v5  ;;  %v3168_v22 = vsub.f32 %v15595_v37, %v15590_v7 }
 0x4d1   : > { %v12891_v57 = vpop.eup %8590  ;;  %8622 = vpow2.f32 %v4045_v30  ;;  %v4077_v9 = vmul.f32 1.442695, %v3191_v50  ;;  %v4027_v56 = vmul.f32 1.442695, %v3166_v59  ;;  %v4089_v30 = vmul.f32 1.442695, %v3197_v18 }
 0x4d2   : > { %v8593_v28 = vpop.eup %8592  ;;  %5868 = vmatmul.mubr.bf16.gmra.mxu0 %v4493_v35  ;;  %v5652_v35 = vpop.f32.mrf.mxu1  ;;  %8624 = vpow2.f32 %v3983_v19  ;;  %v3205_v11 = vsub.f32 %v15599_v41, %v12188_v42  ;;  %v4031_v50 = vmul.f32 1.442695, %v3168_v22  ;;  %v4015_v17 = vmul.f32 1.442695, %v3160_v54  ;;  %v15601_v18 = vld [vmem:[#allocation160_spill] sm:$0xff] }
 0x4d3   : > { %v12900_v21 = vpop.eup %8594  ;;  %5875 = vmatprep.mubr.bf16.mxu0 %v4502_v36  ;;  %v4504_v52 = vpack.c.bf16 %v8589_v23, %v8593_v28  ;;  %v12906_v12 = vadd.f32 %v5652_v35, %v5363_v44  ;;  %8626 = vpow2.f32 %v4057_v32  ;;  %v15598_v23 = vld [vmem:[#allocation40_spill] sm:$0xff]  ;;  %v5366_v28 = vpop.f32.mrf.mxu0 }
 0x4d4   : > { %v8597_v2 = vpop.eup %8596  ;;  %6157 = vmatmul.mubr.bf16.gmra.mxu1 %v4495_v27  ;;  %v3199_v36 = vsub.f32 %v15598_v23, %v15592_v60  ;;  %v5654_v62 = vpop.f32.mrf.mxu1  ;;  %v4011_v27 = vmul.f32 1.442695, %v3158_v0  ;;  %8628 = vpow2.f32 %v4061_v45  ;;  %v15600_v44 = vld [vmem:[#allocation424_spill] sm:$0xff]  ;;  %v3167_v23 = vsub.f32 %v15601_v18, %v15590_v7 }
 0x4d5   : > { %v8599_v31 = vpop.eup %8598  ;;  %6164 = vmatprep.mubr.bf16.mxu1 %v4504_v52  ;;  %15597 = vst [vmem:[#allocation154_spill] sm:$0xff] %v12906_v12  ;;  %v3165_v52 = vsub.f32 %v15600_v44, %v15590_v7  ;;  %8630 = vpow2.f32 %v4073_v46  ;;  %v4501_v32 = vpack.c.bf16 %v8597_v2, %v12744_v61  ;;  %v5368_v35 = vpop.f32.mrf.mxu0  ;;  %v15602_v22 = vld [vmem:[#allocation184_spill] sm:$0xff]  ;;  %v15603_v46 = vld [vmem:[#allocation38_spill] sm:$0xff]  ;;  %v15604_v7 = vld [vmem:[#allocation391_spill] sm:$0xff] }
 0x4d6   : > { %v8601_v5 = vpop.eup %8600  ;;  %v5655_v59 = vpop.f32.mrf.mxu1  ;;  %8632 = vpow2.f32 %v4027_v56  ;;  %v3182_v41 = vsub.f32 %v15602_v22, %v15582_v53  ;;  %v3207_v12 = vsub.f32 %v15603_v46, %v12188_v42  ;;  %v4503_v61 = vpack.c.bf16 %v8599_v31, %v12761_v14  ;;  %v15606_v14 = vld [vmem:[#allocation180_spill] sm:$0xff] }
 0x4d7   : > { %v8603_v37 = vpop.eup %8602  ;;  %v12919_v62 = vadd.f32 %v5655_v59, %v5366_v28  ;;  %8634 = vpow2.f32 %v4011_v27  ;;  %v3174_v54 = vsub.f32 %v15604_v7, %v15573_v6  ;;  %v4025_v56 = vmul.f32 1.442695, %v3165_v52  ;;  %v15605_v28 = vld [vmem:[#allocation26_spill] sm:$0xff] }
 0x4d8   : > { %v8605_v19 = vpop.eup %8604  ;;  %v4510_v45 = vpack.c.bf16 %v8601_v5, %v8603_v37  ;;  %v5657_v2 = vpop.f32.mrf.mxu1  ;;  %8636 = vpow2.f32 %v4031_v50  ;;  %v3184_v37 = vsub.f32 %v15605_v28, %v15582_v53  ;;  %v3176_v31 = vsub.f32 %v15606_v14, %v15573_v6  ;;  %v15607_v53 = vld [vmem:[#allocation43_spill] sm:$0xff]  ;;  %v15610_v28 = vld [vmem:[#allocation429_spill] sm:$0xff] }
 0x4d9   : > { %v12917_v0 = vpop.eup %8606  ;;  %8638 = vpow2.f32 %v4077_v9  ;;  %v4059_v18 = vmul.f32 1.442695, %v3182_v41  ;;  %v4043_v52 = vmul.f32 1.442695, %v3174_v54  ;;  %v4109_v46 = vmul.f32 1.442695, %v3207_v12 }
 0x4da   : > { %v8609_v44 = vpop.eup %8608  ;;  %5876 = vmatmul.mubr.bf16.gmra.mxu0 %v4501_v32  ;;  %v4029_v32 = vmul.f32 1.442695, %v3167_v23  ;;  %8640 = vpow2.f32 %v4015_v17  ;;  %v3213_v9 = vsub.f32 %v15607_v53, %v12192_v43  ;;  %v4063_v23 = vmul.f32 1.442695, %v3184_v37  ;;  %v15608_v6 = vld [vmem:[#allocation47_spill] sm:$0xff]  ;;  %v15609_v54 = vld [vmem:[#allocation33_spill] sm:$0xff] }
 0x4db   : > { %v12928_v35 = vpop.eup %8610  ;;  %5883 = vmatprep.mubr.bf16.mxu0 %v4510_v45  ;;  %v4512_v5 = vpack.c.bf16 %v8605_v19, %v8609_v44  ;;  %8642 = vpow2.f32 %v4089_v30  ;;  %v4093_v45 = vmul.f32 1.442695, %v3199_v36  ;;  %v4105_v19 = vmul.f32 1.442695, %v3205_v11  ;;  %v15613_v53 = vld [vmem:[#allocation427_spill] sm:$0xff] }
 0x4dc   : > { %v8613_v59 = vpop.eup %8612  ;;  %6165 = vmatmul.mubr.bf16.gmra.mxu1 %v4503_v61  ;;  %8644 = vpow2.f32 %v4025_v56  ;;  %v3215_v2 = vsub.f32 %v15608_v6, %v12192_v43  ;;  %v4047_v36 = vmul.f32 1.442695, %v3176_v31  ;;  %v3221_v37 = vsub.f32 %v15610_v28, %v12216_v15 }
 0x4dd   : > { %v8615_v27 = vpop.eup %8614  ;;  %6172 = vmatprep.mubr.bf16.mxu1 %v4512_v5  ;;  %v5371_v50 = vpop.f32.mrf.mxu0  ;;  %v4509_v17 = vpack.c.bf16 %v8613_v59, %v12806_v29  ;;  %8646 = vpow2.f32 %v4029_v32  ;;  %v3198_v5 = vsub.f32 %v15609_v54, %v15592_v60  ;;  %v15611_v32 = vld [vmem:[#allocation39_spill] sm:$0xff]  ;;  %v3200_v6 = vsub.f32 %v15613_v53, %v15592_v60 }
 0x4de   : > { %v8617_v22 = vpop.eup %8616  ;;  %8648 = vpow2.f32 %v4059_v18  ;;  %v4511_v14 = vpack.c.bf16 %v8615_v27, %v12823_v47  ;;  %v3190_v31 = vsub.f32 %v15611_v32, %v12164_v40  ;;  %v15612_v18 = vld [vmem:[#allocation42_spill] sm:$0xff]  ;;  %v4121_v47 = vmul.f32 1.442695, %v3213_v9 }
 0x4df   : > { %v8619_v44 = vpop.eup %8618  ;;  %v5373_v41 = vpop.f32.mrf.mxu0  ;;  %8650 = vpow2.f32 %v4043_v52  ;;  %v4091_v54 = vmul.f32 1.442695, %v3198_v5  ;;  %v4125_v60 = vmul.f32 1.442695, %v3215_v2  ;;  %v4137_v9 = vmul.f32 1.442695, %v3221_v37 }
 0x4e0   : > { %v8621_v61 = vpop.eup %8620  ;;  %v5660_v7 = vpop.f32.mrf.mxu1  ;;  %v4518_v12 = vpack.c.bf16 %v8617_v22, %v8619_v44  ;;  %v3223_v22 = vsub.f32 %v15612_v18, %v12216_v15  ;;  %8652 = vpow2.f32 %v4063_v23  ;;  %v4075_v28 = vmul.f32 1.442695, %v3190_v31 }
 0x4e1   : > { %v12939_v30 = vpop.eup %8622  ;;  %v12941_v11 = vadd.f32 %v5660_v7, %v5371_v50  ;;  %v5374_v59 = vpop.f32.mrf.mxu0  ;;  %8654 = vpow2.f32 %v4093_v45 }
 0x4e2   : > { %v8625_v56 = vpop.eup %8624  ;;  %5884 = vmatmul.mubr.bf16.gmra.mxu0 %v4509_v17  ;;  %v5662_v29 = vpop.f32.mrf.mxu1  ;;  %8656 = vpow2.f32 %v4047_v36  ;;  %v15616_v36 = vld [vmem:[#allocation51_spill] sm:$0xff] }
 0x4e3   : > { %v12950_v50 = vpop.eup %8626  ;;  %5891 = vmatprep.mubr.bf16.mxu0 %v4518_v12  ;;  %v4520_v44 = vpack.c.bf16 %v8621_v61, %v8625_v56  ;;  %v5376_v52 = vpop.f32.mrf.mxu0  ;;  %v15614_v61 = vld [vmem:[#allocation36_spill] sm:$0xff]  ;;  %8658 = vpow2.f32 %v4105_v19  ;;  %v4095_v29 = vmul.f32 1.442695, %v3200_v6  ;;  %v3231_v5 = vsub.f32 %v15616_v36, %v12218_v33 }
 0x4e4   : > { %v12956_v7 = vpop.eup %8628  ;;  %6173 = vmatmul.mubr.bf16.gmra.mxu1 %v4511_v14  ;;  %v5663_v27 = vpop.f32.mrf.mxu1  ;;  %v3192_v23 = vsub.f32 %v15614_v61, %v12164_v40  ;;  %8660 = vpow2.f32 %v4109_v46  ;;  %v4141_v14 = vmul.f32 1.442695, %v3223_v22  ;;  %v4517_v40 = vpack.c.bf16 %v12876_v58, %v12852_v51  ;;  %v15617_v46 = vld [vmem:[#allocation44_spill] sm:$0xff]  ;;  %v15619_v51 = vld [vmem:[#allocation395_spill] sm:$0xff]  ;;  %v15620_v52 = vld [vmem:[#allocation49_spill] sm:$0xff] }
 0x4e5   : > { %v12958_v17 = vpop.eup %8630  ;;  %6180 = vmatprep.mubr.bf16.mxu1 %v4520_v44  ;;  %v12960_v41 = vadd.f32 %v5663_v27, %v5374_v59  ;;  %8662 = vpow2.f32 %v4121_v47  ;;  %v15615_v59 = vld [vmem:[#allocation46_spill] sm:$0xff]  ;;  %v3214_v37 = vsub.f32 %v15617_v46, %v12192_v43  ;;  %v15618_v44 = vld [vmem:[#allocation208_spill] sm:$0xff]  ;;  %v4519_v47 = vpack.c.bf16 %v12891_v57, %v12865_v55 }
 0x4e6   : > { %v8633_v12 = vpop.eup %8632  ;;  %v5665_v56 = vpop.f32.mrf.mxu1  ;;  %v3229_v18 = vsub.f32 %v15615_v59, %v12218_v33  ;;  %8664 = vpow2.f32 %v4091_v54  ;;  %v4079_v31 = vmul.f32 1.442695, %v3192_v23  ;;  %v3237_v53 = vsub.f32 %v15618_v44, %v12245_v63  ;;  %v15621_v23 = vld [vmem:[#allocation48_spill] sm:$0xff] }
 0x4e7   : > { %v8635_v45 = vpop.eup %8634  ;;  %8666 = vpow2.f32 %v4075_v28  ;;  %v3206_v58 = vsub.f32 %v15619_v51, %v12188_v42  ;;  %v3239_v54 = vsub.f32 %v15620_v52, %v12245_v63  ;;  %v15622_v57 = vld [vmem:[#allocation196_spill] sm:$0xff] }
 0x4e8   : > { %v8637_v32 = vpop.eup %8636  ;;  %v4526_v2 = vpack.c.bf16 %v8633_v12, %v8635_v45  ;;  %8668 = vpow2.f32 %v4095_v29  ;;  %v3216_v12 = vsub.f32 %v15621_v23, %v12192_v43  ;;  %v4153_v45 = vmul.f32 1.442695, %v3229_v18 }
 0x4e9   : > { %v12970_v19 = vpop.eup %8638  ;;  %8670 = vpow2.f32 %v4125_v60  ;;  %v3208_v28 = vsub.f32 %v15622_v57, %v12188_v42  ;;  %v4157_v29 = vmul.f32 1.442695, %v3231_v5  ;;  %v4169_v46 = vmul.f32 1.442695, %v3237_v53 }
 0x4ea   : > { %v8641_v22 = vpop.eup %8640  ;;  %v5379_v6 = vpop.f32.mrf.mxu0  ;;  %5892 = vmatmul.mubr.bf16.gmra.mxu0 %v4517_v40  ;;  %8672 = vpow2.f32 %v4079_v31  ;;  %v4107_v60 = vmul.f32 1.442695, %v3206_v58  ;;  %v4173_v44 = vmul.f32 1.442695, %v3239_v54  ;;  %v4127_v42 = vmul.f32 1.442695, %v3216_v12 }
 0x4eb   : > { %v12980_v27 = vpop.eup %8642  ;;  %5899 = vmatprep.mubr.bf16.mxu0 %v4526_v2  ;;  %v4528_v61 = vpack.c.bf16 %v8637_v32, %v8641_v22  ;;  %v4123_v2 = vmul.f32 1.442695, %v3214_v37  ;;  %8674 = vpow2.f32 %v4137_v9  ;;  %v4111_v5 = vmul.f32 1.442695, %v3208_v28  ;;  %v15625_v54 = vld [vmem:[#allocation55_spill] sm:$0xff] }
 0x4ec   : > { %v8645_v56 = vpop.eup %8644  ;;  %v5668_v59 = vpop.f32.mrf.mxu1  ;;  %6181 = vmatmul.mubr.bf16.gmra.mxu1 %v4519_v47  ;;  %8676 = vpow2.f32 %v4141_v14  ;;  %v15623_v47 = vld [vmem:[#allocation54_spill] sm:$0xff]  ;;  %v3230_v23 = vsub.f32 %v15625_v54, %v12218_v33 }
 0x4ed   : > { %v5381_v55 = vpop.f32.mrf.mxu0  ;;  %v8647_v36 = vpop.eup %8646  ;;  %v12988_v40 = vadd.f32 %v5668_v59, %v5379_v6  ;;  %6188 = vmatprep.mubr.bf16.mxu1 %v4528_v61  ;;  %v3245_v51 = vsub.f32 %v15623_v47, %v12251_v48  ;;  %8678 = vpow2.f32 %v4153_v45  ;;  %v15624_v6 = vld [vmem:[#allocation59_spill] sm:$0xff]  ;;  %v4525_v9 = vpack.c.bf16 %v8645_v56, %v12900_v21  ;;  %v15627_v45 = vld [vmem:[#allocation60_spill] sm:$0xff]  ;;  %v15628_v21 = vld [vmem:[#allocation398_spill] sm:$0xff] }
 0x4ee   : > { %v8649_v32 = vpop.eup %8648  ;;  %v5670_v43 = vpop.f32.mrf.mxu1  ;;  %v3247_v31 = vsub.f32 %v15624_v6, %v12251_v48  ;;  %8680 = vpow2.f32 %v4123_v2  ;;  %v15626_v59 = vld [vmem:[#allocation127_spill] sm:$0xff]  ;;  %v4527_v47 = vpack.c.bf16 %v8647_v36, %v12917_v0  ;;  %v3222_v56 = vsub.f32 %v15628_v21, %v12216_v15  ;;  %v15629_v2 = vld [vmem:[#allocation64_spill] sm:$0xff] }
 0x4ef   : > { %v5382_v22 = vpop.f32.mrf.mxu0  ;;  %v8651_v18 = vpop.eup %8650  ;;  %v3253_v55 = vsub.f32 %v15627_v45, %v15626_v59  ;;  %8682 = vpow2.f32 %v4107_v60  ;;  %v15631_v60 = vld [vmem:[#allocation204_spill] sm:$0xff] }
 0x4f0   : > { %v8653_v52 = vpop.eup %8652  ;;  %v5671_v37 = vpop.f32.mrf.mxu1  ;;  %v4534_v14 = vpack.c.bf16 %v8649_v32, %v8651_v18  ;;  %v3255_v32 = vsub.f32 %v15629_v2, %v15626_v59  ;;  %8684 = vpow2.f32 %v4127_v42  ;;  %v15630_v18 = vld [vmem:[#allocation52_spill] sm:$0xff]  ;;  %v4155_v42 = vmul.f32 1.442695, %v3230_v23 }
 0x4f1   : > { %v5384_v61 = vpop.f32.mrf.mxu0  ;;  %v12995_v53 = vpop.eup %8654  ;;  %v12997_v58 = vadd.f32 %v5671_v37, %v5382_v22  ;;  %v3232_v6 = vsub.f32 %v15630_v18, %v12218_v33  ;;  %8686 = vpow2.f32 %v4157_v29  ;;  %v4189_v33 = vmul.f32 1.442695, %v3247_v31  ;;  %v15633_v18 = vld [vmem:[#allocation432_spill] sm:$0xff] }
 0x4f2   : > { %v8657_v12 = vpop.eup %8656  ;;  %v5673_v57 = vpop.f32.mrf.mxu1  ;;  %5900 = vmatmul.mubr.bf16.gmra.mxu0 %v4525_v9  ;;  %v4185_v61 = vmul.f32 1.442695, %v3245_v51  ;;  %v3224_v9 = vsub.f32 %v15631_v60, %v12216_v15  ;;  %8688 = vpow2.f32 %v4111_v5  ;;  %v4139_v29 = vmul.f32 1.442695, %v3222_v56  ;;  %v15632_v15 = vld [vmem:[#allocation124_spill] sm:$0xff] }
 0x4f3   : > { %v5387_v43 = vpop.f32.mrf.mxu0  ;;  %v13006_v28 = vpop.eup %8658  ;;  %5907 = vmatprep.mubr.bf16.mxu0 %v4534_v14  ;;  %v4536_v22 = vpack.c.bf16 %v8653_v52, %v8657_v12  ;;  %8690 = vpow2.f32 %v4169_v46  ;;  %v4201_v57 = vmul.f32 1.442695, %v3253_v55  ;;  %v4159_v21 = vmul.f32 1.442695, %v3232_v6  ;;  %v15635_v6 = vld [vmem:[#allocation58_spill] sm:$0xff] }
 0x4f4   : > { %v13012_v37 = vpop.eup %8660  ;;  %v5676_v0 = vpop.f32.mrf.mxu1  ;;  %6189 = vmatmul.mubr.bf16.gmra.mxu1 %v4527_v47  ;;  %8692 = vpow2.f32 %v4173_v44  ;;  %v4205_v47 = vmul.f32 1.442695, %v3255_v32  ;;  %v4533_v5 = vpack.c.bf16 %v12950_v50, %v12928_v35  ;;  %v4143_v46 = vmul.f32 1.442695, %v3224_v9  ;;  %v15634_v44 = vld [vmem:[#allocation63_spill] sm:$0xff]  ;;  %v15636_v50 = vld [vmem:[#allocation53_spill] sm:$0xff] }
 0x4f5   : > { %v5389_v36 = vpop.f32.mrf.mxu0  ;;  %v13016_v54 = vpop.eup %8662  ;;  %v13018_v45 = vadd.f32 %v5676_v0, %v5387_v43  ;;  %6196 = vmatprep.mubr.bf16.mxu1 %v4536_v22  ;;  %8694 = vpow2.f32 %v4185_v61  ;;  %v3261_v43 = vsub.f32 %v15633_v18, %v15632_v15  ;;  %v3246_v55 = vsub.f32 %v15634_v44, %v12251_v48 }
 0x4f6   : > { %v8665_v52 = vpop.eup %8664  ;;  %v5678_v14 = vpop.f32.mrf.mxu1  ;;  %8696 = vpow2.f32 %v4155_v42  ;;  %v3263_v61 = vsub.f32 %v15635_v6, %v15632_v15  ;;  %v4535_v35 = vpack.c.bf16 %v12956_v7, %v12939_v30  ;;  %v3238_v9 = vsub.f32 %v15636_v50, %v12245_v63  ;;  %v15637_v42 = vld [vmem:[#allocation67_spill] sm:$0xff] }
 0x4f7   : > { %v5390_v12 = vpop.f32.mrf.mxu0  ;;  %v8667_v51 = vpop.eup %8666  ;;  %8698 = vpow2.f32 %v4139_v29  ;;  %v15639_v29 = vld [vmem:[#allocation50_spill] sm:$0xff] }
 0x4f8   : > { %v8669_v2 = vpop.eup %8668  ;;  %v5679_v0 = vpop.f32.mrf.mxu1  ;;  %v4542_v56 = vpack.c.bf16 %v8665_v52, %v8667_v51  ;;  %v3269_v52 = vsub.f32 %v15637_v42, %v12299_v3  ;;  %8700 = vpow2.f32 %v4159_v21  ;;  %v15638_v51 = vld [vmem:[#allocation430_spill] sm:$0xff]  ;;  %v4187_v21 = vmul.f32 1.442695, %v3246_v55 }
 0x4f9   : > { %v5392_v22 = vpop.f32.mrf.mxu0  ;;  %v13024_v31 = vpop.eup %8670  ;;  %v13026_v23 = vadd.f32 %v5679_v0, %v5390_v12  ;;  %v3248_v18 = vsub.f32 %v15638_v51, %v12251_v48  ;;  %8702 = vpow2.f32 %v4189_v33  ;;  %v15640_v48 = vld [vmem:[#allocation71_spill] sm:$0xff]  ;;  %v15642_v51 = vld [vmem:[#allocation402_spill] sm:$0xff] }
 0x4fa   : > { %v8673_v32 = vpop.eup %8672  ;;  %v5681_v36 = vpop.f32.mrf.mxu1  ;;  %5908 = vmatmul.mubr.bf16.gmra.mxu0 %v4533_v5  ;;  %v4217_v22 = vmul.f32 1.442695, %v3261_v43  ;;  %v3240_v5 = vsub.f32 %v15639_v29, %v12245_v63  ;;  %8704 = vpow2.f32 %v4143_v46  ;;  %v4233_v50 = vmul.f32 1.442695, %v3269_v52 }
 0x4fb   : > { %v5395_v60 = vpop.f32.mrf.mxu0  ;;  %v13036_v14 = vpop.eup %8674  ;;  %5915 = vmatprep.mubr.bf16.mxu0 %v4542_v56  ;;  %v4544_v12 = vpack.c.bf16 %v8669_v2, %v8673_v32  ;;  %8706 = vpow2.f32 %v4201_v57  ;;  %v3271_v56 = vsub.f32 %v15640_v48, %v12299_v3  ;;  %v4171_v32 = vmul.f32 1.442695, %v3238_v9 }
 0x4fc   : > { %v13042_v0 = vpop.eup %8676  ;;  %v5684_v30 = vpop.f32.mrf.mxu1  ;;  %6197 = vmatmul.mubr.bf16.gmra.mxu1 %v4535_v35  ;;  %8708 = vpow2.f32 %v4205_v47  ;;  %v4221_v35 = vmul.f32 1.442695, %v3263_v61  ;;  %v4191_v63 = vmul.f32 1.442695, %v3248_v18  ;;  %v4541_v57 = vpack.c.bf16 %v12980_v27, %v12958_v17  ;;  %v15643_v47 = vld [vmem:[#allocation62_spill] sm:$0xff]  ;;  %v15644_v17 = vld [vmem:[#allocation61_spill] sm:$0xff] }
 0x4fd   : > { %v5397_v7 = vpop.f32.mrf.mxu0  ;;  %v13046_v44 = vpop.eup %8678  ;;  %v13048_v6 = vadd.f32 %v5684_v30, %v5395_v60  ;;  %6204 = vmatprep.mubr.bf16.mxu1 %v4544_v12  ;;  %8710 = vpow2.f32 %v4217_v22  ;;  %v15641_v60 = vld [vmem:[#allocation121_spill] sm:$0xff]  ;;  %v4175_v30 = vmul.f32 1.442695, %v3240_v5  ;;  %v3262_v61 = vsub.f32 %v15643_v47, %v15632_v15 }
 0x4fe   : > { %v8681_v2 = vpop.eup %8680  ;;  %v5686_v33 = vpop.f32.mrf.mxu1  ;;  %v3277_v12 = vsub.f32 %v15642_v51, %v15641_v60  ;;  %8712 = vpow2.f32 %v4187_v21  ;;  %v4237_v18 = vmul.f32 1.442695, %v3271_v56  ;;  %v3254_v27 = vsub.f32 %v15644_v17, %v15626_v59  ;;  %v15646_v56 = vld [vmem:[#allocation224_spill] sm:$0xff] }
 0x4ff   : > { %v5398_v43 = vpop.f32.mrf.mxu0  ;;  %v8683_v36 = vpop.eup %8682  ;;  %v4543_v33 = vpack.c.bf16 %v12995_v53, %v12970_v19  ;;  %8714 = vpow2.f32 %v4171_v32 }
 0x500   : > { %v8685_v42 = vpop.eup %8684  ;;  %v5687_v46 = vpop.f32.mrf.mxu1  ;;  %v4550_v9 = vpack.c.bf16 %v8681_v2, %v8683_v36  ;;  %v15645_v2 = vld [vmem:[#allocation228_spill] sm:$0xff]  ;;  %8716 = vpow2.f32 %v4191_v63  ;;  %v3264_v36 = vsub.f32 %v15646_v56, %v15632_v15  ;;  %v15648_v15 = vld [vmem:[#allocation69_spill] sm:$0xff] }
 0x501   : > { %v5400_v55 = vpop.f32.mrf.mxu0  ;;  %v13056_v7 = vpop.eup %8686  ;;  %v13058_v29 = vadd.f32 %v5687_v46, %v5398_v43  ;;  %v3279_v21 = vsub.f32 %v15645_v2, %v15641_v60  ;;  %8718 = vpow2.f32 %v4221_v35  ;;  %v4249_v46 = vmul.f32 1.442695, %v3277_v12 }
 0x502   : > { %v8689_v52 = vpop.eup %8688  ;;  %v5689_v22 = vpop.f32.mrf.mxu1  ;;  %5916 = vmatmul.mubr.bf16.gmra.mxu0 %v4541_v57  ;;  %8720 = vpow2.f32 %v4175_v30  ;;  %v4219_v57 = vmul.f32 1.442695, %v3262_v61  ;;  %v3285_v47 = vsub.f32 %v15648_v15, %v12319_v25  ;;  %v4223_v17 = vmul.f32 1.442695, %v3264_v36 }
 0x503   : > { %v5403_v48 = vpop.f32.mrf.mxu0  ;;  %v13066_v5 = vpop.eup %8690  ;;  %5923 = vmatprep.mubr.bf16.mxu0 %v4550_v9  ;;  %v4552_v43 = vpack.c.bf16 %v8685_v42, %v8689_v52  ;;  %v15647_v42 = vld [vmem:[#allocation220_spill] sm:$0xff]  ;;  %8722 = vpow2.f32 %v4233_v50  ;;  %v4203_v52 = vmul.f32 1.442695, %v3254_v27  ;;  %v4549_v61 = vpack.c.bf16 %v13016_v54, %v13006_v28  ;;  %v15651_v54 = vld [vmem:[#allocation241_spill] sm:$0xff] }
 0x504   : > { %v13072_v51 = vpop.eup %8692  ;;  %v5692_v19 = vpop.f32.mrf.mxu1  ;;  %6205 = vmatmul.mubr.bf16.gmra.mxu1 %v4543_v33  ;;  %v3256_v63 = vsub.f32 %v15647_v42, %v15626_v59  ;;  %8724 = vpow2.f32 %v4237_v18  ;;  %v4253_v33 = vmul.f32 1.442695, %v3279_v21  ;;  %v15649_v59 = vld [vmem:[#allocation68_spill] sm:$0xff]  ;;  %v4551_v28 = vpack.c.bf16 %v13024_v31, %v13012_v37 }
 0x505   : > { %v5405_v53 = vpop.f32.mrf.mxu0  ;;  %v13074_v32 = vpop.eup %8694  ;;  %v13076_v55 = vadd.f32 %v5692_v19, %v5403_v48  ;;  %6212 = vmatprep.mubr.bf16.mxu1 %v4552_v43  ;;  %8726 = vpow2.f32 %v4249_v46  ;;  %v3270_v50 = vsub.f32 %v15649_v59, %v12299_v3  ;;  %v15650_v43 = vld [vmem:[#allocation65_spill] sm:$0xff]  ;;  %v4265_v46 = vmul.f32 1.442695, %v3285_v47 }
 0x506   : > { %v8697_v9 = vpop.eup %8696  ;;  %v5694_v35 = vpop.f32.mrf.mxu1  ;;  %v3278_v56 = vsub.f32 %v15650_v43, %v15641_v60  ;;  %8728 = vpow2.f32 %v4219_v57  ;;  %v4207_v21 = vmul.f32 1.442695, %v3256_v63  ;;  %v3280_v15 = vsub.f32 %v15651_v54, %v15641_v60 }
 0x507   : > { %v5406_v12 = vpop.f32.mrf.mxu0  ;;  %v8699_v22 = vpop.eup %8698  ;;  %8730 = vpow2.f32 %v4203_v52  ;;  %v4235_v31 = vmul.f32 1.442695, %v3270_v50  ;;  %v15654_v52 = vld [vmem:[#allocation72_spill] sm:$0xff] }
 0x508   : > { %v8701_v48 = vpop.eup %8700  ;;  %v5695_v2 = vpop.f32.mrf.mxu1  ;;  %v4558_v18 = vpack.c.bf16 %v8697_v9, %v8699_v22  ;;  %v15653_v9 = vld [vmem:[#allocation107_spill] sm:$0xff]  ;;  %8732 = vpow2.f32 %v4223_v17  ;;  %v3272_v60 = vsub.f32 %v15654_v52, %v12299_v3  ;;  %v4251_v59 = vmul.f32 1.442695, %v3278_v56  ;;  %v15655_v17 = vld [vmem:[#allocation242_spill] sm:$0xff]  ;;  %v15656_v3 = vld [vmem:[#allocation108_spill] sm:$0xff] }
 0x509   : > { %v5408_v30 = vpop.f32.mrf.mxu0  ;;  %v13088_v19 = vpop.eup %8702  ;;  %v13090_v27 = vadd.f32 %v5695_v2, %v5406_v12  ;;  %v15652_v12 = vld [vmem:[#allocation66_spill] sm:$0xff]  ;;  %8734 = vpow2.f32 %v4253_v33  ;;  %v4557_v56 = vpack.c.bf16 %v13046_v44, %v13036_v14 }
 0x50a   : > { %v8705_v36 = vpop.eup %8704  ;;  %v5697_v53 = vpop.f32.mrf.mxu1  ;;  %5924 = vmatmul.mubr.bf16.gmra.mxu0 %v4549_v61  ;;  %v3287_v2 = vsub.f32 %v15652_v12, %v12319_v25  ;;  %8736 = vpow2.f32 %v4207_v21  ;;  %v4239_v21 = vmul.f32 1.442695, %v3272_v60  ;;  %v15659_v60 = vld [vmem:[#allocation244_spill] sm:$0xff] }
 0x50b   : > { %v5733_v42 = vpop.f32.mrf.mxu0  ;;  %v13096_v35 = vpop.eup %8706  ;;  %5931 = vmatprep.mubr.bf16.mxu0 %v4558_v18  ;;  %v4560_v63 = vpack.c.bf16 %v8701_v48, %v8705_v36  ;;  %8738 = vpow2.f32 %v4265_v46  ;;  %v3293_v48 = vsub.f32 %v15655_v17, %v12329_v49  ;;  %v4255_v36 = vmul.f32 1.442695, %v3280_v15  ;;  %v15657_v46 = vld [vmem:[#allocation238_spill] sm:$0xff] }
 0x50c   : > { %v5734_v57 = vadd.f32 %v5733_v42, %v15653_v9  ;;  %v13101_v47 = vpop.eup %8708  ;;  %v6022_v22 = vpop.f32.mrf.mxu1  ;;  %6213 = vmatmul.mubr.bf16.gmra.mxu1 %v4551_v28  ;;  %v4269_v50 = vmul.f32 1.442695, %v3287_v2  ;;  %v3286_v9 = vsub.f32 %v15657_v46, %v12319_v25  ;;  %v3296_v17 = vsub.f32 %v15659_v60, %v12329_v49  ;;  %v6861_v46 = vld [vmem:[%s9386_s20 + $0x30] sm:$0xff] }
 0x50d   : > { %v5735_v37 = vpop.f32.mrf.mxu0  ;;  %v13105_v30 = vpop.eup %8710  ;;  %6220 = vmatprep.mubr.bf16.mxu1 %v4560_v63  ;;  %v15658_v63 = vld [vmem:[#allocation70_spill] sm:$0xff]  ;;  %v4281_v52 = vmul.f32 1.442695, %v3293_v48 }
 0x50e   : > { %v13107_v61 = vadd.f32 %v6022_v22, %v5734_v57  ;;  %v8713_v43 = vpop.eup %8712  ;;  %v6024_v33 = vpop.f32.mrf.mxu1  ;;  %v3294_v22 = vsub.f32 %v15658_v63, %v12329_v49  ;;  %v4287_v60 = vmul.f32 1.442695, %v3296_v17 }
 0x50f   : > { %v5736_v18 = vpop.f32.mrf.mxu0  ;;  %v8715_v53 = vpop.eup %8714 }
 0x510   : > { %8740 = vrcp.f32 %v13107_v61  ;;  %v5737_v42 = vadd.f32 %v5736_v18, %v15656_v3  ;;  %v8717_v28 = vpop.eup %8716  ;;  %v6025_v54 = vpop.f32.mrf.mxu1  ;;  %v4566_v2 = vpack.c.bf16 %v8713_v43, %v8715_v53  ;;  %v15661_v18 = vld [vmem:[#allocation112_spill] sm:$0xff]  ;;  %v6860_v3 = vld [vmem:[%s9386_s20 + $0x28] sm:$0xff] }
 0x511   : > { %v5738_v12 = vpop.f32.mrf.mxu0  ;;  %8742 = vpow2.f32 %v4235_v31  ;;  %v13117_v57 = vpop.eup %8718  ;;  %v4559_v31 = vpack.c.bf16 %v13056_v7, %v13042_v0  ;;  %6899 = vmatprep.subr.mxu0 %v6860_v3 }
 0x512   : > { %v13119_v15 = vadd.f32 %v6025_v54, %v5737_v42  ;;  %8744 = vpow2.f32 %v4251_v59  ;;  %v8721_v37 = vpop.eup %8720  ;;  %v6027_v14 = vpop.f32.mrf.mxu1  ;;  %5932 = vmatmul.mubr.bf16.gmra.mxu0 %v4557_v56  ;;  %v15660_v59 = vld [vmem:[#allocation86_spill] sm:$0xff]  ;;  %v6862_v42 = vld [vmem:[%s9386_s20 + $0x38] sm:$0xff]  ;;  %v6859_v54 = vld [vmem:[%s9386_s20 + $0x20] sm:$0xff]  ;;  %v4267_v12 = vmul.f32 1.442695, %v3286_v9 }
 0x513   : > { %v5741_v44 = vpop.f32.mrf.mxu0  ;;  %8746 = vpow2.f32 %v4255_v36  ;;  %v13127_v43 = vpop.eup %8722  ;;  %v3295_v33 = vsub.f32 %v15660_v59, %v12329_v49  ;;  %5939 = vmatprep.mubr.bf16.mxu0 %v4566_v2  ;;  %v4568_v53 = vpack.c.bf16 %v8717_v28, %v8721_v37  ;;  %v15662_v56 = vld [vmem:[#allocation85_spill] sm:$0xff]  ;;  %v4283_v28 = vmul.f32 1.442695, %v3294_v22  ;;  %6976 = vmatprep.subr.mxu1 %v6862_v42  ;;  %v15664_v37 = vld [vmem:[#allocation252_spill] sm:$0xff] }
 0x514   : > { %8748 = vrcp.f32 %v13119_v15  ;;  %v5742_v48 = vadd.f32 %v5741_v44, %v15661_v18  ;;  %v13136_v0 = vpop.eup %8724  ;;  %v6030_v7 = vpop.f32.mrf.mxu1  ;;  %6221 = vmatmul.mubr.bf16.gmra.mxu1 %v4559_v31  ;;  %v3288_v49 = vsub.f32 %v15662_v56, %v12319_v25  ;;  %6900 = vmatpush1.msra.mxu0 %v6859_v54  ;;  %v15665_v18 = vld [vmem:[#allocation105_spill] sm:$0xff]  ;;  %v15666_v42 = vld [vmem:[#allocation256_spill] sm:$0xff] }
 0x515   : > { %8750 = vpow2.f32 %v4269_v50  ;;  %v5743_v36 = vpop.f32.mrf.mxu0  ;;  %v13141_v63 = vpop.eup %8726  ;;  %6228 = vmatprep.mubr.bf16.mxu1 %v4568_v53  ;;  %v15663_v50 = vld [vmem:[#allocation122_spill] sm:$0xff]  ;;  %6977 = vmatpush1.msra.mxu1 %v6861_v46  ;;  %v4285_v59 = vmul.f32 1.442695, %v3295_v33  ;;  %v15668_v56 = vld [vmem:[#allocation77_spill] sm:$0xff] }
 0x516   : > { %v13143_v14 = vadd.f32 %v6030_v7, %v5742_v48  ;;  %8752 = vpow2.f32 %v4239_v21  ;;  %v8729_v2 = vpop.eup %8728  ;;  %v3301_v44 = vsub.f32 %v15664_v37, %v15663_v50  ;;  %v6032_v31 = vpop.f32.mrf.mxu1  ;;  %v4271_v3 = vmul.f32 1.442695, %v3288_v49  ;;  %v15667_v36 = vld [vmem:[#allocation126_spill] sm:$0xff] }
 0x517   : > { %8754 = vpow2.f32 %v4281_v52  ;;  %v5744_v9 = vpop.f32.mrf.mxu0  ;;  %v8731_v25 = vpop.eup %8730  ;;  %v4565_v52 = vpack.c.bf16 %v13074_v32, %v13066_v5  ;;  %v3302_v7 = vsub.f32 %v15666_v42, %v15663_v50  ;;  %v3310_v46 = vsub.f32 %v15668_v56, %v15667_v36  ;;  %v15669_v32 = vld [vmem:[#allocation74_spill] sm:$0xff] }
 0x518   : > { %8756 = vrcp.f32 %v13143_v14  ;;  %v5745_v48 = vadd.f32 %v5744_v9, %v15665_v18  ;;  %v8733_v53 = vpop.eup %8732  ;;  %v6033_v21 = vpop.f32.mrf.mxu1  ;;  %v4574_v33 = vpack.c.bf16 %v8729_v2, %v8731_v25  ;;  %v4297_v31 = vmul.f32 1.442695, %v3301_v44  ;;  %v15670_v2 = vld [vmem:[#allocation76_spill] sm:$0xff]  ;;  %v15671_v25 = vld [vmem:[#allocation106_spill] sm:$0xff] }
 0x519   : > { %v5746_v22 = vpop.f32.mrf.mxu0  ;;  %8758 = vpow2.f32 %v4267_v12  ;;  %v13153_v17 = vpop.eup %8734  ;;  %v4567_v5 = vpack.c.bf16 %v13088_v19, %v13072_v51  ;;  %v3312_v12 = vsub.f32 %v15669_v32, %v15667_v36  ;;  %v4299_v19 = vmul.f32 1.442695, %v3302_v7 }
 0x51a   : > { %v13155_v54 = vadd.f32 %v6033_v21, %v5745_v48  ;;  %8760 = vpow2.f32 %v4283_v28  ;;  %v8737_v37 = vpop.eup %8736  ;;  %v6035_v9 = vpop.f32.mrf.mxu1  ;;  %5940 = vmatmul.mubr.bf16.gmra.mxu0 %v4565_v52  ;;  %v3309_v28 = vsub.f32 %v15670_v2, %v15667_v36  ;;  %v15674_v2 = vld [vmem:[#allocation110_spill] sm:$0xff] }
 0x51b   : > { %v5749_v18 = vpop.f32.mrf.mxu0  ;;  %8762 = vpow2.f32 %v4287_v60  ;;  %v13163_v49 = vpop.eup %8738  ;;  %5947 = vmatprep.mubr.bf16.mxu0 %v4574_v33  ;;  %v4576_v44 = vpack.c.bf16 %v8733_v53, %v8737_v37  ;;  %v15672_v60 = vld [vmem:[#allocation79_spill] sm:$0xff]  ;;  %v4315_v9 = vmul.f32 1.442695, %v3310_v46  ;;  %v15673_v53 = vld [vmem:[#allocation73_spill] sm:$0xff] }
 0x51c   : > { %8764 = vrcp.f32 %v13155_v54  ;;  %v5750_v48 = vadd.f32 %v5749_v18, %v15671_v25  ;;  %v6038_v22 = vpop.f32.mrf.mxu1  ;;  %6229 = vmatmul.mubr.bf16.gmra.mxu1 %v4567_v5  ;;  %v3304_v52 = vsub.f32 %v15672_v60, %v15663_v50  ;;  %v3311_v33 = vsub.f32 %v15673_v53, %v15667_v36 }
 0x51d   : > { %v8741_v21 = vpop.eup %8740  ;;  %8766 = vpow2.f32 %v4285_v59  ;;  %v5751_v51 = vpop.f32.mrf.mxu0  ;;  %6236 = vmatprep.mubr.bf16.mxu1 %v4576_v44  ;;  %v4319_v18 = vmul.f32 1.442695, %v3312_v12  ;;  %v4313_v7 = vmul.f32 1.442695, %v3309_v28 }
 0x51e   : > { %v8743_v42 = vpop.eup %8742  ;;  %v13171_v56 = vadd.f32 %v6038_v22, %v5750_v48  ;;  %6345 = vperm.xlu0 %7672, %v8741_v21   ;;  %8768 = vpow2.f32 %v4271_v3  ;;  %v6040_v59 = vpop.f32.mrf.mxu1  ;;  %v4573_v3 = vpack.c.bf16 %v13105_v30, %v13096_v35  ;;  %v4303_v46 = vmul.f32 1.442695, %v3304_v52  ;;  %v15676_v51 = vld [vmem:[#allocation82_spill] sm:$0xff] }
 0x51f   : > { %v8745_v32 = vpop.eup %8744  ;;  %8770 = vpow2.f32 %v4297_v31  ;;  %v5752_v37 = vpop.f32.mrf.mxu0  ;;  %v15675_v31 = vld [vmem:[#allocation83_spill] sm:$0xff]  ;;  %v3326_v60 = vsub.f32 %v15676_v51, %v12389_v26  ;;  %v4317_v59 = vmul.f32 1.442695, %v3311_v33  ;;  %v4575_v35 = vpack.c.bf16 %v13117_v57, %v13101_v47  ;;  %v15677_v30 = vld [vmem:[#allocation90_spill] sm:$0xff] }
 0x520   : > { %v8747_v5 = vpop.eup %8746  ;;  %8772 = vrcp.f32 %v13171_v56  ;;  %v5753_v25 = vadd.f32 %v5752_v37, %v15674_v2  ;;  %v6041_v22 = vpop.f32.mrf.mxu1  ;;  %v3318_v36 = vsub.f32 %v15675_v31, %v12387_v34  ;;  %v4582_v28 = vpack.c.bf16 %v8745_v32, %v8743_v42  ;;  %v15678_v42 = vld [vmem:[#allocation75_spill] sm:$0xff]  ;;  %v15679_v32 = vld [vmem:[#allocation113_spill] sm:$0xff] }
 0x521   : > { %v8749_v48 = vpop.eup %8748  ;;  %v5754_v44 = vpop.f32.mrf.mxu0  ;;  %8774 = vpow2.f32 %v4299_v19  ;;  %v3328_v19 = vsub.f32 %v15677_v30, %v12389_v26  ;;  %v15682_v30 = vld [vmem:[#allocation78_spill] sm:$0xff] }
 0x522   : > { %v13181_v21 = vpop.eup %8750  ;;  %v13183_v12 = vadd.f32 %v6041_v22, %v5753_v25  ;;  %6350 = vperm.xlu1 %7673, %v8749_v48   ;;  %8776 = vpow2.f32 %v4315_v9  ;;  %v6043_v37 = vpop.f32.mrf.mxu1  ;;  %5948 = vmatmul.mubr.bf16.gmra.mxu0 %v4573_v3  ;;  %v3303_v9 = vsub.f32 %v15678_v42, %v15663_v50  ;;  %v4331_v57 = vmul.f32 1.442695, %v3318_v36  ;;  %v15680_v50 = vld [vmem:[#allocation81_spill] sm:$0xff]  ;;  %v15681_v36 = vld [vmem:[#allocation114_spill] sm:$0xff] }
 0x523   : > { %v8753_v53 = vpop.eup %8752  ;;  %v5757_v2 = vpop.f32.mrf.mxu0  ;;  %8778 = vpow2.f32 %v4319_v18  ;;  %5955 = vmatprep.mubr.bf16.mxu0 %v4582_v28  ;;  %v4347_v3 = vmul.f32 1.442695, %v3326_v60  ;;  %v3320_v31 = vsub.f32 %v15680_v50, %v12387_v34  ;;  %v3317_v42 = vsub.f32 %v15682_v30, %v12387_v34 }
 0x524   : > { %v13191_v52 = vpop.eup %8754  ;;  %8780 = vrcp.f32 %v13183_v12  ;;  %v5758_v25 = vadd.f32 %v5757_v2, %v15679_v32  ;;  %v4584_v33 = vpack.c.bf16 %v8747_v5, %v8753_v53  ;;  %v6046_v22 = vpop.f32.mrf.mxu1  ;;  %6237 = vmatmul.mubr.bf16.gmra.mxu1 %v4575_v35  ;;  %v4351_v53 = vmul.f32 1.442695, %v3328_v19 }
 0x525   : > { %v8757_v48 = vpop.eup %8756  ;;  %8782 = vpow2.f32 %v4313_v7  ;;  %v5759_v47 = vpop.f32.mrf.mxu0  ;;  %v4301_v37 = vmul.f32 1.442695, %v3303_v9 }
 0x526   : > { %v8759_v18 = vpop.eup %8758  ;;  %v13197_v44 = vadd.f32 %v6046_v22, %v5758_v25  ;;  %6244 = vmatprep.mubr.bf16.mxu1 %v4584_v33  ;;  %6355 = vperm.xlu1 %7673, %v8757_v48   ;;  %8784 = vpow2.f32 %v4303_v46  ;;  %v6048_v28 = vpop.f32.mrf.mxu1  ;;  %v15683_v46 = vld [vmem:[#allocation84_spill] sm:$0xff]  ;;  %v4335_v48 = vmul.f32 1.442695, %v3320_v31  ;;  %v15684_v47 = vld [vmem:[#allocation91_spill] sm:$0xff] }
 0x527   : > { %v8761_v51 = vpop.eup %8760  ;;  %8786 = vpow2.f32 %v4317_v59  ;;  %v5760_v5 = vpop.f32.mrf.mxu0  ;;  %v3325_v60 = vsub.f32 %v15683_v46, %v12389_v26  ;;  %v4581_v59 = vpack.c.bf16 %v13141_v63, %v13127_v43  ;;  %v3327_v50 = vsub.f32 %v15684_v47, %v12389_v26  ;;  %v15685_v63 = vld [vmem:[#allocation115_spill] sm:$0xff] }
 0x528   : > { %v8763_v7 = vpop.eup %8762  ;;  %8788 = vrcp.f32 %v13197_v44  ;;  %v5761_v2 = vadd.f32 %v5760_v5, %v15681_v36  ;;  %v6049_v32 = vpop.f32.mrf.mxu1  ;;  %v4590_v33 = vpack.c.bf16 %v8761_v51, %v8759_v18  ;;  %v4583_v36 = vpack.c.bf16 %v13153_v17, %v13136_v0  ;;  %v15686_v31 = vld [vmem:[#allocation87_spill] sm:$0xff] }
 0x529   : > { %v8765_v35 = vpop.eup %8764  ;;  %v5762_v25 = vpop.f32.mrf.mxu0  ;;  %8790 = vpow2.f32 %v4331_v57  ;;  %v3319_v26 = vsub.f32 %v15686_v31, %v12387_v34  ;;  %v4345_v51 = vmul.f32 1.442695, %v3325_v60  ;;  %v4329_v0 = vmul.f32 1.442695, %v3317_v42 }
 0x52a   : > { %v13209_v19 = vpop.eup %8766  ;;  %v13211_v9 = vadd.f32 %v6049_v32, %v5761_v2  ;;  %6360 = vperm.xlu1 %7673, %v8765_v35   ;;  %8792 = vpow2.f32 %v4347_v3  ;;  %v6051_v28 = vpop.f32.mrf.mxu1  ;;  %5956 = vmatmul.mubr.bf16.gmra.mxu0 %v4581_v59  ;;  %v4349_v46 = vmul.f32 1.442695, %v3327_v50  ;;  %v4589_v42 = vpack.c.bf16 %v13191_v52, %v13163_v49 }
 0x52b   : > { %v8769_v22 = vpop.eup %8768  ;;  %v5765_v5 = vpop.f32.mrf.mxu0  ;;  %8794 = vpow2.f32 %v4351_v53  ;;  %5963 = vmatprep.mubr.bf16.mxu0 %v4590_v33  ;;  %v4333_v59 = vmul.f32 1.442695, %v3319_v26 }
 0x52c   : > { %v13217_v43 = vpop.eup %8770  ;;  %8796 = vrcp.f32 %v13211_v9  ;;  %v5766_v57 = vadd.f32 %v5765_v5, %v15685_v63  ;;  %v4592_v18 = vpack.c.bf16 %v8763_v7, %v8769_v22  ;;  %v6054_v2 = vpop.f32.mrf.mxu1  ;;  %6245 = vmatmul.mubr.bf16.gmra.mxu1 %v4583_v36  ;;  %v4591_v63 = vpack.c.bf16 %v13209_v19, %v13181_v21 }
 0x52d   : > { %v8773_v3 = vpop.eup %8772  ;;  %8798 = vpow2.f32 %v4301_v37  ;;  %v5767_v35 = vpop.f32.mrf.mxu0  ;;  %v15687_v37 = vld [vmem:[#allocation119_spill] sm:$0xff] }
 0x52e   : > { %v8775_v30 = vpop.eup %8774  ;;  %v13223_v17 = vadd.f32 %v6054_v2, %v5766_v57  ;;  %6252 = vmatprep.mubr.bf16.mxu1 %v4592_v18  ;;  %6365 = vperm.xlu1 %7673, %v8773_v3   ;;  %8800 = vpow2.f32 %v4335_v48  ;;  %v6056_v32 = vpop.f32.mrf.mxu1  ;;  %v15688_v18 = vld [vmem:[#allocation116_spill] sm:$0xff] }
 0x52f   : > { %v8777_v53 = vpop.eup %8776  ;;  %v5768_v7 = vpop.f32.mrf.mxu0 }
 0x530   : > { %v8779_v25 = vpop.eup %8778  ;;  %8802 = vrcp.f32 %v13223_v17  ;;  %v5769_v34 = vadd.f32 %v5768_v7, %v15687_v37  ;;  %v6057_v33 = vpop.f32.mrf.mxu1  ;;  %v4598_v50 = vpack.c.bf16 %v8777_v53, %v8775_v30 }
 0x531   : > { %v8781_v60 = vpop.eup %8780  ;;  %8804 = vpow2.f32 %v4345_v51  ;;  %v5770_v22 = vpop.f32.mrf.mxu0 }
 0x532   : > { %v8783_v47 = vpop.eup %8782  ;;  %8806 = vpow2.f32 %v4329_v0  ;;  %v13229_v48 = vadd.f32 %v6057_v33, %v5769_v34  ;;  %6370 = vperm.xlu1 %7673, %v8781_v60   ;;  %v6059_v5 = vpop.f32.mrf.mxu1  ;;  %5964 = vmatmul.mubr.bf16.gmra.mxu0 %v4589_v42  ;;  %v15689_v0 = vld [vmem:[#allocation120_spill] sm:$0xff] }
 0x533   : > { %v8785_v28 = vpop.eup %8784  ;;  %8808 = vpow2.f32 %v4349_v46  ;;  %v5773_v36 = vpop.f32.mrf.mxu0  ;;  %5971 = vmatprep.mubr.bf16.mxu0 %v4598_v50  ;;  %v15690_v50 = vld [vmem:[#allocation117_spill] sm:$0xff] }
 0x534   : > { %v8787_v57 = vpop.eup %8786  ;;  %8810 = vrcp.f32 %v13229_v48  ;;  %v5774_v3 = vadd.f32 %v5773_v36, %v15688_v18  ;;  %v4600_v49 = vpack.c.bf16 %v8779_v25, %v8785_v28  ;;  %v6062_v31 = vpop.f32.mrf.mxu1  ;;  %6253 = vmatmul.mubr.bf16.gmra.mxu1 %v4591_v63  ;;  %v4597_v25 = vpack.c.bf16 %v8783_v47, %v13217_v43 }
 0x535   : > { %v8789_v52 = vpop.eup %8788  ;;  %8812 = vpow2.f32 %v4333_v59  ;;  %v5775_v26 = vpop.f32.mrf.mxu0 }
 0x536   : > { %v8791_v51 = vpop.eup %8790  ;;  %v13235_v2 = vadd.f32 %v6062_v31, %v5774_v3  ;;  %6260 = vmatprep.mubr.bf16.mxu1 %v4600_v49  ;;  %6375 = vperm.xlu1 %7673, %v8789_v52   ;;  %v6064_v30 = vpop.f32.mrf.mxu1 }
 0x537   : > { %v8793_v35 = vpop.eup %8792  ;;  %v5776_v21 = vpop.f32.mrf.mxu0 }
 0x538   : > { %v8795_v19 = vpop.eup %8794  ;;  %8814 = vrcp.f32 %v13235_v2  ;;  %v5777_v53 = vadd.f32 %v5776_v21, %v15689_v0  ;;  %v6065_v32 = vpop.f32.mrf.mxu1  ;;  %v4606_v60 = vpack.c.bf16 %v8793_v35, %v8791_v51 }
 0x539   : > { %v8797_v46 = vpop.eup %8796  ;;  %v5778_v7 = vpop.f32.mrf.mxu0 }
 0x53a   : > { %v8799_v37 = vpop.eup %8798  ;;  %v13240_v34 = vadd.f32 %v6065_v32, %v5777_v53  ;;  %6380 = vperm.xlu1 %7673, %v8797_v46   ;;  %v6067_v33 = vpop.f32.mrf.mxu1  ;;  %5972 = vmatmul.mubr.bf16.gmra.mxu0 %v4597_v25  ;;  %v15692_v7 = vld [vmem:[#allocation123_spill] sm:$0xff] }
 0x53b   : > { %v8801_v59 = vpop.eup %8800  ;;  %v5781_v22 = vpop.f32.mrf.mxu0  ;;  %v4599_v42 = vpack.c.bf16 %v8787_v57, %v8799_v37  ;;  %5979 = vmatprep.mubr.bf16.mxu0 %v4606_v60  ;;  %v15691_v57 = vld [vmem:[#allocation118_spill] sm:$0xff] }
 0x53c   : > { %8816 = vrcp.f32 %v13240_v34  ;;  %v5782_v28 = vadd.f32 %v5781_v22, %v15690_v50  ;;  %v4608_v5 = vpack.c.bf16 %v8795_v19, %v8801_v59  ;;  %v6070_v63 = vpop.f32.mrf.mxu1  ;;  %v15693_v50 = vld [vmem:[#allocation128_spill] sm:$0xff] }
 0x53d   : > { %v8803_v36 = vpop.eup %8802  ;;  %6261 = vmatmul.mubr.bf16.gmra.mxu1 %v4599_v42  ;;  %v5783_v43 = vpop.f32.mrf.mxu0 }
 0x53e   : > { %v8805_v47 = vpop.eup %8804  ;;  %v13244_v18 = vadd.f32 %v6070_v63, %v5782_v28  ;;  %6268 = vmatprep.mubr.bf16.mxu1 %v4608_v5  ;;  %6385 = vperm.xlu1 %7673, %v8803_v36   ;;  %v6072_v49 = vpop.f32.mrf.mxu1 }
 0x53f   : > { %v8807_v3 = vpop.eup %8806  ;;  %v5784_v52 = vpop.f32.mrf.mxu0  ;;  %v15694_v49 = vld [vmem:[#allocation125_spill] sm:$0xff] }
 0x540   : > { %v8809_v31 = vpop.eup %8808  ;;  %8818 = vrcp.f32 %v13244_v18  ;;  %v5785_v26 = vadd.f32 %v5784_v52, %v15691_v57  ;;  %v6073_v35 = vpop.f32.mrf.mxu1  ;;  %v4605_v21 = vpack.c.bf16 %v8805_v47, %v8807_v3 }
 0x541   : > { %v8811_v51 = vpop.eup %8810  ;;  %v5786_v30 = vpop.f32.mrf.mxu0 }
 0x542   : > { %v8813_v19 = vpop.eup %8812  ;;  %v13248_v0 = vadd.f32 %v6073_v35, %v5785_v26  ;;  %6390 = vperm.xlu0 %7672, %v8811_v51   ;;  %v6075_v53 = vpop.f32.mrf.mxu1  ;;  %5980 = vmatmul.mubr.bf16.gmra.mxu0 %v4605_v21  ;;  %v15695_v21 = vld [vmem:[#allocation129_spill] sm:$0xff] }
 0x543   : > { %v5789_v46 = vpop.f32.mrf.mxu0  ;;  %v4607_v32 = vpack.c.bf16 %v8809_v31, %v8813_v19 }
 0x544   : > { %8820 = vrcp.f32 %v13248_v0  ;;  %v5790_v25 = vadd.f32 %v5789_v46, %v15692_v7  ;;  %v6078_v60 = vpop.f32.mrf.mxu1 }
 0x545   : > { %v8815_v37 = vpop.eup %8814  ;;  %6269 = vmatmul.mubr.bf16.gmra.mxu1 %v4607_v32  ;;  %v5791_v59 = vpop.f32.mrf.mxu0 }
 0x546   : > { %v13252_v33 = vadd.f32 %v6078_v60, %v5790_v25  ;;  %6395 = vperm.xlu1 %7673, %v8815_v37   ;;  %v6080_v22 = vpop.f32.mrf.mxu1  ;;  %v15696_v60 = vld [vmem:[#allocation130_spill] sm:$0xff] }
 0x547   : > { %v5792_v42 = vpop.f32.mrf.mxu0 }
 0x548   : > { %8822 = vrcp.f32 %v13252_v33  ;;  %v5793_v28 = vadd.f32 %v5792_v42, %v15693_v50  ;;  %v6081_v36 = vpop.f32.mrf.mxu1 }
 0x549   : > { %v8817_v5 = vpop.eup %8816  ;;  %v5794_v63 = vpop.f32.mrf.mxu0 }
 0x54a   : > { %v13256_v43 = vadd.f32 %v6081_v36, %v5793_v28  ;;  %6400 = vperm.xlu0 %7672, %v8817_v5   ;;  %v6083_v47 = vpop.f32.mrf.mxu1  ;;  %v15697_v63 = vld [vmem:[#allocation131_spill] sm:$0xff] }
 0x54b   : > { %v5797_v3 = vpop.f32.mrf.mxu0 }
 0x54c   : > { %8824 = vrcp.f32 %v13256_v43  ;;  %v5798_v52 = vadd.f32 %v5797_v3, %v15694_v49  ;;  %v6086_v57 = vpop.f32.mrf.mxu1 }
 0x54d   : > { %v8819_v31 = vpop.eup %8818  ;;  %v5799_v26 = vpop.f32.mrf.mxu0 }
 0x54e   : > { %v13260_v51 = vadd.f32 %v6086_v57, %v5798_v52  ;;  %6405 = vperm.xlu1 %7673, %v8819_v31   ;;  %v6088_v35 = vpop.f32.mrf.mxu1 }
 0x54f   : > { %v5800_v30 = vpop.f32.mrf.mxu0  ;;  %v15698_v35 = vld [vmem:[#allocation135_spill] sm:$0xff] }
 0x550   : > { %8826 = vrcp.f32 %v13260_v51  ;;  %v5801_v19 = vadd.f32 %v5800_v30, %v15695_v21  ;;  %v6089_v46 = vpop.f32.mrf.mxu1 }
 0x551   : > { %v8821_v53 = vpop.eup %8820  ;;  %v5802_v32 = vpop.f32.mrf.mxu0 }
 0x552   : > { %v13264_v7 = vadd.f32 %v6089_v46, %v5801_v19  ;;  %6410 = vperm.xlu0 %7672, %v8821_v53   ;;  %v6091_v25 = vpop.f32.mrf.mxu1 }
 0x553   : > { %v5805_v37 = vpop.f32.mrf.mxu0 }
 0x554   : > { %8828 = vrcp.f32 %v13264_v7  ;;  %v5806_v59 = vadd.f32 %v5805_v37, %v15696_v60  ;;  %v6094_v42 = vpop.f32.mrf.mxu1  ;;  %v15699_v37 = vld [vmem:[#allocation132_spill] sm:$0xff] }
 0x555   : > { %v8823_v22 = vpop.eup %8822  ;;  %v5807_v50 = vpop.f32.mrf.mxu0 }
 0x556   : > { %v13268_v28 = vadd.f32 %v6094_v42, %v5806_v59  ;;  %6415 = vperm.xlu1 %7673, %v8823_v22   ;;  %v6096_v5 = vpop.f32.mrf.mxu1 }
 0x557   : > { %v5808_v36 = vpop.f32.mrf.mxu0 }
 0x558   : > { %8830 = vrcp.f32 %v13268_v28  ;;  %v5809_v47 = vadd.f32 %v5808_v36, %v15697_v63  ;;  %v6097_v49 = vpop.f32.mrf.mxu1  ;;  %v15700_v63 = vld [vmem:[#allocation136_spill] sm:$0xff] }
 0x559   : > { %v8825_v3 = vpop.eup %8824  ;;  %v5810_v52 = vpop.f32.mrf.mxu0 }
 0x55a   : > { %v13272_v31 = vadd.f32 %v6097_v49, %v5809_v47  ;;  %6420 = vperm.xlu0 %7672, %v8825_v3   ;;  %v6099_v57 = vpop.f32.mrf.mxu1 }
 0x55b   : > { %v5813_v26 = vpop.f32.mrf.mxu0 }
 0x55c   : > { %8832 = vrcp.f32 %v13272_v31  ;;  %v5814_v30 = vadd.f32 %v5813_v26, %v15698_v35  ;;  %v6102_v19 = vpop.f32.mrf.mxu1 }
 0x55d   : > { %v8827_v21 = vpop.eup %8826  ;;  %v5815_v53 = vpop.f32.mrf.mxu0 }
 0x55e   : > { %v13276_v46 = vadd.f32 %v6102_v19, %v5814_v30  ;;  %6425 = vperm.xlu1 %7673, %v8827_v21   ;;  %v6104_v32 = vpop.f32.mrf.mxu1  ;;  %v15701_v30 = vld [vmem:[#allocation133_spill] sm:$0xff] }
 0x55f   : > { %v5816_v25 = vpop.f32.mrf.mxu0 }
 0x560   : > { %8834 = vrcp.f32 %v13276_v46  ;;  %v5817_v60 = vadd.f32 %v5816_v25, %v15699_v37  ;;  %v6105_v22 = vpop.f32.mrf.mxu1 }
 0x561   : > { %v8829_v59 = vpop.eup %8828  ;;  %v5818_v42 = vpop.f32.mrf.mxu0 }
 0x562   : > { %v13280_v50 = vadd.f32 %v6105_v22, %v5817_v60  ;;  %6430 = vperm.xlu0 %7672, %v8829_v59   ;;  %v6107_v5 = vpop.f32.mrf.mxu1  ;;  %v15702_v59 = vld [vmem:[#allocation134_spill] sm:$0xff] }
 0x563   : > { %v5821_v36 = vpop.f32.mrf.mxu0 }
 0x564   : > { %8836 = vrcp.f32 %v13280_v50  ;;  %v5822_v47 = vadd.f32 %v5821_v36, %v15700_v63  ;;  %v6110_v49 = vpop.f32.mrf.mxu1 }
 0x565   : > { %v8831_v3 = vpop.eup %8830  ;;  %v5823_v52 = vpop.f32.mrf.mxu0 }
 0x566   : > { %v13284_v57 = vadd.f32 %v6110_v49, %v5822_v47  ;;  %6435 = vperm.xlu1 %7673, %v8831_v3   ;;  %v6112_v26 = vpop.f32.mrf.mxu1  ;;  %v15703_v49 = vld [vmem:[#allocation137_spill] sm:$0xff] }
 0x567   : > { %v5824_v35 = vpop.f32.mrf.mxu0 }
 0x568   : > { %8838 = vrcp.f32 %v13284_v57  ;;  %v5825_v21 = vadd.f32 %v5824_v35, %v15701_v30  ;;  %v6113_v53 = vpop.f32.mrf.mxu1 }
 0x569   : > { %v8833_v19 = vpop.eup %8832  ;;  %v5826_v32 = vpop.f32.mrf.mxu0 }
 0x56a   : > { %v13288_v25 = vadd.f32 %v6113_v53, %v5825_v21  ;;  %6440 = vperm.xlu0 %7672, %v8833_v19   ;;  %v6115_v37 = vpop.f32.mrf.mxu1  ;;  %v15704_v32 = vld [vmem:[#allocation138_spill] sm:$0xff] }
 0x56b   : > { %v5829_v60 = vpop.f32.mrf.mxu0 }
 0x56c   : > { %8840 = vrcp.f32 %v13288_v25  ;;  %v5830_v22 = vadd.f32 %v5829_v60, %v15702_v59  ;;  %v6118_v5 = vpop.f32.mrf.mxu1 }
 0x56d   : > { %v8835_v42 = vpop.eup %8834  ;;  %v5831_v36 = vpop.f32.mrf.mxu0 }
 0x56e   : > { %v13292_v63 = vadd.f32 %v6118_v5, %v5830_v22  ;;  %6445 = vperm.xlu1 %7673, %v8835_v42   ;;  %v6120_v47 = vpop.f32.mrf.mxu1 }
 0x56f   : > { %v5832_v3 = vpop.f32.mrf.mxu0  ;;  %v15705_v47 = vld [vmem:[#allocation139_spill] sm:$0xff] }
 0x570   : > { %8842 = vrcp.f32 %v13292_v63  ;;  %v5833_v52 = vadd.f32 %v5832_v3, %v15703_v49  ;;  %v6121_v35 = vpop.f32.mrf.mxu1 }
 0x571   : > { %v8837_v26 = vpop.eup %8836  ;;  %v5834_v30 = vpop.f32.mrf.mxu0 }
 0x572   : > { %v13296_v21 = vadd.f32 %v6121_v35, %v5833_v52  ;;  %6450 = vperm.xlu0 %7672, %v8837_v26   ;;  %v6123_v19 = vpop.f32.mrf.mxu1 }
 0x573   : > { %v5837_v53 = vpop.f32.mrf.mxu0 }
 0x574   : > { %8844 = vrcp.f32 %v13296_v21  ;;  %v5838_v37 = vadd.f32 %v5837_v53, %v15704_v32  ;;  %v6126_v59 = vpop.f32.mrf.mxu1  ;;  %v15707_v53 = vld [vmem:[#allocation143_spill] sm:$0xff] }
 0x575   : > { %v8839_v60 = vpop.eup %8838  ;;  %v5839_v22 = vpop.f32.mrf.mxu0 }
 0x576   : > { %v13300_v42 = vadd.f32 %v6126_v59, %v5838_v37  ;;  %6455 = vperm.xlu1 %7673, %v8839_v60   ;;  %v6128_v5 = vpop.f32.mrf.mxu1 }
 0x577   : > { %v5840_v36 = vpop.f32.mrf.mxu0 }
 0x578   : > { %8846 = vrcp.f32 %v13300_v42  ;;  %v5841_v3 = vadd.f32 %v5840_v36, %v15705_v47  ;;  %v6129_v52 = vpop.f32.mrf.mxu1  ;;  %v15708_v47 = vld [vmem:[#allocation140_spill] sm:$0xff] }
 0x579   : > { %v8841_v49 = vpop.eup %8840  ;;  %v5842_v26 = vpop.f32.mrf.mxu0 }
 0x57a   : > { %v13304_v35 = vadd.f32 %v6129_v52, %v5841_v3  ;;  %6460 = vperm.xlu0 %7672, %v8841_v49   ;;  %v6131_v30 = vpop.f32.mrf.mxu1 }
 0x57b   : > { %v5845_v19 = vpop.f32.mrf.mxu0 }
 0x57c   : > { %15706 = vst [vmem:[#allocation155_spill] sm:$0xff] %v13304_v35  ;;  %8848 = vrcp.f32 %v13304_v35  ;;  %v5846_v32 = vadd.f32 %v5845_v19, %v15707_v53  ;;  %v6134_v60 = vpop.f32.mrf.mxu1  ;;  %v15710_v53 = vld [vmem:[#allocation144_spill] sm:$0xff] }
 0x57d   : > { %v8843_v37 = vpop.eup %8842  ;;  %v5847_v59 = vpop.f32.mrf.mxu0 }
 0x57e   : > { %v13308_v22 = vadd.f32 %v6134_v60, %v5846_v32  ;;  %6465 = vperm.xlu1 %7673, %v8843_v37   ;;  %v6136_v5 = vpop.f32.mrf.mxu1 }
 0x57f   : > { %v5848_v36 = vpop.f32.mrf.mxu0 }
 0x580   : > { %8850 = vrcp.f32 %v13308_v22  ;;  %v5849_v3 = vadd.f32 %v5848_v36, %v15708_v47  ;;  %v6137_v49 = vpop.f32.mrf.mxu1 }
 0x581   : > { %v8845_v52 = vpop.eup %8844  ;;  %v5850_v26 = vpop.f32.mrf.mxu0 }
 0x582   : > { %v13312_v30 = vadd.f32 %v6137_v49, %v5849_v3  ;;  %6470 = vperm.xlu0 %7672, %v8845_v52   ;;  %v6139_v35 = vpop.f32.mrf.mxu1  ;;  %v15712_v3 = vld [vmem:[#allocation141_spill] sm:$0xff] }
 0x583   : > { %v5853_v19 = vpop.f32.mrf.mxu0 }
 0x584   : > { %15709 = vst [vmem:[#allocation159_spill] sm:$0xff] %v13312_v30  ;;  %8852 = vrcp.f32 %v13312_v30  ;;  %v5854_v32 = vadd.f32 %v5853_v19, %v15710_v53  ;;  %v6142_v37 = vpop.f32.mrf.mxu1 }
 0x585   : > { %v8847_v60 = vpop.eup %8846  ;;  %v5855_v59 = vpop.f32.mrf.mxu0 }
 0x586   : > { %v13316_v5 = vadd.f32 %v6142_v37, %v5854_v32  ;;  %6475 = vperm.xlu1 %7673, %v8847_v60   ;;  %v6144_v36 = vpop.f32.mrf.mxu1  ;;  %v15714_v32 = vld [vmem:[#allocation142_spill] sm:$0xff]  ;;  %v13325_v60 = vld [vmem:[%s9386_s20 + $0x8] sm:$0xff]  ;;  %v13328_v59 = vld [vmem:[%s9386_s20] sm:$0xff] }
 0x587   : > { %v5856_v47 = vpop.f32.mrf.mxu0  ;;  %15715 = vst [vmem:[#allocation161_spill] sm:$0xff] %v13325_v60  ;;  %15716 = vst [vmem:[#allocation162_spill] sm:$0xff] %v13328_v59  ;;  %v6863_v36 = vld [vmem:[%s356_s0] sm:$0xff]  ;;  %6901 = vmatprep.subr.mxu0 %v13325_v60  ;;  %v6864_v60 = vld [vmem:[%s356_s0 + $0x8] sm:$0xff]  ;;  %s6277_s0 = sld [smem:[#allocation2]] }
 0x588   : > { %15711 = vst [vmem:[#allocation157_spill] sm:$0xff] %v13316_v5  ;;  %8854 = vrcp.f32 %v13316_v5  ;;  %v5857_v35 = vadd.f32 %v5856_v47, %v15712_v3  ;;  %v6145_v49 = vpop.f32.mrf.mxu1  ;;  %6902 = vmatpush1.msra.mxu0 %v13328_v59 }
 0x589   : > { %v8849_v52 = vpop.eup %8848  ;;  %v5858_v26 = vpop.f32.mrf.mxu0 }
 0x58a   : > { %v13320_v30 = vadd.f32 %v6145_v49, %v5857_v35  ;;  %6480 = vperm.xlu0 %7672, %v8849_v52   ;;  %v6147_v19 = vpop.f32.mrf.mxu1  ;;  %v9145_v35 = vmov 0.0  }
 0x58b   : > { %v5861_v53 = vpop.f32.mrf.mxu0  ;;  %6935 = vmatprep.mubr.f32.mxu0 %v9145_v35  ;;  %7012 = vmatprep.mubr.f32.mxu1 %v9145_v35 }
 0x58c   : > { %15713 = vst [vmem:[#allocation158_spill] sm:$0xff] %v13320_v30  ;;  %8856 = vrcp.f32 %v13320_v30  ;;  %v5862_v37 = vadd.f32 %v5861_v53, %v15714_v32  ;;  %v6150_v3 = vpop.f32.mrf.mxu1  ;;  %7530 = vmatmul.mubr.msk.f32.vlgmr.msra.gmra.mxu0 %vm732_vm0, %v6863_v36  ;;  %v6858_v53 = vld [vmem:[%s9386_s20 + $0x18] sm:$0xff]  ;;  %v15718_v32 = vld [vmem:[#allocation145_spill] sm:$0xff] }
 0x58d   : > { %v8851_v47 = vpop.eup %8850  ;;  %v5863_v26 = vpop.f32.mrf.mxu0  ;;  %6941 = vmatprep.mubr.f32.mxu0 %v9145_v35  ;;  %6978 = vmatprep.subr.mxu1 %v6858_v53 }
 0x58e   : > { %v13333_v52 = vadd.f32 %v6150_v3, %v5862_v37  ;;  %6485 = vperm.xlu1 %7673, %v8851_v47   ;;  %v6152_v49 = vpop.f32.mrf.mxu1 }
 0x58f   : > { %v5864_v19 = vpop.f32.mrf.mxu0  ;;  %v6857_v49 = vld [vmem:[%s9386_s20 + $0x10] sm:$0xff] }
 0x590   : > { %15717 = vst [vmem:[#allocation165_spill] sm:$0xff] %v13333_v52  ;;  %8858 = vrcp.f32 %v13333_v52  ;;  %v5865_v26 = vadd.f32 %v5864_v19, %v15718_v32  ;;  %v6153_v3 = vpop.f32.mrf.mxu1  ;;  %7531 = vmatmul.mubr.msk.f32.gmra.mxu0 %vm732_vm0, %v6864_v60  ;;  %6979 = vmatpush1.msra.mxu1 %v6857_v49 }
 0x591   : > { %v8853_v37 = vpop.eup %8852  ;;  %v5866_v47 = vpop.f32.mrf.mxu0  ;;  %7532 = vmatmul.mubr.msk.f32.vlgmr.msra.gmra.mxu1 %vm732_vm0, %v6863_v36 }
 0x592   : > { %v13342_v30 = vadd.f32 %v6153_v3, %v5865_v26  ;;  %6490 = vperm.xlu0 %7672, %v8853_v37   ;;  %v6155_v59 = vpop.f32.mrf.mxu1  ;;  %7018 = vmatprep.mubr.f32.mxu1 %v9145_v35  ;;  %v15722_v35 = vld [vmem:[#allocation147_spill] sm:$0xff] }
 0x593   : > { %v5869_v5 = vpop.f32.mrf.mxu0  ;;  %v15721_v59 = vld [vmem:[#allocation146_spill] sm:$0xff] }
 0x594   : > { %15719 = vst [vmem:[#allocation166_spill] sm:$0xff] %v13342_v30  ;;  %8860 = vrcp.f32 %v13342_v30  ;;  %v5870_v19 = vadd.f32 %v5869_v5, %v12616_v24  ;;  %v6158_v53 = vpop.f32.mrf.mxu1 }
 0x595   : > { %v8855_v32 = vpop.eup %8854  ;;  %v5871_v52 = vpop.f32.mrf.mxu0  ;;  %7533 = vmatmul.mubr.msk.f32.gmra.mxu1 %vm732_vm0, %v6864_v60 }
 0x596   : > { %v13349_v47 = vadd.f32 %v6158_v53, %v5870_v19  ;;  %6495 = vperm.xlu1 %7673, %v8855_v32   ;;  %v6160_v26 = vpop.f32.mrf.mxu1 }
 0x597   : > { %v5872_v37 = vpop.f32.mrf.mxu0 }
 0x598   : > { %15720 = vst [vmem:[#allocation163_spill] sm:$0xff] %v13349_v47  ;;  %8862 = vrcp.f32 %v13349_v47  ;;  %v5873_v3 = vadd.f32 %v5872_v37, %v15721_v59  ;;  %v6161_v30 = vpop.f32.mrf.mxu1 }
 0x599   : > { %v8857_v49 = vpop.eup %8856  ;;  %v5874_v24 = vpop.f32.mrf.mxu0 }
 0x59a   : > { %v13354_v5 = vadd.f32 %v6161_v30, %v5873_v3  ;;  %6500 = vperm.xlu0 %7672, %v8857_v49   ;;  %v6163_v36 = vpop.f32.mrf.mxu1 }
 0x59b   : > { %v5877_v52 = vpop.f32.mrf.mxu0 }
 0x59c   : > { %8864 = vrcp.f32 %v13354_v5  ;;  %v5878_v19 = vadd.f32 %v5877_v52, %v15722_v35  ;;  %v6166_v53 = vpop.f32.mrf.mxu1 }
 0x59d   : > { %v8859_v32 = vpop.eup %8858  ;;  %v5879_v26 = vpop.f32.mrf.mxu0 }
 0x59e   : > { %v13358_v47 = vadd.f32 %v6166_v53, %v5878_v19  ;;  %6505 = vperm.xlu1 %7673, %v8859_v32   ;;  %v6168_v37 = vpop.f32.mrf.mxu1 }
 0x59f   : > { %v5880_v60 = vpop.f32.mrf.mxu0 }
 0x5a0   : > { %8866 = vrcp.f32 %v13358_v47  ;;  %v5881_v30 = vadd.f32 %v5880_v60, %v12660_v10  ;;  %v6169_v3 = vpop.f32.mrf.mxu1  ;;  %v15725_v60 = vld [vmem:[#allocation151_spill] sm:$0xff] }
 0x5a1   : > { %v8861_v59 = vpop.eup %8860  ;;  %v5882_v49 = vpop.f32.mrf.mxu0 }
 0x5a2   : > { %v13362_v24 = vadd.f32 %v6169_v3, %v5881_v30  ;;  %6510 = vperm.xlu0 %7672, %v8861_v59   ;;  %v6171_v36 = vpop.f32.mrf.mxu1 }
 0x5a3   : > { %v5885_v52 = vpop.f32.mrf.mxu0 }
 0x5a4   : > { %15723 = vst [vmem:[#allocation167_spill] sm:$0xff] %v13362_v24  ;;  %8868 = vrcp.f32 %v13362_v24  ;;  %v5886_v35 = vadd.f32 %v5885_v52, %v12672_v8  ;;  %v6174_v32 = vpop.f32.mrf.mxu1  ;;  %v15727_v52 = vld [vmem:[#allocation148_spill] sm:$0xff] }
 0x5a5   : > { %v8863_v19 = vpop.eup %8862  ;;  %v5887_v53 = vpop.f32.mrf.mxu0 }
 0x5a6   : > { %v13366_v26 = vadd.f32 %v6174_v32, %v5886_v35  ;;  %6515 = vperm.xlu1 %7673, %v8863_v19   ;;  %v6176_v37 = vpop.f32.mrf.mxu1 }
 0x5a7   : > { %v5888_v10 = vpop.f32.mrf.mxu0 }
 0x5a8   : > { %15724 = vst [vmem:[#allocation169_spill] sm:$0xff] %v13366_v26  ;;  %8870 = vrcp.f32 %v13366_v26  ;;  %v5889_v30 = vadd.f32 %v5888_v10, %v15725_v60  ;;  %v6177_v59 = vpop.f32.mrf.mxu1  ;;  %v15728_v60 = vld [vmem:[#allocation152_spill] sm:$0xff] }
 0x5a9   : > { %v8865_v3 = vpop.eup %8864  ;;  %v5890_v49 = vpop.f32.mrf.mxu0 }
 0x5aa   : > { %v13370_v36 = vadd.f32 %v6177_v59, %v5889_v30  ;;  %6520 = vperm.xlu0 %7672, %v8865_v3   ;;  %v6179_v24 = vpop.f32.mrf.mxu1 }
 0x5ab   : > { %v5893_v8 = vpop.f32.mrf.mxu0 }
 0x5ac   : > { %15726 = vst [vmem:[#allocation170_spill] sm:$0xff] %v13370_v36  ;;  %8872 = vrcp.f32 %v13370_v36  ;;  %v5894_v35 = vadd.f32 %v5893_v8, %v15727_v52  ;;  %v6182_v19 = vpop.f32.mrf.mxu1 }
 0x5ad   : > { %v8867_v32 = vpop.eup %8866  ;;  %v5895_v53 = vpop.f32.mrf.mxu0 }
 0x5ae   : > { %v13374_v37 = vadd.f32 %v6182_v19, %v5894_v35  ;;  %6525 = vperm.xlu1 %7673, %v8867_v32   ;;  %v6184_v26 = vpop.f32.mrf.mxu1 }
 0x5af   : > { %v5896_v10 = vpop.f32.mrf.mxu0 }
 0x5b0   : > { %8874 = vrcp.f32 %v13374_v37  ;;  %v5897_v30 = vadd.f32 %v5896_v10, %v15728_v60  ;;  %v6185_v3 = vpop.f32.mrf.mxu1 }
 0x5b1   : > { %v8869_v59 = vpop.eup %8868  ;;  %v5898_v24 = vpop.f32.mrf.mxu0 }
 0x5b2   : > { %v13378_v49 = vadd.f32 %v6185_v3, %v5897_v30  ;;  %6530 = vperm.xlu0 %7672, %v8869_v59   ;;  %v6187_v36 = vpop.f32.mrf.mxu1 }
 0x5b3   : > { %v5901_v8 = vpop.f32.mrf.mxu0 }
 0x5b4   : > { %8876 = vrcp.f32 %v13378_v49  ;;  %v5902_v52 = vadd.f32 %v5901_v8, %v12735_v1  ;;  %v6190_v32 = vpop.f32.mrf.mxu1 }
 0x5b5   : > { %v8871_v35 = vpop.eup %8870  ;;  %v5903_v26 = vpop.f32.mrf.mxu0 }
 0x5b6   : > { %v13382_v19 = vadd.f32 %v6190_v32, %v5902_v52  ;;  %6535 = vperm.xlu1 %7673, %v8871_v35   ;;  %v6192_v53 = vpop.f32.mrf.mxu1 }
 0x5b7   : > { %v5904_v10 = vpop.f32.mrf.mxu0 }
 0x5b8   : > { %8878 = vrcp.f32 %v13382_v19  ;;  %v5905_v60 = vadd.f32 %v5904_v10, %v12750_v39  ;;  %v6193_v59 = vpop.f32.mrf.mxu1  ;;  %v15731_v10 = vld [vmem:[#allocation149_spill] sm:$0xff] }
 0x5b9   : > { %v8873_v30 = vpop.eup %8872  ;;  %v5906_v36 = vpop.f32.mrf.mxu0 }
 0x5ba   : > { %v13386_v3 = vadd.f32 %v6193_v59, %v5905_v60  ;;  %6540 = vperm.xlu0 %7672, %v8873_v30   ;;  %v6195_v24 = vpop.f32.mrf.mxu1 }
 0x5bb   : > { %v5909_v1 = vpop.f32.mrf.mxu0 }
 0x5bc   : > { %15729 = vst [vmem:[#allocation171_spill] sm:$0xff] %v13386_v3  ;;  %8880 = vrcp.f32 %v13386_v3  ;;  %v5910_v8 = vadd.f32 %v5909_v1, %v12772_v20  ;;  %v6198_v35 = vpop.f32.mrf.mxu1 }
 0x5bd   : > { %v8875_v52 = vpop.eup %8874  ;;  %v5911_v32 = vpop.f32.mrf.mxu0 }
 0x5be   : > { %v13390_v26 = vadd.f32 %v6198_v35, %v5910_v8  ;;  %6545 = vperm.xlu1 %7673, %v8875_v52   ;;  %v6200_v53 = vpop.f32.mrf.mxu1 }
 0x5bf   : > { %v5912_v39 = vpop.f32.mrf.mxu0 }
 0x5c0   : > { %15730 = vst [vmem:[#allocation175_spill] sm:$0xff] %v13390_v26  ;;  %8882 = vrcp.f32 %v13390_v26  ;;  %v5913_v60 = vadd.f32 %v5912_v39, %v15731_v10  ;;  %v6201_v30 = vpop.f32.mrf.mxu1  ;;  %v15734_v10 = vld [vmem:[#allocation150_spill] sm:$0xff] }
 0x5c1   : > { %v8877_v59 = vpop.eup %8876  ;;  %v5914_v36 = vpop.f32.mrf.mxu0 }
 0x5c2   : > { %v13394_v24 = vadd.f32 %v6201_v30, %v5913_v60  ;;  %6550 = vperm.xlu0 %7672, %v8877_v59   ;;  %v6203_v3 = vpop.f32.mrf.mxu1 }
 0x5c3   : > { %v5917_v20 = vpop.f32.mrf.mxu0 }
 0x5c4   : > { %15732 = vst [vmem:[#allocation173_spill] sm:$0xff] %v13394_v24  ;;  %8884 = vrcp.f32 %v13394_v24  ;;  %v5918_v1 = vadd.f32 %v5917_v20, %v12800_v4  ;;  %v6206_v52 = vpop.f32.mrf.mxu1  ;;  %v15736_v20 = vld [vmem:[#allocation153_spill] sm:$0xff] }
 0x5c5   : > { %v8879_v8 = vpop.eup %8878  ;;  %v5919_v35 = vpop.f32.mrf.mxu0 }
 0x5c6   : > { %v13398_v32 = vadd.f32 %v6206_v52, %v5918_v1  ;;  %6555 = vperm.xlu1 %7673, %v8879_v8   ;;  %v6208_v53 = vpop.f32.mrf.mxu1 }
 0x5c7   : > { %v5920_v39 = vpop.f32.mrf.mxu0 }
 0x5c8   : > { %15733 = vst [vmem:[#allocation174_spill] sm:$0xff] %v13398_v32  ;;  %8886 = vrcp.f32 %v13398_v32  ;;  %v5921_v60 = vadd.f32 %v5920_v39, %v15734_v10  ;;  %v6209_v59 = vpop.f32.mrf.mxu1 }
 0x5c9   : > { %v8881_v30 = vpop.eup %8880  ;;  %v5922_v3 = vpop.f32.mrf.mxu0 }
 0x5ca   : > { %v13402_v36 = vadd.f32 %v6209_v59, %v5921_v60  ;;  %6560 = vperm.xlu0 %7672, %v8881_v30   ;;  %v6211_v24 = vpop.f32.mrf.mxu1 }
 0x5cb   : > { %v5925_v4 = vpop.f32.mrf.mxu0 }
 0x5cc   : > { %15735 = vst [vmem:[#allocation177_spill] sm:$0xff] %v13402_v36  ;;  %8888 = vrcp.f32 %v13402_v36  ;;  %v5926_v1 = vadd.f32 %v5925_v4, %v15736_v20  ;;  %v6214_v8 = vpop.f32.mrf.mxu1 }
 0x5cd   : > { %v8883_v52 = vpop.eup %8882  ;;  %v5927_v35 = vpop.f32.mrf.mxu0 }
 0x5ce   : > { %v13406_v53 = vadd.f32 %v6214_v8, %v5926_v1  ;;  %6565 = vperm.xlu1 %7673, %v8883_v52   ;;  %v6216_v32 = vpop.f32.mrf.mxu1 }
 0x5cf   : > { %v5928_v39 = vpop.f32.mrf.mxu0 }
 0x5d0   : > { %v5929_v10 = vadd.f32 %v5928_v39, %v12844_v38  ;;  %v6217_v60 = vpop.f32.mrf.mxu1 }
 0x5d1   : > { %v8885_v3 = vpop.eup %8884  ;;  %v5930_v59 = vpop.f32.mrf.mxu0 }
 0x5d2   : > { %v13409_v30 = vadd.f32 %v6217_v60, %v5929_v10  ;;  %6570 = vperm.xlu0 %7672, %v8885_v3   ;;  %v6219_v24 = vpop.f32.mrf.mxu1 }
 0x5d3   : > { %v5933_v36 = vpop.f32.mrf.mxu0 }
 0x5d4   : > { %8890 = vrcp.f32 %v13409_v30  ;;  %v5934_v4 = vadd.f32 %v5933_v36, %v12867_v16  ;;  %v6222_v1 = vpop.f32.mrf.mxu1  ;;  %v15737_v16 = vld [vmem:[#allocation154_spill] sm:$0xff] }
 0x5d5   : > { %v8887_v20 = vpop.eup %8886  ;;  %v5935_v8 = vpop.f32.mrf.mxu0 }
 0x5d6   : > { %v13413_v52 = vadd.f32 %v6222_v1, %v5934_v4  ;;  %6575 = vperm.xlu1 %7673, %v8887_v20   ;;  %v6224_v32 = vpop.f32.mrf.mxu1 }
 0x5d7   : > { %v5936_v38 = vpop.f32.mrf.mxu0 }
 0x5d8   : > { %v5937_v35 = vadd.f32 %v5936_v38, %v12880_v13  ;;  %v6225_v10 = vpop.f32.mrf.mxu1 }
 0x5d9   : > { %v8889_v39 = vpop.eup %8888  ;;  %v5938_v60 = vpop.f32.mrf.mxu0 }
 0x5da   : > { %v13416_v3 = vadd.f32 %v6225_v10, %v5937_v35  ;;  %6580 = vperm.xlu0 %7672, %v8889_v39   ;;  %v6227_v59 = vpop.f32.mrf.mxu1 }
 0x5db   : > { %v5941_v24 = vpop.f32.mrf.mxu0 }
 0x5dc   : > { %8892 = vrcp.f32 %v13416_v3  ;;  %v5942_v36 = vadd.f32 %v5941_v24, %v15737_v16  ;;  %v6230_v8 = vpop.f32.mrf.mxu1 }
 0x5dd   : > { %v5943_v4 = vpop.f32.mrf.mxu0 }
 0x5de   : > { %v13420_v1 = vadd.f32 %v6230_v8, %v5942_v36  ;;  %v6232_v20 = vpop.f32.mrf.mxu1 }
 0x5df   : > { %v5944_v32 = vpop.f32.mrf.mxu0 }
 0x5e0   : > { %v5945_v13 = vadd.f32 %v5944_v32, %v12919_v62  ;;  %v6233_v26 = vpop.f32.mrf.mxu1 }
 0x5e1   : > { %v8891_v38 = vpop.eup %8890  ;;  %v5946_v60 = vpop.f32.mrf.mxu0 }
 0x5e2   : > { %v13423_v35 = vadd.f32 %v6233_v26, %v5945_v13  ;;  %6590 = vperm.xlu0 %7672, %v8891_v38   ;;  %v6235_v39 = vpop.f32.mrf.mxu1 }
 0x5e3   : > { %v5949_v10 = vpop.f32.mrf.mxu0 }
 0x5e4   : > { %15738 = vst [vmem:[#allocation178_spill] sm:$0xff] %v13423_v35  ;;  %8894 = vrcp.f32 %v13423_v35  ;;  %v5950_v59 = vadd.f32 %v5949_v10, %v12941_v11  ;;  %v6238_v24 = vpop.f32.mrf.mxu1 }
 0x5e5   : > { %v5951_v16 = vpop.f32.mrf.mxu0 }
 0x5e6   : > { %v13427_v36 = vadd.f32 %v6238_v24, %v5950_v59  ;;  %v6240_v8 = vpop.f32.mrf.mxu1 }
 0x5e7   : > { %v5952_v4 = vpop.f32.mrf.mxu0  ;;  %v6351_v8 = vpop.permute.xlu1 %6350 }
 0x5e8   : > { %v5953_v62 = vadd.f32 %v5952_v4, %v12960_v41  ;;  %v6241_v32 = vpop.f32.mrf.mxu1 }
 0x5e9   : > { %v8893_v20 = vpop.eup %8892  ;;  %v5954_v60 = vpop.f32.mrf.mxu0 }
 0x5ea   : > { %v13430_v26 = vadd.f32 %v6241_v32, %v5953_v62  ;;  %6600 = vperm.xlu0 %7672, %v8893_v20   ;;  %v6243_v13 = vpop.f32.mrf.mxu1 }
 0x5eb   : > { %v5957_v38 = vpop.f32.mrf.mxu0 }
 0x5ec   : > { %15739 = vst [vmem:[#allocation181_spill] sm:$0xff] %v13430_v26  ;;  %8896 = vrcp.f32 %v13430_v26  ;;  %v5958_v11 = vadd.f32 %v5957_v38, %v12988_v40  ;;  %v6246_v39 = vpop.f32.mrf.mxu1 }
 0x5ed   : > { %v5959_v10 = vpop.f32.mrf.mxu0 }
 0x5ee   : > { %v13434_v59 = vadd.f32 %v6246_v39, %v5958_v11  ;;  %v6248_v24 = vpop.f32.mrf.mxu1  ;;  %v6356_v39 = vpop.permute.xlu1 %6355 }
 0x5ef   : > { %v5960_v16 = vpop.f32.mrf.mxu0 }
 0x5f0   : > { %v5961_v41 = vadd.f32 %v5960_v16, %v12997_v58  ;;  %v6249_v60 = vpop.f32.mrf.mxu1 }
 0x5f1   : > { %v8895_v4 = vpop.eup %8894  ;;  %v5962_v62 = vpop.f32.mrf.mxu0 }
 0x5f2   : > { %v13437_v32 = vadd.f32 %v6249_v60, %v5961_v41  ;;  %6610 = vperm.xlu0 %7672, %v8895_v4   ;;  %v6251_v20 = vpop.f32.mrf.mxu1  ;;  %v6346_v60 = vpop.permute.xlu0 %6345 }
 0x5f3   : > { %v5965_v13 = vpop.f32.mrf.mxu0  ;;  %v6361_v35 = vpop.permute.xlu1 %6360 }
 0x5f4   : > { %15740 = vst [vmem:[#allocation182_spill] sm:$0xff] %v13437_v32  ;;  %8898 = vrcp.f32 %v13437_v32  ;;  %v5966_v40 = vadd.f32 %v5965_v13, %v13018_v45  ;;  %v6254_v38 = vpop.f32.mrf.mxu1  ;;  %v6663_v13 = vmul.f32 %v6346_v60, %v13107_v61  ;;  %v6665_v60 = vmul.f32 %v6356_v39, %v13143_v14 }
 0x5f5   : > { %v5967_v11 = vpop.f32.mrf.mxu0 }
 0x5f6   : > { %v13441_v10 = vadd.f32 %v6254_v38, %v5966_v40  ;;  %v6256_v24 = vpop.f32.mrf.mxu1 }
 0x5f7   : > { %v5968_v26 = vpop.f32.mrf.mxu0 }
 0x5f8   : > { %v5969_v58 = vadd.f32 %v5968_v26, %v13026_v23  ;;  %v6257_v62 = vpop.f32.mrf.mxu1 }
 0x5f9   : > { %v8897_v16 = vpop.eup %8896  ;;  %v5970_v41 = vpop.f32.mrf.mxu0 }
 0x5fa   : > { %v13444_v4 = vadd.f32 %v6257_v62, %v5969_v58  ;;  %6620 = vperm.xlu0 %7672, %v8897_v16   ;;  %v6259_v20 = vpop.f32.mrf.mxu1  ;;  %v6664_v16 = vmul.f32 %v6351_v8, %v13119_v15 }
 0x5fb   : > { %v5973_v32 = vpop.f32.mrf.mxu0  ;;  %v6366_v20 = vpop.permute.xlu1 %6365 }
 0x5fc   : > { %15741 = vst [vmem:[#allocation179_spill] sm:$0xff] %v13444_v4  ;;  %8900 = vrcp.f32 %v13444_v4  ;;  %v5974_v45 = vadd.f32 %v5973_v32, %v13048_v6  ;;  %v6667_v14 = vmul.f32 %v6366_v20, %v13171_v56 }
 0x5fd   : > { %v6262_v40 = vpop.f32.mrf.mxu1  ;;  %v5975_v38 = vpop.f32.mrf.mxu0 }
 0x5fe   : > { %v13449_v11 = vadd.f32 %v6262_v40, %v5974_v45 }
 0x5ff   : > { %v6264_v23 = vpop.f32.mrf.mxu1  ;;  %v5976_v26 = vpop.f32.mrf.mxu0  ;;  %6727 = vxpose.xlu1.b32.start [1/16] (narrow) %v6663_v13, 16 }
 0x600   : > { %v5977_v24 = vadd.f32 %v5976_v26, %v13058_v29  ;;  %v6371_v40 = vpop.permute.xlu1 %6370  ;;  %v6666_v26 = vmul.f32 %v6361_v35, %v13155_v54 }
 0x601   : > { %v8899_v58 = vpop.eup %8898  ;;  %v6265_v62 = vpop.f32.mrf.mxu1 }
 0x602   : > { %v5978_v41 = vpop.f32.mrf.mxu0  ;;  %v13453_v4 = vadd.f32 %v6265_v62, %v5977_v24  ;;  %6630 = vperm.xlu0 %7672, %v8899_v58  }
 0x603   : > { %v6267_v6 = vpop.f32.mrf.mxu1  ;;  %6728 = vxpose.xlu1.b32.cont [2/16] (narrow) %v6664_v16, 16  ;;  %v6668_v41 = vmul.f32 %v6371_v40, %v13183_v12 }
 0x604   : > { %v5981_v61 = vpop.f32.mrf.mxu0  ;;  %8902 = vrcp.f32 %v13453_v4  ;;  %v6376_v39 = vpop.permute.xlu1 %6375 }
 0x605   : > { %v5982_v32 = vadd.f32 %v5981_v61, %v13076_v55  ;;  %v6270_v45 = vpop.f32.mrf.mxu1  ;;  %v6669_v6 = vmul.f32 %v6376_v39, %v13197_v44  ;;  %8904 = vrcp.f32 %v13406_v53 }
 0x606   : > { %v5983_v29 = vpop.f32.mrf.mxu0  ;;  %8906 = vrcp.f32 %v13413_v52 }
 0x607   : > { %v13458_v13 = vadd.f32 %v6270_v45, %v5982_v32  ;;  %v6272_v15 = vpop.f32.mrf.mxu1  ;;  %6729 = vxpose.xlu1.b32.cont [3/16] (narrow) %v6665_v60, 16  ;;  %v6391_v32 = vpop.permute.xlu0 %6390  ;;  %8908 = vrcp.f32 %v13420_v1 }
 0x608   : > { %v5984_v8 = vpop.f32.mrf.mxu0  ;;  %v6672_v56 = vmul.f32 %v6391_v32, %v13229_v48  ;;  %8910 = vrcp.f32 %v13427_v36 }
 0x609   : > { %v5985_v38 = vadd.f32 %v5984_v8, %v13090_v27  ;;  %v8901_v23 = vpop.eup %8900  ;;  %v6273_v24 = vpop.f32.mrf.mxu1  ;;  %8912 = vrcp.f32 %v13434_v59 }
 0x60a   : > { %v5986_v58 = vpop.f32.mrf.mxu0  ;;  %6640 = vperm.xlu0 %7672, %v8901_v23   ;;  %v6381_v27 = vpop.permute.xlu1 %6380  ;;  %8914 = vrcp.f32 %v13441_v10 }
 0x60b   : > { %v13462_v16 = vadd.f32 %v6273_v24, %v5985_v38  ;;  %v6275_v55 = vpop.f32.mrf.mxu1  ;;  %6730 = vxpose.xlu1.b32.cont [4/16] (narrow) %v6666_v26, 16  ;;  %v6670_v54 = vmul.f32 %v6381_v27, %v13211_v9  ;;  %v6401_v20 = vpop.permute.xlu0 %6400  ;;  %8916 = vrcp.f32 %v13449_v11 }
 0x60c   : > { %v6674_v44 = vmul.f32 %v6401_v20, %v13240_v34  ;;  %8918 = vrcp.f32 %v13458_v13 }
 0x60d   : > { %8920 = vrcp.f32 %v13462_v16 }
 0x60e   : > { %v6386_v35 = vpop.permute.xlu1 %6385 }
 0x60f   : > { %6731 = vxpose.xlu1.b32.cont [5/16] (narrow) %v6667_v14, 16  ;;  %v6671_v61 = vmul.f32 %v6386_v35, %v13223_v17  ;;  %v6411_v29 = vpop.permute.xlu0 %6410 }
 0x610   : > { %v6676_v48 = vmul.f32 %v6411_v29, %v13248_v0  ;;  %v15744_v29 = vld [vmem:[#allocation157_spill] sm:$0xff] }
 0x611   : > { %v8903_v62 = vpop.eup %8902 }
 0x612   : > { %6650 = vperm.xlu0 %7672, %v8903_v62   ;;  %v6396_v60 = vpop.permute.xlu1 %6395 }
 0x613   : > { %6732 = vxpose.xlu1.b32.cont [6/16] (narrow) %v6668_v41, 16  ;;  %v6673_v12 = vmul.f32 %v6396_v60, %v13235_v2  ;;  %v6421_v9 = vpop.permute.xlu0 %6420 }
 0x616   : > { %v6406_v45 = vpop.permute.xlu1 %6405 }
 0x617   : > { %6733 = vxpose.xlu1.b32.cont [7/16] (narrow) %v6669_v6, 16  ;;  %v6675_v17 = vmul.f32 %v6406_v45, %v13244_v18  ;;  %v6431_v38 = vpop.permute.xlu0 %6430  ;;  %v6678_v18 = vmul.f32 %v6421_v9, %v13256_v43  ;;  %v8905_v6 = vpop.eup %8904 }
 0x618   : > { %v6680_v23 = vmul.f32 %v6431_v38, %v13264_v7 }
 0x61a   : > { %v6416_v15 = vpop.permute.xlu1 %6415 }
 0x61b   : > { %6734 = vxpose.xlu1.b32.cont [8/16] (narrow) %v6670_v54, 16  ;;  %v6677_v26 = vmul.f32 %v6416_v15, %v13252_v33  ;;  %v6441_v24 = vpop.permute.xlu0 %6440 }
 0x61e   : > { %v6426_v8 = vpop.permute.xlu1 %6425 }
 0x61f   : > { %6735 = vxpose.xlu1.b32.cont [9/16] (narrow) %v6671_v61, 16  ;;  %v6679_v40 = vmul.f32 %v6426_v8, %v13260_v51  ;;  %v6682_v51 = vmul.f32 %v6441_v24, %v13272_v31  ;;  %v6451_v7 = vpop.permute.xlu0 %6450  ;;  %v15745_v8 = vld [vmem:[#allocation158_spill] sm:$0xff] }
 0x620   : > { %v6684_v55 = vmul.f32 %v6451_v7, %v13280_v50 }
 0x622   : > { %v6436_v2 = vpop.permute.xlu1 %6435 }
 0x623   : > { %6736 = vxpose.xlu1.b32.cont [10/16] (narrow) %v6672_v56, 16  ;;  %v6681_v34 = vmul.f32 %v6436_v2, %v13268_v28  ;;  %v6461_v28 = vpop.permute.xlu0 %6460  ;;  %v15743_v56 = vld [vmem:[#allocation159_spill] sm:$0xff] }
 0x624   : > { %v6686_v39 = vmul.f32 %v6461_v28, %v13288_v25 }
 0x626   : > { %v6446_v58 = vpop.permute.xlu1 %6445 }
 0x627   : > { %6737 = vxpose.xlu1.b32.cont [11/16] (narrow) %v6673_v12, 16  ;;  %v6683_v0 = vmul.f32 %v6446_v58, %v13276_v46  ;;  %v6471_v46 = vpop.permute.xlu0 %6470  ;;  %v13516_v58 = vstv %s7529_s9 }
 0x628   : > { %v6688_v50 = vmul.f32 %v6471_v46, %v13296_v21  ;;  %v8907_v21 = vpop.eup %8906 }
 0x629   : > { %v8909_v60 = vpop.eup %8908 }
 0x62a   : > { %v6456_v14 = vpop.permute.xlu1 %6455  ;;  %v8911_v12 = vpop.eup %8910 }
 0x62b   : > { %6738 = vxpose.xlu1.b32.cont [12/16] (narrow) %v6674_v44, 16  ;;  %v6685_v33 = vmul.f32 %v6456_v14, %v13284_v57  ;;  %v6481_v25 = vpop.permute.xlu0 %6480  ;;  %v8913_v9 = vpop.eup %8912 }
 0x62c   : > { %v8915_v38 = vpop.eup %8914 }
 0x62e   : > { %v6466_v43 = vpop.permute.xlu1 %6465 }
 0x62f   : > { %6739 = vxpose.xlu1.b32.cont [13/16] (narrow) %v6675_v17, 16  ;;  %v6687_v31 = vmul.f32 %v6466_v43, %v13292_v63  ;;  %v15742_v63 = vld [vmem:[#allocation155_spill] sm:$0xff] }
 0x630   : > { %6759 = vxpose.xlu0.b32.start [1/16] (narrow) %v6679_v40, 16  ;;  %v6690_v54 = vmul.f32 %v6481_v25, %v15742_v63 }
 0x632   : > { %v6476_v62 = vpop.permute.xlu1 %6475 }
 0x633   : > { %6740 = vxpose.xlu1.b32.cont [14/16] (narrow) %v6676_v48, 16  ;;  %v6689_v41 = vmul.f32 %v6476_v62, %v13300_v42  ;;  %v6491_v42 = vpop.permute.xlu0 %6490 }
 0x634   : > { %6760 = vxpose.xlu0.b32.cont [2/16] (narrow) %v6680_v23, 16  ;;  %v6692_v20 = vmul.f32 %v6491_v42, %v15743_v56  ;;  %v8917_v23 = vpop.eup %8916 }
 0x635   : > { %v8919_v24 = vpop.eup %8918 }
 0x636   : > { %v6486_v57 = vpop.permute.xlu1 %6485 }
 0x637   : > { %6741 = vxpose.xlu1.b32.cont [15/16] (narrow) %v6677_v26, 16  ;;  %v6691_v61 = vmul.f32 %v6486_v57, %v13308_v22  ;;  %v6501_v22 = vpop.permute.xlu0 %6500 }
 0x638   : > { %6761 = vxpose.xlu0.b32.cont [3/16] (narrow) %v6681_v34, 16  ;;  %v6694_v17 = vmul.f32 %v6501_v22, %v15745_v8 }
 0x63a   : > { %v6496_v27 = vpop.permute.xlu1 %6495 }
 0x63b   : > { %6742 = vxpose.xlu1.b32.end [16/16] (narrow) %v6678_v18, 16  ;;  %v6693_v15 = vmul.f32 %v6496_v27, %v15744_v29  ;;  %v6511_v2 = vpop.permute.xlu0 %6510 }
 0x63c   : > { %6762 = vxpose.xlu0.b32.cont [4/16] (narrow) %v6682_v51, 16 }
 0x63e   : > { %v13493_v35 = vpop.permute.xlu1 %6505 }
 0x63f   : > { %v6521_v18 = vpop.permute.xlu0 %6520 }
 0x640   : > { %6763 = vxpose.xlu0.b32.cont [5/16] (narrow) %v6683_v0, 16 }
 0x642   : > { %v13497_v32 = vpop.permute.xlu1 %6515 }
 0x643   : > { %v6531_v7 = vpop.permute.xlu0 %6530 }
 0x644   : > { %6764 = vxpose.xlu0.b32.cont [6/16] (narrow) %v6684_v55, 16  ;;  %v13518_v55 = vstv %s6277_s0 }
 0x646   : > { %v13501_v45 = vpop.permute.xlu1 %6525 }
 0x648   : > { %6765 = vxpose.xlu0.b32.cont [7/16] (narrow) %v6685_v33, 16 }
 0x64a   : > { %v13505_v44 = vpop.permute.xlu1 %6535 }
 0x64c   : > { %6766 = vxpose.xlu0.b32.cont [8/16] (narrow) %v6686_v39, 16  ;;  %v6937_v34 = vpop.f32.mrf.mxu0  ;;  %v15746_v39 = vld [vmem:[#allocation162_spill] sm:$0xff] }
 0x64d   : > { %v7035_v14 = vmul.f32 %v13516_v58, %v6937_v34  ;;  %v7051_v43 = vmul.f32 2.0, %v15746_v39  ;;  %v15747_v34 = vld [vmem:[#allocation161_spill] sm:$0xff] }
 0x64e   : > { %v13508_v40 = vpop.permute.xlu1 %6545  ;;  %v6939_v0 = vpop.f32.mrf.mxu0 }
 0x650   : > { %6767 = vxpose.xlu0.b32.cont [9/16] (narrow) %v6687_v31, 16  ;;  %v6943_v28 = vpop.f32.mrf.mxu0  ;;  %v6541_v31 = vpop.permute.xlu0 %6540 }
 0x652   : > { %v13510_v48 = vpop.permute.xlu1 %6555 }
 0x654   : > { %6768 = vxpose.xlu0.b32.cont [10/16] (narrow) %v6688_v50, 16  ;;  %v7039_v50 = vmul.f32 %v13516_v58, %v6943_v28  ;;  %v6551_v27 = vpop.permute.xlu0 %6550 }
 0x656   : > { %v13512_v26 = vpop.permute.xlu1 %6565 }
 0x658   : > { %6769 = vxpose.xlu0.b32.cont [11/16] (narrow) %v6689_v41, 16  ;;  %v8928_v41 = vld [vmem:[%s9386_s20 + $0x20] sm:$0xff] }
 0x659   : > { %6585 = vperm.xlu1 %7673, %v8905_v6   ;;  %v7055_v25 = vmul.f32 2.0, %v8928_v41 }
 0x65a   : > { %v13514_v51 = vpop.permute.xlu1 %6575 }
 0x65c   : > { %6770 = vxpose.xlu0.b32.cont [12/16] (narrow) %v6690_v54, 16 }
 0x65d   : > { %6595 = vperm.xlu1 %7673, %v8907_v21   ;;  %v6561_v21 = vpop.permute.xlu0 %6560 }
 0x660   : > { %6771 = vxpose.xlu0.b32.cont [13/16] (narrow) %v6691_v61, 16 }
 0x661   : > { %6605 = vperm.xlu1 %7673, %v8909_v60   ;;  %v13533_v42 = vpop.permute.xlu0 %6570 }
 0x664   : > { %6772 = vxpose.xlu0.b32.cont [14/16] (narrow) %v6692_v20, 16  ;;  %v8921_v20 = vpop.eup %8920 }
 0x665   : > { %6615 = vperm.xlu1 %7673, %v8911_v12   ;;  %v13535_v60 = vpop.permute.xlu0 %6580 }
 0x668   : > { %6773 = vxpose.xlu0.b32.cont [15/16] (narrow) %v6693_v15, 16 }
 0x669   : > { %6625 = vperm.xlu1 %7673, %v8913_v9   ;;  %v6591_v56 = vpop.permute.xlu0 %6590 }
 0x66c   : > { %6774 = vxpose.xlu0.b32.end [16/16] (narrow) %v6694_v17, 16  ;;  %v7036_v17 = vmul.f32 %v13516_v58, %v6939_v0 }
 0x66d   : > { %6635 = vperm.xlu1 %7673, %v8915_v38   ;;  %v6601_v12 = vpop.permute.xlu0 %6600 }
 0x671   : > { %6645 = vperm.xlu1 %7673, %v8917_v23   ;;  %v13537_v29 = vpop.permute.xlu0 %6610  ;;  %v6945_v23 = vpop.f32.mrf.mxu0 }
 0x672   : > { %v7040_v28 = vmul.f32 %v13516_v58, %v6945_v23  ;;  %v15752_v23 = vld [vmem:[#allocation169_spill] sm:$0xff] }
 0x675   : > { %6655 = vperm.xlu1 %7673, %v8919_v24   ;;  %v13539_v15 = vpop.permute.xlu0 %6620  ;;  %v7052_v24 = vmul.f32 2.0, %v15747_v34  ;;  %v15753_v34 = vld [vmem:[#allocation170_spill] sm:$0xff] }
 0x67b   : > { %v6743_v33 = vpop.trf.xlu1 }
 0x67c   : > { %v7026_v46 = vmul.f32 %v13518_v55, %v6743_v33 }
 0x67d   : > { %v13541_v22 = vpop.permute.xlu0 %6630 }
 0x67e   : > { %v7043_v62 = vadd.f32 %v7035_v14, %v7026_v46 }
 0x67f   : > { %v6744_v57 = vpop.trf.xlu1 }
 0x680   : > { %v7059_v6 = vadd.f32 %v7051_v43, %v7043_v62  ;;  %v7030_v63 = vmul.f32 %v13518_v55, %v6744_v57  ;;  %v8929_v43 = vld [vmem:[%s9386_s20 + $0x28] sm:$0xff] }
 0x681   : > { %v7056_v46 = vmul.f32 2.0, %v8929_v43  ;;  %v15748_v62 = vld [vmem:[#allocation165_spill] sm:$0xff]  ;;  %v15761_v43 = vld [vmem:[#allocation182_spill] sm:$0xff] }
 0x682   : > { %7067 = vst [vmem:[%s13528_s18] sm:$0xff] %v7059_v6  ;;  %v7047_v54 = vadd.f32 %v7039_v50, %v7030_v63  ;;  %v6695_v50 = vmul.f32 %v13493_v35, %v15748_v62  ;;  %v6699_v35 = vmul.f32 %v13501_v45, %v13358_v47  ;;  %v6705_v45 = vmul.f32 %v13510_v48, %v13382_v19  ;;  %v15756_v19 = vld [vmem:[#allocation173_spill] sm:$0xff] }
 0x684   : > { %v7063_v61 = vadd.f32 %v7055_v25, %v7047_v54  ;;  %v15749_v25 = vld [vmem:[#allocation166_spill] sm:$0xff]  ;;  %v15750_v54 = vld [vmem:[#allocation163_spill] sm:$0xff] }
 0x685   : > { %v13543_v9 = vpop.permute.xlu0 %6640  ;;  %v6696_v6 = vmul.f32 %v6511_v2, %v15749_v25  ;;  %v6701_v2 = vmul.f32 %v13505_v44, %v15752_v23  ;;  %v6712_v44 = vmul.f32 %v6591_v56, %v13409_v30  ;;  %v6708_v30 = vmul.f32 %v13533_v42, %v15756_v19  ;;  %v15758_v56 = vld [vmem:[#allocation178_spill] sm:$0xff]  ;;  %v15760_v42 = vld [vmem:[#allocation181_spill] sm:$0xff] }
 0x686   : > { %7071 = vst [vmem:[%s13528_s18 + $0x20] sm:$0xff] %v7063_v61  ;;  %v6697_v61 = vmul.f32 %v13497_v32, %v15750_v54  ;;  %v6703_v32 = vmul.f32 %v13508_v40, %v13374_v37  ;;  %v15755_v40 = vld [vmem:[#allocation175_spill] sm:$0xff] }
 0x68d   : > { %v13545_v8 = vpop.permute.xlu0 %6650 }
 0x695   : > { %6660 = vperm.xlu0 %7672, %v8921_v20   ;;  %v6698_v20 = vmul.f32 %v6521_v18, %v13354_v5  ;;  %v6704_v18 = vmul.f32 %v6551_v27, %v13378_v49  ;;  %v6707_v49 = vmul.f32 %v13512_v26, %v15755_v40 }
 0x6ac   : > { %v6775_v38 = vpop.trf.xlu0 }
 0x6ad   : > { %v7027_v14 = vmul.f32 %v13518_v55, %v6775_v38 }
 0x6af   : > { %v7044_v33 = vadd.f32 %v7036_v17, %v7027_v14  ;;  %v15751_v17 = vld [vmem:[#allocation167_spill] sm:$0xff] }
 0x6b0   : > { %v6776_v39 = vpop.trf.xlu0  ;;  %v6700_v38 = vmul.f32 %v6531_v7, %v15751_v17 }
 0x6b1   : > { %v7060_v57 = vadd.f32 %v7052_v24, %v7044_v33  ;;  %v7031_v41 = vmul.f32 %v13518_v55, %v6776_v39  ;;  %v6702_v24 = vmul.f32 %v6541_v31, %v15753_v34  ;;  %v15754_v31 = vld [vmem:[#allocation171_spill] sm:$0xff]  ;;  %v6716_v33 = vmul.f32 %v13537_v29, %v15758_v56 }
 0x6b2   : > { %v6706_v14 = vmul.f32 %v6561_v21, %v15754_v31  ;;  %v15757_v21 = vld [vmem:[#allocation174_spill] sm:$0xff]  ;;  %v6720_v29 = vmul.f32 %v13541_v22, %v15761_v43  ;;  %v8932_v34 = vld [vmem:[%s9386_s20 + $0x18] sm:$0xff] }
 0x6b3   : > { %6791 = vxpose.xlu0.b32.start [1/16] (narrow) %v6695_v50, 16  ;;  %7068 = vst [vmem:[%s13528_s18 + $0x8] sm:$0xff] %v7060_v57  ;;  %v7048_v0 = vadd.f32 %v7040_v28, %v7031_v41 }
 0x6b5   : > { %v7064_v63 = vadd.f32 %v7056_v46, %v7048_v0 }
 0x6b7   : > { %6792 = vxpose.xlu0.b32.cont [2/16] (narrow) %v6696_v6, 16  ;;  %7072 = vst [vmem:[%s13528_s18 + $0x28] sm:$0xff] %v7064_v63  ;;  %v8930_v6 = vld [vmem:[%s9386_s20 + $0x10] sm:$0xff] }
 0x6bb   : > { %6793 = vxpose.xlu0.b32.cont [3/16] (narrow) %v6697_v61, 16  ;;  %v8931_v61 = vld [vmem:[%s9386_s20 + $0x30] sm:$0xff] }
 0x6bf   : > { %6794 = vxpose.xlu0.b32.cont [4/16] (narrow) %v6698_v20, 16  ;;  %v7057_v20 = vmul.f32 2.0, %v8931_v61 }
 0x6c3   : > { %6795 = vxpose.xlu0.b32.cont [5/16] (narrow) %v6699_v35, 16 }
 0x6c7   : > { %6796 = vxpose.xlu0.b32.cont [6/16] (narrow) %v6700_v38, 16 }
 0x6cb   : > { %6797 = vxpose.xlu0.b32.cont [7/16] (narrow) %v6701_v2, 16 }
 0x6cf   : > { %6798 = vxpose.xlu0.b32.cont [8/16] (narrow) %v6702_v24, 16  ;;  %v7054_v24 = vmul.f32 2.0, %v8932_v34 }
 0x6d3   : > { %6799 = vxpose.xlu0.b32.cont [9/16] (narrow) %v6703_v32, 16 }
 0x6d4   : > { %v6586_v5 = vpop.permute.xlu1 %6585 }
 0x6d5   : > { %v6711_v47 = vmul.f32 %v6586_v5, %v13406_v53  ;;  %v6714_v53 = vmul.f32 %v6601_v12, %v13416_v3  ;;  %v15759_v3 = vld [vmem:[#allocation177_spill] sm:$0xff] }
 0x6d6   : > { %v6710_v26 = vmul.f32 %v13535_v60, %v15759_v3  ;;  %v15762_v60 = vld [vmem:[#allocation179_spill] sm:$0xff] }
 0x6d7   : > { %6823 = vxpose.xlu1.b32.start [1/16] (narrow) %v6711_v47, 16  ;;  %6800 = vxpose.xlu0.b32.cont [10/16] (narrow) %v6704_v18, 16 }
 0x6d8   : > { %v6596_v7 = vpop.permute.xlu1 %6595 }
 0x6d9   : > { %v6713_v37 = vmul.f32 %v6596_v7, %v13413_v52  ;;  %v6709_v52 = vmul.f32 %v13514_v51, %v15757_v21 }
 0x6db   : > { %6801 = vxpose.xlu0.b32.cont [11/16] (narrow) %v6705_v45, 16  ;;  %6824 = vxpose.xlu1.b32.cont [2/16] (narrow) %v6712_v44, 16  ;;  %v8933_v44 = vld [vmem:[%s9386_s20 + $0x38] sm:$0xff]  ;;  %s7076_s20 = scalar_lea.sflag [#allocation4], %s9380_s15 }
 0x6dc   : > { %v6606_v27 = vpop.permute.xlu1 %6605  ;;  %v7058_v7 = vmul.f32 2.0, %v8933_v44 }
 0x6dd   : > { %v6715_v48 = vmul.f32 %v6606_v27, %v13420_v1  ;;  %v6718_v1 = vmul.f32 %v13539_v15, %v15760_v42 }
 0x6df   : > { %6802 = vxpose.xlu0.b32.cont [12/16] (narrow) %v6706_v14, 16  ;;  %6825 = vxpose.xlu1.b32.cont [3/16] (narrow) %v6713_v37, 16 }
 0x6e0   : > { %v6616_v28 = vpop.permute.xlu1 %6615 }
 0x6e1   : > { %v6717_v12 = vmul.f32 %v6616_v28, %v13427_v36  ;;  %v6722_v36 = vmul.f32 %v13543_v9, %v15762_v60  ;;  %v7014_v9 = vpop.f32.mrf.mxu1 }
 0x6e2   : > { %v7037_v25 = vmul.f32 %v13516_v58, %v7014_v9 }
 0x6e3   : > { %6803 = vxpose.xlu0.b32.cont [13/16] (narrow) %v6707_v49, 16  ;;  %6826 = vxpose.xlu1.b32.cont [4/16] (narrow) %v6714_v53, 16  ;;  %v7016_v0 = vpop.f32.mrf.mxu1 }
 0x6e4   : > { %v6626_v39 = vpop.permute.xlu1 %6625  ;;  %v7038_v32 = vmul.f32 %v13516_v58, %v7016_v0 }
 0x6e5   : > { %v6719_v51 = vmul.f32 %v6626_v39, %v13434_v59  ;;  %v6724_v59 = vmul.f32 %v13545_v8, %v13453_v4  ;;  %v7053_v4 = vmul.f32 2.0, %v8930_v6 }
 0x6e7   : > { %6804 = vxpose.xlu0.b32.cont [14/16] (narrow) %v6708_v30, 16  ;;  %6827 = vxpose.xlu1.b32.cont [5/16] (narrow) %v6715_v48, 16 }
 0x6e8   : > { %v6636_v46 = vpop.permute.xlu1 %6635 }
 0x6e9   : > { %v6721_v62 = vmul.f32 %v6636_v46, %v13441_v10 }
 0x6eb   : > { %6805 = vxpose.xlu0.b32.cont [15/16] (narrow) %v6709_v52, 16  ;;  %6828 = vxpose.xlu1.b32.cont [6/16] (narrow) %v6716_v33, 16 }
 0x6ec   : > { %v6646_v50 = vpop.permute.xlu1 %6645 }
 0x6ed   : > { %v6723_v15 = vmul.f32 %v6646_v50, %v13449_v11 }
 0x6ef   : > { %6806 = vxpose.xlu0.b32.end [16/16] (narrow) %v6710_v26, 16  ;;  %6829 = vxpose.xlu1.b32.cont [7/16] (narrow) %v6717_v12, 16 }
 0x6f0   : > { %v6656_v57 = vpop.permute.xlu1 %6655 }
 0x6f1   : > { %v6725_v22 = vmul.f32 %v6656_v57, %v13458_v13  ;;  %v7020_v13 = vpop.f32.mrf.mxu1 }
 0x6f2   : > { %v7041_v54 = vmul.f32 %v13516_v58, %v7020_v13 }
 0x6f3   : > { %6830 = vxpose.xlu1.b32.cont [8/16] (narrow) %v6718_v1, 16  ;;  %v7022_v18 = vpop.f32.mrf.mxu1 }
 0x6f4   : > { %v7042_v14 = vmul.f32 %v13516_v58, %v7022_v18 }
 0x6f7   : > { %6831 = vxpose.xlu1.b32.cont [9/16] (narrow) %v6719_v51, 16 }
 0x6fb   : > { %6832 = vxpose.xlu1.b32.cont [10/16] (narrow) %v6720_v29, 16 }
 0x6ff   : > { %6833 = vxpose.xlu1.b32.cont [11/16] (narrow) %v6721_v62, 16 }
 0x703   : > { %6834 = vxpose.xlu1.b32.cont [12/16] (narrow) %v6722_v36, 16 }
 0x707   : > { %6835 = vxpose.xlu1.b32.cont [13/16] (narrow) %v6723_v15, 16 }
 0x70b   : > { %6836 = vxpose.xlu1.b32.cont [14/16] (narrow) %v6724_v59, 16 }
 0x70f   : > { %6837 = vxpose.xlu1.b32.cont [15/16] (narrow) %v6725_v22, 16 }
 0x710   : > { %v6661_v10 = vpop.permute.xlu0 %6660 }
 0x711   : > { %v6726_v41 = vmul.f32 %v6661_v10, %v13462_v16 }
 0x713   : > { %6838 = vxpose.xlu1.b32.end [16/16] (narrow) %v6726_v41, 16 }
 0x72f   : > { %v6807_v11 = vpop.trf.xlu0 }
 0x730   : > { %v7028_v8 = vmul.f32 %v13518_v55, %v6807_v11 }
 0x732   : > { %v7045_v63 = vadd.f32 %v7037_v25, %v7028_v8 }
 0x733   : > { %v6808_v16 = vpop.trf.xlu0 }
 0x734   : > { %v7061_v35 = vadd.f32 %v7053_v4, %v7045_v63  ;;  %v7032_v17 = vmul.f32 %v13518_v55, %v6808_v16 }
 0x736   : > { %7069 = vst [vmem:[%s13528_s18 + $0x10] sm:$0xff] %v7061_v35  ;;  %v7049_v38 = vadd.f32 %v7041_v54, %v7032_v17 }
 0x738   : > { %v7065_v23 = vadd.f32 %v7057_v20, %v7049_v38 }
 0x73a   : > { %7073 = vst [vmem:[%s13528_s18 + $0x30] sm:$0xff] %v7065_v23 }
 0x753   : > { %v6839_v2 = vpop.trf.xlu1 }
 0x754   : > { %v7029_v5 = vmul.f32 %v13518_v55, %v6839_v2 }
 0x756   : > { %v7046_v47 = vadd.f32 %v7038_v32, %v7029_v5 }
 0x757   : > { %v6840_v45 = vpop.trf.xlu1 }
 0x758   : > { %v7062_v31 = vadd.f32 %v7054_v24, %v7046_v47  ;;  %v7033_v37 = vmul.f32 %v13518_v55, %v6840_v45 }
 0x75a   : > { %7070 = vst [vmem:[%s13528_s18 + $0x18] sm:$0xff] %v7062_v31  ;;  %v7050_v40 = vadd.f32 %v7042_v14, %v7033_v37 }
 0x75c   : > { %v7066_v49 = vadd.f32 %v7058_v7, %v7050_v40 }
 0x75e   : > { %7074 = vst [vmem:[%s13528_s18 + $0x38] sm:$0xff] %v7066_v49 }
 0x75f   : > { %9018 = shalt.err (!%p9015_p4)
}
 0x760   : > { %s9019_s14 = scalar_lea.hbm %s13625_s5, 1024  ;;  %s9023_s18 = scalar_lea.hbm %s15764_s11, 4096 }
 0x761   : > { %p9020_p10 = scmp.ne.s32.totalorder %s13625_s5, %s9019_s14  ;;  %p9024_p2 = scmp.lt.s32.totalorder %s13625_s5, %s15764_s11 }
 0x762   : > { %p9025_p1 = scmp.lt.s32.totalorder %s9023_s18, %s9019_s14 }
 0x763   : > { %p9021_p5 = pnand %p9020_p10, %p15765_p9 }
 0x764   : > { %p9026_p8 = por %p9025_p1, %p9024_p2 }
 0x765   : > { %p9022_p7 = pneg %p9021_p5 }
 0x767   : > { %p9027_p0 = pnand %p9026_p8, %p9022_p7 }
 0x769   : > { %9030 = shalt.err (!%p9027_p0)
}
 0x76a   : > { %s9147_s21 = smov 512   ;;  %s9148_s27 = smov 1024  }
 0x76b   : > { %s9149_s28 = smov 32  }
 0x76c   : > { %7551 = dma.vmem_to_hbm [thread:$0]  (%p15765_p9), %s13619_s13, 1024, %s13625_s5, %s7076_s20, %s9147_s21, %s9148_s27, %s9149_s28  }
 0x76d PF: > { %s15766_s19 = sld [smem:[#allocation16_spill]] }
 0x76e   : > { %s15767_s4 = sld [smem:[#allocation14_spill]] }
 0x76f   : > { %s15768_s17 = sld [smem:[#allocation18_spill]] }
 0x773   : > { %p7571_p13 = scmp.ge.s32.totalorder %s15766_s19, 2 }
 0x774   : > { %s7106_s12 = sand.u32 1, %s15767_s4  }
 0x775   : > { %p15769_p6 = scmp.ne.s32.totalorder %s15768_s17, 0  ;;  %s7107_s24 = scalar_lea.sflag [#allocation4], %s7106_s12 }
 0x777   : > { %p7565_p11 = pnand %p7571_p13, %p15769_p6 }
 0x779   : > { %p7566_p12 = pneg %p7565_p11 }
 0x77b   : > { %9088 = dma.done.wait (%p7566_p12), %s7107_s24, 1024  }
 0x77c   : > { %9090 = vsyncadd (%p7566_p12), %s7107_s24, 4294966272  ;;  %s26_s14 = sadd.s32 1, %s15766_s19   ;;  %s15770_s27 = sld [smem:[#allocation15_spill]] }
 0x77d   : > { %p23_p3 = scmp.ge.s32.totalorder %s26_s14, 6   ;;  %s15771_s29 = sld [smem:[#allocation19_spill]] }
 0x77e   : > { %s15772_s21 = smov %s9097_s22  ;;  %s15773_s22 = smov %s9101_s23 }
 0x77f   : > { %s15774_s23 = smov %s9354_s6  ;;  %s15775_s24 = smov %s9109_s25 }
 0x780   : > { %s15776_s25 = smov %s9113_s26  ;;  %s15777_s26 = smov %s9349_s7 }
 0x781   : > { %s15778_s28 = smov %s9129_s30  ;;  %s15779_s30 = smov %s15786_s8 }
 0x782   : > { %s15780_s7 = smov %s26_s14  ;;  %25 = sbr.rel (!%p23_p3) target bundleno = 17 (0x11), region = 116 }
 0x787   :  { %7112 = vsyncpa [#allocation3], 1 }
 0x788   :  { %7114 = vsyncpa [#allocation3 + $0x1], 1 }
 0x789   :  { %7115 = vsyncpa [#allocation8], 1 }
 0x78a   :  { %7117 = vsyncpa [#allocation8 + $0x1], 1 }
 0x78b   :  { %7118 = vsyncpa [#allocation4], 1 }
 0x78c   :  { %7120 = vsyncpa [#allocation4 + $0x1], 1 }
 0x78d   :  { %7121 = vsyncpa [#allocation5], 1 }
 0x78e   :  { %7123 = vsyncpa [#allocation5 + $0x1], 1 }

</bundles_post_ra>
